<compile_context>
chip_gen: v6e
topology: v6e:2x2x1
jax: 0.10.0
libtpu: 0.0.40
codegen_flags: <defaults>
</compile_context>

<pallas_src>
import functools
import math

import jax
import jax.numpy as jnp
from jax.experimental import pallas as pl
from jax.experimental.pallas import tpu as pltpu


# ---------------------------------------------------------------------------
# Pallas kernel: one full transformer block for one batch element.
# ---------------------------------------------------------------------------
def transformer_block_kernel(x_ref, cos_ref, sin_ref,
                             attn_nw_ref, ffn_nw_ref,
                             wqkv_ref, wo_ref,
                             w13_ref, w2_ref,
                             o_ref,
                             *, n_heads, head_dim, eps):
    S, D = x_ref.shape[1], x_ref.shape[2]
    H = w2_ref.shape[0]
    x = x_ref[0]                                   # (S, D) float32

    def rmsnorm(v, w):                             # w: (1, D) f32
        ms = jnp.mean(v * v, axis=-1, keepdims=True)
        return v * jax.lax.rsqrt(ms + eps) * w

    cos = cos_ref[...]                             # (S, head_dim) f32
    sin = sin_ref[...]                             # (S, head_dim) f32, sign-adjusted

    # ---------------- attention ----------------
    xn = rmsnorm(x, attn_nw_ref[...]).astype(jnp.bfloat16)

    # Fused q/k/v projection. wqkv already has 1/sqrt(head_dim) folded into the q
    # columns and the rotate-half column permutation applied to q and k.
    qkv = jnp.dot(xn, wqkv_ref[...], preferred_element_type=jnp.float32)   # (S, 3D)
    q = qkv[:, :D]
    k = qkv[:, D:2 * D]
    v = qkv[:, 2 * D:]

    # heads-major layout: (n_heads, S, head_dim)
    qh = jnp.transpose(q.reshape(S, n_heads, head_dim), (1, 0, 2))
    kh = jnp.transpose(k.reshape(S, n_heads, head_dim), (1, 0, 2))
    vh = jnp.transpose(v.reshape(S, n_heads, head_dim), (1, 0, 2)).astype(jnp.bfloat16)

    # RoPE in rotate-half layout: out = t*cos + rotate_half(t)*sin_signed
    def rope(t):
        return t * cos[None] + pltpu.roll(t, head_dim // 2, axis=2) * sin[None]

    qh = rope(qh).astype(jnp.bfloat16)
    kh = rope(kh).astype(jnp.bfloat16)

    # scores for all heads at once (bf16 in, f32 accumulate)
    s = jnp.einsum('hqd,hkd->hqk', qh, kh, preferred_element_type=jnp.float32)

    # causal mask generated in-kernel (pure index predicate, no HBM traffic)
    row = jax.lax.broadcasted_iota(jnp.int32, (S, S), 0)
    col = jax.lax.broadcasted_iota(jnp.int32, (S, S), 1)
    s = jnp.where((col <= row)[None], s, jnp.float32(-1e30))

    s = s - jnp.max(s, axis=-1, keepdims=True)
    p = jnp.exp(s)
    p = p * pl.reciprocal(jnp.sum(p, axis=-1, keepdims=True), approx=True)

    oh = jnp.einsum('hqk,hkd->hqd', p.astype(jnp.bfloat16), vh,
                    preferred_element_type=jnp.float32)          # (n_heads, S, hd)
    attn = jnp.transpose(oh, (1, 0, 2)).reshape(S, D).astype(jnp.bfloat16)
    attn = jnp.dot(attn, wo_ref[...], preferred_element_type=jnp.float32)

    h = x + attn

    # ---------------- feed forward (SwiGLU) ----------------
    hn = rmsnorm(h, ffn_nw_ref[...]).astype(jnp.bfloat16)
    gu = jnp.dot(hn, w13_ref[...], preferred_element_type=jnp.float32)     # (S, 2H)
    g = gu[:, :H]
    u = gu[:, H:]
    ff = jnp.dot((g * jax.nn.sigmoid(g) * u).astype(jnp.bfloat16), w2_ref[...],
                 preferred_element_type=jnp.float32)

    o_ref[0] = (h + ff).astype(o_ref.dtype)


# ---------------------------------------------------------------------------
# Wrapper
# ---------------------------------------------------------------------------
def transformer_block(x, params, cos_k, sin_k, *, n_heads, head_dim, eps):
    B, S, D = x.shape
    H = params["w2"].shape[0]

    kernel = functools.partial(transformer_block_kernel,
                               n_heads=n_heads, head_dim=head_dim, eps=eps)

    grid_spec = pltpu.PrefetchScalarGridSpec(
        num_scalar_prefetch=0,
        grid=(B,),
        in_specs=[
            pl.BlockSpec((1, S, D), lambda b: (b, 0, 0)),                 # x
            pl.BlockSpec((S, head_dim), lambda b: (0, 0)),                # cos
            pl.BlockSpec((S, head_dim), lambda b: (0, 0)),                # sin_signed
            pl.BlockSpec((1, D), lambda b: (0, 0)),                       # attn norm w
            pl.BlockSpec((1, D), lambda b: (0, 0)),                       # ffn norm w
            pl.BlockSpec((D, 3 * D), lambda b: (0, 0)),                   # wqkv (bf16)
            pl.BlockSpec((D, D), lambda b: (0, 0)),                       # wo   (bf16)
            pl.BlockSpec((D, 2 * H), lambda b: (0, 0)),                   # w1|w3 (bf16)
            pl.BlockSpec((H, D), lambda b: (0, 0)),                       # w2   (bf16)
        ],
        out_specs=pl.BlockSpec((1, S, D), lambda b: (b, 0, 0)),
    )

    return pl.pallas_call(
        kernel,
        out_shape=jax.ShapeDtypeStruct((B, S, D), jnp.float32),
        grid_spec=grid_spec,
        compiler_params=pltpu.CompilerParams(
            dimension_semantics=("parallel",),
            vmem_limit_bytes=32 * 1024 * 1024,
        ),
    )(x, cos_k, sin_k,
      params["attn_norm"], params["ffn_norm"],
      params["wqkv"], params["wo"],
      params["w13"], params["w2"])


# ---------------------------------------------------------------------------
# Pure-JAX reference (mirrors the PyTorch module exactly, f32) for validation.
# ---------------------------------------------------------------------------
def reference_block(x, params, cos_half, sin_half, mask, *, n_heads, head_dim, eps):
    B, S, D = x.shape

    def rmsnorm(v, w):
        ms = jnp.mean(v * v, axis=-1, keepdims=True)
        return v * jax.lax.rsqrt(ms + eps) * w

    def rope(t):  # t: (B, S, n_heads, head_dim), interleaved pairs
        tr = t.reshape(B, S, n_heads, head_dim // 2, 2)
        te, to = tr[..., 0], tr[..., 1]
        c = cos_half[None, :, None, :]
        s = sin_half[None, :, None, :]
        oe = te * c - to * s
        oo = te * s + to * c
        return jnp.stack([oe, oo], axis=-1).reshape(B, S, n_heads, head_dim)

    xn = rmsnorm(x, params["attn_norm"])
    q = (xn @ params["wq"]).reshape(B, S, n_heads, head_dim)
    k = (xn @ params["wk"]).reshape(B, S, n_heads, head_dim)
    v = (xn @ params["wv"]).reshape(B, S, n_heads, head_dim)
    q, k = rope(q), rope(k)
    q, k, v = (jnp.transpose(t, (0, 2, 1, 3)) for t in (q, k, v))
    s = jnp.einsum("bhqd,bhkd->bhqk", q, k) / math.sqrt(head_dim) + mask
    p = jax.nn.softmax(s, axis=-1)
    attn = jnp.einsum("bhqk,bhkd->bhqd", p, v)
    attn = jnp.transpose(attn, (0, 2, 1, 3)).reshape(B, S, D) @ params["wo"]
    h = x + attn

    hn = rmsnorm(h, params["ffn_norm"])
    ff = (jax.nn.silu(hn @ params["w1"]) * (hn @ params["w3"])) @ params["w2"]
    return h + ff


# ---------------------------------------------------------------------------
if __name__ == "__main__":
    # Small LLaMA-style config (head_dim=128 matches the real model's lane tile)
    B, S = 2, 8
    n_heads, head_dim = 4, 128
    D = n_heads * head_dim            # 512
    multiple_of = 256
    eps = 1e-5

    # FeedForward hidden dim exactly as the PyTorch module computes it
    hidden = 4 * D
    hidden = int(2 * hidden / 3)
    hidden = multiple_of * ((hidden + multiple_of - 1) // multiple_of)   # -> 1536
    H = hidden

    key = jax.random.PRNGKey(0)
    ks = jax.random.split(key, 12)
    scale = 0.02

    attn_norm = 1.0 + scale * jax.random.normal(ks[0], (1, D), jnp.float32)
    ffn_norm = 1.0 + scale * jax.random.normal(ks[1], (1, D), jnp.float32)
    wq = scale * jax.random.normal(ks[2], (D, D), jnp.float32)
    wk = scale * jax.random.normal(ks[3], (D, D), jnp.float32)
    wv = scale * jax.random.normal(ks[4], (D, D), jnp.float32)
    wo = scale * jax.random.normal(ks[5], (D, D), jnp.float32)
    w1 = scale * jax.random.normal(ks[6], (D, H), jnp.float32)
    w2 = scale * jax.random.normal(ks[7], (H, D), jnp.float32)
    w3 = scale * jax.random.normal(ks[8], (D, H), jnp.float32)

    # Host-side rotate-half column permutation for wq/wk:
    # within each head, even pair-indices first, then odd pair-indices.
    per_head = jnp.concatenate([jnp.arange(0, head_dim, 2), jnp.arange(1, head_dim, 2)])
    perm = (jnp.arange(n_heads)[:, None] * head_dim + per_head[None, :]).reshape(-1)

    wq_p = wq[:, perm] / math.sqrt(head_dim)   # scale folded in, columns permuted
    wk_p = wk[:, perm]

    params = {
        "attn_norm": attn_norm,
        "ffn_norm": ffn_norm,
        "wqkv": jnp.concatenate([wq_p, wk_p, wv], axis=1).astype(jnp.bfloat16),
        "wo": wo.astype(jnp.bfloat16),
        "w13": jnp.concatenate([w1, w3], axis=1).astype(jnp.bfloat16),
        "w2": w2.astype(jnp.bfloat16),
    }

    # Rotary tables (start_pos = 0, theta = 10000), (S, head_dim) in rotate-half layout
    inv_freq = 1.0 / (10000.0 ** (jnp.arange(0, head_dim, 2, dtype=jnp.float32) / head_dim))
    t = jnp.arange(S, dtype=jnp.float32)
    angles = jnp.outer(t, inv_freq)                       # (S, head_dim//2)
    cos_half, sin_half = jnp.cos(angles), jnp.sin(angles)
    cos_k = jnp.concatenate([cos_half, cos_half], axis=-1)          # (S, head_dim)
    sin_k = jnp.concatenate([-sin_half, sin_half], axis=-1)         # sign-adjusted

    x = jax.random.normal(ks[9], (B, S, D), jnp.float32)

    out = transformer_block(x, params, cos_k, sin_k,
                            n_heads=n_heads, head_dim=head_dim, eps=eps)
    out = jax.block_until_ready(out)

    # f32 reference (exact PyTorch semantics); kernel uses bf16 matmul inputs,
    # so compare with a tolerance that covers bf16 rounding.
    mask = jnp.triu(jnp.full((S, S), float("-inf"), jnp.float32), k=1)
    ref_params = {"attn_norm": attn_norm, "ffn_norm": ffn_norm,
                  "wq": wq, "wk": wk, "wv": wv, "wo": wo,
                  "w1": w1, "w2": w2, "w3": w3}
    ref = reference_block(x, ref_params, cos_half, sin_half, mask,
                          n_heads=n_heads, head_dim=head_dim, eps=eps)

    assert out.shape == (B, S, D)
    err = jnp.max(jnp.abs(out - ref))
    assert jnp.allclose(out, ref, atol=2e-2, rtol=2e-2), f"max abs err {err}"

    print("KERNEL_OK")
</pallas_src>

<mosaic_0001>
module attributes {stable_mosaic.version = 11 : i64} {
  func.func @transformer_block_kernel(%arg0: i32, %arg1: memref<1x8x512xf32, #tpu.memory_space<vmem>>, %arg2: memref<8x128xf32, #tpu.memory_space<vmem>>, %arg3: memref<8x128xf32, #tpu.memory_space<vmem>>, %arg4: memref<1x512xf32, #tpu.memory_space<vmem>>, %arg5: memref<1x512xf32, #tpu.memory_space<vmem>>, %arg6: memref<512x1536xbf16, #tpu.memory_space<vmem>>, %arg7: memref<512x512xbf16, #tpu.memory_space<vmem>>, %arg8: memref<512x3072xbf16, #tpu.memory_space<vmem>>, %arg9: memref<1536x512xbf16, #tpu.memory_space<vmem>>, %arg10: memref<1x8x512xf32, #tpu.memory_space<vmem>>) attributes {dimension_semantics = [#tpu.dimension_semantics<parallel>], iteration_bounds = array<i64: 2>, scalar_prefetch = 0 : i64, scratch_operands = 0 : i64, tpu.core_type = #tpu.core_type<tc>, window_params = [{transform_indices = @transform_0, window_bounds = array<i64: 1, 8, 512>}, {pipeline_mode = #tpu.pipeline_mode<synchronous>, transform_indices = @transform_1, window_bounds = array<i64: 8, 128>}, {pipeline_mode = #tpu.pipeline_mode<synchronous>, transform_indices = @transform_2, window_bounds = array<i64: 8, 128>}, {pipeline_mode = #tpu.pipeline_mode<synchronous>, transform_indices = @transform_3, window_bounds = array<i64: 1, 512>}, {pipeline_mode = #tpu.pipeline_mode<synchronous>, transform_indices = @transform_4, window_bounds = array<i64: 1, 512>}, {pipeline_mode = #tpu.pipeline_mode<synchronous>, transform_indices = @transform_5, window_bounds = array<i64: 512, 1536>}, {pipeline_mode = #tpu.pipeline_mode<synchronous>, transform_indices = @transform_6, window_bounds = array<i64: 512, 512>}, {pipeline_mode = #tpu.pipeline_mode<synchronous>, transform_indices = @transform_7, window_bounds = array<i64: 512, 3072>}, {pipeline_mode = #tpu.pipeline_mode<synchronous>, transform_indices = @transform_8, window_bounds = array<i64: 1536, 512>}, {transform_indices = @transform_9, window_bounds = array<i64: 1, 8, 512>}]} {
    %c0 = arith.constant 0 : index
    %c0_0 = arith.constant 0 : index
    %c0_1 = arith.constant 0 : index
    %0 = vector.load %arg1[%c0, %c0_0, %c0_1] : memref<1x8x512xf32, #tpu.memory_space<vmem>>, vector<1x8x512xf32>
    %1 = vector.shape_cast %0 : vector<1x8x512xf32> to vector<8x512xf32>
    %c0_2 = arith.constant 0 : index
    %c0_3 = arith.constant 0 : index
    %2 = vector.load %arg2[%c0_2, %c0_3] : memref<8x128xf32, #tpu.memory_space<vmem>>, vector<8x128xf32>
    %c0_4 = arith.constant 0 : index
    %c0_5 = arith.constant 0 : index
    %3 = vector.load %arg3[%c0_4, %c0_5] : memref<8x128xf32, #tpu.memory_space<vmem>>, vector<8x128xf32>
    %c0_6 = arith.constant 0 : index
    %c0_7 = arith.constant 0 : index
    %4 = vector.load %arg4[%c0_6, %c0_7] : memref<1x512xf32, #tpu.memory_space<vmem>>, vector<1x512xf32>
    %5 = arith.mulf %1, %1 : vector<8x512xf32>
    %cst = arith.constant dense<0.000000e+00> : vector<8xf32>
    %6 = vector.multi_reduction <add>, %5, %cst [1] : vector<8x512xf32> to vector<8xf32>
    %7 = vector.shape_cast %6 : vector<8xf32> to vector<8x1xf32>
    %cst_8 = arith.constant 5.120000e+02 : f32
    %8 = vector.broadcast %cst_8 : f32 to vector<8x1xf32>
    %9 = arith.divf %7, %8 : vector<8x1xf32>
    %cst_9 = arith.constant 9.99999974E-6 : f32
    %10 = vector.broadcast %cst_9 : f32 to vector<8x1xf32>
    %11 = arith.addf %9, %10 : vector<8x1xf32>
    %12 = math.rsqrt %11 : vector<8x1xf32>
    %13 = vector.broadcast %12 : vector<8x1xf32> to vector<8x512xf32>
    %14 = arith.mulf %1, %13 : vector<8x512xf32>
    %15 = vector.broadcast %4 : vector<1x512xf32> to vector<8x512xf32>
    %16 = arith.mulf %14, %15 : vector<8x512xf32>
    %17 = arith.truncf %16 : vector<8x512xf32> to vector<8x512xbf16>
    %c0_10 = arith.constant 0 : index
    %c0_11 = arith.constant 0 : index
    %18 = vector.load %arg6[%c0_10, %c0_11] : memref<512x1536xbf16, #tpu.memory_space<vmem>>, vector<512x1536xbf16>
    %cst_12 = arith.constant dense<0.000000e+00> : vector<8x1536xf32>
    %19 = tpu.matmul %17, %18, %cst_12 {dimension_numbers = #tpu.dot_dimension_numbers<[1], [0], [0], [1], [0, 0, 1, 1], [], []>} : vector<8x512xbf16>, vector<512x1536xbf16>, vector<8x1536xf32> -> vector<8x1536xf32>
    %20 = vector.extract_strided_slice %19 {offsets = [0, 0], sizes = [8, 512], strides = [1, 1]} : vector<8x1536xf32> to vector<8x512xf32>
    %21 = vector.extract_strided_slice %19 {offsets = [0, 512], sizes = [8, 512], strides = [1, 1]} : vector<8x1536xf32> to vector<8x512xf32>
    %22 = vector.extract_strided_slice %19 {offsets = [0, 1024], sizes = [8, 512], strides = [1, 1]} : vector<8x1536xf32> to vector<8x512xf32>
    %23 = vector.shape_cast %20 : vector<8x512xf32> to vector<8x4x128xf32>
    %24 = tpu.transpose %23, [1, 0, 2] : vector<8x4x128xf32> -> vector<4x8x128xf32>
    %25 = vector.shape_cast %21 : vector<8x512xf32> to vector<8x4x128xf32>
    %26 = tpu.transpose %25, [1, 0, 2] : vector<8x4x128xf32> -> vector<4x8x128xf32>
    %27 = vector.shape_cast %22 : vector<8x512xf32> to vector<8x4x128xf32>
    %28 = tpu.transpose %27, [1, 0, 2] : vector<8x4x128xf32> -> vector<4x8x128xf32>
    %29 = arith.truncf %28 : vector<4x8x128xf32> to vector<4x8x128xbf16>
    %30 = vector.shape_cast %2 : vector<8x128xf32> to vector<1x8x128xf32>
    %31 = vector.broadcast %30 : vector<1x8x128xf32> to vector<4x8x128xf32>
    %32 = arith.mulf %24, %31 : vector<4x8x128xf32>
    %c64_i32 = arith.constant 64 : i32
    %33 = tpu.dynamic_rotate %24 by %c64_i32 dim 2 : vector<4x8x128xf32>, i32 -> vector<4x8x128xf32>
    %34 = vector.shape_cast %3 : vector<8x128xf32> to vector<1x8x128xf32>
    %35 = vector.broadcast %34 : vector<1x8x128xf32> to vector<4x8x128xf32>
    %36 = arith.mulf %33, %35 : vector<4x8x128xf32>
    %37 = arith.addf %32, %36 : vector<4x8x128xf32>
    %38 = arith.truncf %37 : vector<4x8x128xf32> to vector<4x8x128xbf16>
    %39 = vector.shape_cast %2 : vector<8x128xf32> to vector<1x8x128xf32>
    %40 = vector.broadcast %39 : vector<1x8x128xf32> to vector<4x8x128xf32>
    %41 = arith.mulf %26, %40 : vector<4x8x128xf32>
    %c64_i32_13 = arith.constant 64 : i32
    %42 = tpu.dynamic_rotate %26 by %c64_i32_13 dim 2 : vector<4x8x128xf32>, i32 -> vector<4x8x128xf32>
    %43 = vector.shape_cast %3 : vector<8x128xf32> to vector<1x8x128xf32>
    %44 = vector.broadcast %43 : vector<1x8x128xf32> to vector<4x8x128xf32>
    %45 = arith.mulf %42, %44 : vector<4x8x128xf32>
    %46 = arith.addf %41, %45 : vector<4x8x128xf32>
    %47 = arith.truncf %46 : vector<4x8x128xf32> to vector<4x8x128xbf16>
    "tpu.trace_start"() <{level = 10 : i32, message = "hqd,hkd->hqk"}> : () -> ()
    %cst_14 = arith.constant dense<0.000000e+00> : vector<4x8x8xf32>
    %48 = tpu.matmul %38, %47, %cst_14 {dimension_numbers = #tpu.dot_dimension_numbers<[2], [2], [1], [1], [0, 0, 0, 1, 1, 1], [0], [0]>} : vector<4x8x128xbf16>, vector<4x8x128xbf16>, vector<4x8x8xf32> -> vector<4x8x8xf32>
    "tpu.trace_stop"() : () -> ()
    %49 = tpu.iota {dimensions = array<i32: 0>} : vector<8x8xi32>
    %50 = tpu.iota {dimensions = array<i32: 1>} : vector<8x8xi32>
    %51 = arith.cmpi sle, %50, %49 : vector<8x8xi32>
    %52 = vector.shape_cast %51 : vector<8x8xi1> to vector<1x8x8xi1>
    %cst_15 = arith.constant -1.000000e+30 : f32
    %53 = vector.shape_cast %52 : vector<1x8x8xi1> to vector<1x8x8xi1>
    %54 = vector.broadcast %53 : vector<1x8x8xi1> to vector<4x8x8xi1>
    %55 = vector.broadcast %cst_15 : f32 to vector<4x8x8xf32>
    %56 = arith.select %54, %48, %55 : vector<4x8x8xi1>, vector<4x8x8xf32>
    %cst_16 = arith.constant dense<0xFF800000> : vector<4x8xf32>
    %57 = vector.multi_reduction <maximumf>, %56, %cst_16 [2] : vector<4x8x8xf32> to vector<4x8xf32>
    %58 = vector.shape_cast %57 : vector<4x8xf32> to vector<4x8x1xf32>
    %59 = vector.broadcast %58 : vector<4x8x1xf32> to vector<4x8x8xf32>
    %60 = arith.subf %56, %59 : vector<4x8x8xf32>
    %61 = math.exp %60 : vector<4x8x8xf32>
    %cst_17 = arith.constant dense<0.000000e+00> : vector<4x8xf32>
    %62 = vector.multi_reduction <add>, %61, %cst_17 [2] : vector<4x8x8xf32> to vector<4x8xf32>
    %63 = vector.shape_cast %62 : vector<4x8xf32> to vector<4x8x1xf32>
    %64 = tpu.reciprocal %63 {approx = true} : vector<4x8x1xf32> -> vector<4x8x1xf32>
    %65 = vector.broadcast %64 : vector<4x8x1xf32> to vector<4x8x8xf32>
    %66 = arith.mulf %61, %65 : vector<4x8x8xf32>
    %67 = arith.truncf %66 : vector<4x8x8xf32> to vector<4x8x8xbf16>
    "tpu.trace_start"() <{level = 10 : i32, message = "hqk,hkd->hqd"}> : () -> ()
    %cst_18 = arith.constant dense<0.000000e+00> : vector<4x8x128xf32>
    %68 = tpu.matmul %67, %29, %cst_18 {dimension_numbers = #tpu.dot_dimension_numbers<[2], [1], [1], [2], [0, 0, 0, 1, 1, 2], [0], [0]>} : vector<4x8x8xbf16>, vector<4x8x128xbf16>, vector<4x8x128xf32> -> vector<4x8x128xf32>
    "tpu.trace_stop"() : () -> ()
    %69 = tpu.transpose %68, [1, 0, 2] : vector<4x8x128xf32> -> vector<8x4x128xf32>
    %70 = vector.shape_cast %69 : vector<8x4x128xf32> to vector<8x512xf32>
    %71 = arith.truncf %70 : vector<8x512xf32> to vector<8x512xbf16>
    %c0_19 = arith.constant 0 : index
    %c0_20 = arith.constant 0 : index
    %72 = vector.load %arg7[%c0_19, %c0_20] : memref<512x512xbf16, #tpu.memory_space<vmem>>, vector<512x512xbf16>
    %cst_21 = arith.constant dense<0.000000e+00> : vector<8x512xf32>
    %73 = tpu.matmul %71, %72, %cst_21 {dimension_numbers = #tpu.dot_dimension_numbers<[1], [0], [0], [1], [0, 0, 1, 1], [], []>} : vector<8x512xbf16>, vector<512x512xbf16>, vector<8x512xf32> -> vector<8x512xf32>
    %74 = arith.addf %1, %73 : vector<8x512xf32>
    %c0_22 = arith.constant 0 : index
    %c0_23 = arith.constant 0 : index
    %75 = vector.load %arg5[%c0_22, %c0_23] : memref<1x512xf32, #tpu.memory_space<vmem>>, vector<1x512xf32>
    %76 = arith.mulf %74, %74 : vector<8x512xf32>
    %cst_24 = arith.constant dense<0.000000e+00> : vector<8xf32>
    %77 = vector.multi_reduction <add>, %76, %cst_24 [1] : vector<8x512xf32> to vector<8xf32>
    %78 = vector.shape_cast %77 : vector<8xf32> to vector<8x1xf32>
    %cst_25 = arith.constant 5.120000e+02 : f32
    %79 = vector.broadcast %cst_25 : f32 to vector<8x1xf32>
    %80 = arith.divf %78, %79 : vector<8x1xf32>
    %cst_26 = arith.constant 9.99999974E-6 : f32
    %81 = vector.broadcast %cst_26 : f32 to vector<8x1xf32>
    %82 = arith.addf %80, %81 : vector<8x1xf32>
    %83 = math.rsqrt %82 : vector<8x1xf32>
    %84 = vector.broadcast %83 : vector<8x1xf32> to vector<8x512xf32>
    %85 = arith.mulf %74, %84 : vector<8x512xf32>
    %86 = vector.broadcast %75 : vector<1x512xf32> to vector<8x512xf32>
    %87 = arith.mulf %85, %86 : vector<8x512xf32>
    %88 = arith.truncf %87 : vector<8x512xf32> to vector<8x512xbf16>
    %c0_27 = arith.constant 0 : index
    %c0_28 = arith.constant 0 : index
    %89 = vector.load %arg8[%c0_27, %c0_28] : memref<512x3072xbf16, #tpu.memory_space<vmem>>, vector<512x3072xbf16>
    %cst_29 = arith.constant dense<0.000000e+00> : vector<8x3072xf32>
    %90 = tpu.matmul %88, %89, %cst_29 {dimension_numbers = #tpu.dot_dimension_numbers<[1], [0], [0], [1], [0, 0, 1, 1], [], []>} : vector<8x512xbf16>, vector<512x3072xbf16>, vector<8x3072xf32> -> vector<8x3072xf32>
    %91 = vector.extract_strided_slice %90 {offsets = [0, 0], sizes = [8, 1536], strides = [1, 1]} : vector<8x3072xf32> to vector<8x1536xf32>
    %92 = vector.extract_strided_slice %90 {offsets = [0, 1536], sizes = [8, 1536], strides = [1, 1]} : vector<8x3072xf32> to vector<8x1536xf32>
    %93 = arith.negf %91 : vector<8x1536xf32>
    %94 = math.exp %93 : vector<8x1536xf32>
    %cst_30 = arith.constant 1.000000e+00 : f32
    %95 = vector.broadcast %cst_30 : f32 to vector<8x1536xf32>
    %96 = arith.addf %95, %94 : vector<8x1536xf32>
    %97 = arith.divf %95, %96 : vector<8x1536xf32>
    %98 = arith.mulf %91, %97 : vector<8x1536xf32>
    %99 = arith.mulf %98, %92 : vector<8x1536xf32>
    %100 = arith.truncf %99 : vector<8x1536xf32> to vector<8x1536xbf16>
    %c0_31 = arith.constant 0 : index
    %c0_32 = arith.constant 0 : index
    %101 = vector.load %arg9[%c0_31, %c0_32] : memref<1536x512xbf16, #tpu.memory_space<vmem>>, vector<1536x512xbf16>
    %cst_33 = arith.constant dense<0.000000e+00> : vector<8x512xf32>
    %102 = tpu.matmul %100, %101, %cst_33 {dimension_numbers = #tpu.dot_dimension_numbers<[1], [0], [0], [1], [0, 0, 1, 1], [], []>} : vector<8x1536xbf16>, vector<1536x512xbf16>, vector<8x512xf32> -> vector<8x512xf32>
    %103 = arith.addf %74, %102 : vector<8x512xf32>
    %c0_34 = arith.constant 0 : index
    %c0_35 = arith.constant 0 : index
    %c0_36 = arith.constant 0 : index
    %104 = vector.load %arg10[%c0_34, %c0_35, %c0_36] : memref<1x8x512xf32, #tpu.memory_space<vmem>>, vector<1x8x512xf32>
    %105 = vector.shape_cast %104 : vector<1x8x512xf32> to vector<8x512xf32>
    %106 = vector.shape_cast %103 : vector<8x512xf32> to vector<1x8x512xf32>
    tpu.vector_store %arg10[%c0_34, %c0_35, %c0_36], %106 {strides = array<i32>} : memref<1x8x512xf32, #tpu.memory_space<vmem>>, vector<1x8x512xf32>,
    return
  }
  func.func @transform_0(%arg0: i32) -> (i32, i32, i32) {
    %c0_i32 = arith.constant 0 : i32
    %c0_i32_0 = arith.constant 0 : i32
    %c0_i32_1 = arith.constant 0 : i32
    return %arg0, %c0_i32, %c0_i32_0 : i32, i32, i32
  }
  func.func @transform_1(%arg0: i32) -> (i32, i32) {
    %c0_i32 = arith.constant 0 : i32
    %c0_i32_0 = arith.constant 0 : i32
    %c0_i32_1 = arith.constant 0 : i32
    return %c0_i32, %c0_i32_0 : i32, i32
  }
  func.func @transform_2(%arg0: i32) -> (i32, i32) {
    %c0_i32 = arith.constant 0 : i32
    %c0_i32_0 = arith.constant 0 : i32
    %c0_i32_1 = arith.constant 0 : i32
    return %c0_i32, %c0_i32_0 : i32, i32
  }
  func.func @transform_3(%arg0: i32) -> (i32, i32) {
    %c0_i32 = arith.constant 0 : i32
    %c0_i32_0 = arith.constant 0 : i32
    %c0_i32_1 = arith.constant 0 : i32
    return %c0_i32, %c0_i32_0 : i32, i32
  }
  func.func @transform_4(%arg0: i32) -> (i32, i32) {
    %c0_i32 = arith.constant 0 : i32
    %c0_i32_0 = arith.constant 0 : i32
    %c0_i32_1 = arith.constant 0 : i32
    return %c0_i32, %c0_i32_0 : i32, i32
  }
  func.func @transform_5(%arg0: i32) -> (i32, i32) {
    %c0_i32 = arith.constant 0 : i32
    %c0_i32_0 = arith.constant 0 : i32
    %c0_i32_1 = arith.constant 0 : i32
    return %c0_i32, %c0_i32_0 : i32, i32
  }
  func.func @transform_6(%arg0: i32) -> (i32, i32) {
    %c0_i32 = arith.constant 0 : i32
    %c0_i32_0 = arith.constant 0 : i32
    %c0_i32_1 = arith.constant 0 : i32
    return %c0_i32, %c0_i32_0 : i32, i32
  }
  func.func @transform_7(%arg0: i32) -> (i32, i32) {
    %c0_i32 = arith.constant 0 : i32
    %c0_i32_0 = arith.constant 0 : i32
    %c0_i32_1 = arith.constant 0 : i32
    return %c0_i32, %c0_i32_0 : i32, i32
  }
  func.func @transform_8(%arg0: i32) -> (i32, i32) {
    %c0_i32 = arith.constant 0 : i32
    %c0_i32_0 = arith.constant 0 : i32
    %c0_i32_1 = arith.constant 0 : i32
    return %c0_i32, %c0_i32_0 : i32, i32
  }
  func.func @transform_9(%arg0: i32) -> (i32, i32, i32) {
    %c0_i32 = arith.constant 0 : i32
    %c0_i32_0 = arith.constant 0 : i32
    %c0_i32_1 = arith.constant 0 : i32
    return %arg0, %c0_i32, %c0_i32_0 : i32, i32, i32
  }
}

</mosaic_0001>

<bundles_post_ra>
// kernel: tpu_custom_call.1
= control target key start
LH: loop header
LB: loop body
LE: loop exit
PB: predicated region body
PF: predicated region fallthrough
CT: control target
= control target key end

     0   :  { %s18442_s0 = inlined_call_operand.hbm [shape: f32[2,8,512], index: 0, kind: input, shape index: {}]   ;;  %s18443_s1 = inlined_call_operand.hbm [shape: f32[8,128], index: 1, kind: input, shape index: {}]   ;;  %s18444_s2 = inlined_call_operand.hbm [shape: f32[8,128], index: 2, kind: input, shape index: {}]   ;;  %s18445_s3 = inlined_call_operand.hbm [shape: f32[1,512], index: 3, kind: input, shape index: {}]   ;;  %s18446_s4 = inlined_call_operand.hbm [shape: f32[1,512], index: 4, kind: input, shape index: {}]   ;;  %s18447_s5 = inlined_call_operand.hbm [shape: bf16[512,1536], index: 5, kind: input, shape index: {}]   ;;  %s18448_s6 = inlined_call_operand.hbm [shape: bf16[512,512], index: 6, kind: input, shape index: {}]   ;;  %s18449_s7 = inlined_call_operand.hbm [shape: bf16[512,3072], index: 7, kind: input, shape index: {}]   ;;  %s18450_s8 = inlined_call_operand.hbm [shape: bf16[1536,512], index: 8, kind: input, shape index: {}]   ;;  %s18451_s9 = inlined_call_operand.hbm [shape: f32[2,8,512], index: 9, kind: output, shape index: {}]  }
   0x1   :  { %18456 = sst [smem:[#allocation24_spill]] %s18443_s1 }
   0x2   :  { %18457 = sst [smem:[#allocation25_spill]] %s18444_s2 }
   0x3   :  { %18458 = sst [smem:[#allocation26_spill]] %s18445_s3 }
   0x4   :  { %18459 = sst [smem:[#allocation27_spill]] %s18446_s4 }
   0x5   :  { %14 = vsyncpa [#allocation3], 0 }
   0x6   :  { %16 = vsyncpa [#allocation3 + $0x1], 0 }
   0x7   :  { %17 = vsyncpa [#allocation6], 0 }
   0x8   :  { %18 = vsyncpa [#allocation9], 0 }
   0x9   :  { %19 = vsyncpa [#allocation12], 0 }
   0xa   :  { %20 = vsyncpa [#allocation15], 0 }
   0xb   :  { %21 = vsyncpa [#allocation4], 0 }
   0xc   :  { %23 = vsyncpa [#allocation4 + $0x1], 0  ;;  %s17686_s30 = smov 0   ;;  %s17688_s10 = smov 0  }
   0xd   :  { %s17690_s11 = smov 0   ;;  %s17692_s12 = smov 0  }
   0xe LB: > { %s17615_s13 = smov [#allocation5]   ;;  %s17707_s15 = sadd.s32 4294967295, %s17613_s12   ;;  %s17613_s12 = sphi %s17692_s12, %s18489_s12   ;;  %s17609_s11 = sphi %s17690_s11, %s18488_s11   ;;  %s17605_s10 = sphi %s17688_s10, %s18487_s10   ;;  %s17601_s30 = sphi %s17686_s30, %s18486_s30  }
   0xf   : > { %s267_s14 = sshll.u32 %s17615_s13, 4  ;;  %p13960_p0 = scmp.ge.s32.totalorder %s17613_s12, 1  ;;  %s268_s14 = int_to_ptr.vmem [resolvable:$true] %s267_s14 }
  0x10   : > { %p18452_p1 = scmp.eq.s32.totalorder %s17707_s15, 0  ;;  %p254_p2 = scmp.lt.s32.totalorder %s17613_s12, 3 }
  0x11   : > { %s17616_s17 = smov [#allocation8]   ;;  %s17617_s19 = smov [#allocation11]  }
  0x12   : > { %p17712_p3 = pnand %p13960_p0, %p254_p2  ;;  %s289_s18 = sshll.u32 %s17616_s17, 4  ;;  %s290_s18 = int_to_ptr.vmem [resolvable:$true] %s289_s18 }
  0x13   : > { %s310_s20 = sshll.u32 %s17617_s19, 4  ;;  %s17308_s23 = scalar_lea.vmem %s268_s14, 128  ;;  %s17725_s20 = int_to_ptr.vmem [resolvable:$true] %s310_s20 }
  0x14   : > { %s18460_s16 = scalar_select %p17712_p3, 1, 0 }
  0x15   : > { %p15779_p5 = pneg %p17712_p3  ;;  %p17309_p8 = scmp.ne.s32.totalorder %s268_s14, %s17308_s23 }
  0x16   : > { %p17316_p11 = scmp.lt.s32.totalorder %s268_s14, %s268_s14  ;;  %p17317_p12 = scmp.lt.s32.totalorder %s17308_s23, %s17308_s23 }
  0x17   : > { %p17721_p6 = pnand %p15779_p5, %p18452_p1 }
  0x18   : > { %p17318_p13 = por %p17317_p12, %p17316_p11 }
  0x19   : > { %p17729_p7 = pneg %p17721_p6 }
  0x1b   : > { %p17311_p9 = pnand %p17309_p8, %p17729_p7 }
  0x1d   : > { %p17312_p10 = pneg %p17311_p9 }
  0x1f   : > { %p17319_p0 = pnand %p17318_p13, %p17312_p10 }
  0x21   : > { %17322 = shalt.err (!%p17319_p0)
}
  0x22   : > { %s18463_s1 = sld [smem:[#allocation24_spill]]  ;;  %s17334_s26 = scalar_lea.vmem %s290_s18, 64 }
  0x23   : > { %p17335_p2 = scmp.ne.s32.totalorder %s290_s18, %s17334_s26  ;;  %p17342_p1 = scmp.lt.s32.totalorder %s290_s18, %s290_s18 }
  0x24   : > { %p17343_p8 = scmp.lt.s32.totalorder %s17334_s26, %s17334_s26 }
  0x25   : > { %p17337_p5 = pnand %p17335_p2, %p17729_p7 }
  0x26   : > { %p17344_p9 = por %p17343_p8, %p17342_p1 }
  0x27   : > { %p17338_p4 = pneg %p17337_p5 }
  0x28   : > { %15782 = dma.hbm_to_vmem [thread:$0]  (!%p17721_p6), %s18463_s1, 128, %s268_s14, [#allocation6]  }
  0x29   : > { %p17345_p3 = pnand %p17344_p9, %p17338_p4 }
  0x2b   : > { %17348 = shalt.err (!%p17345_p3)
}
  0x2c   : > { %s18464_s3 = sld [smem:[#allocation26_spill]]  ;;  %s17360_s29 = scalar_lea.vmem %s17725_s20, 49152 }
  0x2d   : > { %p17361_p10 = scmp.ne.s32.totalorder %s17725_s20, %s17360_s29  ;;  %p17368_p13 = scmp.lt.s32.totalorder %s17725_s20, %s17725_s20 }
  0x2e   : > { %p17369_p1 = scmp.lt.s32.totalorder %s17360_s29, %s17360_s29 }
  0x2f   : > { %p17363_p11 = pnand %p17361_p10, %p17729_p7 }
  0x30   : > { %p17370_p4 = por %p17369_p1, %p17368_p13 }
  0x31   : > { %p17364_p12 = pneg %p17363_p11 }
  0x32   : > { %15788 = dma.hbm_to_vmem [thread:$0]  (!%p17721_p6), %s18464_s3, 64, %s290_s18, [#allocation9]  }
  0x33   : > { %p17371_p3 = pnand %p17370_p4, %p17364_p12 }
  0x35   : > { %17374 = shalt.err (!%p17371_p3)
}
  0x36   : > { %s17618_s13 = smov 768   ;;  %s17619_s14 = smov 48  }
  0x37   : > { %15794 = dma.hbm_to_vmem [thread:$0]  (!%p17721_p6), %s18447_s5, 49152, %s17725_s20, [#allocation12], %s17618_s13, %s17618_s13, %s17619_s14  }
  0x38   : > { %s17620_s18 = smov [#allocation14]  }
  0x39   : > { %s336_s23 = sshll.u32 %s17620_s18, 4  ;;  %s337_s23 = int_to_ptr.vmem [resolvable:$true] %s336_s23 }
  0x3a   : > { %s17386_s24 = scalar_lea.vmem %s337_s23, 98304  ;;  %p17394_p8 = scmp.lt.s32.totalorder %s337_s23, %s337_s23 }
  0x3b   : > { %p17387_p0 = scmp.ne.s32.totalorder %s337_s23, %s17386_s24  ;;  %p17395_p9 = scmp.lt.s32.totalorder %s17386_s24, %s17386_s24 }
  0x3d   : > { %p17389_p2 = pnand %p17387_p0, %p17729_p7  ;;  %p17396_p10 = por %p17395_p9, %p17394_p8 }
  0x3f   : > { %p17390_p5 = pneg %p17389_p2 }
  0x41   : > { %p17397_p11 = pnand %p17396_p10, %p17390_p5 }
  0x43   : > { %17400 = shalt.err (!%p17397_p11)
}
  0x44   : > { %s17621_s25 = smov 1536   ;;  %s17622_s26 = smov 96  }
  0x45   : > { %15800 = dma.hbm_to_vmem [thread:$0]  (!%p17721_p6), %s18449_s7, 98304, %s337_s23, [#allocation15], %s17621_s25, %s17621_s25, %s17622_s26  }
  0x46   : > { %s17623_s28 = smov [#allocation7]   ;;  %s17624_s13 = smov [#allocation10]  }
  0x47   : > { %s278_s29 = sshll.u32 %s17623_s28, 4  ;;  %s300_s14 = sshll.u32 %s17624_s13, 4  ;;  %s279_s29 = int_to_ptr.vmem [resolvable:$true] %s278_s29  ;;  %s301_s14 = int_to_ptr.vmem [resolvable:$true] %s300_s14 }
  0x48   : > { %s17412_s17 = scalar_lea.vmem %s279_s29, 128  ;;  %p17420_p4 = scmp.lt.s32.totalorder %s279_s29, %s279_s29 }
  0x49   : > { %p17413_p12 = scmp.ne.s32.totalorder %s279_s29, %s17412_s17  ;;  %p17421_p3 = scmp.lt.s32.totalorder %s17412_s17, %s17412_s17 }
  0x4b   : > { %p17415_p13 = pnand %p17413_p12, %p17729_p7  ;;  %p17422_p0 = por %p17421_p3, %p17420_p4 }
  0x4d   : > { %p17416_p1 = pneg %p17415_p13 }
  0x4f   : > { %p17423_p2 = pnand %p17422_p0, %p17416_p1 }
  0x51   : > { %17426 = shalt.err (!%p17423_p2)
}
  0x52   : > { %s18465_s2 = sld [smem:[#allocation25_spill]]  ;;  %s17438_s23 = scalar_lea.vmem %s301_s14, 64 }
  0x53   : > { %p17439_p5 = scmp.ne.s32.totalorder %s301_s14, %s17438_s23  ;;  %p17446_p10 = scmp.lt.s32.totalorder %s301_s14, %s301_s14 }
  0x54   : > { %p17447_p11 = scmp.lt.s32.totalorder %s17438_s23, %s17438_s23 }
  0x55   : > { %p17441_p8 = pnand %p17439_p5, %p17729_p7 }
  0x56   : > { %p17448_p12 = por %p17447_p11, %p17446_p10 }
  0x57   : > { %p17442_p9 = pneg %p17441_p8 }
  0x58   : > { %15785 = dma.hbm_to_vmem [thread:$0]  (!%p17721_p6), %s18465_s2, 128, %s279_s29, [#allocation6]  }
  0x59   : > { %p17449_p13 = pnand %p17448_p12, %p17442_p9 }
  0x5b   : > { %17452 = shalt.err (!%p17449_p13)
}
  0x5c   : > { %s18466_s4 = sld [smem:[#allocation27_spill]]  ;;  %s17625_s26 = smov [#allocation13]  }
  0x5d   : > { %s323_s27 = sshll.u32 %s17625_s26, 4  ;;  %s324_s27 = int_to_ptr.vmem [resolvable:$true] %s323_s27 }
  0x5e   : > { %s17464_s20 = scalar_lea.vmem %s324_s27, 16384  ;;  %p17472_p0 = scmp.lt.s32.totalorder %s324_s27, %s324_s27 }
  0x5f   : > { %p17465_p1 = scmp.ne.s32.totalorder %s324_s27, %s17464_s20  ;;  %p17473_p2 = scmp.lt.s32.totalorder %s17464_s20, %s17464_s20 }
  0x61   : > { %p17467_p4 = pnand %p17465_p1, %p17729_p7  ;;  %p17474_p5 = por %p17473_p2, %p17472_p0 }
  0x62   : > { %15791 = dma.hbm_to_vmem [thread:$0]  (!%p17721_p6), %s18466_s4, 64, %s301_s14, [#allocation9]  }
  0x63   : > { %p17468_p3 = pneg %p17467_p4 }
  0x65   : > { %p17475_p8 = pnand %p17474_p5, %p17468_p3 }
  0x67   : > { %17478 = shalt.err (!%p17475_p8)
}
  0x68   : > { %s17626_s28 = smov 256   ;;  %s17627_s29 = smov 16  }
  0x69   : > { %15797 = dma.hbm_to_vmem [thread:$0]  (!%p17721_p6), %s18448_s6, 16384, %s324_s27, [#allocation12], %s17626_s28, %s17626_s28, %s17627_s29  }
  0x6a   : > { %s17628_s17 = smov [#allocation16]  }
  0x6b   : > { %s349_s19 = sshll.u32 %s17628_s17, 4  ;;  %s350_s19 = int_to_ptr.vmem [resolvable:$true] %s349_s19 }
  0x6c   : > { %s17490_s18 = scalar_lea.vmem %s350_s19, 49152  ;;  %p17498_p12 = scmp.lt.s32.totalorder %s350_s19, %s350_s19 }
  0x6d   : > { %p17491_p9 = scmp.ne.s32.totalorder %s350_s19, %s17490_s18  ;;  %p17499_p13 = scmp.lt.s32.totalorder %s17490_s18, %s17490_s18 }
  0x6f   : > { %p17493_p10 = pnand %p17491_p9, %p17729_p7  ;;  %p17500_p1 = por %p17499_p13, %p17498_p12 }
  0x71   : > { %p17494_p11 = pneg %p17493_p10 }
  0x73   : > { %p17501_p4 = pnand %p17500_p1, %p17494_p11 }
  0x75   : > { %17504 = shalt.err (!%p17501_p4)
}
  0x76   : > { %15803 = dma.hbm_to_vmem [thread:$0]  (!%p17721_p6), %s18450_s8, 49152, %s350_s19, [#allocation15], %s17626_s28, %s17626_s28, %s17627_s29  }
  0x77   : > { %s13959_s22 = sadd.s32 4294967294, %s17613_s12   ;;  %s17796_s21 = sadd.s32 1, %s17613_s12  }
  0x78   : > { %s33_s25 = ssub.s32 %s17613_s12, %s17796_s21  ;;  %s36_s26 = sadd.s32 1, %s17609_s11 }
  0x79   : > { %p34_p7 = scmp.eq.s32.totalorder %s33_s25, 0  ;;  %p43_p3 = scmp.ne.s32.totalorder %s17609_s11, %s17605_s10 }
  0x7a   : > { %p44_p0 = scmp.eq.s32.totalorder %s17613_s12, 0  ;;  %p49_p2 = scmp.ne.s32.totalorder %s17605_s10, %s17601_s30 }
  0x7b   : > { %s17807_s27 = scalar_select %p34_p7, %s17609_s11, %s36_s26  }
  0x7c   : > { %p17809_p5 = por %p44_p0, %p43_p3  ;;  %p18468_p8 = scmp.eq.s32.totalorder %s17707_s15, 0 }
  0x7d   : > { %p241_p9 = scmp.eq.s32.totalorder %s17707_s15, 1  ;;  %p247_p10 = scmp.eq.s32.totalorder %s13959_s22, 1 }
  0x7e   : > { %p17815_p6 = por %p18468_p8, %p49_p2  ;;  %p15820_p11 = scmp.lt.s32.totalorder %s17613_s12, 2 }
  0x7f   : > { %s363_s29 = sand.u32 1, %s17609_s11   ;;  %p17822_p12 = por %p241_p9, %p43_p3 }
  0x80   : > { %s18469_s28 = scalar_select %p17815_p6, 1, 0 }
  0x81   : > { %s18470_s13 = scalar_select %p17822_p12, 1, 0 }
  0x82   : > { %p17826_p13 = por %p247_p10, %p49_p2  ;;  %s13970_s17 = sshll.u32 %s363_s29, 5 }
  0x83   : > { %s15677_s19 = sshll.u32 %s17613_s12, 9  ;;  %s367_s22 = scalar_lea.vmem [#allocation2], %s13970_s17 }
  0x84   : > { %s18471_s14 = scalar_select %p17826_p13, 1, 0 }
  0x85   : > { %s17834_s24 = scalar_lea.hbm %s18442_s0, %s15677_s19  ;;  %s375_s25 = sshll.u32 %s367_s22, 4  ;;  %s376_s25 = int_to_ptr.vmem [resolvable:$true] %s375_s25 }
  0x86   : > { %p17838_p1 = pnand %p15820_p11, %p17809_p5  ;;  %s364_s1 = scalar_lea.sflag [#allocation3], %s363_s29 }
  0x87   : > { %s17505_s2 = scalar_lea.hbm %s17834_s24, 512  ;;  %s17510_s23 = scalar_lea.hbm %s18442_s0, 1024 }
  0x88   : > { %p17506_p4 = scmp.ne.s32.totalorder %s17834_s24, %s17505_s2  ;;  %p17507_p7 = pneg %p17838_p1 }
  0x89   : > { %p17511_p2 = scmp.lt.s32.totalorder %s17834_s24, %s18442_s0  ;;  %p17512_p5 = scmp.lt.s32.totalorder %s17510_s23, %s17505_s2 }
  0x8a   : > { %p17508_p3 = pnand %p17507_p7, %p17506_p4 }
  0x8b   : > { %p17513_p8 = por %p17512_p5, %p17511_p2 }
  0x8c   : > { %p17509_p0 = pneg %p17508_p3 }
  0x8e   : > { %p17514_p9 = pnand %p17513_p8, %p17509_p0 }
  0x90   : > { %17517 = shalt.err (!%p17514_p9)
}
  0x91   : > { %s17518_s20 = scalar_lea.vmem %s376_s25, 512  ;;  %s17629_s29 = smov [#allocation2]  }
  0x92   : > { %p17519_p10 = scmp.ne.s32.totalorder %s376_s25, %s17518_s20  ;;  %s17523_s3 = sshll.u32 %s17629_s29, 4  ;;  %s17524_s3 = int_to_ptr.vmem [resolvable:$false] %s17523_s3 }
  0x93   : > { %s17525_s4 = scalar_lea.vmem %s17524_s3, 1024  ;;  %p17526_p4 = scmp.lt.s32.totalorder %s376_s25, %s17524_s3 }
  0x94   : > { %p17521_p11 = pnand %p17519_p10, %p17507_p7  ;;  %p17527_p3 = scmp.lt.s32.totalorder %s17525_s4, %s17518_s20 }
  0x96   : > { %p17522_p13 = pneg %p17521_p11  ;;  %p17528_p12 = por %p17527_p3, %p17526_p4 }
  0x98   : > { %p17529_p6 = pnand %p17528_p12, %p17522_p13 }
  0x9a   : > { %17532 = shalt.err (!%p17529_p6)
}
  0x9b   : > { %15807 = dma.hbm_to_vmem [thread:$0]  (!%p17838_p1), %s17834_s24, 512, %s376_s25, %s364_s1  }
  0x9c   : > { %p18473_p0 = scmp.ne.s32.totalorder %s18460_s16, 0 }
  0x9d   : > { %s17859_s2 = sand.u32 (!%p18473_p0), 1, %s17605_s10   ;;  %p18474_p6 = scmp.ne.s32.totalorder (!%p18473_p0), %s18469_s28, 0 }
  0x9e   : > { %384 = sbr.rel (%p18473_p0) target bundleno = 3359 (0xd1f), region = 56  ;;  %s13974_s19 = sshll.u32 (!%p18473_p0), %s17859_s2, 5 }
  0x9f   : > { %s387_s3 = scalar_lea.sflag (!%p18473_p0), [#allocation3], %s17859_s2  ;;  %s17865_s4 = scalar_lea.vmem (!%p18473_p0), [#allocation2], %s13974_s19 }
  0xa3   : > { %17576 = dma.done.wait (%p18474_p6), %s387_s3, 512  }
  0xa4   : > { %17578 = vsyncadd (%p18474_p6), %s387_s3, 4294966784  ;;  %p18475_p12 = scmp.eq.s32.totalorder %s17707_s15, 0 }
  0xa6   : > { %17580 = dma.done.wait (%p18475_p12), [#allocation6], 256   ;;  %p18476_p13 = pmov %p18475_p12 }
  0xa7   : > { %p18477_p1 = pmov %p18475_p12 }
  0xa8   : > { %17582 = vsyncadd (%p18476_p13), [#allocation6], 4294967040 }
  0xa9   : > { %17584 = dma.done.wait (%p18477_p1), [#allocation9], 128   ;;  %p18478_p7 = pmov %p18477_p1 }
  0xaa   : > { %p18479_p2 = pmov %p18477_p1 }
  0xab   : > { %17586 = vsyncadd (%p18478_p7), [#allocation9], 4294967168 }
  0xac   : > { %17588 = dma.done.wait (%p18479_p2), [#allocation12], 65536   ;;  %p18480_p5 = pmov %p18477_p1 }
  0xad   : > { %p18481_p8 = pmov %p18477_p1 }
  0xae   : > { %17590 = vsyncadd (%p18480_p5), [#allocation12], 4294901760 }
  0xaf   : > { %17592 = dma.done.wait (%p18481_p8), [#allocation15], 147456   ;;  %p18482_p9 = pmov %p18477_p1 }
  0xb0   : > { %v17888_v0 = vld [vmem:[%s17865_s4] sm:$0xff]  ;;  %v17891_v1 = vld [vmem:[%s17865_s4 + $0x8] sm:$0xff]  ;;  %v17894_v2 = vld [vmem:[%s17865_s4 + $0x10] sm:$0xff]  ;;  %s17632_s1 = smov 64   ;;  %vm17634_vm0 = vmmov 0   ;;  %vm3990_vm1 = vcmask 1043456  }
  0xb1   : > { %17594 = vsyncadd (%p18482_p9), [#allocation15], 4294819840  ;;  %v17897_v3 = vld [vmem:[%s17865_s4 + $0x18] sm:$0xff]  ;;  %v465_v4 = vmul.f32 %v17888_v0, %v17888_v0  ;;  %v466_v5 = vmul.f32 %v17891_v1, %v17891_v1  ;;  %v467_v6 = vmul.f32 %v17894_v2, %v17894_v2  ;;  %vm3938_vm3 = vcmask 64512   ;;  %s18391_s16 = scalar_lea.vmem [#allocation17], %s13974_s19  ;;  %s15678_s28 = sshll.u32 %s17707_s15, 9 }
  0xb2   : > { %v15881_v7 = vld [vmem:[#allocation11 + $0x2a4] ss:$48 sps:$4 sm:$0xff]   ;;  %v468_v8 = vmul.f32 %v17897_v3, %v17897_v3  ;;  %v15885_v11 = vld [vmem:[#allocation11 + $0x2a0] ss:$48 sps:$4 sm:$0xff]   ;;  %s13813_s24 = sshll.u32 %s18391_s16, 4  ;;  %s18404_s18 = scalar_lea.hbm %s18451_s9, %s15678_s28  ;;  %s13814_s24 = int_to_ptr.vmem [resolvable:$true] %s13813_s24 }
  0xb3   : > { %v469_v9 = vadd.f32 %v466_v5, %v465_v4  ;;  %v15883_v10 = vld [vmem:[#allocation11 + $0x8a4] ss:$48 sps:$4 sm:$0xff]   ;;  %v15886_v12 = vld [vmem:[#allocation11 + $0x8a0] ss:$48 sps:$4 sm:$0xff]   ;;  %2815 = vmatprep.subr.bf16.mxu0 %v15881_v7  ;;  %s13799_s23 = scalar_lea.sflag [#allocation4], %s17859_s2  ;;  %s17533_s17 = scalar_lea.vmem %s13814_s24, 512 }
  0xb4   : > { %v15887_v13 = vld [vmem:[#allocation11 + $0x244] ss:$48 sps:$4 sm:$0xff]   ;;  %2856 = vmatprep.subr.bf16.mxu1 %v15883_v10  ;;  %2816 = vmatpush1.bf16.msra.mxu0 %v15885_v11  ;;  %v15891_v16 = vld [vmem:[#allocation11 + $0x240] ss:$48 sps:$4 sm:$0xff]   ;;  %p17534_p10 = scmp.ne.s32.totalorder %s13814_s24, %s17533_s17  ;;  %p18483_p11 = scmp.ne.s32.totalorder %s18470_s13, 0 }
  0xb5   : > { %v470_v14 = vadd.f32 %v469_v9, %v467_v6  ;;  %v15889_v15 = vld [vmem:[#allocation11 + $0x844] ss:$48 sps:$4 sm:$0xff]   ;;  %2857 = vmatpush1.bf16.msra.mxu1 %v15886_v12  ;;  %2817 = vmatprep.subr.bf16.mxu0 %v15887_v13  ;;  %v15892_v17 = vld [vmem:[#allocation11 + $0x840] ss:$48 sps:$4 sm:$0xff]   ;;  %s17635_s15 = smov [#allocation17]  }
  0xb6   : > { %2858 = vmatprep.subr.bf16.mxu1 %v15889_v15  ;;  %v15893_v19 = vld [vmem:[#allocation11 + $0x1e4] ss:$48 sps:$4 sm:$0xff]   ;;  %v15897_v21 = vld [vmem:[#allocation11 + $0x1e0] ss:$48 sps:$4 sm:$0xff]   ;;  %v15979_v15 = vld [vmem:[#allocation11 + $0x2ac] ss:$48 sps:$4 sm:$0xff]   ;;  %p17535_p4 = pnand %p17534_p10, %p18483_p11 }
  0xb7   : > { %v471_v18 = vadd.f32 %v470_v14, %v468_v8  ;;  %v15895_v20 = vld [vmem:[#allocation11 + $0x7e4] ss:$48 sps:$4 sm:$0xff]   ;;  %v15898_v22 = vld [vmem:[#allocation11 + $0x7e0] ss:$48 sps:$4 sm:$0xff]   ;;  %s17537_s22 = sshll.u32 %s17635_s15, 4  ;;  %s17538_s22 = int_to_ptr.vmem [resolvable:$false] %s17537_s22 }
  0xb8   : > { %2818 = vmatpush1.bf16.msra.mxu0 %v15891_v16  ;;  %v15899_v23 = vld [vmem:[#allocation11 + $0x184] ss:$48 sps:$4 sm:$0xff]   ;;  %v15903_v25 = vld [vmem:[#allocation11 + $0x180] ss:$48 sps:$4 sm:$0xff]   ;;  %v15982_v16 = vld [vmem:[#allocation11 + $0x8ac] ss:$48 sps:$4 sm:$0xff]   ;;  %p17536_p3 = pneg %p17535_p4  ;;  %p17540_p0 = scmp.lt.s32.totalorder %s13814_s24, %s17538_s22 }
  0xb9   : > { %472 = vadd.xlane.f32.xlu0 %v471_v18  ;;  %2859 = vmatpush1.bf16.msra.mxu1 %v15892_v17  ;;  %v15901_v24 = vld [vmem:[#allocation11 + $0x784] ss:$48 sps:$4 sm:$0xff]   ;;  %v15904_v26 = vld [vmem:[#allocation11 + $0x780] ss:$48 sps:$4 sm:$0xff]   ;;  %s17539_s20 = scalar_lea.vmem %s17538_s22, 1024 }
  0xba   : > { %2819 = vmatprep.subr.bf16.mxu0 %v15893_v19  ;;  %2860 = vmatprep.subr.bf16.mxu1 %v15895_v20  ;;  %v15905_v27 = vld [vmem:[#allocation11 + $0x124] ss:$48 sps:$4 sm:$0xff]   ;;  %v15909_v29 = vld [vmem:[#allocation11 + $0x120] ss:$48 sps:$4 sm:$0xff]   ;;  %v483_v20 = vlaneseq  ;;  %p17541_p6 = scmp.lt.s32.totalorder %s17539_s20, %s17533_s17 }
  0xbb   : > { %v15907_v28 = vld [vmem:[#allocation11 + $0x724] ss:$48 sps:$4 sm:$0xff]   ;;  %v15910_v30 = vld [vmem:[#allocation11 + $0x720] ss:$48 sps:$4 sm:$0xff]  }
  0xbc   : > { %2820 = vmatpush1.bf16.msra.mxu0 %v15897_v21  ;;  %v15911_v31 = vld [vmem:[#allocation11 + $0xc4] ss:$48 sps:$4 sm:$0xff]   ;;  %v15915_v33 = vld [vmem:[#allocation11 + $0xc0] ss:$48 sps:$4 sm:$0xff]   ;;  %v17908_v21 = vshrl.u32 %v483_v20, 7  ;;  %p17542_p12 = por %p17541_p6, %p17540_p0 }
  0xbd   : > { %2861 = vmatpush1.bf16.msra.mxu1 %v15898_v22  ;;  %2821 = vmatprep.subr.bf16.mxu0 %v15899_v23  ;;  %v15913_v32 = vld [vmem:[#allocation11 + $0x6c4] ss:$48 sps:$4 sm:$0xff]   ;;  %v15916_v34 = vld [vmem:[#allocation11 + $0x6c0] ss:$48 sps:$4 sm:$0xff]  }
  0xbe   : > { %2862 = vmatprep.subr.bf16.mxu1 %v15901_v24  ;;  %v15917_v35 = vld [vmem:[#allocation11 + $0x64] ss:$48 sps:$4 sm:$0xff]   ;;  %v15921_v37 = vld [vmem:[#allocation11 + $0x60] ss:$48 sps:$4 sm:$0xff]   ;;  %v489_v22 = vsub.s32 1, %v17908_v21  ;;  %v497_v23 = vsub.s32 3, %v17908_v21  ;;  %p17543_p13 = pnand %p17542_p12, %p17536_p3 }
  0xbf   : > { %v15919_v36 = vld [vmem:[#allocation11 + $0x664] ss:$48 sps:$4 sm:$0xff]   ;;  %v15922_v38 = vld [vmem:[#allocation11 + $0x660] ss:$48 sps:$4 sm:$0xff]   ;;  %v464_v24 = vld [vmem:[#allocation8] sm:$0xf] }
  0xc0   : > { %2822 = vmatpush1.bf16.msra.mxu0 %v15903_v25  ;;  %v15923_v39 = vld [vmem:[#allocation11 + $0x4] ss:$48 sps:$4 sm:$0xff]   ;;  %v15927_v41 = vld [vmem:[#allocation11] ss:$48 sps:$4 sm:$0xff]   ;;  %v485_v25 = vsub.s32 0, %v17908_v21 }
  0xc1   : > { %2863 = vmatpush1.bf16.msra.mxu1 %v15904_v26  ;;  %2823 = vmatprep.subr.bf16.mxu0 %v15905_v27  ;;  %v15925_v40 = vld [vmem:[#allocation11 + $0x604] ss:$48 sps:$4 sm:$0xff]   ;;  %v15928_v42 = vld [vmem:[#allocation11 + $0x600] ss:$48 sps:$4 sm:$0xff]   ;;  %v493_v26 = vsub.s32 2, %v17908_v21  ;;  %v490_v27 = vrot.slane %v464_v24, %v489_v22 }
  0xc2   : > { %2864 = vmatprep.subr.bf16.mxu1 %v15907_v28  ;;  %v15929_v43 = vld [vmem:[#allocation11 + $0x5a4] ss:$48 sps:$4 sm:$0xff]   ;;  %v15933_v45 = vld [vmem:[#allocation11 + $0x5a0] ss:$48 sps:$4 sm:$0xff]   ;;  %v498_v28 = vrot.slane %v464_v24, %v497_v23 }
  0xc3   : > { %v15931_v44 = vld [vmem:[#allocation11 + $0xba4] ss:$48 sps:$4 sm:$0xff]   ;;  %v15934_v46 = vld [vmem:[#allocation11 + $0xba0] ss:$48 sps:$4 sm:$0xff]  }
  0xc4   : > { %2824 = vmatpush1.bf16.msra.mxu0 %v15909_v29  ;;  %v15935_v47 = vld [vmem:[#allocation11 + $0x544] ss:$48 sps:$4 sm:$0xff]   ;;  %v15939_v49 = vld [vmem:[#allocation11 + $0x540] ss:$48 sps:$4 sm:$0xff]   ;;  %v486_v29 = vrot.slane %v464_v24, %v485_v25 }
  0xc5   : > { %2865 = vmatpush1.bf16.msra.mxu1 %v15910_v30  ;;  %2825 = vmatprep.subr.bf16.mxu0 %v15911_v31  ;;  %v15937_v48 = vld [vmem:[#allocation11 + $0xb44] ss:$48 sps:$4 sm:$0xff]   ;;  %v15940_v50 = vld [vmem:[#allocation11 + $0xb40] ss:$48 sps:$4 sm:$0xff]   ;;  %v494_v30 = vrot.slane %v464_v24, %v493_v26  ;;  %v16037_v24 = vld [vmem:[#allocation11 + $0x4e8] ss:$48 sps:$4 sm:$0xff]  }
  0xc6   : > { %2866 = vmatprep.subr.bf16.mxu1 %v15913_v32  ;;  %v15941_v51 = vld [vmem:[#allocation11 + $0x4e4] ss:$48 sps:$4 sm:$0xff]   ;;  %v15945_v53 = vld [vmem:[#allocation11 + $0x4e0] ss:$48 sps:$4 sm:$0xff]  }
  0xc7   : > { %v15943_v52 = vld [vmem:[#allocation11 + $0xae4] ss:$48 sps:$4 sm:$0xff]   ;;  %v15946_v54 = vld [vmem:[#allocation11 + $0xae0] ss:$48 sps:$4 sm:$0xff]  }
  0xc8   : > { %2826 = vmatpush1.bf16.msra.mxu0 %v15915_v33  ;;  %v15947_v55 = vld [vmem:[#allocation11 + $0x484] ss:$48 sps:$4 sm:$0xff]   ;;  %v15951_v57 = vld [vmem:[#allocation11 + $0x480] ss:$48 sps:$4 sm:$0xff]  }
  0xc9   : > { %2867 = vmatpush1.bf16.msra.mxu1 %v15916_v34  ;;  %2827 = vmatprep.subr.bf16.mxu0 %v15917_v35  ;;  %v15949_v56 = vld [vmem:[#allocation11 + $0xa84] ss:$48 sps:$4 sm:$0xff]   ;;  %v15952_v58 = vld [vmem:[#allocation11 + $0xa80] ss:$48 sps:$4 sm:$0xff]  }
  0xca   : > { %2868 = vmatprep.subr.bf16.mxu1 %v15919_v36  ;;  %v15953_v59 = vld [vmem:[#allocation11 + $0x424] ss:$48 sps:$4 sm:$0xff]   ;;  %v15957_v61 = vld [vmem:[#allocation11 + $0x420] ss:$48 sps:$4 sm:$0xff]  }
  0xcb   : > { %v15955_v60 = vld [vmem:[#allocation11 + $0xa24] ss:$48 sps:$4 sm:$0xff]   ;;  %v15958_v62 = vld [vmem:[#allocation11 + $0xa20] ss:$48 sps:$4 sm:$0xff]  }
  0xcc   : > { %2828 = vmatpush1.bf16.msra.mxu0 %v15921_v37  ;;  %v15959_v63 = vld [vmem:[#allocation11 + $0x3c4] ss:$48 sps:$4 sm:$0xff]   ;;  %v15963_v5 = vld [vmem:[#allocation11 + $0x3c0] ss:$48 sps:$4 sm:$0xff]  }
  0xcd   : > { %2869 = vmatpush1.bf16.msra.mxu1 %v15922_v38  ;;  %2829 = vmatprep.subr.bf16.mxu0 %v15923_v39  ;;  %v15961_v4 = vld [vmem:[#allocation11 + $0x9c4] ss:$48 sps:$4 sm:$0xff]   ;;  %v15964_v6 = vld [vmem:[#allocation11 + $0x9c0] ss:$48 sps:$4 sm:$0xff]   ;;  %v15977_v38 = vld [vmem:[#allocation11 + $0x2a8] ss:$48 sps:$4 sm:$0xff]  }
  0xce   : > { %2870 = vmatprep.subr.bf16.mxu1 %v15925_v40  ;;  %v15965_v7 = vld [vmem:[#allocation11 + $0x364] ss:$48 sps:$4 sm:$0xff]   ;;  %v15969_v9 = vld [vmem:[#allocation11 + $0x360] ss:$48 sps:$4 sm:$0xff]   ;;  %v15980_v39 = vld [vmem:[#allocation11 + $0x8a8] ss:$48 sps:$4 sm:$0xff]  }
  0xcf   : > { %v15967_v8 = vld [vmem:[#allocation11 + $0x964] ss:$48 sps:$4 sm:$0xff]   ;;  %v15970_v10 = vld [vmem:[#allocation11 + $0x960] ss:$48 sps:$4 sm:$0xff]  }
  0xd0   : > { %2830 = vmatpush1.bf16.msra.mxu0 %v15927_v41  ;;  %v15971_v11 = vld [vmem:[#allocation11 + $0x304] ss:$48 sps:$4 sm:$0xff]   ;;  %v15975_v13 = vld [vmem:[#allocation11 + $0x300] ss:$48 sps:$4 sm:$0xff]  }
  0xd1   : > { %2871 = vmatpush1.bf16.msra.mxu1 %v15928_v42  ;;  %2831 = vmatprep.subr.bf16.mxu0 %v15929_v43  ;;  %v15973_v12 = vld [vmem:[#allocation11 + $0x904] ss:$48 sps:$4 sm:$0xff]   ;;  %v15976_v14 = vld [vmem:[#allocation11 + $0x900] ss:$48 sps:$4 sm:$0xff]  }
  0xd2   : > { %2872 = vmatprep.subr.bf16.mxu1 %v15931_v44 }
  0xd4   : > { %2832 = vmatpush2.bf16.msra.mxu0 %v15933_v45 }
  0xd5   : > { %2873 = vmatpush2.bf16.msra.mxu1 %v15934_v46  ;;  %2833 = vmatprep.subr.bf16.mxu0 %v15935_v47  ;;  %v15991_v46 = vld [vmem:[#allocation11 + $0x1ec] ss:$48 sps:$4 sm:$0xff]  }
  0xd6   : > { %2874 = vmatprep.subr.bf16.mxu1 %v15937_v48  ;;  %v15994_v47 = vld [vmem:[#allocation11 + $0x7ec] ss:$48 sps:$4 sm:$0xff]   ;;  %v15989_v48 = vld [vmem:[#allocation11 + $0x1e8] ss:$48 sps:$4 sm:$0xff]  }
  0xd8   : > { %2834 = vmatpush2.bf16.msra.mxu0 %v15939_v49  ;;  %v15992_v49 = vld [vmem:[#allocation11 + $0x7e8] ss:$48 sps:$4 sm:$0xff]  }
  0xd9   : > { %2875 = vmatpush2.bf16.msra.mxu1 %v15940_v50  ;;  %2835 = vmatprep.subr.bf16.mxu0 %v15941_v51  ;;  %v15997_v50 = vld [vmem:[#allocation11 + $0x18c] ss:$48 sps:$4 sm:$0xff]  }
  0xda   : > { %2876 = vmatprep.subr.bf16.mxu1 %v15943_v52  ;;  %v16000_v51 = vld [vmem:[#allocation11 + $0x78c] ss:$48 sps:$4 sm:$0xff]   ;;  %v15995_v52 = vld [vmem:[#allocation11 + $0x188] ss:$48 sps:$4 sm:$0xff]  }
  0xdc   : > { %2836 = vmatpush2.bf16.msra.mxu0 %v15945_v53  ;;  %v15998_v53 = vld [vmem:[#allocation11 + $0x788] ss:$48 sps:$4 sm:$0xff]  }
  0xdd   : > { %2877 = vmatpush2.bf16.msra.mxu1 %v15946_v54  ;;  %2837 = vmatprep.subr.bf16.mxu0 %v15947_v55  ;;  %v16003_v54 = vld [vmem:[#allocation11 + $0x12c] ss:$48 sps:$4 sm:$0xff]  }
  0xde   : > { %2878 = vmatprep.subr.bf16.mxu1 %v15949_v56  ;;  %v16006_v55 = vld [vmem:[#allocation11 + $0x72c] ss:$48 sps:$4 sm:$0xff]   ;;  %v16001_v56 = vld [vmem:[#allocation11 + $0x128] ss:$48 sps:$4 sm:$0xff]  }
  0xe0   : > { %2838 = vmatpush2.bf16.msra.mxu0 %v15951_v57  ;;  %v16004_v57 = vld [vmem:[#allocation11 + $0x728] ss:$48 sps:$4 sm:$0xff]  }
  0xe1   : > { %2879 = vmatpush2.bf16.msra.mxu1 %v15952_v58  ;;  %2839 = vmatprep.subr.bf16.mxu0 %v15953_v59  ;;  %v16009_v58 = vld [vmem:[#allocation11 + $0xcc] ss:$48 sps:$4 sm:$0xff]  }
  0xe2   : > { %2880 = vmatprep.subr.bf16.mxu1 %v15955_v60  ;;  %v16012_v59 = vld [vmem:[#allocation11 + $0x6cc] ss:$48 sps:$4 sm:$0xff]   ;;  %v16007_v60 = vld [vmem:[#allocation11 + $0xc8] ss:$48 sps:$4 sm:$0xff]  }
  0xe4   : > { %2840 = vmatpush2.bf16.msra.mxu0 %v15957_v61  ;;  %v16010_v61 = vld [vmem:[#allocation11 + $0x6c8] ss:$48 sps:$4 sm:$0xff]  }
  0xe5   : > { %2881 = vmatpush2.bf16.msra.mxu1 %v15958_v62  ;;  %2841 = vmatprep.subr.bf16.mxu0 %v15959_v63  ;;  %v16015_v62 = vld [vmem:[#allocation11 + $0x6c] ss:$48 sps:$4 sm:$0xff]  }
  0xe6   : > { %2882 = vmatprep.subr.bf16.mxu1 %v15961_v4  ;;  %v16018_v63 = vld [vmem:[#allocation11 + $0x66c] ss:$48 sps:$4 sm:$0xff]   ;;  %v16013_v4 = vld [vmem:[#allocation11 + $0x68] ss:$48 sps:$4 sm:$0xff]  }
  0xe8   : > { %2842 = vmatpush2.bf16.msra.mxu0 %v15963_v5  ;;  %v16016_v5 = vld [vmem:[#allocation11 + $0x668] ss:$48 sps:$4 sm:$0xff]  }
  0xe9   : > { %2883 = vmatpush2.bf16.msra.mxu1 %v15964_v6  ;;  %2843 = vmatprep.subr.bf16.mxu0 %v15965_v7  ;;  %v16021_v6 = vld [vmem:[#allocation11 + $0xc] ss:$48 sps:$4 sm:$0xff]  }
  0xea   : > { %2884 = vmatprep.subr.bf16.mxu1 %v15967_v8  ;;  %v16024_v7 = vld [vmem:[#allocation11 + $0x60c] ss:$48 sps:$4 sm:$0xff]   ;;  %v16019_v8 = vld [vmem:[#allocation11 + $0x8] ss:$48 sps:$4 sm:$0xff]  }
  0xec   : > { %2844 = vmatpush2.bf16.msra.mxu0 %v15969_v9  ;;  %v16022_v9 = vld [vmem:[#allocation11 + $0x608] ss:$48 sps:$4 sm:$0xff]  }
  0xed   : > { %2885 = vmatpush2.bf16.msra.mxu1 %v15970_v10  ;;  %2845 = vmatprep.subr.bf16.mxu0 %v15971_v11  ;;  %v16027_v10 = vld [vmem:[#allocation11 + $0x5ac] ss:$48 sps:$4 sm:$0xff]  }
  0xee   : > { %2886 = vmatprep.subr.bf16.mxu1 %v15973_v12  ;;  %v16030_v11 = vld [vmem:[#allocation11 + $0xbac] ss:$48 sps:$4 sm:$0xff]   ;;  %v16025_v12 = vld [vmem:[#allocation11 + $0x5a8] ss:$48 sps:$4 sm:$0xff]  }
  0xf0   : > { %2846 = vmatpush2.bf16.msra.mxu0 %v15975_v13  ;;  %v16028_v13 = vld [vmem:[#allocation11 + $0xba8] ss:$48 sps:$4 sm:$0xff]  }
  0xf1   : > { %2887 = vmatpush2.bf16.msra.mxu1 %v15976_v14  ;;  %2897 = vmatprep.subr.bf16.mxu0 %v15979_v15  ;;  %v16033_v14 = vld [vmem:[#allocation11 + $0x54c] ss:$48 sps:$4 sm:$0xff]  }
  0xf2   : > { %2938 = vmatprep.subr.bf16.mxu1 %v15982_v16  ;;  %v16036_v15 = vld [vmem:[#allocation11 + $0xb4c] ss:$48 sps:$4 sm:$0xff]   ;;  %v16031_v16 = vld [vmem:[#allocation11 + $0x548] ss:$48 sps:$4 sm:$0xff]  }
 0x142   : > { %v473_v17 = vpop.xlane.xlu0 %472 }
 0x143   : > { %v475_v18 = vmul.f32 0.001953125, %v473_v17  ;;  %v16034_v17 = vld [vmem:[#allocation11 + $0xb48] ss:$48 sps:$4 sm:$0xff]  }
 0x145   : > { %v476_v19 = vadd.f32 1e-05, %v475_v18  ;;  %v16039_v18 = vld [vmem:[#allocation11 + $0x4ec] ss:$48 sps:$4 sm:$0xff]  }
 0x147   : > { %17225 = vrsqrt.f32 %v476_v19  ;;  %v16042_v19 = vld [vmem:[#allocation11 + $0xaec] ss:$48 sps:$4 sm:$0xff]  }
 0x154   : > { %v17226_v31 = vpop.eup %17225 }
 0x155   : > { %v479_v32 = vmul.f32 %v17226_v31, %v17891_v1  ;;  %v481_v33 = vmul.f32 %v17226_v31, %v17897_v3  ;;  %v478_v34 = vmul.f32 %v17226_v31, %v17888_v0  ;;  %v480_v35 = vmul.f32 %v17226_v31, %v17894_v2  ;;  %v15985_v1 = vld [vmem:[#allocation11 + $0x24c] ss:$48 sps:$4 sm:$0xff]   ;;  %v15983_v0 = vld [vmem:[#allocation11 + $0x248] ss:$48 sps:$4 sm:$0xff]  }
 0x156   : > { %v15986_v2 = vld [vmem:[#allocation11 + $0x848] ss:$48 sps:$4 sm:$0xff]   ;;  %v15988_v3 = vld [vmem:[#allocation11 + $0x84c] ss:$48 sps:$4 sm:$0xff]  }
 0x157   : > { %v504_v36 = vmul.f32 %v490_v27, %v479_v32  ;;  %v506_v37 = vmul.f32 %v498_v28, %v481_v33  ;;  %v503_v40 = vmul.f32 %v486_v29, %v478_v34  ;;  %v505_v41 = vmul.f32 %v494_v30, %v480_v35  ;;  %v16040_v27 = vld [vmem:[#allocation11 + $0xae8] ss:$48 sps:$4 sm:$0xff]   ;;  %v16045_v28 = vld [vmem:[#allocation11 + $0x48c] ss:$48 sps:$4 sm:$0xff]  }
 0x158   : > { %v16048_v29 = vld [vmem:[#allocation11 + $0xa8c] ss:$48 sps:$4 sm:$0xff]   ;;  %v16043_v30 = vld [vmem:[#allocation11 + $0x488] ss:$48 sps:$4 sm:$0xff]  }
 0x159   : > { %v17926_v42 = vpack.c.bf16 %v504_v36, %v504_v36  ;;  %v17928_v43 = vpack.c.bf16 %v506_v37, %v506_v37  ;;  %v17930_v44 = vpack.c.bf16 %v503_v40, %v503_v40  ;;  %v17932_v45 = vpack.c.bf16 %v505_v41, %v505_v41  ;;  %v16046_v31 = vld [vmem:[#allocation11 + $0xa88] ss:$48 sps:$4 sm:$0xff]   ;;  %v16051_v32 = vld [vmem:[#allocation11 + $0x42c] ss:$48 sps:$4 sm:$0xff]  }
 0x15a   : > { %v16054_v33 = vld [vmem:[#allocation11 + $0xa2c] ss:$48 sps:$4 sm:$0xff]   ;;  %v16049_v34 = vld [vmem:[#allocation11 + $0x428] ss:$48 sps:$4 sm:$0xff]  }
 0x15b   : > { %2847 = vmatprep.mubr.bf16.mxu0 %v17926_v42  ;;  %2888 = vmatprep.mubr.bf16.mxu1 %v17928_v43  ;;  %v16052_v35 = vld [vmem:[#allocation11 + $0xa28] ss:$48 sps:$4 sm:$0xff]   ;;  %v16057_v36 = vld [vmem:[#allocation11 + $0x3cc] ss:$48 sps:$4 sm:$0xff]  }
 0x15c   : > { %2848 = vmatmul.mubr.bf16.vlgmr.msra.gmra.mxu0 %v17930_v44  ;;  %2889 = vmatmul.mubr.bf16.vlgmr.msra.gmra.mxu1 %v17932_v45  ;;  %v16060_v37 = vld [vmem:[#allocation11 + $0x9cc] ss:$48 sps:$4 sm:$0xff]  }
 0x15d   : > { %2898 = vmatpush1.bf16.msra.mxu0 %v15977_v38  ;;  %2939 = vmatpush1.bf16.msra.mxu1 %v15980_v39  ;;  %v16055_v38 = vld [vmem:[#allocation11 + $0x3c8] ss:$48 sps:$4 sm:$0xff]   ;;  %v16063_v40 = vld [vmem:[#allocation11 + $0x36c] ss:$48 sps:$4 sm:$0xff]  }
 0x15e   : > { %2929 = vmatprep.mubr.bf16.mxu0 %v17926_v42  ;;  %2970 = vmatprep.mubr.bf16.mxu1 %v17928_v43  ;;  %v16058_v39 = vld [vmem:[#allocation11 + $0x9c8] ss:$48 sps:$4 sm:$0xff]   ;;  %v16066_v41 = vld [vmem:[#allocation11 + $0x96c] ss:$48 sps:$4 sm:$0xff]  }
 0x15f   : > { %2899 = vmatprep.subr.bf16.mxu0 %v15985_v1  ;;  %2940 = vmatprep.subr.bf16.mxu1 %v15988_v3  ;;  %v16061_v1 = vld [vmem:[#allocation11 + $0x368] ss:$48 sps:$4 sm:$0xff]   ;;  %v16072_v3 = vld [vmem:[#allocation11 + $0x90c] ss:$48 sps:$4 sm:$0xff]  }
 0x161   : > { %2900 = vmatpush1.bf16.msra.mxu0 %v15983_v0  ;;  %2941 = vmatpush1.bf16.msra.mxu1 %v15986_v2  ;;  %v16064_v0 = vld [vmem:[#allocation11 + $0x968] ss:$48 sps:$4 sm:$0xff]   ;;  %v16069_v2 = vld [vmem:[#allocation11 + $0x30c] ss:$48 sps:$4 sm:$0xff]  }
 0x162   : > { %2901 = vmatprep.subr.bf16.mxu0 %v15991_v46  ;;  %2942 = vmatprep.subr.bf16.mxu1 %v15994_v47  ;;  %v16067_v46 = vld [vmem:[#allocation11 + $0x308] ss:$48 sps:$4 sm:$0xff]  }
 0x163   : > { %v16070_v47 = vld [vmem:[#allocation11 + $0x908] ss:$48 sps:$4 sm:$0xff]  }
 0x165   : > { %2902 = vmatpush1.bf16.msra.mxu0 %v15989_v48  ;;  %2943 = vmatpush1.bf16.msra.mxu1 %v15992_v49  ;;  %v16075_v48 = vld [vmem:[#allocation11 + $0x2b4] ss:$48 sps:$4 sm:$0xff]  }
 0x166   : > { %2903 = vmatprep.subr.bf16.mxu0 %v15997_v50  ;;  %2944 = vmatprep.subr.bf16.mxu1 %v16000_v51  ;;  %v16078_v49 = vld [vmem:[#allocation11 + $0x8b4] ss:$48 sps:$4 sm:$0xff]   ;;  %v16073_v50 = vld [vmem:[#allocation11 + $0x2b0] ss:$48 sps:$4 sm:$0xff]  }
 0x167   : > { %v16076_v51 = vld [vmem:[#allocation11 + $0x8b0] ss:$48 sps:$4 sm:$0xff]  }
 0x169   : > { %2904 = vmatpush1.bf16.msra.mxu0 %v15995_v52  ;;  %2945 = vmatpush1.bf16.msra.mxu1 %v15998_v53  ;;  %v16081_v52 = vld [vmem:[#allocation11 + $0x254] ss:$48 sps:$4 sm:$0xff]  }
 0x16a   : > { %2905 = vmatprep.subr.bf16.mxu0 %v16003_v54  ;;  %2946 = vmatprep.subr.bf16.mxu1 %v16006_v55  ;;  %v16084_v53 = vld [vmem:[#allocation11 + $0x854] ss:$48 sps:$4 sm:$0xff]   ;;  %v16079_v54 = vld [vmem:[#allocation11 + $0x250] ss:$48 sps:$4 sm:$0xff]  }
 0x16b   : > { %v16082_v55 = vld [vmem:[#allocation11 + $0x850] ss:$48 sps:$4 sm:$0xff]  }
 0x16d   : > { %2906 = vmatpush1.bf16.msra.mxu0 %v16001_v56  ;;  %2947 = vmatpush1.bf16.msra.mxu1 %v16004_v57  ;;  %v16087_v56 = vld [vmem:[#allocation11 + $0x1f4] ss:$48 sps:$4 sm:$0xff]  }
 0x16e   : > { %2907 = vmatprep.subr.bf16.mxu0 %v16009_v58  ;;  %2948 = vmatprep.subr.bf16.mxu1 %v16012_v59  ;;  %v16090_v57 = vld [vmem:[#allocation11 + $0x7f4] ss:$48 sps:$4 sm:$0xff]   ;;  %v16085_v58 = vld [vmem:[#allocation11 + $0x1f0] ss:$48 sps:$4 sm:$0xff]  }
 0x16f   : > { %v16088_v59 = vld [vmem:[#allocation11 + $0x7f0] ss:$48 sps:$4 sm:$0xff]  }
 0x171   : > { %2908 = vmatpush1.bf16.msra.mxu0 %v16007_v60  ;;  %2949 = vmatpush1.bf16.msra.mxu1 %v16010_v61  ;;  %v16093_v60 = vld [vmem:[#allocation11 + $0x194] ss:$48 sps:$4 sm:$0xff]   ;;  %v16091_v61 = vld [vmem:[#allocation11 + $0x190] ss:$48 sps:$4 sm:$0xff]  }
 0x172   : > { %2909 = vmatprep.subr.bf16.mxu0 %v16015_v62  ;;  %2950 = vmatprep.subr.bf16.mxu1 %v16018_v63  ;;  %v16096_v62 = vld [vmem:[#allocation11 + $0x794] ss:$48 sps:$4 sm:$0xff]   ;;  %v16094_v63 = vld [vmem:[#allocation11 + $0x790] ss:$48 sps:$4 sm:$0xff]  }
 0x175   : > { %2910 = vmatpush1.bf16.msra.mxu0 %v16013_v4  ;;  %2951 = vmatpush1.bf16.msra.mxu1 %v16016_v5  ;;  %v16099_v4 = vld [vmem:[#allocation11 + $0x134] ss:$48 sps:$4 sm:$0xff]   ;;  %v16097_v5 = vld [vmem:[#allocation11 + $0x130] ss:$48 sps:$4 sm:$0xff]  }
 0x176   : > { %2911 = vmatprep.subr.bf16.mxu0 %v16021_v6  ;;  %2952 = vmatprep.subr.bf16.mxu1 %v16024_v7  ;;  %v16102_v6 = vld [vmem:[#allocation11 + $0x734] ss:$48 sps:$4 sm:$0xff]   ;;  %v16100_v7 = vld [vmem:[#allocation11 + $0x730] ss:$48 sps:$4 sm:$0xff]  }
 0x179   : > { %2912 = vmatpush1.bf16.msra.mxu0 %v16019_v8  ;;  %2953 = vmatpush1.bf16.msra.mxu1 %v16022_v9  ;;  %v16105_v8 = vld [vmem:[#allocation11 + $0xd4] ss:$48 sps:$4 sm:$0xff]   ;;  %v16103_v9 = vld [vmem:[#allocation11 + $0xd0] ss:$48 sps:$4 sm:$0xff]  }
 0x17a   : > { %2913 = vmatprep.subr.bf16.mxu0 %v16027_v10  ;;  %2954 = vmatprep.subr.bf16.mxu1 %v16030_v11  ;;  %v16108_v10 = vld [vmem:[#allocation11 + $0x6d4] ss:$48 sps:$4 sm:$0xff]   ;;  %v16106_v11 = vld [vmem:[#allocation11 + $0x6d0] ss:$48 sps:$4 sm:$0xff]  }
 0x17d   : > { %2914 = vmatpush2.bf16.msra.mxu0 %v16025_v12  ;;  %2955 = vmatpush2.bf16.msra.mxu1 %v16028_v13  ;;  %v16111_v12 = vld [vmem:[#allocation11 + $0x74] ss:$48 sps:$4 sm:$0xff]   ;;  %v16109_v13 = vld [vmem:[#allocation11 + $0x70] ss:$48 sps:$4 sm:$0xff]  }
 0x17e   : > { %2915 = vmatprep.subr.bf16.mxu0 %v16033_v14  ;;  %2956 = vmatprep.subr.bf16.mxu1 %v16036_v15  ;;  %v16114_v14 = vld [vmem:[#allocation11 + $0x674] ss:$48 sps:$4 sm:$0xff]   ;;  %v16112_v15 = vld [vmem:[#allocation11 + $0x670] ss:$48 sps:$4 sm:$0xff]  }
 0x181   : > { %2916 = vmatpush2.bf16.msra.mxu0 %v16031_v16  ;;  %2957 = vmatpush2.bf16.msra.mxu1 %v16034_v17  ;;  %v16117_v16 = vld [vmem:[#allocation11 + $0x14] ss:$48 sps:$4 sm:$0xff]   ;;  %v16115_v17 = vld [vmem:[#allocation11 + $0x10] ss:$48 sps:$4 sm:$0xff]  }
 0x182   : > { %2917 = vmatprep.subr.bf16.mxu0 %v16039_v18  ;;  %2958 = vmatprep.subr.bf16.mxu1 %v16042_v19  ;;  %v16120_v18 = vld [vmem:[#allocation11 + $0x614] ss:$48 sps:$4 sm:$0xff]   ;;  %v16118_v19 = vld [vmem:[#allocation11 + $0x610] ss:$48 sps:$4 sm:$0xff]  }
 0x185   : > { %2918 = vmatpush2.bf16.msra.mxu0 %v16037_v24  ;;  %2959 = vmatpush2.bf16.msra.mxu1 %v16040_v27  ;;  %v16123_v24 = vld [vmem:[#allocation11 + $0x5b4] ss:$48 sps:$4 sm:$0xff]   ;;  %v16121_v27 = vld [vmem:[#allocation11 + $0x5b0] ss:$48 sps:$4 sm:$0xff]  }
 0x186   : > { %2919 = vmatprep.subr.bf16.mxu0 %v16045_v28  ;;  %2960 = vmatprep.subr.bf16.mxu1 %v16048_v29  ;;  %v16126_v28 = vld [vmem:[#allocation11 + $0xbb4] ss:$48 sps:$4 sm:$0xff]   ;;  %v16124_v29 = vld [vmem:[#allocation11 + $0xbb0] ss:$48 sps:$4 sm:$0xff]  }
 0x189   : > { %2920 = vmatpush2.bf16.msra.mxu0 %v16043_v30  ;;  %2961 = vmatpush2.bf16.msra.mxu1 %v16046_v31  ;;  %v16129_v30 = vld [vmem:[#allocation11 + $0x554] ss:$48 sps:$4 sm:$0xff]   ;;  %v16127_v31 = vld [vmem:[#allocation11 + $0x550] ss:$48 sps:$4 sm:$0xff]  }
 0x18a   : > { %2921 = vmatprep.subr.bf16.mxu0 %v16051_v32  ;;  %2962 = vmatprep.subr.bf16.mxu1 %v16054_v33  ;;  %v16132_v32 = vld [vmem:[#allocation11 + $0xb54] ss:$48 sps:$4 sm:$0xff]   ;;  %v16130_v33 = vld [vmem:[#allocation11 + $0xb50] ss:$48 sps:$4 sm:$0xff]  }
 0x18d   : > { %2922 = vmatpush2.bf16.msra.mxu0 %v16049_v34  ;;  %2963 = vmatpush2.bf16.msra.mxu1 %v16052_v35  ;;  %v16135_v34 = vld [vmem:[#allocation11 + $0x4f4] ss:$48 sps:$4 sm:$0xff]   ;;  %v16133_v35 = vld [vmem:[#allocation11 + $0x4f0] ss:$48 sps:$4 sm:$0xff]  }
 0x18e   : > { %2923 = vmatprep.subr.bf16.mxu0 %v16057_v36  ;;  %2964 = vmatprep.subr.bf16.mxu1 %v16060_v37  ;;  %v16138_v36 = vld [vmem:[#allocation11 + $0xaf4] ss:$48 sps:$4 sm:$0xff]   ;;  %v16136_v37 = vld [vmem:[#allocation11 + $0xaf0] ss:$48 sps:$4 sm:$0xff]  }
 0x191   : > { %2924 = vmatpush2.bf16.msra.mxu0 %v16055_v38  ;;  %2965 = vmatpush2.bf16.msra.mxu1 %v16058_v39  ;;  %v16141_v38 = vld [vmem:[#allocation11 + $0x494] ss:$48 sps:$4 sm:$0xff]   ;;  %v16139_v39 = vld [vmem:[#allocation11 + $0x490] ss:$48 sps:$4 sm:$0xff]  }
 0x192   : > { %2925 = vmatprep.subr.bf16.mxu0 %v16063_v40  ;;  %2966 = vmatprep.subr.bf16.mxu1 %v16066_v41  ;;  %v16144_v40 = vld [vmem:[#allocation11 + $0xa94] ss:$48 sps:$4 sm:$0xff]   ;;  %v16142_v41 = vld [vmem:[#allocation11 + $0xa90] ss:$48 sps:$4 sm:$0xff]  }
 0x195   : > { %2926 = vmatpush2.bf16.msra.mxu0 %v16061_v1  ;;  %2967 = vmatpush2.bf16.msra.mxu1 %v16064_v0  ;;  %v16147_v1 = vld [vmem:[#allocation11 + $0x434] ss:$48 sps:$4 sm:$0xff]   ;;  %v16145_v0 = vld [vmem:[#allocation11 + $0x430] ss:$48 sps:$4 sm:$0xff]  }
 0x196   : > { %2927 = vmatprep.subr.bf16.mxu0 %v16069_v2  ;;  %2968 = vmatprep.subr.bf16.mxu1 %v16072_v3  ;;  %v16150_v2 = vld [vmem:[#allocation11 + $0xa34] ss:$48 sps:$4 sm:$0xff]   ;;  %v16148_v3 = vld [vmem:[#allocation11 + $0xa30] ss:$48 sps:$4 sm:$0xff]  }
 0x199   : > { %2928 = vmatpush2.bf16.msra.mxu0 %v16067_v46  ;;  %2969 = vmatpush2.bf16.msra.mxu1 %v16070_v47  ;;  %v16153_v46 = vld [vmem:[#allocation11 + $0x3d4] ss:$48 sps:$4 sm:$0xff]   ;;  %v16151_v47 = vld [vmem:[#allocation11 + $0x3d0] ss:$48 sps:$4 sm:$0xff]  }
 0x19a   : > { %2979 = vmatprep.subr.bf16.mxu0 %v16075_v48  ;;  %3020 = vmatprep.subr.bf16.mxu1 %v16078_v49  ;;  %v16156_v48 = vld [vmem:[#allocation11 + $0x9d4] ss:$48 sps:$4 sm:$0xff]   ;;  %v16154_v49 = vld [vmem:[#allocation11 + $0x9d0] ss:$48 sps:$4 sm:$0xff]  }
 0x19c   : > { %2930 = vmatmul.mubr.bf16.vlgmr.msra.gmra.mxu0 %v17930_v44  ;;  %2971 = vmatmul.mubr.bf16.vlgmr.msra.gmra.mxu1 %v17932_v45 }
 0x19d   : > { %2980 = vmatpush1.bf16.msra.mxu0 %v16073_v50  ;;  %3011 = vmatprep.mubr.bf16.mxu0 %v17926_v42  ;;  %v16159_v50 = vld [vmem:[#allocation11 + $0x374] ss:$48 sps:$4 sm:$0xff]  }
 0x19e   : > { %3021 = vmatpush1.bf16.msra.mxu1 %v16076_v51  ;;  %3052 = vmatprep.mubr.bf16.mxu1 %v17928_v43  ;;  %v16157_v51 = vld [vmem:[#allocation11 + $0x370] ss:$48 sps:$4 sm:$0xff]  }
 0x19f   : > { %2981 = vmatprep.subr.bf16.mxu0 %v16081_v52  ;;  %3022 = vmatprep.subr.bf16.mxu1 %v16084_v53  ;;  %v16162_v52 = vld [vmem:[#allocation11 + $0x974] ss:$48 sps:$4 sm:$0xff]   ;;  %v16160_v53 = vld [vmem:[#allocation11 + $0x970] ss:$48 sps:$4 sm:$0xff]  }
 0x1a1   : > { %2982 = vmatpush1.bf16.msra.mxu0 %v16079_v54  ;;  %v16165_v54 = vld [vmem:[#allocation11 + $0x314] ss:$48 sps:$4 sm:$0xff]  }
 0x1a2   : > { %3023 = vmatpush1.bf16.msra.mxu1 %v16082_v55  ;;  %2983 = vmatprep.subr.bf16.mxu0 %v16087_v56  ;;  %v16163_v55 = vld [vmem:[#allocation11 + $0x310] ss:$48 sps:$4 sm:$0xff]   ;;  %v16168_v56 = vld [vmem:[#allocation11 + $0x914] ss:$48 sps:$4 sm:$0xff]  }
 0x1a3   : > { %3024 = vmatprep.subr.bf16.mxu1 %v16090_v57  ;;  %v16166_v57 = vld [vmem:[#allocation11 + $0x910] ss:$48 sps:$4 sm:$0xff]  }
 0x1a5   : > { %2984 = vmatpush1.bf16.msra.mxu0 %v16085_v58  ;;  %v16171_v58 = vld [vmem:[#allocation11 + $0x2bc] ss:$48 sps:$4 sm:$0xff]  }
 0x1a6   : > { %3025 = vmatpush1.bf16.msra.mxu1 %v16088_v59  ;;  %2985 = vmatprep.subr.bf16.mxu0 %v16093_v60  ;;  %v16174_v59 = vld [vmem:[#allocation11 + $0x8bc] ss:$48 sps:$4 sm:$0xff]   ;;  %v16169_v60 = vld [vmem:[#allocation11 + $0x2b8] ss:$48 sps:$4 sm:$0xff]  }
 0x1a7   : > { %3026 = vmatprep.subr.bf16.mxu1 %v16096_v62  ;;  %v16177_v62 = vld [vmem:[#allocation11 + $0x25c] ss:$48 sps:$4 sm:$0xff]  }
 0x1a9   : > { %2986 = vmatpush1.bf16.msra.mxu0 %v16091_v61  ;;  %v16172_v61 = vld [vmem:[#allocation11 + $0x8b8] ss:$48 sps:$4 sm:$0xff]  }
 0x1aa   : > { %3027 = vmatpush1.bf16.msra.mxu1 %v16094_v63  ;;  %2987 = vmatprep.subr.bf16.mxu0 %v16099_v4  ;;  %v16175_v63 = vld [vmem:[#allocation11 + $0x258] ss:$48 sps:$4 sm:$0xff]  }
 0x1ab   : > { %3028 = vmatprep.subr.bf16.mxu1 %v16102_v6  ;;  %v16178_v4 = vld [vmem:[#allocation11 + $0x858] ss:$48 sps:$4 sm:$0xff]   ;;  %v16183_v6 = vld [vmem:[#allocation11 + $0x1fc] ss:$48 sps:$4 sm:$0xff]  }
 0x1ad   : > { %2988 = vmatpush1.bf16.msra.mxu0 %v16097_v5  ;;  %v16180_v5 = vld [vmem:[#allocation11 + $0x85c] ss:$48 sps:$4 sm:$0xff]  }
 0x1ae   : > { %3029 = vmatpush1.bf16.msra.mxu1 %v16100_v7  ;;  %2989 = vmatprep.subr.bf16.mxu0 %v16105_v8  ;;  %v16186_v7 = vld [vmem:[#allocation11 + $0x7fc] ss:$48 sps:$4 sm:$0xff]   ;;  %v16181_v8 = vld [vmem:[#allocation11 + $0x1f8] ss:$48 sps:$4 sm:$0xff]  }
 0x1af   : > { %3030 = vmatprep.subr.bf16.mxu1 %v16108_v10  ;;  %v16189_v10 = vld [vmem:[#allocation11 + $0x19c] ss:$48 sps:$4 sm:$0xff]  }
 0x1b1   : > { %2990 = vmatpush1.bf16.msra.mxu0 %v16103_v9  ;;  %v16184_v9 = vld [vmem:[#allocation11 + $0x7f8] ss:$48 sps:$4 sm:$0xff]  }
 0x1b2   : > { %3031 = vmatpush1.bf16.msra.mxu1 %v16106_v11  ;;  %2991 = vmatprep.subr.bf16.mxu0 %v16111_v12  ;;  %v16192_v11 = vld [vmem:[#allocation11 + $0x79c] ss:$48 sps:$4 sm:$0xff]   ;;  %v16187_v12 = vld [vmem:[#allocation11 + $0x198] ss:$48 sps:$4 sm:$0xff]  }
 0x1b3   : > { %3032 = vmatprep.subr.bf16.mxu1 %v16114_v14  ;;  %v16195_v14 = vld [vmem:[#allocation11 + $0x13c] ss:$48 sps:$4 sm:$0xff]  }
 0x1b5   : > { %2992 = vmatpush1.bf16.msra.mxu0 %v16109_v13  ;;  %v16190_v13 = vld [vmem:[#allocation11 + $0x798] ss:$48 sps:$4 sm:$0xff]  }
 0x1b6   : > { %3033 = vmatpush1.bf16.msra.mxu1 %v16112_v15  ;;  %2993 = vmatprep.subr.bf16.mxu0 %v16117_v16  ;;  %v16198_v15 = vld [vmem:[#allocation11 + $0x73c] ss:$48 sps:$4 sm:$0xff]   ;;  %v16193_v16 = vld [vmem:[#allocation11 + $0x138] ss:$48 sps:$4 sm:$0xff]  }
 0x1b7   : > { %3034 = vmatprep.subr.bf16.mxu1 %v16120_v18  ;;  %v16201_v18 = vld [vmem:[#allocation11 + $0xdc] ss:$48 sps:$4 sm:$0xff]  }
 0x1b9   : > { %2994 = vmatpush1.bf16.msra.mxu0 %v16115_v17  ;;  %v16196_v17 = vld [vmem:[#allocation11 + $0x738] ss:$48 sps:$4 sm:$0xff]  }
 0x1ba   : > { %3035 = vmatpush1.bf16.msra.mxu1 %v16118_v19  ;;  %2995 = vmatprep.subr.bf16.mxu0 %v16123_v24  ;;  %v16199_v19 = vld [vmem:[#allocation11 + $0xd8] ss:$48 sps:$4 sm:$0xff]   ;;  %v16204_v24 = vld [vmem:[#allocation11 + $0x6dc] ss:$48 sps:$4 sm:$0xff]  }
 0x1bb   : > { %3036 = vmatprep.subr.bf16.mxu1 %v16126_v28  ;;  %v16207_v28 = vld [vmem:[#allocation11 + $0x7c] ss:$48 sps:$4 sm:$0xff]  }
 0x1bd   : > { %2996 = vmatpush2.bf16.msra.mxu0 %v16121_v27  ;;  %v16202_v27 = vld [vmem:[#allocation11 + $0x6d8] ss:$48 sps:$4 sm:$0xff]  }
 0x1be   : > { %3037 = vmatpush2.bf16.msra.mxu1 %v16124_v29  ;;  %2997 = vmatprep.subr.bf16.mxu0 %v16129_v30  ;;  %v16205_v29 = vld [vmem:[#allocation11 + $0x78] ss:$48 sps:$4 sm:$0xff]   ;;  %v16210_v30 = vld [vmem:[#allocation11 + $0x67c] ss:$48 sps:$4 sm:$0xff]  }
 0x1bf   : > { %3038 = vmatprep.subr.bf16.mxu1 %v16132_v32  ;;  %v16213_v32 = vld [vmem:[#allocation11 + $0x1c] ss:$48 sps:$4 sm:$0xff]  }
 0x1c1   : > { %2998 = vmatpush2.bf16.msra.mxu0 %v16127_v31  ;;  %v16208_v31 = vld [vmem:[#allocation11 + $0x678] ss:$48 sps:$4 sm:$0xff]  }
 0x1c2   : > { %3039 = vmatpush2.bf16.msra.mxu1 %v16130_v33  ;;  %2999 = vmatprep.subr.bf16.mxu0 %v16135_v34  ;;  %v16211_v33 = vld [vmem:[#allocation11 + $0x18] ss:$48 sps:$4 sm:$0xff]   ;;  %v16216_v34 = vld [vmem:[#allocation11 + $0x61c] ss:$48 sps:$4 sm:$0xff]  }
 0x1c3   : > { %3040 = vmatprep.subr.bf16.mxu1 %v16138_v36  ;;  %v16219_v36 = vld [vmem:[#allocation11 + $0x5bc] ss:$48 sps:$4 sm:$0xff]  }
 0x1c5   : > { %3000 = vmatpush2.bf16.msra.mxu0 %v16133_v35  ;;  %v16214_v35 = vld [vmem:[#allocation11 + $0x618] ss:$48 sps:$4 sm:$0xff]  }
 0x1c6   : > { %3041 = vmatpush2.bf16.msra.mxu1 %v16136_v37  ;;  %3001 = vmatprep.subr.bf16.mxu0 %v16141_v38  ;;  %v16222_v37 = vld [vmem:[#allocation11 + $0xbbc] ss:$48 sps:$4 sm:$0xff]   ;;  %v16217_v38 = vld [vmem:[#allocation11 + $0x5b8] ss:$48 sps:$4 sm:$0xff]  }
 0x1c7   : > { %3042 = vmatprep.subr.bf16.mxu1 %v16144_v40  ;;  %v16225_v40 = vld [vmem:[#allocation11 + $0x55c] ss:$48 sps:$4 sm:$0xff]  }
 0x1c9   : > { %3002 = vmatpush2.bf16.msra.mxu0 %v16139_v39  ;;  %v16220_v39 = vld [vmem:[#allocation11 + $0xbb8] ss:$48 sps:$4 sm:$0xff]  }
 0x1ca   : > { %3043 = vmatpush2.bf16.msra.mxu1 %v16142_v41  ;;  %3003 = vmatprep.subr.bf16.mxu0 %v16147_v1  ;;  %v16223_v41 = vld [vmem:[#allocation11 + $0x558] ss:$48 sps:$4 sm:$0xff]   ;;  %v16228_v1 = vld [vmem:[#allocation11 + $0xb5c] ss:$48 sps:$4 sm:$0xff]  }
 0x1cb   : > { %3044 = vmatprep.subr.bf16.mxu1 %v16150_v2  ;;  %v16231_v2 = vld [vmem:[#allocation11 + $0x4fc] ss:$48 sps:$4 sm:$0xff]  }
 0x1cd   : > { %3004 = vmatpush2.bf16.msra.mxu0 %v16145_v0  ;;  %v16226_v0 = vld [vmem:[#allocation11 + $0xb58] ss:$48 sps:$4 sm:$0xff]  }
 0x1ce   : > { %3045 = vmatpush2.bf16.msra.mxu1 %v16148_v3  ;;  %3005 = vmatprep.subr.bf16.mxu0 %v16153_v46  ;;  %v16229_v3 = vld [vmem:[#allocation11 + $0x4f8] ss:$48 sps:$4 sm:$0xff]   ;;  %v16234_v46 = vld [vmem:[#allocation11 + $0xafc] ss:$48 sps:$4 sm:$0xff]  }
 0x1cf   : > { %3046 = vmatprep.subr.bf16.mxu1 %v16156_v48  ;;  %v16237_v48 = vld [vmem:[#allocation11 + $0x49c] ss:$48 sps:$4 sm:$0xff]  }
 0x1d1   : > { %3006 = vmatpush2.bf16.msra.mxu0 %v16151_v47  ;;  %v16232_v47 = vld [vmem:[#allocation11 + $0xaf8] ss:$48 sps:$4 sm:$0xff]  }
 0x1d2   : > { %3047 = vmatpush2.bf16.msra.mxu1 %v16154_v49  ;;  %3007 = vmatprep.subr.bf16.mxu0 %v16159_v50  ;;  %v16235_v49 = vld [vmem:[#allocation11 + $0x498] ss:$48 sps:$4 sm:$0xff]   ;;  %v16240_v50 = vld [vmem:[#allocation11 + $0xa9c] ss:$48 sps:$4 sm:$0xff]  }
 0x1d3   : > { %3048 = vmatprep.subr.bf16.mxu1 %v16162_v52  ;;  %v16243_v52 = vld [vmem:[#allocation11 + $0x43c] ss:$48 sps:$4 sm:$0xff]  }
 0x1d5   : > { %3008 = vmatpush2.bf16.msra.mxu0 %v16157_v51  ;;  %v16238_v51 = vld [vmem:[#allocation11 + $0xa98] ss:$48 sps:$4 sm:$0xff]  }
 0x1d6   : > { %3049 = vmatpush2.bf16.msra.mxu1 %v16160_v53  ;;  %3009 = vmatprep.subr.bf16.mxu0 %v16165_v54  ;;  %v16241_v53 = vld [vmem:[#allocation11 + $0x438] ss:$48 sps:$4 sm:$0xff]   ;;  %v16246_v54 = vld [vmem:[#allocation11 + $0xa3c] ss:$48 sps:$4 sm:$0xff]  }
 0x1d7   : > { %3050 = vmatprep.subr.bf16.mxu1 %v16168_v56  ;;  %v16249_v56 = vld [vmem:[#allocation11 + $0x3dc] ss:$48 sps:$4 sm:$0xff]  }
 0x1d9   : > { %3010 = vmatpush2.bf16.msra.mxu0 %v16163_v55  ;;  %v16244_v55 = vld [vmem:[#allocation11 + $0xa38] ss:$48 sps:$4 sm:$0xff]  }
 0x1da   : > { %3051 = vmatpush2.bf16.msra.mxu1 %v16166_v57  ;;  %3061 = vmatprep.subr.bf16.mxu0 %v16171_v58  ;;  %v16247_v57 = vld [vmem:[#allocation11 + $0x3d8] ss:$48 sps:$4 sm:$0xff]   ;;  %v16252_v58 = vld [vmem:[#allocation11 + $0x9dc] ss:$48 sps:$4 sm:$0xff]  }
 0x1db   : > { %3102 = vmatprep.subr.bf16.mxu1 %v16174_v59  ;;  %v16250_v59 = vld [vmem:[#allocation11 + $0x9d8] ss:$48 sps:$4 sm:$0xff]  }
 0x1dc   : > { %3012 = vmatmul.mubr.bf16.vlgmr.msra.gmra.mxu0 %v17930_v44 }
 0x1dd   : > { %3053 = vmatmul.mubr.bf16.vlgmr.msra.gmra.mxu1 %v17932_v45  ;;  %3062 = vmatpush1.bf16.msra.mxu0 %v16169_v60  ;;  %v16255_v60 = vld [vmem:[#allocation11 + $0x37c] ss:$48 sps:$4 sm:$0xff]  }
 0x1de   : > { %3093 = vmatprep.mubr.bf16.mxu0 %v17926_v42  ;;  %3103 = vmatpush1.bf16.msra.mxu1 %v16172_v61  ;;  %v16253_v61 = vld [vmem:[#allocation11 + $0x378] ss:$48 sps:$4 sm:$0xff]  }
 0x1df   : > { %3134 = vmatprep.mubr.bf16.mxu1 %v17928_v43  ;;  %3063 = vmatprep.subr.bf16.mxu0 %v16177_v62  ;;  %v16258_v62 = vld [vmem:[#allocation11 + $0x97c] ss:$48 sps:$4 sm:$0xff]  }
 0x1e0   : > { %3104 = vmatprep.subr.bf16.mxu1 %v16180_v5  ;;  %v16259_v5 = vld [vmem:[#allocation11 + $0x318] ss:$48 sps:$4 sm:$0xff]  }
 0x1e1   : > { %3064 = vmatpush1.bf16.msra.mxu0 %v16175_v63  ;;  %v16256_v63 = vld [vmem:[#allocation11 + $0x978] ss:$48 sps:$4 sm:$0xff]  }
 0x1e2   : > { %3105 = vmatpush1.bf16.msra.mxu1 %v16178_v4  ;;  %3065 = vmatprep.subr.bf16.mxu0 %v16183_v6  ;;  %v16261_v4 = vld [vmem:[#allocation11 + $0x31c] ss:$48 sps:$4 sm:$0xff]  }
 0x1e3   : > { %3106 = vmatprep.subr.bf16.mxu1 %v16186_v7  ;;  %v16264_v6 = vld [vmem:[#allocation11 + $0x91c] ss:$48 sps:$4 sm:$0xff]   ;;  %v16262_v7 = vld [vmem:[#allocation11 + $0x918] ss:$48 sps:$4 sm:$0xff]  }
 0x1e5   : > { %3066 = vmatpush1.bf16.msra.mxu0 %v16181_v8  ;;  %v16267_v8 = vld [vmem:[#allocation11 + $0x2c4] ss:$48 sps:$4 sm:$0xff]  }
 0x1e6   : > { %3107 = vmatpush1.bf16.msra.mxu1 %v16184_v9  ;;  %3067 = vmatprep.subr.bf16.mxu0 %v16189_v10  ;;  %v16270_v9 = vld [vmem:[#allocation11 + $0x8c4] ss:$48 sps:$4 sm:$0xff]   ;;  %v16265_v10 = vld [vmem:[#allocation11 + $0x2c0] ss:$48 sps:$4 sm:$0xff]  }
 0x1e7   : > { %3108 = vmatprep.subr.bf16.mxu1 %v16192_v11  ;;  %v16268_v11 = vld [vmem:[#allocation11 + $0x8c0] ss:$48 sps:$4 sm:$0xff]  }
 0x1e9   : > { %3068 = vmatpush1.bf16.msra.mxu0 %v16187_v12  ;;  %v16273_v12 = vld [vmem:[#allocation11 + $0x264] ss:$48 sps:$4 sm:$0xff]  }
 0x1ea   : > { %3109 = vmatpush1.bf16.msra.mxu1 %v16190_v13  ;;  %3069 = vmatprep.subr.bf16.mxu0 %v16195_v14  ;;  %v16276_v13 = vld [vmem:[#allocation11 + $0x864] ss:$48 sps:$4 sm:$0xff]   ;;  %v16271_v14 = vld [vmem:[#allocation11 + $0x260] ss:$48 sps:$4 sm:$0xff]  }
 0x1eb   : > { %3110 = vmatprep.subr.bf16.mxu1 %v16198_v15 }
 0x1ed   : > { %3070 = vmatpush1.bf16.msra.mxu0 %v16193_v16 }
 0x1ee   : > { %3111 = vmatpush1.bf16.msra.mxu1 %v16196_v17  ;;  %3071 = vmatprep.subr.bf16.mxu0 %v16201_v18  ;;  %v16274_v17 = vld [vmem:[#allocation11 + $0x860] ss:$48 sps:$4 sm:$0xff]   ;;  %v16279_v18 = vld [vmem:[#allocation11 + $0x204] ss:$48 sps:$4 sm:$0xff]  }
 0x1ef   : > { %3112 = vmatprep.subr.bf16.mxu1 %v16204_v24  ;;  %v16282_v24 = vld [vmem:[#allocation11 + $0x804] ss:$48 sps:$4 sm:$0xff]  }
 0x1f1   : > { %3072 = vmatpush1.bf16.msra.mxu0 %v16199_v19 }
 0x1f2   : > { %3113 = vmatpush1.bf16.msra.mxu1 %v16202_v27  ;;  %3073 = vmatprep.subr.bf16.mxu0 %v16207_v28 }
 0x1f3   : > { %3114 = vmatprep.subr.bf16.mxu1 %v16210_v30  ;;  %v16277_v30 = vld [vmem:[#allocation11 + $0x200] ss:$48 sps:$4 sm:$0xff]  }
 0x1f5   : > { %3074 = vmatpush1.bf16.msra.mxu0 %v16205_v29 }
 0x1f6   : > { %3115 = vmatpush1.bf16.msra.mxu1 %v16208_v31  ;;  %3075 = vmatprep.subr.bf16.mxu0 %v16213_v32 }
 0x1f7   : > { %3116 = vmatprep.subr.bf16.mxu1 %v16216_v34  ;;  %v16285_v34 = vld [vmem:[#allocation11 + $0x1a4] ss:$48 sps:$4 sm:$0xff]  }
 0x1f9   : > { %3076 = vmatpush1.bf16.msra.mxu0 %v16211_v33  ;;  %v16280_v33 = vld [vmem:[#allocation11 + $0x800] ss:$48 sps:$4 sm:$0xff]  }
 0x1fa   : > { %3117 = vmatpush1.bf16.msra.mxu1 %v16214_v35  ;;  %3077 = vmatprep.subr.bf16.mxu0 %v16219_v36  ;;  %v16288_v35 = vld [vmem:[#allocation11 + $0x7a4] ss:$48 sps:$4 sm:$0xff]  }
 0x1fb   : > { %3118 = vmatprep.subr.bf16.mxu1 %v16222_v37 }
 0x1fd   : > { %3078 = vmatpush2.bf16.msra.mxu0 %v16217_v38  ;;  %v16283_v38 = vld [vmem:[#allocation11 + $0x1a0] ss:$48 sps:$4 sm:$0xff]  }
 0x1fe   : > { %3119 = vmatpush2.bf16.msra.mxu1 %v16220_v39  ;;  %3079 = vmatprep.subr.bf16.mxu0 %v16225_v40  ;;  %v16286_v39 = vld [vmem:[#allocation11 + $0x7a0] ss:$48 sps:$4 sm:$0xff]   ;;  %v16291_v40 = vld [vmem:[#allocation11 + $0x144] ss:$48 sps:$4 sm:$0xff]  }
 0x1ff   : > { %3120 = vmatprep.subr.bf16.mxu1 %v16228_v1  ;;  %v16289_v1 = vld [vmem:[#allocation11 + $0x140] ss:$48 sps:$4 sm:$0xff]  }
 0x201   : > { %3080 = vmatpush2.bf16.msra.mxu0 %v16223_v41  ;;  %v16294_v41 = vld [vmem:[#allocation11 + $0x744] ss:$48 sps:$4 sm:$0xff]  }
 0x202   : > { %3121 = vmatpush2.bf16.msra.mxu1 %v16226_v0  ;;  %3081 = vmatprep.subr.bf16.mxu0 %v16231_v2  ;;  %v16292_v0 = vld [vmem:[#allocation11 + $0x740] ss:$48 sps:$4 sm:$0xff]   ;;  %v16297_v2 = vld [vmem:[#allocation11 + $0xe4] ss:$48 sps:$4 sm:$0xff]  }
 0x203   : > { %3122 = vmatprep.subr.bf16.mxu1 %v16234_v46  ;;  %v16295_v46 = vld [vmem:[#allocation11 + $0xe0] ss:$48 sps:$4 sm:$0xff]  }
 0x205   : > { %3082 = vmatpush2.bf16.msra.mxu0 %v16229_v3  ;;  %v16300_v3 = vld [vmem:[#allocation11 + $0x6e4] ss:$48 sps:$4 sm:$0xff]  }
 0x206   : > { %3123 = vmatpush2.bf16.msra.mxu1 %v16232_v47  ;;  %3083 = vmatprep.subr.bf16.mxu0 %v16237_v48  ;;  %v16298_v47 = vld [vmem:[#allocation11 + $0x6e0] ss:$48 sps:$4 sm:$0xff]   ;;  %v16303_v48 = vld [vmem:[#allocation11 + $0x84] ss:$48 sps:$4 sm:$0xff]  }
 0x207   : > { %3124 = vmatprep.subr.bf16.mxu1 %v16240_v50  ;;  %v16301_v50 = vld [vmem:[#allocation11 + $0x80] ss:$48 sps:$4 sm:$0xff]  }
 0x209   : > { %3084 = vmatpush2.bf16.msra.mxu0 %v16235_v49  ;;  %v16306_v49 = vld [vmem:[#allocation11 + $0x684] ss:$48 sps:$4 sm:$0xff]  }
 0x20a   : > { %3125 = vmatpush2.bf16.msra.mxu1 %v16238_v51  ;;  %3085 = vmatprep.subr.bf16.mxu0 %v16243_v52  ;;  %v16304_v51 = vld [vmem:[#allocation11 + $0x680] ss:$48 sps:$4 sm:$0xff]   ;;  %v16309_v52 = vld [vmem:[#allocation11 + $0x24] ss:$48 sps:$4 sm:$0xff]  }
 0x20b   : > { %3126 = vmatprep.subr.bf16.mxu1 %v16246_v54  ;;  %v16307_v54 = vld [vmem:[#allocation11 + $0x20] ss:$48 sps:$4 sm:$0xff]  }
 0x20d   : > { %3086 = vmatpush2.bf16.msra.mxu0 %v16241_v53  ;;  %v16312_v53 = vld [vmem:[#allocation11 + $0x624] ss:$48 sps:$4 sm:$0xff]  }
 0x20e   : > { %3127 = vmatpush2.bf16.msra.mxu1 %v16244_v55  ;;  %3087 = vmatprep.subr.bf16.mxu0 %v16249_v56  ;;  %v16310_v55 = vld [vmem:[#allocation11 + $0x620] ss:$48 sps:$4 sm:$0xff]   ;;  %v16315_v56 = vld [vmem:[#allocation11 + $0x5c4] ss:$48 sps:$4 sm:$0xff]  }
 0x20f   : > { %3128 = vmatprep.subr.bf16.mxu1 %v16252_v58  ;;  %v16313_v58 = vld [vmem:[#allocation11 + $0x5c0] ss:$48 sps:$4 sm:$0xff]  }
 0x211   : > { %3088 = vmatpush2.bf16.msra.mxu0 %v16247_v57  ;;  %v16318_v57 = vld [vmem:[#allocation11 + $0xbc4] ss:$48 sps:$4 sm:$0xff]  }
 0x212   : > { %3129 = vmatpush2.bf16.msra.mxu1 %v16250_v59  ;;  %3089 = vmatprep.subr.bf16.mxu0 %v16255_v60  ;;  %v16316_v59 = vld [vmem:[#allocation11 + $0xbc0] ss:$48 sps:$4 sm:$0xff]   ;;  %v16321_v60 = vld [vmem:[#allocation11 + $0x564] ss:$48 sps:$4 sm:$0xff]  }
 0x213   : > { %3130 = vmatprep.subr.bf16.mxu1 %v16258_v62  ;;  %v16319_v62 = vld [vmem:[#allocation11 + $0x560] ss:$48 sps:$4 sm:$0xff]  }
 0x215   : > { %3090 = vmatpush2.bf16.msra.mxu0 %v16253_v61  ;;  %v16324_v61 = vld [vmem:[#allocation11 + $0xb64] ss:$48 sps:$4 sm:$0xff]  }
 0x216   : > { %3131 = vmatpush2.bf16.msra.mxu1 %v16256_v63  ;;  %3091 = vmatprep.subr.bf16.mxu0 %v16261_v4  ;;  %v16322_v63 = vld [vmem:[#allocation11 + $0xb60] ss:$48 sps:$4 sm:$0xff]   ;;  %v16327_v4 = vld [vmem:[#allocation11 + $0x504] ss:$48 sps:$4 sm:$0xff]  }
 0x217   : > { %3132 = vmatprep.subr.bf16.mxu1 %v16264_v6  ;;  %v16325_v6 = vld [vmem:[#allocation11 + $0x500] ss:$48 sps:$4 sm:$0xff]  }
 0x219   : > { %3092 = vmatpush2.bf16.msra.mxu0 %v16259_v5  ;;  %v16330_v5 = vld [vmem:[#allocation11 + $0xb04] ss:$48 sps:$4 sm:$0xff]  }
 0x21a   : > { %3133 = vmatpush2.bf16.msra.mxu1 %v16262_v7  ;;  %3143 = vmatprep.subr.bf16.mxu0 %v16267_v8  ;;  %v16328_v7 = vld [vmem:[#allocation11 + $0xb00] ss:$48 sps:$4 sm:$0xff]   ;;  %v16333_v8 = vld [vmem:[#allocation11 + $0x4a4] ss:$48 sps:$4 sm:$0xff]  }
 0x21b   : > { %3184 = vmatprep.subr.bf16.mxu1 %v16270_v9  ;;  %v16336_v9 = vld [vmem:[#allocation11 + $0xaa4] ss:$48 sps:$4 sm:$0xff]  }
 0x21c   : > { %3094 = vmatmul.mubr.bf16.vlgmr.msra.gmra.mxu0 %v17930_v44  ;;  %v2849_v15 = vpop.f32.mrf.mxu0  ;;  %v2890_v16 = vpop.f32.mrf.mxu1 }
 0x21d   : > { %3135 = vmatmul.mubr.bf16.vlgmr.msra.gmra.mxu1 %v17932_v45  ;;  %v17950_v19 = vadd.f32 %v2890_v16, %v2849_v15  ;;  %3144 = vmatpush1.bf16.msra.mxu0 %v16265_v10  ;;  %v16331_v10 = vld [vmem:[#allocation11 + $0x4a0] ss:$48 sps:$4 sm:$0xff]   ;;  %v16345_v16 = vld [vmem:[#allocation11 + $0x3e4] ss:$48 sps:$4 sm:$0xff]  }
 0x21e   : > { %3175 = vmatprep.mubr.bf16.mxu0 %v17926_v42  ;;  %3185 = vmatpush1.bf16.msra.mxu1 %v16268_v11  ;;  %v2851_v27 = vpop.f32.mrf.mxu0  ;;  %v2892_v28 = vpop.f32.mrf.mxu1  ;;  %v16334_v11 = vld [vmem:[#allocation11 + $0xaa0] ss:$48 sps:$4 sm:$0xff]  }
 0x21f   : > { %3216 = vmatprep.mubr.bf16.mxu1 %v17928_v43  ;;  %v17954_v29 = vadd.f32 %v2892_v28, %v2851_v27  ;;  %3145 = vmatprep.subr.bf16.mxu0 %v16273_v12  ;;  %v16339_v12 = vld [vmem:[#allocation11 + $0x444] ss:$48 sps:$4 sm:$0xff]   ;;  %v16340_v15 = vld [vmem:[#allocation11 + $0xa40] ss:$48 sps:$4 sm:$0xff]  }
 0x220   : > { %3186 = vmatprep.subr.bf16.mxu1 %v16276_v13  ;;  %v2853_v31 = vpop.f32.mrf.mxu0  ;;  %v2894_v32 = vpop.f32.mrf.mxu1  ;;  %v16342_v13 = vld [vmem:[#allocation11 + $0xa44] ss:$48 sps:$4 sm:$0xff]  }
 0x221   : > { %3146 = vmatpush1.bf16.msra.mxu0 %v16271_v14  ;;  %v16337_v14 = vld [vmem:[#allocation11 + $0x440] ss:$48 sps:$4 sm:$0xff]   ;;  %v16351_v27 = vld [vmem:[#allocation11 + $0x384] ss:$48 sps:$4 sm:$0xff]  }
 0x222   : > { %3187 = vmatpush1.bf16.msra.mxu1 %v16274_v17  ;;  %v2854_v36 = vpop.f32.mrf.mxu0  ;;  %v2895_v37 = vpop.f32.mrf.mxu1  ;;  %3147 = vmatprep.subr.bf16.mxu0 %v16279_v18  ;;  %v16348_v17 = vld [vmem:[#allocation11 + $0x9e4] ss:$48 sps:$4 sm:$0xff]   ;;  %v16343_v18 = vld [vmem:[#allocation11 + $0x3e0] ss:$48 sps:$4 sm:$0xff]  }
 0x223   : > { %3188 = vmatprep.subr.bf16.mxu1 %v16282_v24  ;;  %v16346_v24 = vld [vmem:[#allocation11 + $0x9e0] ss:$48 sps:$4 sm:$0xff]   ;;  %v16354_v28 = vld [vmem:[#allocation11 + $0x984] ss:$48 sps:$4 sm:$0xff]   ;;  %v16363_v36 = vld [vmem:[#allocation11 + $0x2cc] ss:$48 sps:$4 sm:$0xff]  }
 0x224   : > { %v16352_v31 = vld [vmem:[#allocation11 + $0x980] ss:$48 sps:$4 sm:$0xff]   ;;  %v16357_v32 = vld [vmem:[#allocation11 + $0x324] ss:$48 sps:$4 sm:$0xff]   ;;  %v16366_v37 = vld [vmem:[#allocation11 + $0x8cc] ss:$48 sps:$4 sm:$0xff]  }
 0x225   : > { %3148 = vmatpush1.bf16.msra.mxu0 %v16277_v30  ;;  %v16349_v30 = vld [vmem:[#allocation11 + $0x380] ss:$48 sps:$4 sm:$0xff]  }
 0x226   : > { %3189 = vmatpush1.bf16.msra.mxu1 %v16280_v33  ;;  %3149 = vmatprep.subr.bf16.mxu0 %v16285_v34  ;;  %v16360_v33 = vld [vmem:[#allocation11 + $0x924] ss:$48 sps:$4 sm:$0xff]   ;;  %v16355_v34 = vld [vmem:[#allocation11 + $0x320] ss:$48 sps:$4 sm:$0xff]  }
 0x227   : > { %3190 = vmatprep.subr.bf16.mxu1 %v16288_v35  ;;  %v16358_v35 = vld [vmem:[#allocation11 + $0x920] ss:$48 sps:$4 sm:$0xff]  }
 0x229   : > { %3150 = vmatpush1.bf16.msra.mxu0 %v16283_v38  ;;  %v17630_v38 = vmov 1983009808  }
 0x22a   : > { %3191 = vmatpush1.bf16.msra.mxu1 %v16286_v39  ;;  %3151 = vmatprep.subr.bf16.mxu0 %v16291_v40  ;;  %v3310_v39 = vunpack.c.l.s4 %v17630_v38  ;;  %v16361_v40 = vld [vmem:[#allocation11 + $0x2c8] ss:$48 sps:$4 sm:$0xff]   ;;  %v16393_v38 = vld [vmem:[#allocation11 + $0xec] ss:$48 sps:$4 sm:$0xff]  }
 0x22b   : > { %3192 = vmatprep.subr.bf16.mxu1 %v16294_v41  ;;  %v16364_v41 = vld [vmem:[#allocation11 + $0x8c8] ss:$48 sps:$4 sm:$0xff]  }
 0x22d   : > { %3152 = vmatpush1.bf16.msra.mxu0 %v16289_v1  ;;  %v16369_v1 = vld [vmem:[#allocation11 + $0x26c] ss:$48 sps:$4 sm:$0xff]  }
 0x22e   : > { %3193 = vmatpush1.bf16.msra.mxu1 %v16292_v0  ;;  %3153 = vmatprep.subr.bf16.mxu0 %v16297_v2  ;;  %v3311_v0 = vunpack.c.0.s8 %v3310_v39  ;;  %v17631_v2 = vmov 1934713408   ;;  %v16396_v39 = vld [vmem:[#allocation11 + $0x6ec] ss:$48 sps:$4 sm:$0xff]  }
 0x22f   : > { %3194 = vmatprep.subr.bf16.mxu1 %v16300_v3  ;;  %v3342_v3 = vunpack.c.l.s4 %v17631_v2  ;;  %v16391_v2 = vld [vmem:[#allocation11 + $0xe8] ss:$48 sps:$4 sm:$0xff]  }
 0x231   : > { %3154 = vmatpush1.bf16.msra.mxu0 %v16295_v46  ;;  %v16372_v46 = vld [vmem:[#allocation11 + $0x86c] ss:$48 sps:$4 sm:$0xff]  }
 0x232   : > { %3195 = vmatpush1.bf16.msra.mxu1 %v16298_v47  ;;  %3155 = vmatprep.subr.bf16.mxu0 %v16303_v48 }
 0x233   : > { %3196 = vmatprep.subr.bf16.mxu1 %v16306_v49 }
 0x235   : > { %3156 = vmatpush1.bf16.msra.mxu0 %v16301_v50  ;;  %v16367_v50 = vld [vmem:[#allocation11 + $0x268] ss:$48 sps:$4 sm:$0xff]  }
 0x236   : > { %3197 = vmatpush1.bf16.msra.mxu1 %v16304_v51  ;;  %3157 = vmatprep.subr.bf16.mxu0 %v16309_v52  ;;  %v17959_v51 = vsub.s32 %v3311_v0, %v17908_v21  ;;  %v3343_v52 = vunpack.c.0.s8 %v3342_v3 }
 0x237   : > { %3198 = vmatprep.subr.bf16.mxu1 %v16312_v53 }
 0x239   : > { %3158 = vmatpush1.bf16.msra.mxu0 %v16307_v54 }
 0x23a   : > { %3199 = vmatpush1.bf16.msra.mxu1 %v16310_v55  ;;  %3159 = vmatprep.subr.bf16.mxu0 %v16315_v56  ;;  %v16370_v55 = vld [vmem:[#allocation11 + $0x868] ss:$48 sps:$4 sm:$0xff]   ;;  %v16375_v56 = vld [vmem:[#allocation11 + $0x20c] ss:$48 sps:$4 sm:$0xff]  }
 0x23b   : > { %3200 = vmatprep.subr.bf16.mxu1 %v16318_v57 }
 0x23d   : > { %3160 = vmatpush2.bf16.msra.mxu0 %v16313_v58 }
 0x23e   : > { %3201 = vmatpush2.bf16.msra.mxu1 %v16316_v59  ;;  %3161 = vmatprep.subr.bf16.mxu0 %v16321_v60  ;;  %v16378_v60 = vld [vmem:[#allocation11 + $0x80c] ss:$48 sps:$4 sm:$0xff]  }
 0x23f   : > { %3202 = vmatprep.subr.bf16.mxu1 %v16324_v61 }
 0x241   : > { %3162 = vmatpush2.bf16.msra.mxu0 %v16319_v62 }
 0x242   : > { %3203 = vmatpush2.bf16.msra.mxu1 %v16322_v63  ;;  %3163 = vmatprep.subr.bf16.mxu0 %v16327_v4  ;;  %v16373_v4 = vld [vmem:[#allocation11 + $0x208] ss:$48 sps:$4 sm:$0xff]  }
 0x243   : > { %3204 = vmatprep.subr.bf16.mxu1 %v16330_v5  ;;  %v17968_v5 = vsub.s32 %v3343_v52, %v17908_v21 }
 0x245   : > { %3164 = vmatpush2.bf16.msra.mxu0 %v16325_v6 }
 0x246   : > { %3205 = vmatpush2.bf16.msra.mxu1 %v16328_v7  ;;  %3165 = vmatprep.subr.bf16.mxu0 %v16333_v8  ;;  %v16381_v7 = vld [vmem:[#allocation11 + $0x1ac] ss:$48 sps:$4 sm:$0xff]  }
 0x247   : > { %3206 = vmatprep.subr.bf16.mxu1 %v16336_v9 }
 0x249   : > { %3166 = vmatpush2.bf16.msra.mxu0 %v16331_v10 }
 0x24a   : > { %3207 = vmatpush2.bf16.msra.mxu1 %v16334_v11  ;;  %3167 = vmatprep.subr.bf16.mxu0 %v16339_v12 }
 0x24b   : > { %3208 = vmatprep.subr.bf16.mxu1 %v16342_v13 }
 0x24d   : > { %3168 = vmatpush2.bf16.msra.mxu0 %v16337_v14 }
 0x24e   : > { %3209 = vmatpush2.bf16.msra.mxu1 %v16340_v15  ;;  %3169 = vmatprep.subr.bf16.mxu0 %v16345_v16  ;;  %v16379_v16 = vld [vmem:[#allocation11 + $0x1a8] ss:$48 sps:$4 sm:$0xff]  }
 0x24f   : > { %3210 = vmatprep.subr.bf16.mxu1 %v16348_v17  ;;  %v16382_v17 = vld [vmem:[#allocation11 + $0x7a8] ss:$48 sps:$4 sm:$0xff]  }
 0x251   : > { %3170 = vmatpush2.bf16.msra.mxu0 %v16343_v18  ;;  %v16387_v18 = vld [vmem:[#allocation11 + $0x14c] ss:$48 sps:$4 sm:$0xff]  }
 0x252   : > { %3211 = vmatpush2.bf16.msra.mxu1 %v16346_v24  ;;  %3171 = vmatprep.subr.bf16.mxu0 %v16351_v27 }
 0x253   : > { %3212 = vmatprep.subr.bf16.mxu1 %v16354_v28 }
 0x255   : > { %3172 = vmatpush2.bf16.msra.mxu0 %v16349_v30 }
 0x256   : > { %3213 = vmatpush2.bf16.msra.mxu1 %v16352_v31  ;;  %3173 = vmatprep.subr.bf16.mxu0 %v16357_v32  ;;  %v16390_v31 = vld [vmem:[#allocation11 + $0x74c] ss:$48 sps:$4 sm:$0xff]   ;;  %v16385_v32 = vld [vmem:[#allocation11 + $0x148] ss:$48 sps:$4 sm:$0xff]  }
 0x257   : > { %3214 = vmatprep.subr.bf16.mxu1 %v16360_v33 }
 0x259   : > { %3174 = vmatpush2.bf16.msra.mxu0 %v16355_v34 }
 0x25a   : > { %3215 = vmatpush2.bf16.msra.mxu1 %v16358_v35  ;;  %3225 = vmatprep.subr.bf16.mxu0 %v16363_v36 }
 0x25b   : > { %3266 = vmatprep.subr.bf16.mxu1 %v16366_v37  ;;  %v16388_v37 = vld [vmem:[#allocation11 + $0x748] ss:$48 sps:$4 sm:$0xff]  }
 0x25c   : > { %v2931_v47 = vpop.f32.mrf.mxu0  ;;  %v2972_v48 = vpop.f32.mrf.mxu1  ;;  %3176 = vmatmul.mubr.bf16.vlgmr.msra.gmra.mxu0 %v17930_v44 }
 0x25d   : > { %v2973_v49 = vadd.f32 %v2972_v48, %v2931_v47  ;;  %3217 = vmatmul.mubr.bf16.vlgmr.msra.gmra.mxu1 %v17932_v45  ;;  %3226 = vmatpush1.bf16.msra.mxu0 %v16361_v40 }
 0x25e   : > { %3257 = vmatprep.mubr.bf16.mxu0 %v17926_v42  ;;  %3267 = vmatpush1.bf16.msra.mxu1 %v16364_v41  ;;  %v2933_v53 = vpop.f32.mrf.mxu0  ;;  %v2974_v54 = vpop.f32.mrf.mxu1 }
 0x25f   : > { %v3307_v57 = vcombine.low %v17950_v19, %v2973_v49  ;;  %v3308_v58 = vcombine.high %v17950_v19, %v2973_v49  ;;  %3298 = vmatprep.mubr.bf16.mxu1 %v17928_v43  ;;  %v2975_v59 = vadd.f32 %v2974_v54, %v2933_v53  ;;  %3227 = vmatprep.subr.bf16.mxu0 %v16369_v1  ;;  %v16376_v43 = vld [vmem:[#allocation11 + $0x808] ss:$48 sps:$4 sm:$0xff]   ;;  %v16402_v54 = vld [vmem:[#allocation11 + $0x68c] ss:$48 sps:$4 sm:$0xff]  }
 0x260   : > { %v2935_v61 = vpop.f32.mrf.mxu0  ;;  %v2976_v62 = vpop.f32.mrf.mxu1  ;;  %3268 = vmatprep.subr.bf16.mxu1 %v16372_v46  ;;  %v16394_v49 = vld [vmem:[#allocation11 + $0x6e8] ss:$48 sps:$4 sm:$0xff]  }
 0x261   : > { %v3323_v63 = vcombine.low %v17954_v29, %v2975_v59  ;;  %v3324_v42 = vcombine.high %v17954_v29, %v2975_v59  ;;  %3228 = vmatpush1.bf16.msra.mxu0 %v16367_v50  ;;  %v3315_v8 = vrot.slane %v3307_v57, %v17959_v51  ;;  %v3322_v9 = vrot.slane %v3308_v58, %v17959_v51  ;;  %v16384_v29 = vld [vmem:[#allocation11 + $0x7ac] ss:$48 sps:$4 sm:$0xff]   ;;  %v16397_v58 = vld [vmem:[#allocation11 + $0x88] ss:$48 sps:$4 sm:$0xff]  }
 0x262   : > { %3269 = vmatpush1.bf16.msra.mxu1 %v16370_v55  ;;  %v2936_v6 = vpop.f32.mrf.mxu0  ;;  %v2977_v19 = vpop.f32.mrf.mxu1  ;;  %3229 = vmatprep.subr.bf16.mxu0 %v16375_v56  ;;  %v16399_v50 = vld [vmem:[#allocation11 + $0x8c] ss:$48 sps:$4 sm:$0xff]   ;;  %v16400_v62 = vld [vmem:[#allocation11 + $0x688] ss:$48 sps:$4 sm:$0xff]  }
 0x263   : > { %v3331_v10 = vrot.slane %v3323_v63, %v17959_v51  ;;  %v3338_v11 = vrot.slane %v3324_v42, %v17959_v51  ;;  %3270 = vmatprep.subr.bf16.mxu1 %v16378_v60  ;;  %v16405_v63 = vld [vmem:[#allocation11 + $0x2c] ss:$48 sps:$4 sm:$0xff]   ;;  %v16406_v6 = vld [vmem:[#allocation11 + $0x628] ss:$48 sps:$4 sm:$0xff]  }
 0x264   : > { %v16408_v42 = vld [vmem:[#allocation11 + $0x62c] ss:$48 sps:$4 sm:$0xff]  }
 0x265   : > { %v3339_v12 = vcombine.low %v3315_v8, %v3331_v10  ;;  %v3340_v13 = vcombine.high %v3315_v8, %v3331_v10  ;;  %v3355_v14 = vcombine.low %v3322_v9, %v3338_v11  ;;  %v3356_v15 = vcombine.high %v3322_v9, %v3338_v11  ;;  %3230 = vmatpush1.bf16.msra.mxu0 %v16373_v4  ;;  %v16403_v4 = vld [vmem:[#allocation11 + $0x28] ss:$48 sps:$4 sm:$0xff]   ;;  %v16411_v19 = vld [vmem:[#allocation11 + $0x5cc] ss:$48 sps:$4 sm:$0xff]  }
 0x266   : > { %3271 = vmatpush1.bf16.msra.mxu1 %v16376_v43  ;;  %3231 = vmatprep.subr.bf16.mxu0 %v16381_v7  ;;  %v16414_v43 = vld [vmem:[#allocation11 + $0xbcc] ss:$48 sps:$4 sm:$0xff]   ;;  %v16409_v7 = vld [vmem:[#allocation11 + $0x5c8] ss:$48 sps:$4 sm:$0xff]  }
 0x267   : > { %v3347_v24 = vrot.slane %v3339_v12, %v17968_v5  ;;  %v3354_v27 = vrot.slane %v3340_v13, %v17968_v5  ;;  %v3363_v28 = vrot.slane %v3355_v14, %v17968_v5  ;;  %v3370_v30 = vrot.slane %v3356_v15, %v17968_v5  ;;  %3272 = vmatprep.subr.bf16.mxu1 %v16384_v29  ;;  %v16412_v8 = vld [vmem:[#allocation11 + $0xbc8] ss:$48 sps:$4 sm:$0xff]   ;;  %v16417_v9 = vld [vmem:[#allocation11 + $0x56c] ss:$48 sps:$4 sm:$0xff]  }
 0x268   : > { %v16420_v10 = vld [vmem:[#allocation11 + $0xb6c] ss:$48 sps:$4 sm:$0xff]   ;;  %v16415_v11 = vld [vmem:[#allocation11 + $0x568] ss:$48 sps:$4 sm:$0xff]  }
 0x269   : > { %3232 = vmatpush1.bf16.msra.mxu0 %v16379_v16  ;;  %v3375_v33 = vcombine.low %v3347_v24, %v3354_v27  ;;  %v14368_v34 = vcombine.high %v3347_v24, %v3354_v27  ;;  %v3391_v35 = vcombine.low %v3363_v28, %v3370_v30  ;;  %v14369_v36 = vcombine.high %v3363_v28, %v3370_v30  ;;  %v16418_v29 = vld [vmem:[#allocation11 + $0xb68] ss:$48 sps:$4 sm:$0xff]   ;;  %v16423_v12 = vld [vmem:[#allocation11 + $0x50c] ss:$48 sps:$4 sm:$0xff]  }
 0x26a   : > { %3273 = vmatpush1.bf16.msra.mxu1 %v16382_v17  ;;  %3233 = vmatprep.subr.bf16.mxu0 %v16387_v18  ;;  %v16426_v13 = vld [vmem:[#allocation11 + $0xb0c] ss:$48 sps:$4 sm:$0xff]   ;;  %v16421_v14 = vld [vmem:[#allocation11 + $0x508] ss:$48 sps:$4 sm:$0xff]  }
 0x26b   : > { %3274 = vmatprep.subr.bf16.mxu1 %v16390_v31  ;;  %v3382_v40 = vrot.slane %v3375_v33, %v17959_v51  ;;  %v3390_v41 = vrot.slane %v14368_v34, %v17959_v51  ;;  %v3398_v1 = vrot.slane %v3391_v35, %v17959_v51  ;;  %v3406_v0 = vrot.slane %v14369_v36, %v17959_v51  ;;  %v16424_v15 = vld [vmem:[#allocation11 + $0xb08] ss:$48 sps:$4 sm:$0xff]   ;;  %v16429_v16 = vld [vmem:[#allocation11 + $0x4ac] ss:$48 sps:$4 sm:$0xff]  }
 0x26c   : > { %v16432_v17 = vld [vmem:[#allocation11 + $0xaac] ss:$48 sps:$4 sm:$0xff]   ;;  %v16427_v18 = vld [vmem:[#allocation11 + $0x4a8] ss:$48 sps:$4 sm:$0xff]  }
 0x26d   : > { %3234 = vmatpush1.bf16.msra.mxu0 %v16385_v32  ;;  %v3407_v3 = vcombine.low %v3382_v40, %v3390_v41  ;;  %v3423_v46 = vcombine.low %v3398_v1, %v3406_v0  ;;  %v3408_v47 = vcombine.high %v3382_v40, %v3390_v41  ;;  %v3424_v48 = vcombine.high %v3398_v1, %v3406_v0  ;;  %v16430_v24 = vld [vmem:[#allocation11 + $0xaa8] ss:$48 sps:$4 sm:$0xff]   ;;  %v16435_v27 = vld [vmem:[#allocation11 + $0x44c] ss:$48 sps:$4 sm:$0xff]  }
 0x26e   : > { %3275 = vmatpush1.bf16.msra.mxu1 %v16388_v37  ;;  %3235 = vmatprep.subr.bf16.mxu0 %v16393_v38  ;;  %v16438_v28 = vld [vmem:[#allocation11 + $0xa4c] ss:$48 sps:$4 sm:$0xff]   ;;  %v16433_v30 = vld [vmem:[#allocation11 + $0x448] ss:$48 sps:$4 sm:$0xff]  }
 0x26f   : > { %3276 = vmatprep.subr.bf16.mxu1 %v16396_v39  ;;  %v3415_v52 = vrot.slane %v3407_v3, %v17968_v5  ;;  %v3431_v53 = vrot.slane %v3423_v46, %v17968_v5  ;;  %v3422_v55 = vrot.slane %v3408_v47, %v17968_v5  ;;  %v3438_v56 = vrot.slane %v3424_v48, %v17968_v5  ;;  %v16436_v31 = vld [vmem:[#allocation11 + $0xa48] ss:$48 sps:$4 sm:$0xff]   ;;  %v16441_v32 = vld [vmem:[#allocation11 + $0x3ec] ss:$48 sps:$4 sm:$0xff]  }
 0x270   : > { %v16444_v33 = vld [vmem:[#allocation11 + $0x9ec] ss:$48 sps:$4 sm:$0xff]   ;;  %v16439_v34 = vld [vmem:[#allocation11 + $0x3e8] ss:$48 sps:$4 sm:$0xff]  }
 0x271   : > { %3236 = vmatpush1.bf16.msra.mxu0 %v16391_v2  ;;  %v17986_v57 = vcombine.low %v3415_v52, %v3431_v53  ;;  %v17988_v59 = vcombine.high %v3415_v52, %v3431_v53  ;;  %v17990_v60 = vcombine.low %v3422_v55, %v3438_v56  ;;  %v17992_v61 = vcombine.high %v3422_v55, %v3438_v56  ;;  %v16442_v35 = vld [vmem:[#allocation11 + $0x9e8] ss:$48 sps:$4 sm:$0xff]   ;;  %v16447_v36 = vld [vmem:[#allocation11 + $0x38c] ss:$48 sps:$4 sm:$0xff]  }
 0x272   : > { %3277 = vmatpush1.bf16.msra.mxu1 %v16394_v49  ;;  %3237 = vmatprep.subr.bf16.mxu0 %v16399_v50  ;;  %v16450_v37 = vld [vmem:[#allocation11 + $0x98c] ss:$48 sps:$4 sm:$0xff]   ;;  %v16445_v38 = vld [vmem:[#allocation11 + $0x388] ss:$48 sps:$4 sm:$0xff]  }
 0x273   : > { %3723 = vrot.lane.b32.xlu1 %v17986_v57, %s17632_s1  ;;  %3278 = vmatprep.subr.bf16.mxu1 %v16402_v54  ;;  %v16448_v39 = vld [vmem:[#allocation11 + $0x988] ss:$48 sps:$4 sm:$0xff]   ;;  %v16453_v40 = vld [vmem:[#allocation11 + $0x32c] ss:$48 sps:$4 sm:$0xff]  }
 0x274   : > { %v16456_v41 = vld [vmem:[#allocation11 + $0x92c] ss:$48 sps:$4 sm:$0xff]   ;;  %v16451_v1 = vld [vmem:[#allocation11 + $0x328] ss:$48 sps:$4 sm:$0xff]  }
 0x275   : > { %3238 = vmatpush1.bf16.msra.mxu0 %v16397_v58  ;;  %v16454_v0 = vld [vmem:[#allocation11 + $0x928] ss:$48 sps:$4 sm:$0xff]  }
 0x276   : > { %3279 = vmatpush1.bf16.msra.mxu1 %v16400_v62  ;;  %3239 = vmatprep.subr.bf16.mxu0 %v16405_v63 }
 0x277   : > { %3725 = vrot.lane.b32.xlu1 %v17988_v59, %s17632_s1  ;;  %3280 = vmatprep.subr.bf16.mxu1 %v16408_v42 }
 0x279   : > { %3240 = vmatpush1.bf16.msra.mxu0 %v16403_v4 }
 0x27a   : > { %3281 = vmatpush1.bf16.msra.mxu1 %v16406_v6  ;;  %3241 = vmatprep.subr.bf16.mxu0 %v16411_v19 }
 0x27b   : > { %3282 = vmatprep.subr.bf16.mxu1 %v16414_v43 }
 0x27d   : > { %3242 = vmatpush2.bf16.msra.mxu0 %v16409_v7 }
 0x27e   : > { %3283 = vmatpush2.bf16.msra.mxu1 %v16412_v8  ;;  %3243 = vmatprep.subr.bf16.mxu0 %v16417_v9 }
 0x27f   : > { %3284 = vmatprep.subr.bf16.mxu1 %v16420_v10 }
 0x281   : > { %3244 = vmatpush2.bf16.msra.mxu0 %v16415_v11 }
 0x282   : > { %3285 = vmatpush2.bf16.msra.mxu1 %v16418_v29  ;;  %3245 = vmatprep.subr.bf16.mxu0 %v16423_v12 }
 0x283   : > { %3286 = vmatprep.subr.bf16.mxu1 %v16426_v13 }
 0x285   : > { %3246 = vmatpush2.bf16.msra.mxu0 %v16421_v14 }
 0x286   : > { %3287 = vmatpush2.bf16.msra.mxu1 %v16424_v15  ;;  %3247 = vmatprep.subr.bf16.mxu0 %v16429_v16 }
 0x287   : > { %3288 = vmatprep.subr.bf16.mxu1 %v16432_v17 }
 0x289   : > { %3248 = vmatpush2.bf16.msra.mxu0 %v16427_v18 }
 0x28a   : > { %3289 = vmatpush2.bf16.msra.mxu1 %v16430_v24  ;;  %3249 = vmatprep.subr.bf16.mxu0 %v16435_v27 }
 0x28b   : > { %3290 = vmatprep.subr.bf16.mxu1 %v16438_v28 }
 0x28d   : > { %3250 = vmatpush2.bf16.msra.mxu0 %v16433_v30 }
 0x28e   : > { %3291 = vmatpush2.bf16.msra.mxu1 %v16436_v31  ;;  %3251 = vmatprep.subr.bf16.mxu0 %v16441_v32 }
 0x28f   : > { %3292 = vmatprep.subr.bf16.mxu1 %v16444_v33 }
 0x291   : > { %3252 = vmatpush2.bf16.msra.mxu0 %v16439_v34 }
 0x292   : > { %3293 = vmatpush2.bf16.msra.mxu1 %v16442_v35  ;;  %3253 = vmatprep.subr.bf16.mxu0 %v16447_v36 }
 0x293   : > { %3294 = vmatprep.subr.bf16.mxu1 %v16450_v37 }
 0x295   : > { %3254 = vmatpush2.bf16.msra.mxu0 %v16445_v38 }
 0x296   : > { %3295 = vmatpush2.bf16.msra.mxu1 %v16448_v39  ;;  %3255 = vmatprep.subr.bf16.mxu0 %v16453_v40  ;;  %v17633_v40 = vmov 0.0  }
 0x297   : > { %3296 = vmatprep.subr.bf16.mxu1 %v16456_v41 }
 0x299   : > { %3256 = vmatpush2.bf16.msra.mxu0 %v16451_v1 }
 0x29a   : > { %3297 = vmatpush2.bf16.msra.mxu1 %v16454_v0  ;;  %15695 = vmatprep.subr.bf16.mxu0 %v17633_v40 }
 0x29b   : > { %15701 = vmatprep.subr.bf16.mxu1 %v17633_v40 }
 0x29c   : > { %v3013_v2 = vpop.f32.mrf.mxu0  ;;  %3258 = vmatmul.mubr.bf16.vlgmr.msra.gmra.mxu0 %v17930_v44 }
 0x29d   : > { %v3054_v3 = vpop.f32.mrf.mxu1  ;;  %3299 = vmatmul.mubr.bf16.vlgmr.msra.gmra.mxu1 %v17932_v45  ;;  %15697 = vmatprep.mubr.msk.bf16.mxu0 %vm17634_vm0, %v17633_v40 }
 0x29e   : > { %v3055_v46 = vadd.f32 %v3054_v3, %v3013_v2  ;;  %v3015_v47 = vpop.f32.mrf.mxu0  ;;  %15703 = vmatprep.mubr.msk.bf16.mxu1 %vm17634_vm0, %v17633_v40 }
 0x29f   : > { %v3056_v48 = vpop.f32.mrf.mxu1 }
 0x2a0   : > { %v3057_v49 = vadd.f32 %v3056_v48, %v3015_v47  ;;  %v3017_v50 = vpop.f32.mrf.mxu0 }
 0x2a1   : > { %v3058_v52 = vpop.f32.mrf.mxu1 }
 0x2a2   : > { %v3018_v53 = vpop.f32.mrf.mxu0 }
 0x2a3   : > { %v3059_v54 = vpop.f32.mrf.mxu1 }
 0x2dc   : > { %v3095_v55 = vpop.f32.mrf.mxu0 }
 0x2dd   : > { %v3136_v56 = vpop.f32.mrf.mxu1 }
 0x2de   : > { %v3137_v58 = vadd.f32 %v3136_v56, %v3095_v55  ;;  %v3097_v62 = vpop.f32.mrf.mxu0 }
 0x2df   : > { %v3138_v63 = vpop.f32.mrf.mxu1 }
 0x2e0   : > { %v3443_v42 = vcombine.low %v3055_v46, %v3137_v58  ;;  %v3444_v4 = vcombine.high %v3055_v46, %v3137_v58  ;;  %v3139_v6 = vadd.f32 %v3138_v63, %v3097_v62  ;;  %v3099_v44 = vpop.f32.mrf.mxu0 }
 0x2e1   : > { %v3140_v19 = vpop.f32.mrf.mxu1 }
 0x2e2   : > { %v3459_v43 = vcombine.low %v3057_v49, %v3139_v6  ;;  %v3460_v45 = vcombine.high %v3057_v49, %v3139_v6  ;;  %v3100_v7 = vpop.f32.mrf.mxu0  ;;  %v3451_v9 = vrot.slane %v3443_v42, %v17959_v51  ;;  %v3458_v10 = vrot.slane %v3444_v4, %v17959_v51 }
 0x2e3   : > { %v3141_v8 = vpop.f32.mrf.mxu1 }
 0x2e4   : > { %v3467_v11 = vrot.slane %v3459_v43, %v17959_v51  ;;  %v3474_v29 = vrot.slane %v3460_v45, %v17959_v51 }
 0x2e5   : > { %v3724_v42 = vpop.permute.xlu1 %3723 }
 0x2e6   : > { %v3475_v12 = vcombine.low %v3451_v9, %v3467_v11  ;;  %v3476_v13 = vcombine.high %v3451_v9, %v3467_v11  ;;  %v3491_v14 = vcombine.low %v3458_v10, %v3474_v29  ;;  %v3492_v15 = vcombine.high %v3458_v10, %v3474_v29  ;;  %v18036_v11 = vld [vmem:[#allocation5] sm:$0xff] }
 0x2e8   : > { %v3483_v16 = vrot.slane %v3475_v12, %v17968_v5  ;;  %v3490_v17 = vrot.slane %v3476_v13, %v17968_v5  ;;  %v3499_v18 = vrot.slane %v3491_v14, %v17968_v5  ;;  %v3506_v24 = vrot.slane %v3492_v15, %v17968_v5 }
 0x2e9   : > { %v3726_v29 = vpop.permute.xlu1 %3725 }
 0x2ea   : > { %v3511_v27 = vcombine.low %v3483_v16, %v3490_v17  ;;  %v14370_v28 = vcombine.high %v3483_v16, %v3490_v17  ;;  %v3527_v30 = vcombine.low %v3499_v18, %v3506_v24  ;;  %v14371_v31 = vcombine.high %v3499_v18, %v3506_v24 }
 0x2ec   : > { %v3518_v32 = vrot.slane %v3511_v27, %v17959_v51  ;;  %v3526_v33 = vrot.slane %v14370_v28, %v17959_v51  ;;  %v3534_v34 = vrot.slane %v3527_v30, %v17959_v51  ;;  %v3542_v35 = vrot.slane %v14371_v31, %v17959_v51  ;;  %v18046_v30 = vld [vmem:[#allocation7] sm:$0xff] }
 0x2ed   : > { %v3719_v27 = vmul.f32 %v17986_v57, %v18036_v11  ;;  %v3720_v28 = vmul.f32 %v17988_v59, %v18036_v11 }
 0x2ee   : > { %v3543_v36 = vcombine.low %v3518_v32, %v3526_v33  ;;  %v3559_v37 = vcombine.low %v3534_v34, %v3542_v35  ;;  %v3544_v38 = vcombine.high %v3518_v32, %v3526_v33  ;;  %v3560_v39 = vcombine.high %v3534_v34, %v3542_v35 }
 0x2f0   : > { %v3551_v41 = vrot.slane %v3543_v36, %v17968_v5  ;;  %v3567_v1 = vrot.slane %v3559_v37, %v17968_v5  ;;  %v3558_v0 = vrot.slane %v3544_v38, %v17968_v5  ;;  %v3574_v2 = vrot.slane %v3560_v39, %v17968_v5 }
 0x2f2   : > { %v3576_v3 = vcombine.high %v3551_v41, %v3567_v1  ;;  %v3575_v46 = vcombine.low %v3551_v41, %v3567_v1  ;;  %v18018_v47 = vcombine.low %v3558_v0, %v3574_v2  ;;  %v18020_v48 = vcombine.high %v3558_v0, %v3574_v2 }
 0x2f3   : > { %v3731_v2 = vmul.f32 %v3724_v42, %v18046_v30 }
 0x2f4   : > { %3749 = vrot.lane.b32.xlu1 %v3576_v3, %s17632_s1  ;;  %3747 = vrot.lane.b32.xlu0 %v3575_v46, %s17632_s1  ;;  %v3744_v37 = vmul.f32 %v3576_v3, %v18036_v11  ;;  %v3743_v39 = vmul.f32 %v3575_v46, %v18036_v11 }
 0x2f8   : > { %3751 = vrot.lane.b32.xlu1 %v18018_v47, %s17632_s1 }
 0x2fc   : > { %3753 = vrot.lane.b32.xlu1 %v18020_v48, %s17632_s1 }
 0x300   : > { %3727 = vrot.lane.b32.xlu1 %v17990_v60, %s17632_s1 }
 0x304   : > { %3729 = vrot.lane.b32.xlu1 %v17992_v61, %s17632_s1 }
 0x31c   : > { %v3177_v49 = vpop.f32.mrf.mxu0 }
 0x31d   : > { %v3218_v50 = vpop.f32.mrf.mxu1 }
 0x31e   : > { %v3219_v52 = vadd.f32 %v3218_v50, %v3177_v49  ;;  %v3179_v53 = vpop.f32.mrf.mxu0  ;;  %v3732_v49 = vmul.f32 %v3726_v29, %v18046_v30 }
 0x31f   : > { %v3220_v54 = vpop.f32.mrf.mxu1 }
 0x320   : > { %v3221_v55 = vadd.f32 %v3220_v54, %v3179_v53  ;;  %v3181_v56 = vpop.f32.mrf.mxu0 }
 0x321   : > { %v3222_v58 = vpop.f32.mrf.mxu1 }
 0x322   : > { %v3182_v62 = vpop.f32.mrf.mxu0 }
 0x323   : > { %v3223_v63 = vpop.f32.mrf.mxu1  ;;  %v3745_v62 = vmul.f32 %v18018_v47, %v18036_v11 }
 0x35c   : > { %v3259_v4 = vpop.f32.mrf.mxu0 }
 0x35d   : > { %v3300_v6 = vpop.f32.mrf.mxu1 }
 0x35e   : > { %v3301_v44 = vadd.f32 %v3300_v6, %v3259_v4  ;;  %v3261_v19 = vpop.f32.mrf.mxu0 }
 0x35f   : > { %v3302_v43 = vpop.f32.mrf.mxu1 }
 0x360   : > { %v3579_v45 = vcombine.low %v3219_v52, %v3301_v44  ;;  %v3580_v7 = vcombine.high %v3219_v52, %v3301_v44  ;;  %v3303_v8 = vadd.f32 %v3302_v43, %v3261_v19  ;;  %v3263_v9 = vpop.f32.mrf.mxu0  ;;  %v3735_v19 = vadd.f32 %v3731_v2, %v3719_v27 }
 0x361   : > { %v3304_v10 = vpop.f32.mrf.mxu1  ;;  %v3736_v43 = vadd.f32 %v3732_v49, %v3720_v28 }
 0x362   : > { %v3595_v12 = vcombine.low %v3221_v55, %v3303_v8  ;;  %v3596_v13 = vcombine.high %v3221_v55, %v3303_v8  ;;  %v3264_v14 = vpop.f32.mrf.mxu0  ;;  %v3587_v16 = vrot.slane %v3579_v45, %v17959_v51  ;;  %v3594_v17 = vrot.slane %v3580_v7, %v17959_v51 }
 0x363   : > { %v3305_v15 = vpop.f32.mrf.mxu1  ;;  %v3746_v10 = vmul.f32 %v18020_v48, %v18036_v11 }
 0x364   : > { %v3603_v18 = vrot.slane %v3595_v12, %v17959_v51  ;;  %v3610_v24 = vrot.slane %v3596_v13, %v17959_v51 }
 0x366   : > { %v3611_v31 = vcombine.low %v3587_v16, %v3603_v18  ;;  %v3612_v32 = vcombine.high %v3587_v16, %v3603_v18  ;;  %v3627_v33 = vcombine.low %v3594_v17, %v3610_v24  ;;  %v3628_v34 = vcombine.high %v3594_v17, %v3610_v24  ;;  %v3750_v35 = vpop.permute.xlu1 %3749  ;;  %v3748_v36 = vpop.permute.xlu0 %3747 }
 0x367   : > { %v3756_v38 = vmul.f32 %v3750_v35, %v18046_v30  ;;  %v3755_v41 = vmul.f32 %v3748_v36, %v18046_v30  ;;  %v3739_v16 = vpack.c.bf16 %v3735_v19, %v3735_v19  ;;  %v3740_v24 = vpack.c.bf16 %v3736_v43, %v3736_v43 }
 0x368   : > { %v3619_v57 = vrot.slane %v3611_v31, %v17968_v5  ;;  %v3626_v59 = vrot.slane %v3612_v32, %v17968_v5  ;;  %v3635_v1 = vrot.slane %v3627_v33, %v17968_v5  ;;  %v3642_v0 = vrot.slane %v3628_v34, %v17968_v5 }
 0x369   : > { %v3760_v50 = vadd.f32 %v3756_v38, %v3744_v37  ;;  %v3759_v3 = vadd.f32 %v3755_v41, %v3743_v39  ;;  %v3721_v36 = vmul.f32 %v17990_v60, %v18036_v11 }
 0x36a   : > { %v3647_v52 = vcombine.low %v3619_v57, %v3626_v59  ;;  %v14372_v53 = vcombine.high %v3619_v57, %v3626_v59  ;;  %v3663_v54 = vcombine.low %v3635_v1, %v3642_v0  ;;  %v14373_v46 = vcombine.high %v3635_v1, %v3642_v0  ;;  %v3752_v55 = vpop.permute.xlu1 %3751 }
 0x36b   : > { %v3764_v56 = vpack.c.bf16 %v3760_v50, %v3760_v50  ;;  %v3763_v58 = vpack.c.bf16 %v3759_v3, %v3759_v3  ;;  %v3757_v63 = vmul.f32 %v3752_v55, %v18046_v30  ;;  %v3722_v57 = vmul.f32 %v17992_v61, %v18036_v11 }
 0x36c   : > { %v3654_v4 = vrot.slane %v3647_v52, %v17959_v51  ;;  %v3662_v42 = vrot.slane %v14372_v53, %v17959_v51  ;;  %v3670_v6 = vrot.slane %v3663_v54, %v17959_v51  ;;  %v3678_v44 = vrot.slane %v14373_v46, %v17959_v51 }
 0x36d   : > { %v3761_v45 = vadd.f32 %v3757_v63, %v3745_v62  ;;  %15696 = vmatpush3.bf16.xpose.msra.mxu0 %v3763_v58  ;;  %15702 = vmatpush3.bf16.xpose.msra.mxu1 %v3764_v56 }
 0x36e   : > { %v3754_v7 = vpop.permute.xlu1 %3753  ;;  %15707 = vmatprep.subr.bf16.mxu0 %v17633_v40  ;;  %15713 = vmatprep.subr.bf16.mxu1 %v17633_v40  ;;  %v3679_v47 = vcombine.low %v3654_v4, %v3662_v42  ;;  %v3695_v8 = vcombine.low %v3670_v6, %v3678_v44  ;;  %v3680_v9 = vcombine.high %v3654_v4, %v3662_v42 }
 0x36f   : > { %v3758_v29 = vmul.f32 %v3754_v7, %v18046_v30  ;;  %v3696_v12 = vcombine.high %v3670_v6, %v3678_v44  ;;  %v3765_v27 = vpack.c.bf16 %v3761_v45, %v3761_v45 }
 0x370   : > { %v3687_v13 = vrot.slane %v3679_v47, %v17968_v5  ;;  %v3703_v14 = vrot.slane %v3695_v8, %v17968_v5  ;;  %v3694_v15 = vrot.slane %v3680_v9, %v17968_v5 }
 0x371   : > { %v3762_v17 = vadd.f32 %v3758_v29, %v3746_v10  ;;  %v3710_v18 = vrot.slane %v3696_v12, %v17968_v5 }
 0x372   : > { %v3728_v28 = vpop.permute.xlu1 %3727  ;;  %v3711_v31 = vcombine.low %v3687_v13, %v3703_v14  ;;  %v3712_v32 = vcombine.high %v3687_v13, %v3703_v14 }
 0x373   : > { %v3766_v33 = vpack.c.bf16 %v3762_v17, %v3762_v17  ;;  %v3733_v48 = vmul.f32 %v3728_v28, %v18046_v30  ;;  %v3713_v34 = vcombine.low %v3694_v15, %v3710_v18  ;;  %v3714_v35 = vcombine.high %v3694_v15, %v3710_v18 }
 0x374   : > { %15698 = vmatmul.mubr.bf16.vlgmr.msra.gmra.mxu0 %v3739_v16  ;;  %15704 = vmatmul.mubr.bf16.vlgmr.msra.gmra.mxu1 %v3740_v24  ;;  %v3715_v0 = vpack.c.bf16 %v3711_v31, %v3711_v31  ;;  %v3716_v49 = vpack.c.bf16 %v3712_v32, %v3712_v32 }
 0x375   : > { %15708 = vmatpush3.bf16.xpose.msra.mxu0 %v3765_v27  ;;  %15714 = vmatpush3.bf16.xpose.msra.mxu1 %v3766_v33  ;;  %v3717_v37 = vpack.c.bf16 %v3713_v34, %v3713_v34  ;;  %v3718_v38 = vpack.c.bf16 %v3714_v35, %v3714_v35  ;;  %v3737_v39 = vadd.f32 %v3733_v48, %v3721_v36 }
 0x376   : > { %v3730_v41 = vpop.permute.xlu1 %3729  ;;  %15709 = vmatprep.mubr.msk.bf16.mxu0 %vm17634_vm0, %v17633_v40  ;;  %15715 = vmatprep.mubr.msk.bf16.mxu1 %vm17634_vm0, %v17633_v40  ;;  %v3992_v61 = vsel %vm3990_vm1, %v3715_v0, 0  ;;  %v4038_v11 = vsel %vm3990_vm1, %v3716_v49, 0 }
 0x377   : > { %v3734_v60 = vmul.f32 %v3730_v41, %v18046_v30  ;;  %15719 = vmatprep.subr.bf16.mxu0 %v17633_v40  ;;  %15725 = vmatprep.subr.bf16.mxu1 %v17633_v40  ;;  %v18087_v59 = vsel %vm3990_vm1, %v3717_v37, 0  ;;  %v18090_v1 = vsel %vm3990_vm1, %v3718_v38, 0  ;;  %v3741_v50 = vpack.c.bf16 %v3737_v39, %v3737_v39 }
 0x378   : > { %v3930_v30 = vand.u32 127, %v483_v20 }
 0x379   : > { %v3738_v2 = vadd.f32 %v3734_v60, %v3722_v57 }
 0x37a   : > { %vm3931_vm2 = vcmp.le.s32.totalorder %v3930_v30, %v17908_v21 }
 0x37b   : > { %v3742_v3 = vpack.c.bf16 %v3738_v2, %v3738_v2 }
 0x37c   : > { %15710 = vmatmul.mubr.bf16.vlgmr.msra.gmra.mxu0 %v3741_v50 }
 0x37d   : > { %15716 = vmatmul.mubr.bf16.vlgmr.msra.gmra.mxu1 %v3742_v3  ;;  %15720 = vmatpush3.bf16.msra.mxu0 %v3992_v61 }
 0x37e   : > { %15726 = vmatpush3.bf16.msra.mxu1 %v4038_v11  ;;  %15721 = vmatprep.mubr.msk.bf16.mxu0 %vm17634_vm0, %v17633_v40 }
 0x37f   : > { %15727 = vmatprep.mubr.msk.bf16.mxu1 %vm17634_vm0, %v17633_v40  ;;  %15731 = vmatprep.subr.bf16.mxu0 %v17633_v40 }
 0x380   : > { %15737 = vmatprep.subr.bf16.mxu1 %v17633_v40 }
 0x434   : > { %v3801_v52 = vpop.f32.mrf.mxu0  ;;  %v3841_v53 = vpop.f32.mrf.mxu1 }
 0x435   : > { %v3934_v54 = vsel %vm3931_vm2, %v3801_v52, -1e+30  ;;  %v3935_v46 = vsel %vm3931_vm2, %v3841_v53, -1e+30  ;;  %v16459_v52 = vld [vmem:[#allocation13 + $0xe4] ss:$16 sps:$4 sm:$0xff]  }
 0x436   : > { %v15699_v55 = vpop.f32.mrf.mxu0  ;;  %v15705_v56 = vpop.f32.mrf.mxu1  ;;  %v3942_v58 = vsel %vm3938_vm3, %v3935_v46, -inf  ;;  %v3939_v62 = vsel %vm3938_vm3, %v3934_v54, -inf  ;;  %v16462_v53 = vld [vmem:[#allocation13 + $0x2e4] ss:$16 sps:$4 sm:$0xff]  }
 0x437   : > { %3943 = vmax.xlane.f32.xlu1 %v3942_v58  ;;  %3940 = vmax.xlane.f32.xlu0 %v3939_v62  ;;  %v16457_v56 = vld [vmem:[#allocation13 + $0xe0] ss:$16 sps:$4 sm:$0xff]   ;;  %v16465_v62 = vld [vmem:[#allocation13 + $0xc4] ss:$16 sps:$4 sm:$0xff]  }
 0x438   : > { %v3804_v20 = vpop.f32.mrf.mxu0  ;;  %v3844_v63 = vpop.f32.mrf.mxu1 }
 0x43a   : > { %v15700_v4 = vpop.f32.mrf.mxu0  ;;  %v15706_v42 = vpop.f32.mrf.mxu1 }
 0x43b   : > { %v16468_v4 = vld [vmem:[#allocation13 + $0x2c4] ss:$16 sps:$4 sm:$0xff]  }
 0x43c   : > { %v3881_v6 = vpop.f32.mrf.mxu0  ;;  %v16471_v42 = vld [vmem:[#allocation13 + $0xa4] ss:$16 sps:$4 sm:$0xff]  }
 0x43d   : > { %v3936_v44 = vsel %vm3931_vm2, %v3881_v6, -1e+30  ;;  %v3921_v19 = vpop.f32.mrf.mxu1  ;;  %v16469_v6 = vld [vmem:[#allocation13 + $0xa0] ss:$16 sps:$4 sm:$0xff]  }
 0x43e   : > { %v15711_v43 = vpop.f32.mrf.mxu0  ;;  %v3945_v45 = vsel %vm3938_vm3, %v3936_v44, -inf  ;;  %v3937_v7 = vsel %vm3931_vm2, %v3921_v19, -1e+30  ;;  %v16477_v19 = vld [vmem:[#allocation13 + $0x84] ss:$16 sps:$4 sm:$0xff]  }
 0x43f   : > { %v15717_v47 = vpop.f32.mrf.mxu1  ;;  %3946 = vmax.xlane.f32.xlu0 %v3945_v45  ;;  %v3948_v29 = vsel %vm3938_vm3, %v3937_v7, -inf  ;;  %v16472_v43 = vld [vmem:[#allocation13 + $0x2a0] ss:$16 sps:$4 sm:$0xff]  }
 0x440   : > { %v3884_v8 = vpop.f32.mrf.mxu0  ;;  %v16475_v45 = vld [vmem:[#allocation13 + $0x80] ss:$16 sps:$4 sm:$0xff]   ;;  %v16483_v47 = vld [vmem:[#allocation13 + $0x64] ss:$16 sps:$4 sm:$0xff]  }
 0x441   : > { %v3924_v9 = vpop.f32.mrf.mxu1  ;;  %v16478_v8 = vld [vmem:[#allocation13 + $0x280] ss:$16 sps:$4 sm:$0xff]  }
 0x442   : > { %v15712_v10 = vpop.f32.mrf.mxu0  ;;  %v16481_v9 = vld [vmem:[#allocation13 + $0x60] ss:$16 sps:$4 sm:$0xff]  }
 0x443   : > { %v15718_v12 = vpop.f32.mrf.mxu1  ;;  %3949 = vmax.xlane.f32.xlu0 %v3948_v29  ;;  %v16486_v10 = vld [vmem:[#allocation13 + $0x264] ss:$16 sps:$4 sm:$0xff]  }
 0x444   : > { %v16489_v29 = vld [vmem:[#allocation13 + $0x44] ss:$16 sps:$4 sm:$0xff]   ;;  %v16484_v12 = vld [vmem:[#allocation13 + $0x260] ss:$16 sps:$4 sm:$0xff]  }
 0x4c0   : > { %v3944_v13 = vpop.xlane.xlu1 %3943  ;;  %v3941_v14 = vpop.xlane.xlu0 %3940 }
 0x4c1   : > { %v3952_v15 = vsub.f32 %v3935_v46, %v3944_v13  ;;  %v3951_v16 = vsub.f32 %v3934_v54, %v3941_v14  ;;  %v16487_v13 = vld [vmem:[#allocation13 + $0x40] ss:$16 sps:$4 sm:$0xff]   ;;  %v16492_v14 = vld [vmem:[#allocation13 + $0x244] ss:$16 sps:$4 sm:$0xff]  }
 0x4c3   : > { %v3957_v17 = vmul.f32 1.442695, %v3952_v15  ;;  %v3955_v18 = vmul.f32 1.442695, %v3951_v16  ;;  %v16495_v15 = vld [vmem:[#allocation13 + $0x24] ss:$16 sps:$4 sm:$0xff]  }
 0x4c4   : > { %v16490_v16 = vld [vmem:[#allocation13 + $0x240] ss:$16 sps:$4 sm:$0xff]  }
 0x4c5   : > { %17227 = vpow2.f32 %v3957_v17  ;;  %v16493_v17 = vld [vmem:[#allocation13 + $0x20] ss:$16 sps:$4 sm:$0xff]  }
 0x4c6   : > { %17229 = vpow2.f32 %v3955_v18  ;;  %v16498_v18 = vld [vmem:[#allocation13 + $0x224] ss:$16 sps:$4 sm:$0xff]  }
 0x4c8   : > { %v3947_v24 = vpop.xlane.xlu0 %3946 }
 0x4c9   : > { %v3953_v27 = vsub.f32 %v3936_v44, %v3947_v24  ;;  %v16474_v44 = vld [vmem:[#allocation13 + $0x2a4] ss:$16 sps:$4 sm:$0xff]  }
 0x4ca   : > { %v16501_v24 = vld [vmem:[#allocation13 + $0x4] ss:$16 sps:$4 sm:$0xff]  }
 0x4cb   : > { %v3959_v28 = vmul.f32 1.442695, %v3953_v27  ;;  %v16496_v27 = vld [vmem:[#allocation13 + $0x220] ss:$16 sps:$4 sm:$0xff]  }
 0x4cc   : > { %v3950_v31 = vpop.xlane.xlu0 %3949 }
 0x4cd   : > { %17231 = vpow2.f32 %v3959_v28  ;;  %v3954_v32 = vsub.f32 %v3937_v7, %v3950_v31  ;;  %v16480_v7 = vld [vmem:[#allocation13 + $0x284] ss:$16 sps:$4 sm:$0xff]   ;;  %v16499_v28 = vld [vmem:[#allocation13] ss:$16 sps:$4 sm:$0xff]  }
 0x4ce   : > { %v16504_v31 = vld [vmem:[#allocation13 + $0x204] ss:$16 sps:$4 sm:$0xff]  }
 0x4cf   : > { %v3961_v33 = vmul.f32 1.442695, %v3954_v32  ;;  %v16502_v32 = vld [vmem:[#allocation13 + $0x200] ss:$16 sps:$4 sm:$0xff]  }
 0x4d1   : > { %17233 = vpow2.f32 %v3961_v33  ;;  %v16505_v33 = vld [vmem:[#allocation13 + $0x1e0] ss:$16 sps:$4 sm:$0xff]  }
 0x4d2   : > { %v17228_v48 = vpop.eup %17227 }
 0x4d3   : > { %v17230_v34 = vpop.eup %17229  ;;  %v3966_v35 = vsel %vm3938_vm3, %v17228_v48, 0.0 }
 0x4d4   : > { %v3963_v36 = vsel %vm3938_vm3, %v17230_v34, 0.0  ;;  %3967 = vadd.xlane.f32.xlu0 %v3966_v35  ;;  %v16510_v35 = vld [vmem:[#allocation13 + $0x3e4] ss:$16 sps:$4 sm:$0xff]  }
 0x4d5   : > { %3964 = vadd.xlane.f32.xlu1 %v3963_v36  ;;  %v16511_v36 = vld [vmem:[#allocation13 + $0x1c0] ss:$16 sps:$4 sm:$0xff]  }
 0x4da   : > { %v17232_v37 = vpop.eup %17231 }
 0x4db   : > { %v3969_v38 = vsel %vm3938_vm3, %v17232_v37, 0.0 }
 0x4dc   : > { %3970 = vadd.xlane.f32.xlu1 %v3969_v38  ;;  %v16514_v38 = vld [vmem:[#allocation13 + $0x3c0] ss:$16 sps:$4 sm:$0xff]  }
 0x4de   : > { %v17234_v39 = vpop.eup %17233 }
 0x4df   : > { %v3972_v41 = vsel %vm3938_vm3, %v17234_v39, 0.0 }
 0x4e0   : > { %3973 = vadd.xlane.f32.xlu0 %v3972_v41  ;;  %v16519_v41 = vld [vmem:[#allocation13 + $0x1a4] ss:$16 sps:$4 sm:$0xff]  }
 0x55d   : > { %v3968_v57 = vpop.xlane.xlu0 %3967 }
 0x55e   : > { %v3965_v60 = vpop.xlane.xlu1 %3964  ;;  %17235 = vrcp.f32 %v3968_v57  ;;  %v16522_v57 = vld [vmem:[#allocation13 + $0x3a4] ss:$16 sps:$4 sm:$0xff]  }
 0x55f   : > { %17237 = vrcp.f32 %v3965_v60  ;;  %v16517_v60 = vld [vmem:[#allocation13 + $0x1a0] ss:$16 sps:$4 sm:$0xff]  }
 0x565   : > { %v3971_v0 = vpop.xlane.xlu1 %3970 }
 0x566   : > { %17239 = vrcp.f32 %v3971_v0  ;;  %v16520_v0 = vld [vmem:[#allocation13 + $0x3a0] ss:$16 sps:$4 sm:$0xff]  }
 0x569   : > { %v3974_v2 = vpop.xlane.xlu0 %3973 }
 0x56a   : > { %17241 = vrcp.f32 %v3974_v2  ;;  %v16525_v2 = vld [vmem:[#allocation13 + $0x184] ss:$16 sps:$4 sm:$0xff]  }
 0x56b   : > { %v17236_v49 = vpop.eup %17235 }
 0x56c   : > { %v17238_v50 = vpop.eup %17237  ;;  %v3980_v3 = vmul.f32 %v17236_v49, %v17228_v48  ;;  %v16507_v48 = vld [vmem:[#allocation13 + $0x1e4] ss:$16 sps:$4 sm:$0xff]  }
 0x56d   : > { %v3979_v61 = vmul.f32 %v17238_v50, %v17230_v34  ;;  %v16508_v34 = vld [vmem:[#allocation13 + $0x3e0] ss:$16 sps:$4 sm:$0xff]   ;;  %v16528_v49 = vld [vmem:[#allocation13 + $0x384] ss:$16 sps:$4 sm:$0xff]  }
 0x56e   : > { %v3984_v11 = vpack.c.bf16 %v3980_v3, %v3980_v3  ;;  %v16523_v50 = vld [vmem:[#allocation13 + $0x180] ss:$16 sps:$4 sm:$0xff]  }
 0x56f   : > { %v3983_v30 = vpack.c.bf16 %v3979_v61, %v3979_v61  ;;  %v16526_v3 = vld [vmem:[#allocation13 + $0x380] ss:$16 sps:$4 sm:$0xff]   ;;  %v16531_v61 = vld [vmem:[#allocation13 + $0x164] ss:$16 sps:$4 sm:$0xff]  }
 0x570   : > { %15728 = vmatmul.mubr.msk.bf16.vlgmr.msra.gmra.mxu1 %vm3938_vm3, %v3984_v11  ;;  %v16534_v11 = vld [vmem:[#allocation13 + $0x364] ss:$16 sps:$4 sm:$0xff]  }
 0x571   : > { %15722 = vmatmul.mubr.msk.bf16.vlgmr.msra.gmra.mxu0 %vm3938_vm3, %v3983_v30  ;;  %15738 = vmatpush3.bf16.msra.mxu1 %v18090_v1  ;;  %v16460_v1 = vld [vmem:[#allocation13 + $0x2e0] ss:$16 sps:$4 sm:$0xff]  }
 0x572   : > { %15732 = vmatpush3.bf16.msra.mxu0 %v18087_v59  ;;  %15733 = vmatprep.mubr.msk.bf16.mxu0 %vm17634_vm0, %v17633_v40  ;;  %v16463_v59 = vld [vmem:[#allocation13 + $0xc0] ss:$16 sps:$4 sm:$0xff]  }
 0x573   : > { %v17240_v54 = vpop.eup %17239  ;;  %15739 = vmatprep.mubr.msk.bf16.mxu1 %vm17634_vm0, %v17633_v40  ;;  %5080 = vmatprep.subr.bf16.mxu0 %v16459_v52  ;;  %v16466_v40 = vld [vmem:[#allocation13 + $0x2c0] ss:$16 sps:$4 sm:$0xff]  }
 0x574   : > { %v3981_v46 = vmul.f32 %v17240_v54, %v17232_v37  ;;  %5121 = vmatprep.subr.bf16.mxu1 %v16462_v53  ;;  %v16513_v37 = vld [vmem:[#allocation13 + $0x1c4] ss:$16 sps:$4 sm:$0xff]   ;;  %v16529_v30 = vld [vmem:[#allocation13 + $0x160] ss:$16 sps:$4 sm:$0xff]  }
 0x575   : > { %v16532_v52 = vld [vmem:[#allocation13 + $0x360] ss:$16 sps:$4 sm:$0xff]   ;;  %v16537_v54 = vld [vmem:[#allocation13 + $0x144] ss:$16 sps:$4 sm:$0xff]  }
 0x576   : > { %v3985_v55 = vpack.c.bf16 %v3981_v46, %v3981_v46  ;;  %v16535_v53 = vld [vmem:[#allocation13 + $0x140] ss:$16 sps:$4 sm:$0xff]  }
 0x577   : > { %v17242_v58 = vpop.eup %17241  ;;  %v16538_v46 = vld [vmem:[#allocation13 + $0x340] ss:$16 sps:$4 sm:$0xff]  }
 0x578   : > { %v3982_v20 = vmul.f32 %v17242_v58, %v17234_v39  ;;  %v16516_v39 = vld [vmem:[#allocation13 + $0x3c4] ss:$16 sps:$4 sm:$0xff]  }
 0x579   : > { %15734 = vmatmul.mubr.msk.bf16.vlgmr.msra.gmra.mxu0 %vm3938_vm3, %v3985_v55  ;;  %v16540_v55 = vld [vmem:[#allocation13 + $0x344] ss:$16 sps:$4 sm:$0xff]  }
 0x57a   : > { %v3986_v63 = vpack.c.bf16 %v3982_v20, %v3982_v20  ;;  %5081 = vmatpush1.bf16.msra.mxu0 %v16457_v56  ;;  %v16543_v56 = vld [vmem:[#allocation13 + $0x124] ss:$16 sps:$4 sm:$0xff]   ;;  %v16544_v20 = vld [vmem:[#allocation13 + $0x320] ss:$16 sps:$4 sm:$0xff]  }
 0x57b   : > { %5082 = vmatprep.subr.bf16.mxu0 %v16465_v62  ;;  %v16546_v58 = vld [vmem:[#allocation13 + $0x324] ss:$16 sps:$4 sm:$0xff]   ;;  %v16541_v62 = vld [vmem:[#allocation13 + $0x120] ss:$16 sps:$4 sm:$0xff]  }
 0x57c   : > { %15740 = vmatmul.mubr.msk.bf16.vlgmr.msra.gmra.mxu1 %vm3938_vm3, %v3986_v63  ;;  %v16552_v63 = vld [vmem:[#allocation13 + $0x304] ss:$16 sps:$4 sm:$0xff]  }
 0x57d   : > { %5122 = vmatpush1.bf16.msra.mxu1 %v16460_v1  ;;  %v16549_v1 = vld [vmem:[#allocation13 + $0x104] ss:$16 sps:$4 sm:$0xff]  }
 0x57e   : > { %5123 = vmatprep.subr.bf16.mxu1 %v16468_v4  ;;  %5083 = vmatpush1.bf16.msra.mxu0 %v16463_v59  ;;  %v16547_v59 = vld [vmem:[#allocation13 + $0x100] ss:$16 sps:$4 sm:$0xff]  }
 0x57f   : > { %5084 = vmatprep.subr.bf16.mxu0 %v16471_v42  ;;  %v16550_v4 = vld [vmem:[#allocation13 + $0x300] ss:$16 sps:$4 sm:$0xff]   ;;  %v16555_v42 = vld [vmem:[#allocation13 + $0xec] ss:$16 sps:$4 sm:$0xff]  }
 0x581   : > { %5124 = vmatpush1.bf16.msra.mxu1 %v16466_v40  ;;  %v16558_v40 = vld [vmem:[#allocation13 + $0x2ec] ss:$16 sps:$4 sm:$0xff]  }
 0x582   : > { %5125 = vmatprep.subr.bf16.mxu1 %v16474_v44  ;;  %5085 = vmatpush1.bf16.msra.mxu0 %v16469_v6 }
 0x583   : > { %5086 = vmatprep.subr.bf16.mxu0 %v16477_v19 }
 0x585   : > { %5126 = vmatpush1.bf16.msra.mxu1 %v16472_v43 }
 0x586   : > { %5127 = vmatprep.subr.bf16.mxu1 %v16480_v7  ;;  %5087 = vmatpush1.bf16.msra.mxu0 %v16475_v45 }
 0x587   : > { %5088 = vmatprep.subr.bf16.mxu0 %v16483_v47 }
 0x589   : > { %5128 = vmatpush1.bf16.msra.mxu1 %v16478_v8 }
 0x58a   : > { %5129 = vmatprep.subr.bf16.mxu1 %v16486_v10  ;;  %5089 = vmatpush1.bf16.msra.mxu0 %v16481_v9 }
 0x58b   : > { %5090 = vmatprep.subr.bf16.mxu0 %v16489_v29 }
 0x58d   : > { %5130 = vmatpush1.bf16.msra.mxu1 %v16484_v12 }
 0x58e   : > { %5131 = vmatprep.subr.bf16.mxu1 %v16492_v14  ;;  %5091 = vmatpush1.bf16.msra.mxu0 %v16487_v13 }
 0x58f   : > { %5092 = vmatprep.subr.bf16.mxu0 %v16495_v15 }
 0x591   : > { %5132 = vmatpush1.bf16.msra.mxu1 %v16490_v16 }
 0x592   : > { %5133 = vmatprep.subr.bf16.mxu1 %v16498_v18  ;;  %5093 = vmatpush1.bf16.msra.mxu0 %v16493_v17 }
 0x593   : > { %5094 = vmatprep.subr.bf16.mxu0 %v16501_v24 }
 0x595   : > { %5134 = vmatpush1.bf16.msra.mxu1 %v16496_v27 }
 0x596   : > { %5135 = vmatprep.subr.bf16.mxu1 %v16504_v31  ;;  %5095 = vmatpush1.bf16.msra.mxu0 %v16499_v28 }
 0x597   : > { %5096 = vmatprep.subr.bf16.mxu0 %v16507_v48 }
 0x599   : > { %5136 = vmatpush1.bf16.msra.mxu1 %v16502_v32 }
 0x59a   : > { %5137 = vmatprep.subr.bf16.mxu1 %v16510_v35  ;;  %5097 = vmatpush2.bf16.msra.mxu0 %v16505_v33 }
 0x59b   : > { %5098 = vmatprep.subr.bf16.mxu0 %v16513_v37 }
 0x59d   : > { %5138 = vmatpush2.bf16.msra.mxu1 %v16508_v34 }
 0x59e   : > { %5139 = vmatprep.subr.bf16.mxu1 %v16516_v39  ;;  %5099 = vmatpush2.bf16.msra.mxu0 %v16511_v36 }
 0x59f   : > { %5100 = vmatprep.subr.bf16.mxu0 %v16519_v41 }
 0x5a1   : > { %5140 = vmatpush2.bf16.msra.mxu1 %v16514_v38 }
 0x5a2   : > { %5141 = vmatprep.subr.bf16.mxu1 %v16522_v57  ;;  %5101 = vmatpush2.bf16.msra.mxu0 %v16517_v60 }
 0x5a3   : > { %5102 = vmatprep.subr.bf16.mxu0 %v16525_v2 }
 0x5a5   : > { %5142 = vmatpush2.bf16.msra.mxu1 %v16520_v0 }
 0x5a6   : > { %5143 = vmatprep.subr.bf16.mxu1 %v16528_v49  ;;  %5103 = vmatpush2.bf16.msra.mxu0 %v16523_v50 }
 0x5a7   : > { %5104 = vmatprep.subr.bf16.mxu0 %v16531_v61 }
 0x5a9   : > { %5144 = vmatpush2.bf16.msra.mxu1 %v16526_v3 }
 0x5aa   : > { %5145 = vmatprep.subr.bf16.mxu1 %v16534_v11  ;;  %5105 = vmatpush2.bf16.msra.mxu0 %v16529_v30 }
 0x5ab   : > { %5106 = vmatprep.subr.bf16.mxu0 %v16537_v54 }
 0x5ad   : > { %5146 = vmatpush2.bf16.msra.mxu1 %v16532_v52 }
 0x5ae   : > { %5147 = vmatprep.subr.bf16.mxu1 %v16540_v55  ;;  %5107 = vmatpush2.bf16.msra.mxu0 %v16535_v53 }
 0x5af   : > { %5108 = vmatprep.subr.bf16.mxu0 %v16543_v56 }
 0x5b1   : > { %5148 = vmatpush2.bf16.msra.mxu1 %v16538_v46 }
 0x5b2   : > { %5149 = vmatprep.subr.bf16.mxu1 %v16546_v58  ;;  %5109 = vmatpush2.bf16.msra.mxu0 %v16541_v62 }
 0x5b3   : > { %5110 = vmatprep.subr.bf16.mxu0 %v16549_v1 }
 0x5b5   : > { %5150 = vmatpush2.bf16.msra.mxu1 %v16544_v20 }
 0x5b6   : > { %5151 = vmatprep.subr.bf16.mxu1 %v16552_v63  ;;  %5111 = vmatpush2.bf16.msra.mxu0 %v16547_v59 }
 0x5b7   : > { %5162 = vmatprep.subr.bf16.mxu0 %v16555_v42 }
 0x5b9   : > { %5152 = vmatpush2.bf16.msra.mxu1 %v16550_v4  ;;  %v16553_v4 = vld [vmem:[#allocation13 + $0xe8] ss:$16 sps:$4 sm:$0xff]  }
 0x5ba   : > { %5203 = vmatprep.subr.bf16.mxu1 %v16558_v40 }
 0x630   : > { %v4074_v6 = vpop.f32.mrf.mxu1 }
 0x631   : > { %v4028_v44 = vpop.f32.mrf.mxu0 }
 0x632   : > { %v15729_v19 = vpop.f32.mrf.mxu1 }
 0x633   : > { %v15723_v43 = vpop.f32.mrf.mxu0  ;;  %v16562_v19 = vld [vmem:[#allocation13 + $0x2c8] ss:$16 sps:$4 sm:$0xff]  }
 0x634   : > { %v4077_v45 = vpop.f32.mrf.mxu1  ;;  %v16567_v43 = vld [vmem:[#allocation13 + $0xac] ss:$16 sps:$4 sm:$0xff]  }
 0x635   : > { %v4031_v7 = vpop.f32.mrf.mxu0  ;;  %v16570_v45 = vld [vmem:[#allocation13 + $0x2ac] ss:$16 sps:$4 sm:$0xff]  }
 0x636   : > { %v15730_v47 = vpop.f32.mrf.mxu1  ;;  %v16565_v7 = vld [vmem:[#allocation13 + $0xa8] ss:$16 sps:$4 sm:$0xff]  }
 0x637   : > { %v15724_v8 = vpop.f32.mrf.mxu0  ;;  %v16568_v47 = vld [vmem:[#allocation13 + $0x2a8] ss:$16 sps:$4 sm:$0xff]  }
 0x638   : > { %v16573_v8 = vld [vmem:[#allocation13 + $0x8c] ss:$16 sps:$4 sm:$0xff]  }
 0x639   : > { %v4120_v9 = vpop.f32.mrf.mxu0 }
 0x63a   : > { %v4172_v10 = vcombine.low %v4028_v44, %v4120_v9  ;;  %v4173_v29 = vcombine.high %v4028_v44, %v4120_v9  ;;  %v16564_v44 = vld [vmem:[#allocation13 + $0x2cc] ss:$16 sps:$4 sm:$0xff]  }
 0x63b   : > { %v15735_v12 = vpop.f32.mrf.mxu0  ;;  %v16576_v9 = vld [vmem:[#allocation13 + $0x28c] ss:$16 sps:$4 sm:$0xff]  }
 0x63c   : > { %v4166_v13 = vpop.f32.mrf.mxu1  ;;  %v4180_v18 = vrot.slane %v4172_v10, %v17959_v51  ;;  %v4187_v24 = vrot.slane %v4173_v29, %v17959_v51  ;;  %v16571_v10 = vld [vmem:[#allocation13 + $0x88] ss:$16 sps:$4 sm:$0xff]   ;;  %v16579_v12 = vld [vmem:[#allocation13 + $0x6c] ss:$16 sps:$4 sm:$0xff]  }
 0x63d   : > { %v4123_v14 = vpop.f32.mrf.mxu0  ;;  %v4188_v15 = vcombine.low %v4074_v6, %v4166_v13  ;;  %v4189_v16 = vcombine.high %v4074_v6, %v4166_v13  ;;  %v16561_v6 = vld [vmem:[#allocation13 + $0xcc] ss:$16 sps:$4 sm:$0xff]   ;;  %v16574_v29 = vld [vmem:[#allocation13 + $0x288] ss:$16 sps:$4 sm:$0xff]  }
 0x63e   : > { %v15741_v17 = vpop.f32.mrf.mxu1  ;;  %v16582_v13 = vld [vmem:[#allocation13 + $0x26c] ss:$16 sps:$4 sm:$0xff]   ;;  %v16577_v14 = vld [vmem:[#allocation13 + $0x68] ss:$16 sps:$4 sm:$0xff]  }
 0x63f   : > { %v4196_v27 = vrot.slane %v4188_v15, %v17959_v51  ;;  %v4203_v28 = vrot.slane %v4189_v16, %v17959_v51  ;;  %v15736_v31 = vpop.f32.mrf.mxu0  ;;  %v16580_v15 = vld [vmem:[#allocation13 + $0x268] ss:$16 sps:$4 sm:$0xff]   ;;  %v16585_v16 = vld [vmem:[#allocation13 + $0x4c] ss:$16 sps:$4 sm:$0xff]  }
 0x640   : > { %v4169_v32 = vpop.f32.mrf.mxu1  ;;  %v16588_v17 = vld [vmem:[#allocation13 + $0x24c] ss:$16 sps:$4 sm:$0xff]   ;;  %v16589_v31 = vld [vmem:[#allocation13 + $0x28] ss:$16 sps:$4 sm:$0xff]  }
 0x641   : > { %v4204_v33 = vcombine.low %v4180_v18, %v4196_v27  ;;  %v4205_v48 = vcombine.high %v4180_v18, %v4196_v27  ;;  %v4220_v34 = vcombine.low %v4187_v24, %v4203_v28  ;;  %v4221_v35 = vcombine.high %v4187_v24, %v4203_v28  ;;  %v16583_v18 = vld [vmem:[#allocation13 + $0x48] ss:$16 sps:$4 sm:$0xff]   ;;  %v16591_v27 = vld [vmem:[#allocation13 + $0x2c] ss:$16 sps:$4 sm:$0xff]  }
 0x642   : > { %v15742_v36 = vpop.f32.mrf.mxu1  ;;  %v16586_v24 = vld [vmem:[#allocation13 + $0x248] ss:$16 sps:$4 sm:$0xff]   ;;  %v16594_v28 = vld [vmem:[#allocation13 + $0x22c] ss:$16 sps:$4 sm:$0xff]  }
 0x643   : > { %v4212_v37 = vrot.slane %v4204_v33, %v17968_v5  ;;  %v4219_v38 = vrot.slane %v4205_v48, %v17968_v5  ;;  %v4228_v39 = vrot.slane %v4220_v34, %v17968_v5  ;;  %v4235_v41 = vrot.slane %v4221_v35, %v17968_v5  ;;  %v16592_v32 = vld [vmem:[#allocation13 + $0x228] ss:$16 sps:$4 sm:$0xff]   ;;  %v16597_v33 = vld [vmem:[#allocation13 + $0xc] ss:$16 sps:$4 sm:$0xff]  }
 0x644   : > { %v16600_v48 = vld [vmem:[#allocation13 + $0x20c] ss:$16 sps:$4 sm:$0xff]   ;;  %v16595_v34 = vld [vmem:[#allocation13 + $0x8] ss:$16 sps:$4 sm:$0xff]  }
 0x645   : > { %v4240_v57 = vcombine.low %v4212_v37, %v4219_v38  ;;  %v14378_v60 = vcombine.high %v4212_v37, %v4219_v38  ;;  %v4256_v0 = vcombine.low %v4228_v39, %v4235_v41  ;;  %v14379_v2 = vcombine.high %v4228_v39, %v4235_v41  ;;  %v16598_v35 = vld [vmem:[#allocation13 + $0x208] ss:$16 sps:$4 sm:$0xff]   ;;  %v16603_v36 = vld [vmem:[#allocation13 + $0x1ec] ss:$16 sps:$4 sm:$0xff]  }
 0x646   : > { %v16606_v37 = vld [vmem:[#allocation13 + $0x3ec] ss:$16 sps:$4 sm:$0xff]   ;;  %v16601_v38 = vld [vmem:[#allocation13 + $0x1e8] ss:$16 sps:$4 sm:$0xff]  }
 0x647   : > { %v4247_v49 = vrot.slane %v4240_v57, %v17959_v51  ;;  %v4255_v50 = vrot.slane %v14378_v60, %v17959_v51  ;;  %v4263_v3 = vrot.slane %v4256_v0, %v17959_v51  ;;  %v4271_v61 = vrot.slane %v14379_v2, %v17959_v51  ;;  %v16556_v51 = vld [vmem:[#allocation13 + $0x2e8] ss:$16 sps:$4 sm:$0xff]   ;;  %v16609_v41 = vld [vmem:[#allocation13 + $0x1cc] ss:$16 sps:$4 sm:$0xff]  }
 0x648   : > { %v16604_v39 = vld [vmem:[#allocation13 + $0x3e8] ss:$16 sps:$4 sm:$0xff]   ;;  %v16612_v57 = vld [vmem:[#allocation13 + $0x3cc] ss:$16 sps:$4 sm:$0xff]  }
 0x649   : > { %v4272_v11 = vcombine.low %v4247_v49, %v4255_v50  ;;  %v4288_v30 = vcombine.low %v4263_v3, %v4271_v61  ;;  %v4273_v52 = vcombine.high %v4247_v49, %v4255_v50  ;;  %v4289_v53 = vcombine.high %v4263_v3, %v4271_v61  ;;  %v16607_v60 = vld [vmem:[#allocation13 + $0x1c8] ss:$16 sps:$4 sm:$0xff]   ;;  %v16615_v2 = vld [vmem:[#allocation13 + $0x1ac] ss:$16 sps:$4 sm:$0xff]  }
 0x64a   : > { %v16610_v0 = vld [vmem:[#allocation13 + $0x3c8] ss:$16 sps:$4 sm:$0xff]   ;;  %v16618_v49 = vld [vmem:[#allocation13 + $0x3ac] ss:$16 sps:$4 sm:$0xff]  }
 0x64b   : > { %v4280_v54 = vrot.slane %v4272_v11, %v17968_v5  ;;  %v4296_v46 = vrot.slane %v4288_v30, %v17968_v5  ;;  %v4287_v55 = vrot.slane %v4273_v52, %v17968_v5  ;;  %v4303_v56 = vrot.slane %v4289_v53, %v17968_v5  ;;  %v16559_v5 = vld [vmem:[#allocation13 + $0xc8] ss:$16 sps:$4 sm:$0xff]   ;;  %v16621_v61 = vld [vmem:[#allocation13 + $0x18c] ss:$16 sps:$4 sm:$0xff]  }
 0x64c   : > { %v16613_v50 = vld [vmem:[#allocation13 + $0x1a8] ss:$16 sps:$4 sm:$0xff]   ;;  %v16624_v11 = vld [vmem:[#allocation13 + $0x38c] ss:$16 sps:$4 sm:$0xff]  }
 0x64d   : > { %v4305_v58 = vcombine.high %v4280_v54, %v4296_v46  ;;  %v4307_v62 = vcombine.high %v4287_v55, %v4303_v56  ;;  %v4304_v20 = vcombine.low %v4280_v54, %v4296_v46  ;;  %v4306_v1 = vcombine.low %v4287_v55, %v4303_v56  ;;  %v16616_v3 = vld [vmem:[#allocation13 + $0x3a8] ss:$16 sps:$4 sm:$0xff]   ;;  %v16627_v53 = vld [vmem:[#allocation13 + $0x16c] ss:$16 sps:$4 sm:$0xff]  }
 0x64e   : > { %v16619_v30 = vld [vmem:[#allocation13 + $0x188] ss:$16 sps:$4 sm:$0xff]   ;;  %v16630_v54 = vld [vmem:[#allocation13 + $0x36c] ss:$16 sps:$4 sm:$0xff]  }
 0x64f   : > { %v4309_v63 = vpack.c.bf16 %v4305_v58, %v4305_v58  ;;  %v4311_v59 = vpack.c.bf16 %v4307_v62, %v4307_v62  ;;  %v18144_v42 = vpack.c.bf16 %v4304_v20, %v4304_v20  ;;  %v18146_v40 = vpack.c.bf16 %v4306_v1, %v4306_v1  ;;  %v16622_v52 = vld [vmem:[#allocation13 + $0x388] ss:$16 sps:$4 sm:$0xff]   ;;  %v16633_v56 = vld [vmem:[#allocation13 + $0x14c] ss:$16 sps:$4 sm:$0xff]  }
 0x650   : > { %v16625_v46 = vld [vmem:[#allocation13 + $0x168] ss:$16 sps:$4 sm:$0xff]   ;;  %v16636_v58 = vld [vmem:[#allocation13 + $0x34c] ss:$16 sps:$4 sm:$0xff]  }
 0x651   : > { %5112 = vmatprep.mubr.bf16.mxu0 %v4309_v63  ;;  %5153 = vmatprep.mubr.bf16.mxu1 %v4311_v59  ;;  %v16628_v55 = vld [vmem:[#allocation13 + $0x368] ss:$16 sps:$4 sm:$0xff]   ;;  %v16639_v1 = vld [vmem:[#allocation13 + $0x12c] ss:$16 sps:$4 sm:$0xff]  }
 0x652   : > { %5113 = vmatmul.mubr.bf16.vlgmr.msra.gmra.mxu0 %v18144_v42  ;;  %5154 = vmatmul.mubr.bf16.vlgmr.msra.gmra.mxu1 %v18146_v40  ;;  %v16631_v62 = vld [vmem:[#allocation13 + $0x148] ss:$16 sps:$4 sm:$0xff]  }
 0x653   : > { %5163 = vmatpush1.bf16.msra.mxu0 %v16553_v4  ;;  %5204 = vmatpush1.bf16.msra.mxu1 %v16556_v51  ;;  %v16634_v20 = vld [vmem:[#allocation13 + $0x348] ss:$16 sps:$4 sm:$0xff]   ;;  %v16645_v51 = vld [vmem:[#allocation13 + $0x10c] ss:$16 sps:$4 sm:$0xff]  }
 0x654   : > { %5194 = vmatprep.mubr.bf16.mxu0 %v4309_v63  ;;  %5235 = vmatprep.mubr.bf16.mxu1 %v4311_v59  ;;  %v16642_v63 = vld [vmem:[#allocation13 + $0x32c] ss:$16 sps:$4 sm:$0xff]   ;;  %v16637_v59 = vld [vmem:[#allocation13 + $0x128] ss:$16 sps:$4 sm:$0xff]  }
 0x655   : > { %5164 = vmatprep.subr.bf16.mxu0 %v16561_v6  ;;  %5205 = vmatprep.subr.bf16.mxu1 %v16564_v44  ;;  %v16640_v4 = vld [vmem:[#allocation13 + $0x328] ss:$16 sps:$4 sm:$0xff]   ;;  %v16648_v6 = vld [vmem:[#allocation13 + $0x30c] ss:$16 sps:$4 sm:$0xff]  }
 0x656   : > { %v16643_v44 = vld [vmem:[#allocation13 + $0x108] ss:$16 sps:$4 sm:$0xff]  }
 0x657   : > { %5165 = vmatpush1.bf16.msra.mxu0 %v16559_v5  ;;  %5206 = vmatpush1.bf16.msra.mxu1 %v16562_v19  ;;  %v16646_v5 = vld [vmem:[#allocation13 + $0x308] ss:$16 sps:$4 sm:$0xff]   ;;  %v5462_v19 = vld [vmem:[#allocation14 + $0x540] sm:$0xff] }
 0x658   : > { %5166 = vmatprep.subr.bf16.mxu0 %v16567_v43  ;;  %5207 = vmatprep.subr.bf16.mxu1 %v16570_v45  ;;  %v5474_v43 = vld [vmem:[#allocation14 + $0x5a0] sm:$0xff] }
 0x659   : > { %v5846_v45 = vld [vmem:[#allocation14 + $0x1140] sm:$0xff] }
 0x65b   : > { %5167 = vmatpush1.bf16.msra.mxu0 %v16565_v7  ;;  %5208 = vmatpush1.bf16.msra.mxu1 %v16568_v47  ;;  %v14676_v7 = vcombine.low %v5462_v19, %v5474_v43  ;;  %v14677_v47 = vcombine.high %v5462_v19, %v5474_v43 }
 0x65c   : > { %5168 = vmatprep.subr.bf16.mxu0 %v16573_v8  ;;  %5209 = vmatprep.subr.bf16.mxu1 %v16576_v9  ;;  %v5858_v8 = vld [vmem:[#allocation14 + $0x11a0] sm:$0xff] }
 0x65d   : > { %v5438_v9 = vld [vmem:[#allocation14 + $0x480] sm:$0xff] }
 0x65f   : > { %5169 = vmatpush1.bf16.msra.mxu0 %v16571_v10  ;;  %5210 = vmatpush1.bf16.msra.mxu1 %v16574_v29  ;;  %v5450_v10 = vld [vmem:[#allocation14 + $0x4e0] sm:$0xff]  ;;  %v15060_v29 = vcombine.low %v5846_v45, %v5858_v8 }
 0x660   : > { %5170 = vmatprep.subr.bf16.mxu0 %v16579_v12  ;;  %5211 = vmatprep.subr.bf16.mxu1 %v16582_v13  ;;  %v15061_v12 = vcombine.high %v5846_v45, %v5858_v8  ;;  %v14653_v13 = vcombine.high %v5438_v9, %v5450_v10  ;;  %v6038_v8 = vld [vmem:[#allocation14 + $0x1740] sm:$0xff] }
 0x663   : > { %5171 = vmatpush1.bf16.msra.mxu0 %v16577_v14  ;;  %5212 = vmatpush1.bf16.msra.mxu1 %v16580_v15  ;;  %v5822_v14 = vld [vmem:[#allocation14 + $0x1080] sm:$0xff] }
 0x664   : > { %5172 = vmatprep.subr.bf16.mxu0 %v16585_v16  ;;  %5213 = vmatprep.subr.bf16.mxu1 %v16588_v17  ;;  %v5834_v15 = vld [vmem:[#allocation14 + $0x10e0] sm:$0xff] }
 0x665   : > { %v5414_v16 = vld [vmem:[#allocation14 + $0x3c0] sm:$0xff]  ;;  %v15037_v17 = vcombine.high %v5822_v14, %v5834_v15 }
 0x667   : > { %5173 = vmatpush1.bf16.msra.mxu0 %v16583_v18  ;;  %5214 = vmatpush1.bf16.msra.mxu1 %v16586_v24  ;;  %v5426_v18 = vld [vmem:[#allocation14 + $0x420] sm:$0xff] }
 0x668   : > { %5174 = vmatprep.subr.bf16.mxu0 %v16591_v27  ;;  %5215 = vmatprep.subr.bf16.mxu1 %v16594_v28  ;;  %v5810_v24 = vld [vmem:[#allocation14 + $0x1020] sm:$0xff]  ;;  %v15036_v27 = vcombine.low %v5822_v14, %v5834_v15  ;;  %v14629_v28 = vcombine.high %v5414_v16, %v5426_v18 }
 0x669   : > { %v5630_v14 = vld [vmem:[#allocation14 + $0xa80] sm:$0xff] }
 0x66a   : > { %v5642_v15 = vld [vmem:[#allocation14 + $0xae0] sm:$0xff] }
 0x66b   : > { %5175 = vmatpush1.bf16.msra.mxu0 %v16589_v31  ;;  %5216 = vmatpush1.bf16.msra.mxu1 %v16592_v32  ;;  %v5390_v32 = vld [vmem:[#allocation14 + $0x300] sm:$0xff] }
 0x66c   : > { %5176 = vmatprep.subr.bf16.mxu0 %v16597_v33  ;;  %5217 = vmatprep.subr.bf16.mxu1 %v16600_v48  ;;  %v5402_v33 = vld [vmem:[#allocation14 + $0x360] sm:$0xff] }
 0x66d   : > { %v5774_v48 = vld [vmem:[#allocation14 + $0xf00] sm:$0xff] }
 0x66f   : > { %5177 = vmatpush1.bf16.msra.mxu0 %v16595_v34  ;;  %5218 = vmatpush1.bf16.msra.mxu1 %v16598_v35  ;;  %v5786_v34 = vld [vmem:[#allocation14 + $0xf60] sm:$0xff]  ;;  %v14628_v35 = vcombine.low %v5414_v16, %v5426_v18 }
 0x670   : > { %5178 = vmatprep.subr.bf16.mxu0 %v16603_v36  ;;  %5219 = vmatprep.subr.bf16.mxu1 %v16606_v37  ;;  %v14605_v37 = vcombine.high %v5390_v32, %v5402_v33  ;;  %v6014_v16 = vld [vmem:[#allocation14 + $0x1680] sm:$0xff] }
 0x673   : > { %5179 = vmatpush2.bf16.msra.mxu0 %v16601_v38  ;;  %5220 = vmatpush2.bf16.msra.mxu1 %v16604_v39  ;;  %v14989_v38 = vcombine.high %v5774_v48, %v5786_v34  ;;  %v5366_v39 = vld [vmem:[#allocation14 + $0x240] sm:$0xff] }
 0x674   : > { %5180 = vmatprep.subr.bf16.mxu0 %v16609_v41  ;;  %5221 = vmatprep.subr.bf16.mxu1 %v16612_v57  ;;  %v5378_v41 = vld [vmem:[#allocation14 + $0x2a0] sm:$0xff] }
 0x675   : > { %v5750_v57 = vld [vmem:[#allocation14 + $0xe40] sm:$0xff] }
 0x677   : > { %5181 = vmatpush2.bf16.msra.mxu0 %v16607_v60  ;;  %5222 = vmatpush2.bf16.msra.mxu1 %v16610_v0  ;;  %v5762_v60 = vld [vmem:[#allocation14 + $0xea0] sm:$0xff]  ;;  %v14604_v0 = vcombine.low %v5390_v32, %v5402_v33 }
 0x678   : > { %5182 = vmatprep.subr.bf16.mxu0 %v16615_v2  ;;  %5223 = vmatprep.subr.bf16.mxu1 %v16618_v49  ;;  %v14988_v2 = vcombine.low %v5774_v48, %v5786_v34  ;;  %v14581_v49 = vcombine.high %v5366_v39, %v5378_v41 }
 0x67b   : > { %5183 = vmatpush2.bf16.msra.mxu0 %v16613_v50  ;;  %5224 = vmatpush2.bf16.msra.mxu1 %v16616_v3  ;;  %v14965_v50 = vcombine.high %v5750_v57, %v5762_v60  ;;  %v5342_v3 = vld [vmem:[#allocation14 + $0x180] sm:$0xff] }
 0x67c   : > { %5184 = vmatprep.subr.bf16.mxu0 %v16621_v61  ;;  %5225 = vmatprep.subr.bf16.mxu1 %v16624_v11  ;;  %v5354_v61 = vld [vmem:[#allocation14 + $0x1e0] sm:$0xff] }
 0x67d   : > { %v5726_v11 = vld [vmem:[#allocation14 + $0xd80] sm:$0xff] }
 0x67f   : > { %5185 = vmatpush2.bf16.msra.mxu0 %v16619_v30  ;;  %5226 = vmatpush2.bf16.msra.mxu1 %v16622_v52  ;;  %v5738_v30 = vld [vmem:[#allocation14 + $0xde0] sm:$0xff]  ;;  %v14580_v52 = vcombine.low %v5366_v39, %v5378_v41  ;;  %v17293_v41 = vld [vmem:[%s17865_s4 + $0x8] sm:$0xff] }
 0x680   : > { %5186 = vmatprep.subr.bf16.mxu0 %v16627_v53  ;;  %5227 = vmatprep.subr.bf16.mxu1 %v16630_v54  ;;  %v14964_v53 = vcombine.low %v5750_v57, %v5762_v60  ;;  %v14557_v54 = vcombine.high %v5342_v3, %v5354_v61  ;;  %v17294_v60 = vld [vmem:[%s17865_s4] sm:$0xff] }
 0x683   : > { %5187 = vmatpush2.bf16.msra.mxu0 %v16625_v46  ;;  %5228 = vmatpush2.bf16.msra.mxu1 %v16628_v55  ;;  %v14941_v46 = vcombine.high %v5726_v11, %v5738_v30  ;;  %v5318_v55 = vld [vmem:[#allocation14 + $0xc0] sm:$0xff] }
 0x684   : > { %5188 = vmatprep.subr.bf16.mxu0 %v16633_v56  ;;  %5229 = vmatprep.subr.bf16.mxu1 %v16636_v58  ;;  %v5330_v56 = vld [vmem:[#allocation14 + $0x120] sm:$0xff] }
 0x685   : > { %v5702_v58 = vld [vmem:[#allocation14 + $0xcc0] sm:$0xff] }
 0x687   : > { %5189 = vmatpush2.bf16.msra.mxu0 %v16631_v62  ;;  %5230 = vmatpush2.bf16.msra.mxu1 %v16634_v20  ;;  %v5714_v62 = vld [vmem:[#allocation14 + $0xd20] sm:$0xff]  ;;  %v14556_v20 = vcombine.low %v5342_v3, %v5354_v61 }
 0x688   : > { %5190 = vmatprep.subr.bf16.mxu0 %v16639_v1  ;;  %5231 = vmatprep.subr.bf16.mxu1 %v16642_v63  ;;  %v14940_v1 = vcombine.low %v5726_v11, %v5738_v30  ;;  %v14533_v63 = vcombine.high %v5318_v55, %v5330_v56  ;;  %v14916_v19 = vcombine.low %v5702_v58, %v5714_v62 }
 0x68b   : > { %5191 = vmatpush2.bf16.msra.mxu0 %v16637_v59  ;;  %5232 = vmatpush2.bf16.msra.mxu1 %v16640_v4  ;;  %v14917_v59 = vcombine.high %v5702_v58, %v5714_v62  ;;  %v5294_v4 = vld [vmem:[#allocation14] sm:$0xff] }
 0x68c   : > { %5192 = vmatprep.subr.bf16.mxu0 %v16645_v51  ;;  %5233 = vmatprep.subr.bf16.mxu1 %v16648_v6  ;;  %v5306_v51 = vld [vmem:[#allocation14 + $0x60] sm:$0xff] }
 0x68d   : > { %v5678_v6 = vld [vmem:[#allocation14 + $0xc00] sm:$0xff]  ;;  %v14509_v43 = vcombine.high %v5294_v4, %v5306_v51 }
 0x68f   : > { %5193 = vmatpush2.bf16.msra.mxu0 %v16643_v44  ;;  %5234 = vmatpush2.bf16.msra.mxu1 %v16646_v5  ;;  %v5690_v44 = vld [vmem:[#allocation14 + $0xc60] sm:$0xff]  ;;  %v14532_v5 = vcombine.low %v5318_v55, %v5330_v56 }
 0x690   : > { %9902 = vmatprep.subr.bf16.mxu0 %v14677_v47  ;;  %9943 = vmatprep.subr.bf16.mxu1 %v15061_v12  ;;  %v14893_v45 = vcombine.high %v5678_v6, %v5690_v44  ;;  %v5666_v47 = vld [vmem:[#allocation14 + $0xba0] sm:$0xff] }
 0x691   : > { %v17296_v56 = vld [vmem:[%s17865_s4 + $0x18] sm:$0xff] }
 0x692   : > { %5195 = vmatmul.mubr.bf16.vlgmr.msra.gmra.mxu0 %v18144_v42  ;;  %5236 = vmatmul.mubr.bf16.vlgmr.msra.gmra.mxu1 %v18146_v40  ;;  %v5798_v42 = vld [vmem:[#allocation14 + $0xfc0] sm:$0xff]  ;;  %v14652_v40 = vcombine.low %v5438_v9, %v5450_v10  ;;  %v14508_v10 = vcombine.low %v5294_v4, %v5306_v51 }
 0x693   : > { %9903 = vmatpush1.bf16.msra.mxu0 %v14676_v7  ;;  %9944 = vmatpush1.bf16.msra.mxu1 %v15060_v29  ;;  %v15013_v31 = vcombine.high %v5798_v42, %v5810_v24  ;;  %v15012_v36 = vcombine.low %v5798_v42, %v5810_v24  ;;  %v5654_v7 = vld [vmem:[#allocation14 + $0xb40] sm:$0xff]  ;;  %v14892_v29 = vcombine.low %v5678_v6, %v5690_v44 }
 0x694   : > { %9904 = vmatprep.subr.bf16.mxu0 %v14653_v13  ;;  %9945 = vmatprep.subr.bf16.mxu1 %v15037_v17  ;;  %v6050_v9 = vld [vmem:[#allocation14 + $0x17a0] sm:$0xff]  ;;  %v14869_v12 = vcombine.high %v5654_v7, %v5666_v47  ;;  %v14868_v18 = vcombine.low %v5654_v7, %v5666_v47  ;;  %v14845_v24 = vcombine.high %v5630_v14, %v5642_v15 }
 0x695   : > { %v15253_v13 = vcombine.high %v6038_v8, %v6050_v9  ;;  %v6026_v17 = vld [vmem:[#allocation14 + $0x16e0] sm:$0xff]  ;;  %v15252_v42 = vcombine.low %v6038_v8, %v6050_v9 }
 0x696   : > { %v5606_v6 = vld [vmem:[#allocation14 + $0x9c0] sm:$0xff] }
 0x697   : > { %9905 = vmatpush1.bf16.msra.mxu0 %v14652_v40  ;;  %9946 = vmatpush1.bf16.msra.mxu1 %v15036_v27  ;;  %v15229_v40 = vcombine.high %v6014_v16, %v6026_v17  ;;  %v14844_v27 = vcombine.low %v5630_v14, %v5642_v15  ;;  %v5618_v44 = vld [vmem:[#allocation14 + $0xa20] sm:$0xff] }
 0x698   : > { %9906 = vmatprep.subr.bf16.mxu0 %v14629_v28  ;;  %9947 = vmatprep.subr.bf16.mxu1 %v15013_v31  ;;  %v15228_v28 = vcombine.low %v6014_v16, %v6026_v17  ;;  %v5582_v8 = vld [vmem:[#allocation14 + $0x900] sm:$0xff] }
 0x699   : > { %v5594_v9 = vld [vmem:[#allocation14 + $0x960] sm:$0xff] }
 0x69a   : > { %v5558_v16 = vld [vmem:[#allocation14 + $0x840] sm:$0xff] }
 0x69b   : > { %9907 = vmatpush1.bf16.msra.mxu0 %v14628_v35  ;;  %9948 = vmatpush1.bf16.msra.mxu1 %v15012_v36  ;;  %v5570_v17 = vld [vmem:[#allocation14 + $0x8a0] sm:$0xff] }
 0x69c   : > { %9908 = vmatprep.subr.bf16.mxu0 %v14605_v37  ;;  %9949 = vmatprep.subr.bf16.mxu1 %v14989_v38 }
 0x69f   : > { %9909 = vmatpush1.bf16.msra.mxu0 %v14604_v0  ;;  %9950 = vmatpush1.bf16.msra.mxu1 %v14988_v2 }
 0x6a0   : > { %9910 = vmatprep.subr.bf16.mxu0 %v14581_v49  ;;  %9951 = vmatprep.subr.bf16.mxu1 %v14965_v50 }
 0x6a3   : > { %9911 = vmatpush1.bf16.msra.mxu0 %v14580_v52  ;;  %9952 = vmatpush1.bf16.msra.mxu1 %v14964_v53  ;;  %v17295_v52 = vld [vmem:[%s17865_s4 + $0x10] sm:$0xff] }
 0x6a4   : > { %9912 = vmatprep.subr.bf16.mxu0 %v14557_v54  ;;  %9953 = vmatprep.subr.bf16.mxu1 %v14941_v46 }
 0x6a7   : > { %9913 = vmatpush1.bf16.msra.mxu0 %v14556_v20  ;;  %9954 = vmatpush1.bf16.msra.mxu1 %v14940_v1 }
 0x6a8   : > { %9914 = vmatprep.subr.bf16.mxu0 %v14533_v63  ;;  %9955 = vmatprep.subr.bf16.mxu1 %v14917_v59 }
 0x6ab   : > { %9915 = vmatpush1.bf16.msra.mxu0 %v14532_v5  ;;  %9956 = vmatpush1.bf16.msra.mxu1 %v14916_v19  ;;  %v5990_v5 = vld [vmem:[#allocation14 + $0x15c0] sm:$0xff]  ;;  %v14821_v19 = vcombine.high %v5606_v6, %v5618_v44 }
 0x6ac   : > { %9916 = vmatprep.subr.bf16.mxu0 %v14509_v43  ;;  %9957 = vmatprep.subr.bf16.mxu1 %v14893_v45  ;;  %v6002_v43 = vld [vmem:[#allocation14 + $0x1620] sm:$0xff]  ;;  %v14820_v45 = vcombine.low %v5606_v6, %v5618_v44 }
 0x6ad   : > { %v15204_v7 = vcombine.low %v5990_v5, %v6002_v43  ;;  %v15205_v47 = vcombine.high %v5990_v5, %v6002_v43  ;;  %v5248_v43 = vld [vmem:[#allocation10] sm:$0xf] }
 0x6af   : > { %9917 = vmatpush1.bf16.msra.mxu0 %v14508_v10  ;;  %9958 = vmatpush1.bf16.msra.mxu1 %v14892_v29  ;;  %v5966_v10 = vld [vmem:[#allocation14 + $0x1500] sm:$0xff]  ;;  %v14797_v29 = vcombine.high %v5582_v8, %v5594_v9 }
 0x6b0   : > { %9918 = vmatprep.subr.bf16.mxu0 %v14869_v12  ;;  %9959 = vmatprep.subr.bf16.mxu1 %v15253_v13  ;;  %v5978_v12 = vld [vmem:[#allocation14 + $0x1560] sm:$0xff]  ;;  %v14796_v13 = vcombine.low %v5582_v8, %v5594_v9  ;;  %v5277_v8 = vrot.slane %v5248_v43, %v493_v26 }
 0x6b1   : > { %v15180_v14 = vcombine.low %v5966_v10, %v5978_v12  ;;  %v15181_v15 = vcombine.high %v5966_v10, %v5978_v12 }
 0x6b3   : > { %9919 = vmatpush2.bf16.msra.mxu0 %v14868_v18  ;;  %9960 = vmatpush2.bf16.msra.mxu1 %v15252_v42  ;;  %v5942_v18 = vld [vmem:[#allocation14 + $0x1440] sm:$0xff]  ;;  %v14773_v42 = vcombine.high %v5558_v16, %v5570_v17 }
 0x6b4   : > { %9920 = vmatprep.subr.bf16.mxu0 %v14845_v24  ;;  %9961 = vmatprep.subr.bf16.mxu1 %v15229_v40  ;;  %v5954_v24 = vld [vmem:[#allocation14 + $0x14a0] sm:$0xff]  ;;  %v14772_v40 = vcombine.low %v5558_v16, %v5570_v17  ;;  %v5451_v17 = vld [vmem:[#allocation14 + $0x4e8] sm:$0xff] }
 0x6b7   : > { %9921 = vmatpush2.bf16.msra.mxu0 %v14844_v27  ;;  %9962 = vmatpush2.bf16.msra.mxu1 %v15228_v28  ;;  %v15156_v27 = vcombine.low %v5942_v18, %v5954_v24  ;;  %v15157_v28 = vcombine.high %v5942_v18, %v5954_v24  ;;  %v5823_v18 = vld [vmem:[#allocation14 + $0x1088] sm:$0xff] }
 0x6b8   : > { %9922 = vmatprep.subr.bf16.mxu0 %v14821_v19  ;;  %9963 = vmatprep.subr.bf16.mxu1 %v15205_v47  ;;  %v5269_v47 = vrot.slane %v5248_v43, %v485_v25  ;;  %v5835_v25 = vld [vmem:[#allocation14 + $0x10e8] sm:$0xff] }
 0x6bb   : > { %9923 = vmatpush2.bf16.msra.mxu0 %v14820_v45  ;;  %9964 = vmatpush2.bf16.msra.mxu1 %v15204_v7  ;;  %v5273_v45 = vrot.slane %v5248_v43, %v489_v22  ;;  %v5281_v7 = vrot.slane %v5248_v43, %v497_v23  ;;  %v5439_v23 = vld [vmem:[#allocation14 + $0x488] sm:$0xff] }
 0x6bc   : > { %9924 = vmatprep.subr.bf16.mxu0 %v14797_v29  ;;  %9965 = vmatprep.subr.bf16.mxu1 %v15181_v15 }
 0x6bf   : > { %9925 = vmatpush2.bf16.msra.mxu0 %v14796_v13  ;;  %9966 = vmatpush2.bf16.msra.mxu1 %v15180_v14 }
 0x6c0   : > { %9926 = vmatprep.subr.bf16.mxu0 %v14773_v42  ;;  %9967 = vmatprep.subr.bf16.mxu1 %v15157_v28  ;;  %v15039_v28 = vcombine.high %v5823_v18, %v5835_v25 }
 0x6c3   : > { %9927 = vmatpush2.bf16.msra.mxu0 %v14772_v40  ;;  %9968 = vmatpush2.bf16.msra.mxu1 %v15156_v27  ;;  %v5415_v40 = vld [vmem:[#allocation14 + $0x3c8] sm:$0xff]  ;;  %v14655_v27 = vcombine.high %v5439_v23, %v5451_v17 }
 0x712   : > { %v5114_v31 = vpop.f32.mrf.mxu0  ;;  %v5155_v32 = vpop.f32.mrf.mxu1 }
 0x713   : > { %v5156_v39 = vadd.f32 %v5155_v32, %v5114_v31  ;;  %v5534_v31 = vld [vmem:[#allocation14 + $0x780] sm:$0xff] }
 0x714   : > { %v5116_v33 = vpop.f32.mrf.mxu0  ;;  %v5157_v48 = vpop.f32.mrf.mxu1  ;;  %v5546_v32 = vld [vmem:[#allocation14 + $0x7e0] sm:$0xff] }
 0x715   : > { %v5158_v38 = vadd.f32 %v5157_v48, %v5116_v33  ;;  %v18156_v0 = vadd.f32 %v17294_v60, %v5156_v39  ;;  %v5918_v33 = vld [vmem:[#allocation14 + $0x1380] sm:$0xff]  ;;  %v14749_v48 = vcombine.high %v5534_v31, %v5546_v32 }
 0x716   : > { %v5118_v34 = vpop.f32.mrf.mxu0  ;;  %v5159_v35 = vpop.f32.mrf.mxu1  ;;  %v5522_v39 = vld [vmem:[#allocation14 + $0x720] sm:$0xff] }
 0x717   : > { %v18153_v57 = vadd.f32 %v17293_v41, %v5158_v38  ;;  %v5249_v30 = vmul.f32 %v18156_v0, %v18156_v0  ;;  %v5930_v34 = vld [vmem:[#allocation14 + $0x13e0] sm:$0xff]  ;;  %v14748_v35 = vcombine.low %v5534_v31, %v5546_v32  ;;  %9928 = vmatprep.subr.bf16.mxu0 %v14749_v48  ;;  %v5427_v31 = vld [vmem:[#allocation14 + $0x428] sm:$0xff]  ;;  %v14654_v48 = vcombine.low %v5439_v23, %v5451_v17 }
 0x718   : > { %v5119_v36 = vpop.f32.mrf.mxu0  ;;  %v5160_v37 = vpop.f32.mrf.mxu1  ;;  %v5510_v38 = vld [vmem:[#allocation14 + $0x6c0] sm:$0xff]  ;;  %v5799_v32 = vld [vmem:[#allocation14 + $0xfc8] sm:$0xff] }
 0x719   : > { %v5250_v50 = vmul.f32 %v18153_v57, %v18153_v57  ;;  %v15132_v36 = vcombine.low %v5918_v33, %v5930_v34  ;;  %v15133_v37 = vcombine.high %v5918_v33, %v5930_v34  ;;  %9929 = vmatpush2.bf16.msra.mxu0 %v14748_v35  ;;  %v5894_v41 = vld [vmem:[#allocation14 + $0x12c0] sm:$0xff]  ;;  %v14725_v60 = vcombine.high %v5510_v38, %v5522_v39  ;;  %v5811_v33 = vld [vmem:[#allocation14 + $0x1028] sm:$0xff] }
 0x71a   : > { %v15038_v34 = vcombine.low %v5823_v18, %v5835_v25  ;;  %v14631_v35 = vcombine.high %v5415_v40, %v5427_v31  ;;  %v6039_v23 = vld [vmem:[#allocation14 + $0x1748] sm:$0xff] }
 0x71b   : > { %v5253_v20 = vadd.f32 %v5250_v50, %v5249_v30  ;;  %9969 = vmatprep.subr.bf16.mxu1 %v15133_v37  ;;  %9930 = vmatprep.subr.bf16.mxu0 %v14725_v60  ;;  %v5870_v30 = vld [vmem:[#allocation14 + $0x1200] sm:$0xff]  ;;  %v5391_v37 = vld [vmem:[#allocation14 + $0x308] sm:$0xff]  ;;  %v14630_v60 = vcombine.low %v5415_v40, %v5427_v31 }
 0x71c   : > { %9970 = vmatpush2.bf16.msra.mxu1 %v15132_v36  ;;  %v15015_v36 = vcombine.high %v5799_v32, %v5811_v33  ;;  %v6051_v17 = vld [vmem:[#allocation14 + $0x17a8] sm:$0xff] }
 0x71d   : > { %v5643_v31 = vld [vmem:[#allocation14 + $0xae8] sm:$0xff] }
 0x752   : > { %v5196_v2 = vpop.f32.mrf.mxu0  ;;  %v5237_v49 = vpop.f32.mrf.mxu1 }
 0x753   : > { %v5238_v3 = vadd.f32 %v5237_v49, %v5196_v2  ;;  %v5906_v2 = vld [vmem:[#allocation14 + $0x1320] sm:$0xff]  ;;  %v14724_v49 = vcombine.low %v5510_v38, %v5522_v39  ;;  %v5403_v38 = vld [vmem:[#allocation14 + $0x368] sm:$0xff] }
 0x754   : > { %v5198_v61 = vpop.f32.mrf.mxu0  ;;  %v5239_v11 = vpop.f32.mrf.mxu1  ;;  %v15108_v50 = vcombine.low %v5894_v41, %v5906_v2  ;;  %v5775_v39 = vld [vmem:[#allocation14 + $0xf08] sm:$0xff] }
 0x755   : > { %v18163_v53 = vadd.f32 %v17295_v52, %v5238_v3  ;;  %v5240_v54 = vadd.f32 %v5239_v11, %v5198_v61  ;;  %v15109_v3 = vcombine.high %v5894_v41, %v5906_v2  ;;  %9931 = vmatpush2.bf16.msra.mxu0 %v14724_v49  ;;  %v5486_v61 = vld [vmem:[#allocation14 + $0x600] sm:$0xff]  ;;  %v5787_v41 = vld [vmem:[#allocation14 + $0xf68] sm:$0xff]  ;;  %v15014_v2 = vcombine.low %v5799_v32, %v5811_v33 }
 0x756   : > { %v5200_v46 = vpop.f32.mrf.mxu0  ;;  %v5241_v55 = vpop.f32.mrf.mxu1  ;;  %v5498_v11 = vld [vmem:[#allocation14 + $0x660] sm:$0xff]  ;;  %v14607_v49 = vcombine.high %v5391_v37, %v5403_v38  ;;  %v6015_v32 = vld [vmem:[#allocation14 + $0x1688] sm:$0xff] }
 0x757   : > { %v18166_v58 = vadd.f32 %v17296_v56, %v5240_v54  ;;  %v5251_v62 = vmul.f32 %v18163_v53, %v18163_v53  ;;  %9971 = vmatprep.subr.bf16.mxu1 %v15109_v3  ;;  %v14701_v52 = vcombine.high %v5486_v61, %v5498_v11  ;;  %v5882_v54 = vld [vmem:[#allocation14 + $0x1260] sm:$0xff]  ;;  %v14700_v46 = vcombine.low %v5486_v61, %v5498_v11  ;;  %v5367_v3 = vld [vmem:[#allocation14 + $0x248] sm:$0xff] }
 0x758   : > { %v5201_v1 = vpop.f32.mrf.mxu0  ;;  %v5242_v63 = vpop.f32.mrf.mxu1  ;;  %9972 = vmatpush2.bf16.msra.mxu1 %v15108_v50  ;;  %v15084_v55 = vcombine.low %v5870_v30, %v5882_v54  ;;  %v15085_v56 = vcombine.high %v5870_v30, %v5882_v54  ;;  %v14991_v50 = vcombine.high %v5775_v39, %v5787_v41  ;;  %v5379_v61 = vld [vmem:[#allocation14 + $0x2a8] sm:$0xff]  ;;  %v14990_v54 = vcombine.low %v5775_v39, %v5787_v41 }
 0x759   : > { %v5252_v59 = vmul.f32 %v18166_v58, %v18166_v58  ;;  %v5254_v4 = vadd.f32 %v5253_v20, %v5251_v62  ;;  %9932 = vmatprep.subr.bf16.mxu0 %v14701_v52  ;;  %v5463_v62 = vld [vmem:[#allocation14 + $0x548] sm:$0xff]  ;;  %v14606_v52 = vcombine.low %v5391_v37, %v5403_v38 }
 0x75a   : > { %9973 = vmatprep.subr.bf16.mxu1 %v15085_v56  ;;  %9933 = vmatpush2.bf16.msra.mxu0 %v14700_v46  ;;  %v5475_v20 = vld [vmem:[#allocation14 + $0x5a8] sm:$0xff]  ;;  %v14583_v46 = vcombine.high %v5367_v3, %v5379_v61 }
 0x75b   : > { %v5255_v51 = vadd.f32 %v5254_v4, %v5252_v59  ;;  %v5847_v1 = vld [vmem:[#allocation14 + $0x1148] sm:$0xff]  ;;  %v14679_v63 = vcombine.high %v5463_v62, %v5475_v20  ;;  %v14678_v4 = vcombine.low %v5463_v62, %v5475_v20 }
 0x75c   : > { %9974 = vmatpush2.bf16.msra.mxu1 %v15084_v55  ;;  %v5859_v59 = vld [vmem:[#allocation14 + $0x11a8] sm:$0xff] }
 0x75d   : > { %5256 = vadd.xlane.f32.xlu1 %v5255_v51  ;;  %v15062_v51 = vcombine.low %v5847_v1, %v5859_v59  ;;  %v15063_v6 = vcombine.high %v5847_v1, %v5859_v59  ;;  %9984 = vmatprep.subr.bf16.mxu0 %v14679_v63  ;;  %v5751_v11 = vld [vmem:[#allocation14 + $0xe48] sm:$0xff]  ;;  %v14582_v63 = vcombine.low %v5367_v3, %v5379_v61 }
 0x75e   : > { %v5763_v30 = vld [vmem:[#allocation14 + $0xea8] sm:$0xff] }
 0x75f   : > { %10025 = vmatprep.subr.bf16.mxu1 %v15063_v6  ;;  %v14967_v55 = vcombine.high %v5751_v11, %v5763_v30  ;;  %v5343_v56 = vld [vmem:[#allocation14 + $0x188] sm:$0xff]  ;;  %v14966_v59 = vcombine.low %v5751_v11, %v5763_v30 }
 0x760   : > { %v5355_v62 = vld [vmem:[#allocation14 + $0x1e8] sm:$0xff] }
 0x761   : > { %v5727_v20 = vld [vmem:[#allocation14 + $0xd88] sm:$0xff]  ;;  %v14558_v43 = vcombine.low %v5343_v56, %v5355_v62 }
 0x762   : > { %v5739_v1 = vld [vmem:[#allocation14 + $0xde8] sm:$0xff] }
 0x763   : > { %v5319_v6 = vld [vmem:[#allocation14 + $0xc8] sm:$0xff] }
 0x764   : > { %v6027_v33 = vld [vmem:[#allocation14 + $0x16e8] sm:$0xff] }
 0x765   : > { %v5607_v37 = vld [vmem:[#allocation14 + $0x9c8] sm:$0xff] }
 0x766   : > { %v5619_v38 = vld [vmem:[#allocation14 + $0xa28] sm:$0xff] }
 0x767   : > { %v5991_v39 = vld [vmem:[#allocation14 + $0x15c8] sm:$0xff] }
 0x768   : > { %v6003_v41 = vld [vmem:[#allocation14 + $0x1628] sm:$0xff] }
 0x769   : > { %v5583_v3 = vld [vmem:[#allocation14 + $0x908] sm:$0xff] }
 0x76a   : > { %v5595_v61 = vld [vmem:[#allocation14 + $0x968] sm:$0xff] }
 0x76b   : > { %v5967_v11 = vld [vmem:[#allocation14 + $0x1508] sm:$0xff] }
 0x76c   : > { %v5979_v30 = vld [vmem:[#allocation14 + $0x1568] sm:$0xff] }
 0x7e6   : > { %v5257_v44 = vpop.xlane.xlu1 %5256 }
 0x7e7   : > { %v5258_v5 = vmul.f32 0.001953125, %v5257_v44  ;;  %v5331_v44 = vld [vmem:[#allocation14 + $0x128] sm:$0xff] }
 0x7e9   : > { %v5259_v19 = vadd.f32 1e-05, %v5258_v5  ;;  %v5703_v5 = vld [vmem:[#allocation14 + $0xcc8] sm:$0xff] }
 0x7eb   : > { %17243 = vrsqrt.f32 %v5259_v19  ;;  %v5715_v19 = vld [vmem:[#allocation14 + $0xd28] sm:$0xff] }
 0x7f8   : > { %v17244_v9 = vpop.eup %17243 }
 0x7f9   : > { %v5261_v10 = vmul.f32 %v17244_v9, %v18156_v0  ;;  %v5262_v29 = vmul.f32 %v17244_v9, %v18153_v57  ;;  %v5263_v12 = vmul.f32 %v17244_v9, %v18163_v53  ;;  %v5264_v13 = vmul.f32 %v17244_v9, %v18166_v58  ;;  %v5307_v9 = vld [vmem:[#allocation14 + $0x68] sm:$0xff] }
 0x7fb   : > { %v5286_v14 = vmul.f32 %v5269_v47, %v5261_v10  ;;  %v5287_v22 = vmul.f32 %v5273_v45, %v5262_v29  ;;  %v5288_v15 = vmul.f32 %v5277_v8, %v5263_v12  ;;  %v5289_v16 = vmul.f32 %v5281_v7, %v5264_v13  ;;  %v5295_v8 = vld [vmem:[#allocation14 + $0x8] sm:$0xff] }
 0x7fc   : > { %v14942_v45 = vcombine.low %v5727_v20, %v5739_v1  ;;  %v14535_v7 = vcombine.high %v5319_v6, %v5331_v44  ;;  %v14919_v47 = vcombine.high %v5703_v5, %v5715_v19  ;;  %v5679_v10 = vld [vmem:[#allocation14 + $0xc08] sm:$0xff]  ;;  %v14534_v12 = vcombine.low %v5319_v6, %v5331_v44 }
 0x7fd   : > { %v18184_v42 = vpack.c.bf16 %v5286_v14, %v5286_v14  ;;  %v18186_v21 = vpack.c.bf16 %v5287_v22, %v5287_v22  ;;  %v18188_v26 = vpack.c.bf16 %v5288_v15, %v5288_v15  ;;  %v18190_v24 = vpack.c.bf16 %v5289_v16, %v5289_v16  ;;  %v5691_v29 = vld [vmem:[#allocation14 + $0xc68] sm:$0xff] }
 0x7fe   : > { %v14918_v13 = vcombine.low %v5703_v5, %v5715_v19  ;;  %v14511_v14 = vcombine.high %v5295_v8, %v5307_v9  ;;  %v14895_v22 = vcombine.high %v5679_v10, %v5691_v29  ;;  %v5655_v15 = vld [vmem:[#allocation14 + $0xb48] sm:$0xff]  ;;  %v14510_v18 = vcombine.low %v5295_v8, %v5307_v9 }
 0x7ff   : > { %9934 = vmatprep.mubr.bf16.mxu0 %v18186_v21  ;;  %9975 = vmatprep.mubr.bf16.mxu1 %v18190_v24  ;;  %v5667_v16 = vld [vmem:[#allocation14 + $0xba8] sm:$0xff]  ;;  %v14894_v25 = vcombine.low %v5679_v10, %v5691_v29 }
 0x800   : > { %9935 = vmatmul.mubr.bf16.vlgmr.msra.gmra.mxu0 %v18184_v42  ;;  %9976 = vmatmul.mubr.bf16.vlgmr.msra.gmra.mxu1 %v18188_v26  ;;  %v14871_v40 = vcombine.high %v5655_v15, %v5667_v16  ;;  %v5535_v6 = vld [vmem:[#allocation14 + $0x788] sm:$0xff] }
 0x801   : > { %9985 = vmatpush1.bf16.msra.mxu0 %v14678_v4  ;;  %10026 = vmatpush1.bf16.msra.mxu1 %v15062_v51  ;;  %v14559_v4 = vcombine.high %v5343_v56, %v5355_v62  ;;  %v14943_v51 = vcombine.high %v5727_v20, %v5739_v1  ;;  %v5559_v56 = vld [vmem:[#allocation14 + $0x848] sm:$0xff] }
 0x802   : > { %10016 = vmatprep.mubr.bf16.mxu0 %v18186_v21  ;;  %10057 = vmatprep.mubr.bf16.mxu1 %v18190_v24  ;;  %v5571_v62 = vld [vmem:[#allocation14 + $0x8a8] sm:$0xff] }
 0x803   : > { %9986 = vmatprep.subr.bf16.mxu0 %v14655_v27  ;;  %10027 = vmatprep.subr.bf16.mxu1 %v15039_v28  ;;  %v15255_v27 = vcombine.high %v6039_v23, %v6051_v17  ;;  %v5631_v28 = vld [vmem:[#allocation14 + $0xa88] sm:$0xff] }
 0x804   : > { %v5943_v20 = vld [vmem:[#allocation14 + $0x1448] sm:$0xff] }
 0x805   : > { %9987 = vmatpush1.bf16.msra.mxu0 %v14654_v48  ;;  %10028 = vmatpush1.bf16.msra.mxu1 %v15038_v34  ;;  %v14870_v48 = vcombine.low %v5655_v15, %v5667_v16  ;;  %v15254_v34 = vcombine.low %v6039_v23, %v6051_v17  ;;  %v5955_v1 = vld [vmem:[#allocation14 + $0x14a8] sm:$0xff] }
 0x806   : > { %9988 = vmatprep.subr.bf16.mxu0 %v14631_v35  ;;  %10029 = vmatprep.subr.bf16.mxu1 %v15015_v36  ;;  %v14847_v35 = vcombine.high %v5631_v28, %v5643_v31  ;;  %v15231_v36 = vcombine.high %v6015_v32, %v6027_v33  ;;  %v5547_v44 = vld [vmem:[#allocation14 + $0x7e8] sm:$0xff] }
 0x807   : > { %v5919_v5 = vld [vmem:[#allocation14 + $0x1388] sm:$0xff] }
 0x808   : > { %v5931_v19 = vld [vmem:[#allocation14 + $0x13e8] sm:$0xff] }
 0x809   : > { %9989 = vmatpush1.bf16.msra.mxu0 %v14630_v60  ;;  %10030 = vmatpush1.bf16.msra.mxu1 %v15014_v2  ;;  %v14846_v60 = vcombine.low %v5631_v28, %v5643_v31  ;;  %v15230_v2 = vcombine.low %v6015_v32, %v6027_v33  ;;  %v5511_v8 = vld [vmem:[#allocation14 + $0x6c8] sm:$0xff]  ;;  %v5464_v28 = vld [vmem:[#allocation14 + $0x550] sm:$0xff] }
 0x80a   : > { %9990 = vmatprep.subr.bf16.mxu0 %v14607_v49  ;;  %10031 = vmatprep.subr.bf16.mxu1 %v14991_v50  ;;  %v14823_v49 = vcombine.high %v5607_v37, %v5619_v38  ;;  %v15207_v50 = vcombine.high %v5991_v39, %v6003_v41  ;;  %v5523_v9 = vld [vmem:[#allocation14 + $0x728] sm:$0xff]  ;;  %v5476_v31 = vld [vmem:[#allocation14 + $0x5b0] sm:$0xff] }
 0x80b   : > { %v5895_v10 = vld [vmem:[#allocation14 + $0x12c8] sm:$0xff]  ;;  %v5848_v32 = vld [vmem:[#allocation14 + $0x1150] sm:$0xff] }
 0x80c   : > { %v5907_v29 = vld [vmem:[#allocation14 + $0x1328] sm:$0xff]  ;;  %v5860_v33 = vld [vmem:[#allocation14 + $0x11b0] sm:$0xff] }
 0x80d   : > { %9991 = vmatpush1.bf16.msra.mxu0 %v14606_v52  ;;  %10032 = vmatpush1.bf16.msra.mxu1 %v14990_v54  ;;  %v14822_v52 = vcombine.low %v5607_v37, %v5619_v38  ;;  %v15206_v54 = vcombine.low %v5991_v39, %v6003_v41  ;;  %v5487_v15 = vld [vmem:[#allocation14 + $0x608] sm:$0xff]  ;;  %v5440_v37 = vld [vmem:[#allocation14 + $0x490] sm:$0xff] }
 0x80e   : > { %9992 = vmatprep.subr.bf16.mxu0 %v14583_v46  ;;  %10033 = vmatprep.subr.bf16.mxu1 %v14967_v55  ;;  %v14799_v46 = vcombine.high %v5583_v3, %v5595_v61  ;;  %v15183_v55 = vcombine.high %v5967_v11, %v5979_v30  ;;  %v5499_v16 = vld [vmem:[#allocation14 + $0x668] sm:$0xff]  ;;  %v5452_v38 = vld [vmem:[#allocation14 + $0x4f0] sm:$0xff] }
 0x80f   : > { %v5871_v23 = vld [vmem:[#allocation14 + $0x1208] sm:$0xff]  ;;  %v5824_v39 = vld [vmem:[#allocation14 + $0x1090] sm:$0xff] }
 0x810   : > { %v5883_v17 = vld [vmem:[#allocation14 + $0x1268] sm:$0xff]  ;;  %v5836_v41 = vld [vmem:[#allocation14 + $0x10f0] sm:$0xff] }
 0x811   : > { %9993 = vmatpush1.bf16.msra.mxu0 %v14582_v63  ;;  %10034 = vmatpush1.bf16.msra.mxu1 %v14966_v59  ;;  %v14798_v63 = vcombine.low %v5583_v3, %v5595_v61  ;;  %v15182_v59 = vcombine.low %v5967_v11, %v5979_v30  ;;  %v5416_v3 = vld [vmem:[#allocation14 + $0x3d0] sm:$0xff] }
 0x812   : > { %9994 = vmatprep.subr.bf16.mxu0 %v14559_v4  ;;  %10035 = vmatprep.subr.bf16.mxu1 %v14943_v51  ;;  %v14775_v4 = vcombine.high %v5559_v56, %v5571_v62  ;;  %v15159_v51 = vcombine.high %v5943_v20, %v5955_v1  ;;  %v5428_v61 = vld [vmem:[#allocation14 + $0x430] sm:$0xff] }
 0x813   : > { %v5800_v11 = vld [vmem:[#allocation14 + $0xfd0] sm:$0xff] }
 0x814   : > { %v5812_v30 = vld [vmem:[#allocation14 + $0x1030] sm:$0xff] }
 0x815   : > { %9995 = vmatpush1.bf16.msra.mxu0 %v14558_v43  ;;  %10036 = vmatpush1.bf16.msra.mxu1 %v14942_v45  ;;  %v14774_v43 = vcombine.low %v5559_v56, %v5571_v62  ;;  %v15158_v45 = vcombine.low %v5943_v20, %v5955_v1  ;;  %v5392_v56 = vld [vmem:[#allocation14 + $0x310] sm:$0xff] }
 0x816   : > { %9996 = vmatprep.subr.bf16.mxu0 %v14535_v7  ;;  %10037 = vmatprep.subr.bf16.mxu1 %v14919_v47  ;;  %v14751_v7 = vcombine.high %v5535_v6, %v5547_v44  ;;  %v15135_v47 = vcombine.high %v5919_v5, %v5931_v19  ;;  %v5404_v62 = vld [vmem:[#allocation14 + $0x370] sm:$0xff] }
 0x817   : > { %v5776_v20 = vld [vmem:[#allocation14 + $0xf10] sm:$0xff] }
 0x818   : > { %v5788_v1 = vld [vmem:[#allocation14 + $0xf70] sm:$0xff] }
 0x819   : > { %9997 = vmatpush1.bf16.msra.mxu0 %v14534_v12  ;;  %10038 = vmatpush1.bf16.msra.mxu1 %v14918_v13  ;;  %v14750_v12 = vcombine.low %v5535_v6, %v5547_v44  ;;  %v15134_v13 = vcombine.low %v5919_v5, %v5931_v19  ;;  %v5368_v6 = vld [vmem:[#allocation14 + $0x250] sm:$0xff] }
 0x81a   : > { %9998 = vmatprep.subr.bf16.mxu0 %v14511_v14  ;;  %10039 = vmatprep.subr.bf16.mxu1 %v14895_v22  ;;  %v14727_v14 = vcombine.high %v5511_v8, %v5523_v9  ;;  %v15111_v22 = vcombine.high %v5895_v10, %v5907_v29  ;;  %v5380_v44 = vld [vmem:[#allocation14 + $0x2b0] sm:$0xff] }
 0x81b   : > { %v5752_v5 = vld [vmem:[#allocation14 + $0xe50] sm:$0xff] }
 0x81c   : > { %v5764_v19 = vld [vmem:[#allocation14 + $0xeb0] sm:$0xff] }
 0x81d   : > { %9999 = vmatpush1.bf16.msra.mxu0 %v14510_v18  ;;  %10040 = vmatpush1.bf16.msra.mxu1 %v14894_v25  ;;  %v14726_v18 = vcombine.low %v5511_v8, %v5523_v9  ;;  %v15110_v25 = vcombine.low %v5895_v10, %v5907_v29  ;;  %v5344_v8 = vld [vmem:[#allocation14 + $0x190] sm:$0xff] }
 0x81e   : > { %10000 = vmatprep.subr.bf16.mxu0 %v14871_v40  ;;  %10041 = vmatprep.subr.bf16.mxu1 %v15255_v27  ;;  %v14703_v40 = vcombine.high %v5487_v15, %v5499_v16  ;;  %v15087_v27 = vcombine.high %v5871_v23, %v5883_v17  ;;  %v5356_v9 = vld [vmem:[#allocation14 + $0x1f0] sm:$0xff] }
 0x81f   : > { %v5728_v10 = vld [vmem:[#allocation14 + $0xd90] sm:$0xff] }
 0x820   : > { %v5740_v29 = vld [vmem:[#allocation14 + $0xdf0] sm:$0xff] }
 0x821   : > { %10001 = vmatpush2.bf16.msra.mxu0 %v14870_v48  ;;  %10042 = vmatpush2.bf16.msra.mxu1 %v15254_v34  ;;  %v14702_v48 = vcombine.low %v5487_v15, %v5499_v16  ;;  %v15086_v34 = vcombine.low %v5871_v23, %v5883_v17  ;;  %v5320_v15 = vld [vmem:[#allocation14 + $0xd0] sm:$0xff] }
 0x822   : > { %10002 = vmatprep.subr.bf16.mxu0 %v14847_v35  ;;  %10043 = vmatprep.subr.bf16.mxu1 %v15231_v36  ;;  %v14681_v35 = vcombine.high %v5464_v28, %v5476_v31  ;;  %v15065_v36 = vcombine.high %v5848_v32, %v5860_v33  ;;  %v5332_v16 = vld [vmem:[#allocation14 + $0x130] sm:$0xff] }
 0x823   : > { %v5704_v23 = vld [vmem:[#allocation14 + $0xcd0] sm:$0xff] }
 0x824   : > { %v5716_v17 = vld [vmem:[#allocation14 + $0xd30] sm:$0xff] }
 0x825   : > { %10003 = vmatpush2.bf16.msra.mxu0 %v14846_v60  ;;  %10044 = vmatpush2.bf16.msra.mxu1 %v15230_v2  ;;  %v14680_v60 = vcombine.low %v5464_v28, %v5476_v31  ;;  %v15064_v2 = vcombine.low %v5848_v32, %v5860_v33  ;;  %v5296_v28 = vld [vmem:[#allocation14 + $0x10] sm:$0xff] }
 0x826   : > { %10004 = vmatprep.subr.bf16.mxu0 %v14823_v49  ;;  %10045 = vmatprep.subr.bf16.mxu1 %v15207_v50  ;;  %v14657_v49 = vcombine.high %v5440_v37, %v5452_v38  ;;  %v15041_v50 = vcombine.high %v5824_v39, %v5836_v41  ;;  %v5308_v31 = vld [vmem:[#allocation14 + $0x70] sm:$0xff] }
 0x827   : > { %v5680_v32 = vld [vmem:[#allocation14 + $0xc10] sm:$0xff] }
 0x828   : > { %v5692_v33 = vld [vmem:[#allocation14 + $0xc70] sm:$0xff] }
 0x829   : > { %10005 = vmatpush2.bf16.msra.mxu0 %v14822_v52  ;;  %10046 = vmatpush2.bf16.msra.mxu1 %v15206_v54  ;;  %v14656_v52 = vcombine.low %v5440_v37, %v5452_v38  ;;  %v15040_v54 = vcombine.low %v5824_v39, %v5836_v41  ;;  %v5656_v37 = vld [vmem:[#allocation14 + $0xb50] sm:$0xff] }
 0x82a   : > { %10006 = vmatprep.subr.bf16.mxu0 %v14799_v46  ;;  %10047 = vmatprep.subr.bf16.mxu1 %v15183_v55  ;;  %v14633_v46 = vcombine.high %v5416_v3, %v5428_v61  ;;  %v15017_v55 = vcombine.high %v5800_v11, %v5812_v30  ;;  %v5668_v38 = vld [vmem:[#allocation14 + $0xbb0] sm:$0xff] }
 0x82b   : > { %v6040_v39 = vld [vmem:[#allocation14 + $0x1750] sm:$0xff] }
 0x82c   : > { %v6052_v41 = vld [vmem:[#allocation14 + $0x17b0] sm:$0xff] }
 0x82d   : > { %10007 = vmatpush2.bf16.msra.mxu0 %v14798_v63  ;;  %10048 = vmatpush2.bf16.msra.mxu1 %v15182_v59  ;;  %v14632_v63 = vcombine.low %v5416_v3, %v5428_v61  ;;  %v15016_v59 = vcombine.low %v5800_v11, %v5812_v30  ;;  %v5632_v3 = vld [vmem:[#allocation14 + $0xa90] sm:$0xff] }
 0x82e   : > { %10008 = vmatprep.subr.bf16.mxu0 %v14775_v4  ;;  %10049 = vmatprep.subr.bf16.mxu1 %v15159_v51  ;;  %v14609_v4 = vcombine.high %v5392_v56, %v5404_v62  ;;  %v14993_v51 = vcombine.high %v5776_v20, %v5788_v1  ;;  %v5644_v61 = vld [vmem:[#allocation14 + $0xaf0] sm:$0xff] }
 0x82f   : > { %v6016_v11 = vld [vmem:[#allocation14 + $0x1690] sm:$0xff] }
 0x830   : > { %v6028_v30 = vld [vmem:[#allocation14 + $0x16f0] sm:$0xff] }
 0x831   : > { %10009 = vmatpush2.bf16.msra.mxu0 %v14774_v43  ;;  %10050 = vmatpush2.bf16.msra.mxu1 %v15158_v45  ;;  %v14608_v43 = vcombine.low %v5392_v56, %v5404_v62  ;;  %v14992_v45 = vcombine.low %v5776_v20, %v5788_v1  ;;  %v5608_v56 = vld [vmem:[#allocation14 + $0x9d0] sm:$0xff] }
 0x832   : > { %10010 = vmatprep.subr.bf16.mxu0 %v14751_v7  ;;  %10051 = vmatprep.subr.bf16.mxu1 %v15135_v47  ;;  %v14585_v7 = vcombine.high %v5368_v6, %v5380_v44  ;;  %v14969_v47 = vcombine.high %v5752_v5, %v5764_v19  ;;  %v5620_v62 = vld [vmem:[#allocation14 + $0xa30] sm:$0xff] }
 0x833   : > { %v5992_v20 = vld [vmem:[#allocation14 + $0x15d0] sm:$0xff] }
 0x834   : > { %v6004_v1 = vld [vmem:[#allocation14 + $0x1630] sm:$0xff] }
 0x835   : > { %10011 = vmatpush2.bf16.msra.mxu0 %v14750_v12  ;;  %10052 = vmatpush2.bf16.msra.mxu1 %v15134_v13  ;;  %v14584_v12 = vcombine.low %v5368_v6, %v5380_v44  ;;  %v14968_v13 = vcombine.low %v5752_v5, %v5764_v19  ;;  %v5584_v6 = vld [vmem:[#allocation14 + $0x910] sm:$0xff] }
 0x836   : > { %10012 = vmatprep.subr.bf16.mxu0 %v14727_v14  ;;  %10053 = vmatprep.subr.bf16.mxu1 %v15111_v22  ;;  %v14561_v14 = vcombine.high %v5344_v8, %v5356_v9  ;;  %v14945_v22 = vcombine.high %v5728_v10, %v5740_v29  ;;  %v5596_v44 = vld [vmem:[#allocation14 + $0x970] sm:$0xff] }
 0x837   : > { %v5968_v5 = vld [vmem:[#allocation14 + $0x1510] sm:$0xff] }
 0x838   : > { %v5980_v19 = vld [vmem:[#allocation14 + $0x1570] sm:$0xff] }
 0x839   : > { %10013 = vmatpush2.bf16.msra.mxu0 %v14726_v18  ;;  %10054 = vmatpush2.bf16.msra.mxu1 %v15110_v25  ;;  %v14560_v18 = vcombine.low %v5344_v8, %v5356_v9  ;;  %v14944_v25 = vcombine.low %v5728_v10, %v5740_v29  ;;  %v5560_v8 = vld [vmem:[#allocation14 + $0x850] sm:$0xff] }
 0x83a   : > { %10014 = vmatprep.subr.bf16.mxu0 %v14703_v40  ;;  %10055 = vmatprep.subr.bf16.mxu1 %v15087_v27  ;;  %v14537_v40 = vcombine.high %v5320_v15, %v5332_v16  ;;  %v14921_v27 = vcombine.high %v5704_v23, %v5716_v17  ;;  %v5572_v9 = vld [vmem:[#allocation14 + $0x8b0] sm:$0xff] }
 0x83b   : > { %v5944_v10 = vld [vmem:[#allocation14 + $0x1450] sm:$0xff] }
 0x83c   : > { %v5956_v29 = vld [vmem:[#allocation14 + $0x14b0] sm:$0xff] }
 0x83d   : > { %10015 = vmatpush2.bf16.msra.mxu0 %v14702_v48  ;;  %10056 = vmatpush2.bf16.msra.mxu1 %v15086_v34  ;;  %v14536_v48 = vcombine.low %v5320_v15, %v5332_v16  ;;  %v14920_v34 = vcombine.low %v5704_v23, %v5716_v17  ;;  %v5536_v15 = vld [vmem:[#allocation14 + $0x790] sm:$0xff] }
 0x83e   : > { %10066 = vmatprep.subr.bf16.mxu0 %v14681_v35  ;;  %10107 = vmatprep.subr.bf16.mxu1 %v15065_v36  ;;  %v14513_v35 = vcombine.high %v5296_v28, %v5308_v31  ;;  %v14897_v36 = vcombine.high %v5680_v32, %v5692_v33  ;;  %v5548_v16 = vld [vmem:[#allocation14 + $0x7f0] sm:$0xff] }
 0x83f   : > { %v5920_v23 = vld [vmem:[#allocation14 + $0x1390] sm:$0xff] }
 0x840   : > { %10017 = vmatmul.mubr.bf16.vlgmr.msra.gmra.mxu0 %v18184_v42  ;;  %10058 = vmatmul.mubr.bf16.vlgmr.msra.gmra.mxu1 %v18188_v26  ;;  %v5932_v17 = vld [vmem:[#allocation14 + $0x13f0] sm:$0xff] }
 0x841   : > { %10067 = vmatpush1.bf16.msra.mxu0 %v14680_v60  ;;  %10098 = vmatprep.mubr.bf16.mxu0 %v18186_v21  ;;  %v14512_v60 = vcombine.low %v5296_v28, %v5308_v31  ;;  %v5512_v28 = vld [vmem:[#allocation14 + $0x6d0] sm:$0xff] }
 0x842   : > { %10108 = vmatpush1.bf16.msra.mxu1 %v15064_v2  ;;  %10139 = vmatprep.mubr.bf16.mxu1 %v18190_v24  ;;  %v14896_v2 = vcombine.low %v5680_v32, %v5692_v33  ;;  %v5524_v31 = vld [vmem:[#allocation14 + $0x730] sm:$0xff] }
 0x843   : > { %10068 = vmatprep.subr.bf16.mxu0 %v14657_v49  ;;  %10109 = vmatprep.subr.bf16.mxu1 %v15041_v50  ;;  %v14873_v49 = vcombine.high %v5656_v37, %v5668_v38  ;;  %v15257_v50 = vcombine.high %v6040_v39, %v6052_v41  ;;  %v5896_v32 = vld [vmem:[#allocation14 + $0x12d0] sm:$0xff] }
 0x844   : > { %v5908_v33 = vld [vmem:[#allocation14 + $0x1330] sm:$0xff] }
 0x845   : > { %10069 = vmatpush1.bf16.msra.mxu0 %v14656_v52  ;;  %v14872_v52 = vcombine.low %v5656_v37, %v5668_v38  ;;  %v5488_v37 = vld [vmem:[#allocation14 + $0x610] sm:$0xff] }
 0x846   : > { %10110 = vmatpush1.bf16.msra.mxu1 %v15040_v54  ;;  %10070 = vmatprep.subr.bf16.mxu0 %v14633_v46  ;;  %v15256_v54 = vcombine.low %v6040_v39, %v6052_v41  ;;  %v14849_v46 = vcombine.high %v5632_v3, %v5644_v61  ;;  %v5500_v38 = vld [vmem:[#allocation14 + $0x670] sm:$0xff] }
 0x847   : > { %10111 = vmatprep.subr.bf16.mxu1 %v15017_v55  ;;  %v15233_v55 = vcombine.high %v6016_v11, %v6028_v30  ;;  %v5872_v39 = vld [vmem:[#allocation14 + $0x1210] sm:$0xff] }
 0x848   : > { %v5884_v41 = vld [vmem:[#allocation14 + $0x1270] sm:$0xff] }
 0x849   : > { %10071 = vmatpush1.bf16.msra.mxu0 %v14632_v63  ;;  %v14848_v63 = vcombine.low %v5632_v3, %v5644_v61  ;;  %v5465_v3 = vld [vmem:[#allocation14 + $0x558] sm:$0xff] }
 0x84a   : > { %10112 = vmatpush1.bf16.msra.mxu1 %v15016_v59  ;;  %10072 = vmatprep.subr.bf16.mxu0 %v14609_v4  ;;  %v15232_v59 = vcombine.low %v6016_v11, %v6028_v30  ;;  %v14825_v4 = vcombine.high %v5608_v56, %v5620_v62  ;;  %v5477_v61 = vld [vmem:[#allocation14 + $0x5b8] sm:$0xff] }
 0x84b   : > { %10113 = vmatprep.subr.bf16.mxu1 %v14993_v51  ;;  %v15209_v51 = vcombine.high %v5992_v20, %v6004_v1  ;;  %v5849_v11 = vld [vmem:[#allocation14 + $0x1158] sm:$0xff] }
 0x84c   : > { %v5861_v30 = vld [vmem:[#allocation14 + $0x11b8] sm:$0xff] }
 0x84d   : > { %10073 = vmatpush1.bf16.msra.mxu0 %v14608_v43  ;;  %v14824_v43 = vcombine.low %v5608_v56, %v5620_v62  ;;  %v5441_v56 = vld [vmem:[#allocation14 + $0x498] sm:$0xff] }
 0x84e   : > { %10114 = vmatpush1.bf16.msra.mxu1 %v14992_v45  ;;  %10074 = vmatprep.subr.bf16.mxu0 %v14585_v7  ;;  %v15208_v45 = vcombine.low %v5992_v20, %v6004_v1  ;;  %v14801_v7 = vcombine.high %v5584_v6, %v5596_v44  ;;  %v5453_v62 = vld [vmem:[#allocation14 + $0x4f8] sm:$0xff]  ;;  %v14682_v20 = vcombine.low %v5465_v3, %v5477_v61 }
 0x84f   : > { %10115 = vmatprep.subr.bf16.mxu1 %v14969_v47  ;;  %v15185_v47 = vcombine.high %v5968_v5, %v5980_v19  ;;  %v5825_v1 = vld [vmem:[#allocation14 + $0x1098] sm:$0xff] }
 0x851   : > { %10075 = vmatpush1.bf16.msra.mxu0 %v14584_v12  ;;  %v14800_v12 = vcombine.low %v5584_v6, %v5596_v44  ;;  %v5429_v6 = vld [vmem:[#allocation14 + $0x438] sm:$0xff] }
 0x852   : > { %10116 = vmatpush1.bf16.msra.mxu1 %v14968_v13  ;;  %10076 = vmatprep.subr.bf16.mxu0 %v14561_v14  ;;  %v15184_v13 = vcombine.low %v5968_v5, %v5980_v19  ;;  %v14777_v14 = vcombine.high %v5560_v8, %v5572_v9  ;;  %v5801_v5 = vld [vmem:[#allocation14 + $0xfd8] sm:$0xff] }
 0x853   : > { %10117 = vmatprep.subr.bf16.mxu1 %v14945_v22  ;;  %v15161_v22 = vcombine.high %v5944_v10, %v5956_v29  ;;  %v5813_v19 = vld [vmem:[#allocation14 + $0x1038] sm:$0xff] }
 0x855   : > { %10077 = vmatpush1.bf16.msra.mxu0 %v14560_v18  ;;  %v14776_v18 = vcombine.low %v5560_v8, %v5572_v9  ;;  %v5393_v8 = vld [vmem:[#allocation14 + $0x318] sm:$0xff] }
 0x856   : > { %10118 = vmatpush1.bf16.msra.mxu1 %v14944_v25  ;;  %10078 = vmatprep.subr.bf16.mxu0 %v14537_v40  ;;  %v15160_v25 = vcombine.low %v5944_v10, %v5956_v29  ;;  %v14753_v40 = vcombine.high %v5536_v15, %v5548_v16  ;;  %v5405_v9 = vld [vmem:[#allocation14 + $0x378] sm:$0xff] }
 0x857   : > { %10119 = vmatprep.subr.bf16.mxu1 %v14921_v27  ;;  %v15137_v27 = vcombine.high %v5920_v23, %v5932_v17  ;;  %v5777_v10 = vld [vmem:[#allocation14 + $0xf18] sm:$0xff] }
 0x858   : > { %v5789_v29 = vld [vmem:[#allocation14 + $0xf78] sm:$0xff] }
 0x859   : > { %10079 = vmatpush1.bf16.msra.mxu0 %v14536_v48  ;;  %v14752_v48 = vcombine.low %v5536_v15, %v5548_v16  ;;  %v5369_v15 = vld [vmem:[#allocation14 + $0x258] sm:$0xff] }
 0x85a   : > { %10120 = vmatpush1.bf16.msra.mxu1 %v14920_v34  ;;  %10080 = vmatprep.subr.bf16.mxu0 %v14513_v35  ;;  %v15136_v34 = vcombine.low %v5920_v23, %v5932_v17  ;;  %v14729_v35 = vcombine.high %v5512_v28, %v5524_v31  ;;  %v5381_v16 = vld [vmem:[#allocation14 + $0x2b8] sm:$0xff] }
 0x85b   : > { %10121 = vmatprep.subr.bf16.mxu1 %v14897_v36  ;;  %v15113_v36 = vcombine.high %v5896_v32, %v5908_v33  ;;  %v5753_v23 = vld [vmem:[#allocation14 + $0xe58] sm:$0xff] }
 0x85c   : > { %v5765_v17 = vld [vmem:[#allocation14 + $0xeb8] sm:$0xff] }
 0x85d   : > { %10081 = vmatpush1.bf16.msra.mxu0 %v14512_v60  ;;  %v14728_v60 = vcombine.low %v5512_v28, %v5524_v31  ;;  %v5345_v28 = vld [vmem:[#allocation14 + $0x198] sm:$0xff] }
 0x85e   : > { %10122 = vmatpush1.bf16.msra.mxu1 %v14896_v2  ;;  %10082 = vmatprep.subr.bf16.mxu0 %v14873_v49  ;;  %v15112_v2 = vcombine.low %v5896_v32, %v5908_v33  ;;  %v14705_v49 = vcombine.high %v5488_v37, %v5500_v38  ;;  %v5357_v31 = vld [vmem:[#allocation14 + $0x1f8] sm:$0xff] }
 0x85f   : > { %10123 = vmatprep.subr.bf16.mxu1 %v15257_v50  ;;  %v15089_v50 = vcombine.high %v5872_v39, %v5884_v41  ;;  %v5729_v32 = vld [vmem:[#allocation14 + $0xd98] sm:$0xff] }
 0x860   : > { %v5741_v33 = vld [vmem:[#allocation14 + $0xdf8] sm:$0xff] }
 0x861   : > { %10083 = vmatpush2.bf16.msra.mxu0 %v14872_v52  ;;  %v14704_v52 = vcombine.low %v5488_v37, %v5500_v38  ;;  %v5321_v37 = vld [vmem:[#allocation14 + $0xd8] sm:$0xff] }
 0x862   : > { %10124 = vmatpush2.bf16.msra.mxu1 %v15256_v54  ;;  %10084 = vmatprep.subr.bf16.mxu0 %v14849_v46  ;;  %v15088_v54 = vcombine.low %v5872_v39, %v5884_v41  ;;  %v14683_v46 = vcombine.high %v5465_v3, %v5477_v61  ;;  %v5333_v38 = vld [vmem:[#allocation14 + $0x138] sm:$0xff] }
 0x863   : > { %10125 = vmatprep.subr.bf16.mxu1 %v15233_v55  ;;  %v15067_v55 = vcombine.high %v5849_v11, %v5861_v30  ;;  %v5705_v39 = vld [vmem:[#allocation14 + $0xcd8] sm:$0xff] }
 0x864   : > { %v5717_v41 = vld [vmem:[#allocation14 + $0xd38] sm:$0xff] }
 0x865   : > { %10085 = vmatpush2.bf16.msra.mxu0 %v14848_v63  ;;  %v5837_v63 = vld [vmem:[#allocation14 + $0x10f8] sm:$0xff] }
 0x866   : > { %10126 = vmatpush2.bf16.msra.mxu1 %v15232_v59  ;;  %10086 = vmatprep.subr.bf16.mxu0 %v14825_v4  ;;  %v15066_v59 = vcombine.low %v5849_v11, %v5861_v30  ;;  %v14659_v4 = vcombine.high %v5441_v56, %v5453_v62  ;;  %v15043_v44 = vcombine.high %v5825_v1, %v5837_v63  ;;  %v5297_v3 = vld [vmem:[#allocation14 + $0x18] sm:$0xff] }
 0x867   : > { %10127 = vmatprep.subr.bf16.mxu1 %v15209_v51  ;;  %v5417_v51 = vld [vmem:[#allocation14 + $0x3d8] sm:$0xff] }
 0x868   : > { %v5309_v61 = vld [vmem:[#allocation14 + $0x78] sm:$0xff] }
 0x869   : > { %10087 = vmatpush2.bf16.msra.mxu0 %v14824_v43  ;;  %v14658_v43 = vcombine.low %v5441_v56, %v5453_v62  ;;  %v5681_v11 = vld [vmem:[#allocation14 + $0xc18] sm:$0xff] }
 0x86a   : > { %10128 = vmatpush2.bf16.msra.mxu1 %v15208_v45  ;;  %10088 = vmatprep.subr.bf16.mxu0 %v14801_v7  ;;  %v15042_v45 = vcombine.low %v5825_v1, %v5837_v63  ;;  %v14635_v7 = vcombine.high %v5417_v51, %v5429_v6  ;;  %v5693_v30 = vld [vmem:[#allocation14 + $0xc78] sm:$0xff]  ;;  %v14514_v63 = vcombine.low %v5297_v3, %v5309_v61 }
 0x86b   : > { %10129 = vmatprep.subr.bf16.mxu1 %v15185_v47  ;;  %v15019_v47 = vcombine.high %v5801_v5, %v5813_v19  ;;  %v5657_v56 = vld [vmem:[#allocation14 + $0xb58] sm:$0xff] }
 0x86c   : > { %v5669_v62 = vld [vmem:[#allocation14 + $0xbb8] sm:$0xff] }
 0x86d   : > { %10089 = vmatpush2.bf16.msra.mxu0 %v14800_v12  ;;  %v14634_v12 = vcombine.low %v5417_v51, %v5429_v6  ;;  %v6053_v1 = vld [vmem:[#allocation14 + $0x17b8] sm:$0xff] }
 0x86e   : > { %10130 = vmatpush2.bf16.msra.mxu1 %v15184_v13  ;;  %10090 = vmatprep.subr.bf16.mxu0 %v14777_v14  ;;  %v15018_v13 = vcombine.low %v5801_v5, %v5813_v19  ;;  %v14611_v14 = vcombine.high %v5393_v8, %v5405_v9  ;;  %v5633_v6 = vld [vmem:[#allocation14 + $0xa98] sm:$0xff] }
 0x86f   : > { %10131 = vmatprep.subr.bf16.mxu1 %v15161_v22  ;;  %v14995_v22 = vcombine.high %v5777_v10, %v5789_v29  ;;  %v6017_v5 = vld [vmem:[#allocation14 + $0x1698] sm:$0xff] }
 0x870   : > { %v6029_v19 = vld [vmem:[#allocation14 + $0x16f8] sm:$0xff] }
 0x871   : > { %10091 = vmatpush2.bf16.msra.mxu0 %v14776_v18  ;;  %v14610_v18 = vcombine.low %v5393_v8, %v5405_v9  ;;  %v5609_v8 = vld [vmem:[#allocation14 + $0x9d8] sm:$0xff] }
 0x872   : > { %10132 = vmatpush2.bf16.msra.mxu1 %v15160_v25  ;;  %10092 = vmatprep.subr.bf16.mxu0 %v14753_v40  ;;  %v14994_v25 = vcombine.low %v5777_v10, %v5789_v29  ;;  %v14587_v40 = vcombine.high %v5369_v15, %v5381_v16  ;;  %v5621_v9 = vld [vmem:[#allocation14 + $0xa38] sm:$0xff] }
 0x873   : > { %10133 = vmatprep.subr.bf16.mxu1 %v15137_v27  ;;  %v14971_v27 = vcombine.high %v5753_v23, %v5765_v17  ;;  %v5993_v10 = vld [vmem:[#allocation14 + $0x15d8] sm:$0xff] }
 0x874   : > { %v6005_v29 = vld [vmem:[#allocation14 + $0x1638] sm:$0xff] }
 0x875   : > { %10093 = vmatpush2.bf16.msra.mxu0 %v14752_v48  ;;  %v14586_v48 = vcombine.low %v5369_v15, %v5381_v16  ;;  %v5585_v15 = vld [vmem:[#allocation14 + $0x918] sm:$0xff] }
 0x876   : > { %10134 = vmatpush2.bf16.msra.mxu1 %v15136_v34  ;;  %10094 = vmatprep.subr.bf16.mxu0 %v14729_v35  ;;  %v14970_v34 = vcombine.low %v5753_v23, %v5765_v17  ;;  %v14563_v35 = vcombine.high %v5345_v28, %v5357_v31  ;;  %v5597_v16 = vld [vmem:[#allocation14 + $0x978] sm:$0xff] }
 0x877   : > { %10135 = vmatprep.subr.bf16.mxu1 %v15113_v36  ;;  %v14947_v36 = vcombine.high %v5729_v32, %v5741_v33  ;;  %v5969_v23 = vld [vmem:[#allocation14 + $0x1518] sm:$0xff] }
 0x878   : > { %v5981_v17 = vld [vmem:[#allocation14 + $0x1578] sm:$0xff] }
 0x879   : > { %10095 = vmatpush2.bf16.msra.mxu0 %v14728_v60  ;;  %v14562_v60 = vcombine.low %v5345_v28, %v5357_v31  ;;  %v5561_v28 = vld [vmem:[#allocation14 + $0x858] sm:$0xff] }
 0x87a   : > { %10136 = vmatpush2.bf16.msra.mxu1 %v15112_v2  ;;  %10096 = vmatprep.subr.bf16.mxu0 %v14705_v49  ;;  %v14946_v2 = vcombine.low %v5729_v32, %v5741_v33  ;;  %v14539_v49 = vcombine.high %v5321_v37, %v5333_v38  ;;  %v5573_v31 = vld [vmem:[#allocation14 + $0x8b8] sm:$0xff] }
 0x87b   : > { %10137 = vmatprep.subr.bf16.mxu1 %v15089_v50  ;;  %v14923_v50 = vcombine.high %v5705_v39, %v5717_v41  ;;  %v5945_v32 = vld [vmem:[#allocation14 + $0x1458] sm:$0xff] }
 0x87c   : > { %v5957_v33 = vld [vmem:[#allocation14 + $0x14b8] sm:$0xff] }
 0x87d   : > { %10097 = vmatpush2.bf16.msra.mxu0 %v14704_v52  ;;  %v14538_v52 = vcombine.low %v5321_v37, %v5333_v38  ;;  %v5537_v37 = vld [vmem:[#allocation14 + $0x798] sm:$0xff] }
 0x87e   : > { %10138 = vmatpush2.bf16.msra.mxu1 %v15088_v54  ;;  %10148 = vmatprep.subr.bf16.mxu0 %v14683_v46  ;;  %v14922_v54 = vcombine.low %v5705_v39, %v5717_v41  ;;  %v14515_v46 = vcombine.high %v5297_v3, %v5309_v61  ;;  %v5549_v38 = vld [vmem:[#allocation14 + $0x7f8] sm:$0xff] }
 0x87f   : > { %10189 = vmatprep.subr.bf16.mxu1 %v15067_v55  ;;  %v14899_v55 = vcombine.high %v5681_v11, %v5693_v30  ;;  %v5921_v39 = vld [vmem:[#allocation14 + $0x1398] sm:$0xff] }
 0x880   : > { %10099 = vmatmul.mubr.bf16.vlgmr.msra.gmra.mxu0 %v18184_v42  ;;  %v5933_v41 = vld [vmem:[#allocation14 + $0x13f8] sm:$0xff] }
 0x881   : > { %10140 = vmatmul.mubr.bf16.vlgmr.msra.gmra.mxu1 %v18188_v26  ;;  %10149 = vmatpush1.bf16.msra.mxu0 %v14682_v20  ;;  %v6041_v20 = vld [vmem:[#allocation14 + $0x1758] sm:$0xff] }
 0x882   : > { %10180 = vmatprep.mubr.bf16.mxu0 %v18186_v21  ;;  %10190 = vmatpush1.bf16.msra.mxu1 %v15066_v59  ;;  %v14898_v59 = vcombine.low %v5681_v11, %v5693_v30  ;;  %v15259_v51 = vcombine.high %v6041_v20, %v6053_v1  ;;  %v5513_v3 = vld [vmem:[#allocation14 + $0x6d8] sm:$0xff] }
 0x883   : > { %10221 = vmatprep.mubr.bf16.mxu1 %v18190_v24  ;;  %10150 = vmatprep.subr.bf16.mxu0 %v14659_v4  ;;  %v14875_v4 = vcombine.high %v5657_v56, %v5669_v62  ;;  %v5525_v61 = vld [vmem:[#allocation14 + $0x738] sm:$0xff] }
 0x884   : > { %10191 = vmatprep.subr.bf16.mxu1 %v15043_v44  ;;  %v5645_v44 = vld [vmem:[#allocation14 + $0xaf8] sm:$0xff] }
 0x885   : > { %10151 = vmatpush1.bf16.msra.mxu0 %v14658_v43  ;;  %v14874_v43 = vcombine.low %v5657_v56, %v5669_v62  ;;  %v5897_v11 = vld [vmem:[#allocation14 + $0x12d8] sm:$0xff] }
 0x886   : > { %10192 = vmatpush1.bf16.msra.mxu1 %v15042_v45  ;;  %10152 = vmatprep.subr.bf16.mxu0 %v14635_v7  ;;  %v15258_v45 = vcombine.low %v6041_v20, %v6053_v1  ;;  %v14851_v7 = vcombine.high %v5633_v6, %v5645_v44  ;;  %v5909_v30 = vld [vmem:[#allocation14 + $0x1338] sm:$0xff] }
 0x887   : > { %10193 = vmatprep.subr.bf16.mxu1 %v15019_v47  ;;  %v15235_v47 = vcombine.high %v6017_v5, %v6029_v19  ;;  %v5489_v56 = vld [vmem:[#allocation14 + $0x618] sm:$0xff] }
 0x888   : > { %v5501_v62 = vld [vmem:[#allocation14 + $0x678] sm:$0xff] }
 0x889   : > { %10153 = vmatpush1.bf16.msra.mxu0 %v14634_v12  ;;  %v14850_v12 = vcombine.low %v5633_v6, %v5645_v44  ;;  %v5873_v20 = vld [vmem:[#allocation14 + $0x1218] sm:$0xff]  ;;  %v5466_v6 = vld [vmem:[#allocation14 + $0x560] sm:$0xff] }
 0x88a   : > { %10194 = vmatpush1.bf16.msra.mxu1 %v15018_v13  ;;  %10154 = vmatprep.subr.bf16.mxu0 %v14611_v14  ;;  %v15234_v13 = vcombine.low %v6017_v5, %v6029_v19  ;;  %v14827_v14 = vcombine.high %v5609_v8, %v5621_v9  ;;  %v5885_v1 = vld [vmem:[#allocation14 + $0x1278] sm:$0xff]  ;;  %v5478_v44 = vld [vmem:[#allocation14 + $0x5c0] sm:$0xff] }
 0x88b   : > { %10195 = vmatprep.subr.bf16.mxu1 %v14995_v22  ;;  %v15211_v22 = vcombine.high %v5993_v10, %v6005_v29  ;;  %v5850_v5 = vld [vmem:[#allocation14 + $0x1160] sm:$0xff] }
 0x88c   : > { %v5862_v19 = vld [vmem:[#allocation14 + $0x11c0] sm:$0xff] }
 0x88d   : > { %10155 = vmatpush1.bf16.msra.mxu0 %v14610_v18  ;;  %v14826_v18 = vcombine.low %v5609_v8, %v5621_v9  ;;  %v5442_v8 = vld [vmem:[#allocation14 + $0x4a0] sm:$0xff] }
 0x88e   : > { %10196 = vmatpush1.bf16.msra.mxu1 %v14994_v25  ;;  %10156 = vmatprep.subr.bf16.mxu0 %v14587_v40  ;;  %v15210_v25 = vcombine.low %v5993_v10, %v6005_v29  ;;  %v14803_v40 = vcombine.high %v5585_v15, %v5597_v16  ;;  %v5454_v9 = vld [vmem:[#allocation14 + $0x500] sm:$0xff]  ;;  %v14684_v10 = vcombine.low %v5466_v6, %v5478_v44 }
 0x88f   : > { %10197 = vmatprep.subr.bf16.mxu1 %v14971_v27  ;;  %v15187_v27 = vcombine.high %v5969_v23, %v5981_v17  ;;  %v5826_v29 = vld [vmem:[#allocation14 + $0x10a0] sm:$0xff] }
 0x891   : > { %10157 = vmatpush1.bf16.msra.mxu0 %v14586_v48  ;;  %v14802_v48 = vcombine.low %v5585_v15, %v5597_v16  ;;  %v5430_v15 = vld [vmem:[#allocation14 + $0x440] sm:$0xff] }
 0x892   : > { %10198 = vmatpush1.bf16.msra.mxu1 %v14970_v34  ;;  %10158 = vmatprep.subr.bf16.mxu0 %v14563_v35  ;;  %v15186_v34 = vcombine.low %v5969_v23, %v5981_v17  ;;  %v14779_v35 = vcombine.high %v5561_v28, %v5573_v31 }
 0x893   : > { %10199 = vmatprep.subr.bf16.mxu1 %v14947_v36  ;;  %v15163_v36 = vcombine.high %v5945_v32, %v5957_v33 }
 0x895   : > { %10159 = vmatpush1.bf16.msra.mxu0 %v14562_v60  ;;  %v14778_v60 = vcombine.low %v5561_v28, %v5573_v31 }
 0x896   : > { %10200 = vmatpush1.bf16.msra.mxu1 %v14946_v2  ;;  %10160 = vmatprep.subr.bf16.mxu0 %v14539_v49  ;;  %v15162_v2 = vcombine.low %v5945_v32, %v5957_v33  ;;  %v14755_v49 = vcombine.high %v5537_v37, %v5549_v38 }
 0x897   : > { %10201 = vmatprep.subr.bf16.mxu1 %v14923_v50  ;;  %v15139_v50 = vcombine.high %v5921_v39, %v5933_v41 }
 0x899   : > { %10161 = vmatpush1.bf16.msra.mxu0 %v14538_v52  ;;  %v14754_v52 = vcombine.low %v5537_v37, %v5549_v38 }
 0x89a   : > { %10202 = vmatpush1.bf16.msra.mxu1 %v14922_v54  ;;  %10162 = vmatprep.subr.bf16.mxu0 %v14515_v46  ;;  %v15138_v54 = vcombine.low %v5921_v39, %v5933_v41  ;;  %v14731_v46 = vcombine.high %v5513_v3, %v5525_v61  ;;  %v5778_v39 = vld [vmem:[#allocation14 + $0xf20] sm:$0xff] }
 0x89b   : > { %10203 = vmatprep.subr.bf16.mxu1 %v14899_v55  ;;  %v15115_v55 = vcombine.high %v5897_v11, %v5909_v30  ;;  %v5790_v41 = vld [vmem:[#allocation14 + $0xf80] sm:$0xff] }
 0x89d   : > { %10163 = vmatpush1.bf16.msra.mxu0 %v14514_v63  ;;  %v14730_v63 = vcombine.low %v5513_v3, %v5525_v61  ;;  %v14997_v61 = vcombine.high %v5778_v39, %v5790_v41 }
 0x89e   : > { %10204 = vmatpush1.bf16.msra.mxu1 %v14898_v59  ;;  %10164 = vmatprep.subr.bf16.mxu0 %v14875_v4  ;;  %v15114_v59 = vcombine.low %v5897_v11, %v5909_v30  ;;  %v14707_v4 = vcombine.high %v5489_v56, %v5501_v62  ;;  %v5370_v11 = vld [vmem:[#allocation14 + $0x260] sm:$0xff] }
 0x89f   : > { %10205 = vmatprep.subr.bf16.mxu1 %v15259_v51  ;;  %v15091_v51 = vcombine.high %v5873_v20, %v5885_v1  ;;  %v5382_v30 = vld [vmem:[#allocation14 + $0x2c0] sm:$0xff] }
 0x8a1   : > { %10165 = vmatpush2.bf16.msra.mxu0 %v14874_v43  ;;  %v14706_v43 = vcombine.low %v5489_v56, %v5501_v62  ;;  %v14589_v56 = vcombine.high %v5370_v11, %v5382_v30 }
 0x8a2   : > { %10206 = vmatpush2.bf16.msra.mxu1 %v15258_v45  ;;  %10166 = vmatprep.subr.bf16.mxu0 %v14851_v7  ;;  %v15090_v45 = vcombine.low %v5873_v20, %v5885_v1  ;;  %v14685_v7 = vcombine.high %v5466_v6, %v5478_v44  ;;  %v5346_v20 = vld [vmem:[#allocation14 + $0x1a0] sm:$0xff] }
 0x8a3   : > { %10207 = vmatprep.subr.bf16.mxu1 %v15235_v47  ;;  %v15069_v47 = vcombine.high %v5850_v5, %v5862_v19  ;;  %v5358_v1 = vld [vmem:[#allocation14 + $0x200] sm:$0xff] }
 0x8a4   : > { %v14565_v6 = vcombine.high %v5346_v20, %v5358_v1 }
 0x8a5   : > { %10167 = vmatpush2.bf16.msra.mxu0 %v14850_v12  ;;  %v5838_v12 = vld [vmem:[#allocation14 + $0x1100] sm:$0xff] }
 0x8a6   : > { %10208 = vmatpush2.bf16.msra.mxu1 %v15234_v13  ;;  %10168 = vmatprep.subr.bf16.mxu0 %v14827_v14  ;;  %v15068_v13 = vcombine.low %v5850_v5, %v5862_v19  ;;  %v14661_v14 = vcombine.high %v5442_v8, %v5454_v9  ;;  %v15045_v17 = vcombine.high %v5826_v29, %v5838_v12  ;;  %v5322_v5 = vld [vmem:[#allocation14 + $0xe0] sm:$0xff] }
 0x8a7   : > { %10209 = vmatprep.subr.bf16.mxu1 %v15211_v22  ;;  %v5418_v22 = vld [vmem:[#allocation14 + $0x3e0] sm:$0xff]  ;;  %v15044_v32 = vcombine.low %v5826_v29, %v5838_v12 }
 0x8a8   : > { %v14637_v33 = vcombine.high %v5418_v22, %v5430_v15  ;;  %v5334_v19 = vld [vmem:[#allocation14 + $0x140] sm:$0xff] }
 0x8a9   : > { %10169 = vmatpush2.bf16.msra.mxu0 %v14826_v18  ;;  %v5802_v18 = vld [vmem:[#allocation14 + $0xfe0] sm:$0xff] }
 0x8aa   : > { %10210 = vmatpush2.bf16.msra.mxu1 %v15210_v25  ;;  %10170 = vmatprep.subr.bf16.mxu0 %v14803_v40  ;;  %v5814_v25 = vld [vmem:[#allocation14 + $0x1040] sm:$0xff] }
 0x8ab   : > { %10211 = vmatprep.subr.bf16.mxu1 %v15187_v27  ;;  %v14660_v27 = vcombine.low %v5442_v8, %v5454_v9  ;;  %v14541_v8 = vcombine.high %v5322_v5, %v5334_v19  ;;  %v5310_v29 = vld [vmem:[#allocation14 + $0x80] sm:$0xff] }
 0x8ac   : > { %v5682_v12 = vld [vmem:[#allocation14 + $0xc20] sm:$0xff] }
 0x8ad   : > { %10171 = vmatpush2.bf16.msra.mxu0 %v14802_v48 }
 0x8ae   : > { %10212 = vmatpush2.bf16.msra.mxu1 %v15186_v34  ;;  %10172 = vmatprep.subr.bf16.mxu0 %v14779_v35  ;;  %v15021_v34 = vcombine.high %v5802_v18, %v5814_v25  ;;  %v5394_v35 = vld [vmem:[#allocation14 + $0x320] sm:$0xff] }
 0x8af   : > { %10213 = vmatprep.subr.bf16.mxu1 %v15163_v36  ;;  %v5406_v36 = vld [vmem:[#allocation14 + $0x380] sm:$0xff] }
 0x8b0   : > { %v14613_v3 = vcombine.high %v5394_v35, %v5406_v36 }
 0x8b1   : > { %10173 = vmatpush2.bf16.msra.mxu0 %v14778_v60  ;;  %v14636_v60 = vcombine.low %v5418_v22, %v5430_v15 }
 0x8b2   : > { %10214 = vmatpush2.bf16.msra.mxu1 %v15162_v2  ;;  %10174 = vmatprep.subr.bf16.mxu0 %v14755_v49 }
 0x8b3   : > { %10215 = vmatprep.subr.bf16.mxu1 %v15139_v50  ;;  %v15020_v50 = vcombine.low %v5802_v18, %v5814_v25  ;;  %v6042_v18 = vld [vmem:[#allocation14 + $0x1760] sm:$0xff] }
 0x8b4   : > { %v6054_v25 = vld [vmem:[#allocation14 + $0x17c0] sm:$0xff] }
 0x8b5   : > { %10175 = vmatpush2.bf16.msra.mxu0 %v14754_v52  ;;  %v5754_v52 = vld [vmem:[#allocation14 + $0xe60] sm:$0xff] }
 0x8b6   : > { %10216 = vmatpush2.bf16.msra.mxu1 %v15138_v54  ;;  %10176 = vmatprep.subr.bf16.mxu0 %v14731_v46  ;;  %v5766_v54 = vld [vmem:[#allocation14 + $0xec0] sm:$0xff]  ;;  %v14612_v46 = vcombine.low %v5394_v35, %v5406_v36 }
 0x8b7   : > { %10217 = vmatprep.subr.bf16.mxu1 %v15115_v55  ;;  %v14996_v55 = vcombine.low %v5778_v39, %v5790_v41  ;;  %v14973_v62 = vcombine.high %v5754_v52, %v5766_v54  ;;  %v6018_v35 = vld [vmem:[#allocation14 + $0x16a0] sm:$0xff] }
 0x8b8   : > { %v6030_v36 = vld [vmem:[#allocation14 + $0x1700] sm:$0xff] }
 0x8b9   : > { %10177 = vmatpush2.bf16.msra.mxu0 %v14730_v63  ;;  %v5730_v63 = vld [vmem:[#allocation14 + $0xda0] sm:$0xff]  ;;  %v15237_v41 = vcombine.high %v6018_v35, %v6030_v36 }
 0x8ba   : > { %10218 = vmatpush2.bf16.msra.mxu1 %v15114_v59  ;;  %10178 = vmatprep.subr.bf16.mxu0 %v14707_v4  ;;  %v5742_v59 = vld [vmem:[#allocation14 + $0xe00] sm:$0xff]  ;;  %v14588_v4 = vcombine.low %v5370_v11, %v5382_v30 }
 0x8bb   : > { %10219 = vmatprep.subr.bf16.mxu1 %v15091_v51  ;;  %v14972_v51 = vcombine.low %v5754_v52, %v5766_v54  ;;  %v14949_v44 = vcombine.high %v5730_v63, %v5742_v59  ;;  %v5586_v52 = vld [vmem:[#allocation14 + $0x920] sm:$0xff] }
 0x8bc   : > { %v5598_v54 = vld [vmem:[#allocation14 + $0x980] sm:$0xff] }
 0x8bd   : > { %10179 = vmatpush2.bf16.msra.mxu0 %v14706_v43  ;;  %v5706_v43 = vld [vmem:[#allocation14 + $0xce0] sm:$0xff] }
 0x8be   : > { %10220 = vmatpush2.bf16.msra.mxu1 %v15090_v45  ;;  %10230 = vmatprep.subr.bf16.mxu0 %v14685_v7  ;;  %v5718_v45 = vld [vmem:[#allocation14 + $0xd40] sm:$0xff]  ;;  %v14564_v7 = vcombine.low %v5346_v20, %v5358_v1  ;;  %v14805_v20 = vcombine.high %v5586_v52, %v5598_v54 }
 0x8bf   : > { %10271 = vmatprep.subr.bf16.mxu1 %v15069_v47  ;;  %v14948_v47 = vcombine.low %v5730_v63, %v5742_v59  ;;  %v14925_v9 = vcombine.high %v5706_v43, %v5718_v45  ;;  %v14924_v22 = vcombine.low %v5706_v43, %v5718_v45  ;;  %v5562_v63 = vld [vmem:[#allocation14 + $0x860] sm:$0xff] }
 0x8c0   : > { %10181 = vmatmul.mubr.bf16.vlgmr.msra.gmra.mxu0 %v18184_v42  ;;  %v9936_v16 = vpop.f32.mrf.mxu0  ;;  %v9977_v23 = vpop.f32.mrf.mxu1  ;;  %v5574_v59 = vld [vmem:[#allocation14 + $0x8c0] sm:$0xff] }
 0x8c1   : > { %10222 = vmatmul.mubr.bf16.vlgmr.msra.gmra.mxu1 %v18188_v26  ;;  %v18208_v40 = vadd.f32 %v9977_v23, %v9936_v16  ;;  %10231 = vmatpush1.bf16.msra.mxu0 %v14684_v10  ;;  %v5298_v10 = vld [vmem:[#allocation14 + $0x20] sm:$0xff] }
 0x8c2   : > { %10262 = vmatprep.mubr.bf16.mxu0 %v18186_v21  ;;  %10272 = vmatpush1.bf16.msra.mxu1 %v15068_v13  ;;  %v9938_v28 = vpop.f32.mrf.mxu0  ;;  %v9979_v31 = vpop.f32.mrf.mxu1  ;;  %v5694_v13 = vld [vmem:[#allocation14 + $0xc80] sm:$0xff]  ;;  %v14517_v15 = vcombine.high %v5298_v10, %v5310_v29 }
 0x8c3   : > { %10303 = vmatprep.mubr.bf16.mxu1 %v18190_v24  ;;  %v18212_v48 = vadd.f32 %v9979_v31, %v9938_v28  ;;  %10232 = vmatprep.subr.bf16.mxu0 %v14661_v14  ;;  %v14540_v14 = vcombine.low %v5322_v5, %v5334_v19  ;;  %v14901_v16 = vcombine.high %v5682_v12, %v5694_v13  ;;  %v5658_v23 = vld [vmem:[#allocation14 + $0xb60] sm:$0xff] }
 0x8c4   : > { %10273 = vmatprep.subr.bf16.mxu1 %v15045_v17  ;;  %v9940_v37 = vpop.f32.mrf.mxu0  ;;  %v9981_v38 = vpop.f32.mrf.mxu1  ;;  %v5670_v17 = vld [vmem:[#allocation14 + $0xbc0] sm:$0xff]  ;;  %v14900_v28 = vcombine.low %v5682_v12, %v5694_v13  ;;  %v14781_v5 = vcombine.high %v5562_v63, %v5574_v59 }
 0x8c5   : > { %10233 = vmatpush1.bf16.msra.mxu0 %v14660_v27  ;;  %v14516_v27 = vcombine.low %v5298_v10, %v5310_v29  ;;  %v14877_v31 = vcombine.high %v5658_v23, %v5670_v17  ;;  %v14876_v37 = vcombine.low %v5658_v23, %v5670_v17  ;;  %v15260_v38 = vcombine.low %v6042_v18, %v6054_v25  ;;  %v5538_v43 = vld [vmem:[#allocation14 + $0x7a0] sm:$0xff] }
 0x8c6   : > { %10274 = vmatpush1.bf16.msra.mxu1 %v15044_v32  ;;  %v9941_v2 = vpop.f32.mrf.mxu0  ;;  %v9982_v49 = vpop.f32.mrf.mxu1  ;;  %10234 = vmatprep.subr.bf16.mxu0 %v14637_v33  ;;  %v15261_v32 = vcombine.high %v6042_v18, %v6054_v25  ;;  %v5634_v33 = vld [vmem:[#allocation14 + $0xaa0] sm:$0xff] }
 0x8c7   : > { %10275 = vmatprep.subr.bf16.mxu1 %v15021_v34  ;;  %v5646_v34 = vld [vmem:[#allocation14 + $0xb00] sm:$0xff] }
 0x8c8   : > { %v14853_v39 = vcombine.high %v5634_v33, %v5646_v34  ;;  %v5622_v2 = vld [vmem:[#allocation14 + $0xa40] sm:$0xff] }
 0x8c9   : > { %10235 = vmatpush1.bf16.msra.mxu0 %v14636_v60  ;;  %v5610_v60 = vld [vmem:[#allocation14 + $0x9e0] sm:$0xff] }
 0x8ca   : > { %10276 = vmatpush1.bf16.msra.mxu1 %v15020_v50  ;;  %10236 = vmatprep.subr.bf16.mxu0 %v14613_v3  ;;  %v5994_v49 = vld [vmem:[#allocation14 + $0x15e0] sm:$0xff]  ;;  %v14852_v3 = vcombine.low %v5634_v33, %v5646_v34  ;;  %v14829_v11 = vcombine.high %v5610_v60, %v5622_v2 }
 0x8cb   : > { %10277 = vmatprep.subr.bf16.mxu1 %v14997_v61  ;;  %v6006_v50 = vld [vmem:[#allocation14 + $0x1640] sm:$0xff]  ;;  %v15236_v61 = vcombine.low %v6018_v35, %v6030_v36  ;;  %v5467_v35 = vld [vmem:[#allocation14 + $0x568] sm:$0xff] }
 0x8cc   : > { %v15213_v30 = vcombine.high %v5994_v49, %v6006_v50  ;;  %v5550_v45 = vld [vmem:[#allocation14 + $0x800] sm:$0xff]  ;;  %v5479_v36 = vld [vmem:[#allocation14 + $0x5c8] sm:$0xff] }
 0x8cd   : > { %10237 = vmatpush1.bf16.msra.mxu0 %v14612_v46  ;;  %v5970_v46 = vld [vmem:[#allocation14 + $0x1520] sm:$0xff]  ;;  %v14757_v10 = vcombine.high %v5538_v43, %v5550_v45 }
 0x8ce   : > { %10278 = vmatpush1.bf16.msra.mxu1 %v14996_v55  ;;  %10238 = vmatprep.subr.bf16.mxu0 %v14589_v56  ;;  %v5982_v55 = vld [vmem:[#allocation14 + $0x1580] sm:$0xff]  ;;  %v14828_v56 = vcombine.low %v5610_v60, %v5622_v2  ;;  %v14687_v60 = vcombine.high %v5467_v35, %v5479_v36 }
 0x8cf   : > { %10279 = vmatprep.subr.bf16.mxu1 %v14973_v62  ;;  %v15212_v62 = vcombine.low %v5994_v49, %v6006_v50  ;;  %v15189_v1 = vcombine.high %v5970_v46, %v5982_v55  ;;  %v5514_v12 = vld [vmem:[#allocation14 + $0x6e0] sm:$0xff]  ;;  %v5443_v49 = vld [vmem:[#allocation14 + $0x4a8] sm:$0xff] }
 0x8d0   : > { %v5526_v13 = vld [vmem:[#allocation14 + $0x740] sm:$0xff]  ;;  %v5455_v50 = vld [vmem:[#allocation14 + $0x508] sm:$0xff] }
 0x8d1   : > { %10239 = vmatpush1.bf16.msra.mxu0 %v14588_v4  ;;  %v5946_v4 = vld [vmem:[#allocation14 + $0x1460] sm:$0xff]  ;;  %v14733_v23 = vcombine.high %v5514_v12, %v5526_v13 }
 0x8d2   : > { %10280 = vmatpush1.bf16.msra.mxu1 %v14972_v51  ;;  %10240 = vmatprep.subr.bf16.mxu0 %v14565_v6  ;;  %v5958_v51 = vld [vmem:[#allocation14 + $0x14c0] sm:$0xff]  ;;  %v14804_v6 = vcombine.low %v5586_v52, %v5598_v54  ;;  %v14663_v52 = vcombine.high %v5443_v49, %v5455_v50  ;;  %v5419_v54 = vld [vmem:[#allocation14 + $0x3e8] sm:$0xff] }
 0x8d3   : > { %10281 = vmatprep.subr.bf16.mxu1 %v14949_v44  ;;  %v15188_v44 = vcombine.low %v5970_v46, %v5982_v55  ;;  %v15165_v19 = vcombine.high %v5946_v4, %v5958_v51  ;;  %v5490_v18 = vld [vmem:[#allocation14 + $0x620] sm:$0xff]  ;;  %v5431_v46 = vld [vmem:[#allocation14 + $0x448] sm:$0xff] }
 0x8d4   : > { %v5502_v25 = vld [vmem:[#allocation14 + $0x680] sm:$0xff] }
 0x8d5   : > { %10241 = vmatpush1.bf16.msra.mxu0 %v14564_v7  ;;  %v5922_v7 = vld [vmem:[#allocation14 + $0x13a0] sm:$0xff]  ;;  %v14709_v33 = vcombine.high %v5490_v18, %v5502_v25 }
 0x8d6   : > { %10282 = vmatpush1.bf16.msra.mxu1 %v14948_v47  ;;  %10242 = vmatprep.subr.bf16.mxu0 %v14541_v8  ;;  %v5934_v47 = vld [vmem:[#allocation14 + $0x1400] sm:$0xff]  ;;  %v14780_v8 = vcombine.low %v5562_v63, %v5574_v59  ;;  %v14662_v59 = vcombine.low %v5443_v49, %v5455_v50 }
 0x8d7   : > { %10283 = vmatprep.subr.bf16.mxu1 %v14925_v9  ;;  %v15164_v9 = vcombine.low %v5946_v4, %v5958_v51  ;;  %v15141_v29 = vcombine.high %v5922_v7, %v5934_v47 }
 0x8d9   : > { %10243 = vmatpush1.bf16.msra.mxu0 %v14540_v14  ;;  %v5898_v14 = vld [vmem:[#allocation14 + $0x12e0] sm:$0xff] }
 0x8da   : > { %10284 = vmatpush1.bf16.msra.mxu1 %v14924_v22  ;;  %10244 = vmatprep.subr.bf16.mxu0 %v14517_v15  ;;  %v5910_v22 = vld [vmem:[#allocation14 + $0x1340] sm:$0xff]  ;;  %v14756_v15 = vcombine.low %v5538_v43, %v5550_v45  ;;  %v5395_v43 = vld [vmem:[#allocation14 + $0x328] sm:$0xff] }
 0x8db   : > { %10285 = vmatprep.subr.bf16.mxu1 %v14901_v16  ;;  %v15140_v16 = vcombine.low %v5922_v7, %v5934_v47  ;;  %v15117_v17 = vcombine.high %v5898_v14, %v5910_v22  ;;  %v5407_v45 = vld [vmem:[#allocation14 + $0x388] sm:$0xff] }
 0x8dd   : > { %10245 = vmatpush1.bf16.msra.mxu0 %v14516_v27  ;;  %v5874_v27 = vld [vmem:[#allocation14 + $0x1220] sm:$0xff] }
 0x8de   : > { %10286 = vmatpush1.bf16.msra.mxu1 %v14900_v28  ;;  %10246 = vmatprep.subr.bf16.mxu0 %v14877_v31  ;;  %v5886_v28 = vld [vmem:[#allocation14 + $0x1280] sm:$0xff]  ;;  %v14732_v31 = vcombine.low %v5514_v12, %v5526_v13 }
 0x8df   : > { %10287 = vmatprep.subr.bf16.mxu1 %v15261_v32  ;;  %v15116_v32 = vcombine.low %v5898_v14, %v5910_v22  ;;  %v15093_v34 = vcombine.high %v5874_v27, %v5886_v28  ;;  %v14615_v14 = vcombine.high %v5395_v43, %v5407_v45 }
 0x8e1   : > { %10247 = vmatpush2.bf16.msra.mxu0 %v14876_v37  ;;  %v5851_v37 = vld [vmem:[#allocation14 + $0x1168] sm:$0xff] }
 0x8e2   : > { %10288 = vmatpush2.bf16.msra.mxu1 %v15260_v38  ;;  %10248 = vmatprep.subr.bf16.mxu0 %v14853_v39  ;;  %v5863_v38 = vld [vmem:[#allocation14 + $0x11c8] sm:$0xff]  ;;  %v14708_v39 = vcombine.low %v5490_v18, %v5502_v25  ;;  %v14614_v18 = vcombine.low %v5395_v43, %v5407_v45 }
 0x8e3   : > { %10289 = vmatprep.subr.bf16.mxu1 %v15237_v41  ;;  %v15092_v41 = vcombine.low %v5874_v27, %v5886_v28  ;;  %v15071_v2 = vcombine.high %v5851_v37, %v5863_v38  ;;  %v5635_v43 = vld [vmem:[#allocation14 + $0xaa8] sm:$0xff] }
 0x8e4   : > { %v5647_v45 = vld [vmem:[#allocation14 + $0xb08] sm:$0xff] }
 0x8e5   : > { %10249 = vmatpush2.bf16.msra.mxu0 %v14852_v3  ;;  %v14686_v3 = vcombine.low %v5467_v35, %v5479_v36 }
 0x8e6   : > { %10290 = vmatpush2.bf16.msra.mxu1 %v15236_v61  ;;  %10250 = vmatprep.subr.bf16.mxu0 %v14829_v11  ;;  %v5827_v61 = vld [vmem:[#allocation14 + $0x10a8] sm:$0xff] }
 0x8e7   : > { %10291 = vmatprep.subr.bf16.mxu1 %v15213_v30  ;;  %v5839_v11 = vld [vmem:[#allocation14 + $0x1108] sm:$0xff]  ;;  %v15070_v30 = vcombine.low %v5851_v37, %v5863_v38 }
 0x8e9   : > { %10251 = vmatpush2.bf16.msra.mxu0 %v14828_v56 }
 0x8ea   : > { %10292 = vmatpush2.bf16.msra.mxu1 %v15212_v62  ;;  %10252 = vmatprep.subr.bf16.mxu0 %v14805_v20  ;;  %v15047_v62 = vcombine.high %v5827_v61, %v5839_v11  ;;  %v5803_v20 = vld [vmem:[#allocation14 + $0xfe8] sm:$0xff] }
 0x8eb   : > { %10293 = vmatprep.subr.bf16.mxu1 %v15189_v1  ;;  %v5815_v1 = vld [vmem:[#allocation14 + $0x1048] sm:$0xff] }
 0x8ec   : > { %v15022_v13 = vcombine.low %v5803_v20, %v5815_v1 }
 0x8ed   : > { %10253 = vmatpush2.bf16.msra.mxu0 %v14804_v6  ;;  %v15046_v6 = vcombine.low %v5827_v61, %v5839_v11  ;;  %v5299_v11 = vld [vmem:[#allocation14 + $0x28] sm:$0xff] }
 0x8ee   : > { %10294 = vmatpush2.bf16.msra.mxu1 %v15188_v44  ;;  %10254 = vmatprep.subr.bf16.mxu0 %v14781_v5  ;;  %v14639_v44 = vcombine.high %v5419_v54, %v5431_v46 }
 0x8ef   : > { %10295 = vmatprep.subr.bf16.mxu1 %v15165_v19  ;;  %v15023_v19 = vcombine.high %v5803_v20, %v5815_v1  ;;  %v5659_v20 = vld [vmem:[#allocation14 + $0xb68] sm:$0xff] }
 0x8f0   : > { %v5671_v1 = vld [vmem:[#allocation14 + $0xbc8] sm:$0xff] }
 0x8f1   : > { %10255 = vmatpush2.bf16.msra.mxu0 %v14780_v8  ;;  %v5779_v8 = vld [vmem:[#allocation14 + $0xf28] sm:$0xff] }
 0x8f2   : > { %10296 = vmatpush2.bf16.msra.mxu1 %v15164_v9  ;;  %10256 = vmatprep.subr.bf16.mxu0 %v14757_v10  ;;  %v5791_v9 = vld [vmem:[#allocation14 + $0xf88] sm:$0xff]  ;;  %v14638_v10 = vcombine.low %v5419_v54, %v5431_v46 }
 0x8f3   : > { %10297 = vmatprep.subr.bf16.mxu1 %v15141_v29  ;;  %v14999_v22 = vcombine.high %v5779_v8, %v5791_v9  ;;  %v14998_v25 = vcombine.low %v5779_v8, %v5791_v9  ;;  %v5695_v54 = vld [vmem:[#allocation14 + $0xc88] sm:$0xff]  ;;  %v14878_v8 = vcombine.low %v5659_v20, %v5671_v1 }
 0x8f5   : > { %10257 = vmatpush2.bf16.msra.mxu0 %v14756_v15  ;;  %v5371_v15 = vld [vmem:[#allocation14 + $0x268] sm:$0xff] }
 0x8f6   : > { %10298 = vmatpush2.bf16.msra.mxu1 %v15140_v16  ;;  %10258 = vmatprep.subr.bf16.mxu0 %v14733_v23  ;;  %v5383_v16 = vld [vmem:[#allocation14 + $0x2c8] sm:$0xff] }
 0x8f7   : > { %10299 = vmatprep.subr.bf16.mxu1 %v15117_v17  ;;  %v5755_v23 = vld [vmem:[#allocation14 + $0xe68] sm:$0xff]  ;;  %v14591_v27 = vcombine.high %v5371_v15, %v5383_v16  ;;  %v14590_v35 = vcombine.low %v5371_v15, %v5383_v16  ;;  %v14854_v15 = vcombine.low %v5635_v43, %v5647_v45 }
 0x8f8   : > { %v5767_v17 = vld [vmem:[#allocation14 + $0xec8] sm:$0xff] }
 0x8f9   : > { %10259 = vmatpush2.bf16.msra.mxu0 %v14732_v31  ;;  %v14975_v28 = vcombine.high %v5755_v23, %v5767_v17  ;;  %v5347_v31 = vld [vmem:[#allocation14 + $0x1a8] sm:$0xff]  ;;  %v14974_v36 = vcombine.low %v5755_v23, %v5767_v17 }
 0x8fa   : > { %10300 = vmatpush2.bf16.msra.mxu1 %v15116_v32  ;;  %10260 = vmatprep.subr.bf16.mxu0 %v14709_v33  ;;  %v5359_v32 = vld [vmem:[#allocation14 + $0x208] sm:$0xff] }
 0x8fb   : > { %10301 = vmatprep.subr.bf16.mxu1 %v15093_v34  ;;  %v5731_v33 = vld [vmem:[#allocation14 + $0xda8] sm:$0xff]  ;;  %v14567_v37 = vcombine.high %v5347_v31, %v5359_v32  ;;  %v14566_v49 = vcombine.low %v5347_v31, %v5359_v32 }
 0x8fc   : > { %v5743_v34 = vld [vmem:[#allocation14 + $0xe08] sm:$0xff] }
 0x8fd   : > { %10261 = vmatpush2.bf16.msra.mxu0 %v14708_v39  ;;  %v14951_v38 = vcombine.high %v5731_v33, %v5743_v34  ;;  %v5323_v39 = vld [vmem:[#allocation14 + $0xe8] sm:$0xff]  ;;  %v14950_v50 = vcombine.low %v5731_v33, %v5743_v34 }
 0x8fe   : > { %10302 = vmatpush2.bf16.msra.mxu1 %v15092_v41  ;;  %10312 = vmatprep.subr.bf16.mxu0 %v14687_v60  ;;  %v5335_v41 = vld [vmem:[#allocation14 + $0x148] sm:$0xff] }
 0x8ff   : > { %10353 = vmatprep.subr.bf16.mxu1 %v15071_v2  ;;  %v5707_v60 = vld [vmem:[#allocation14 + $0xce8] sm:$0xff]  ;;  %v14542_v46 = vcombine.low %v5323_v39, %v5335_v41 }
 0x900   : > { %v10018_v55 = vpop.f32.mrf.mxu0  ;;  %v10059_v56 = vpop.f32.mrf.mxu1  ;;  %10263 = vmatmul.mubr.bf16.vlgmr.msra.gmra.mxu0 %v18184_v42  ;;  %v5719_v2 = vld [vmem:[#allocation14 + $0xd48] sm:$0xff] }
 0x901   : > { %v18215_v63 = vadd.f32 %v10059_v56, %v10018_v55  ;;  %10304 = vmatmul.mubr.bf16.vlgmr.msra.gmra.mxu1 %v18188_v26  ;;  %10313 = vmatpush1.bf16.msra.mxu0 %v14686_v3  ;;  %v14543_v3 = vcombine.high %v5323_v39, %v5335_v41  ;;  %v14927_v61 = vcombine.high %v5707_v60, %v5719_v2 }
 0x902   : > { %10344 = vmatprep.mubr.bf16.mxu0 %v18186_v21  ;;  %10354 = vmatpush1.bf16.msra.mxu1 %v15070_v30  ;;  %v10020_v4 = vpop.f32.mrf.mxu0  ;;  %v10061_v51 = vpop.f32.mrf.mxu1  ;;  %v5311_v30 = vld [vmem:[#allocation14 + $0x88] sm:$0xff]  ;;  %v14926_v55 = vcombine.low %v5707_v60, %v5719_v2 }
 0x903   : > { %10385 = vmatprep.mubr.bf16.mxu1 %v18190_v24  ;;  %v18220_v5 = vadd.f32 %v10061_v51, %v10020_v4  ;;  %10314 = vmatprep.subr.bf16.mxu0 %v14663_v52  ;;  %v5683_v52 = vld [vmem:[#allocation14 + $0xc28] sm:$0xff]  ;;  %v14519_v56 = vcombine.high %v5299_v11, %v5311_v30  ;;  %v14518_v51 = vcombine.low %v5299_v11, %v5311_v30 }
 0x904   : > { %v10022_v7 = vpop.f32.mrf.mxu0  ;;  %v10063_v47 = vpop.f32.mrf.mxu1  ;;  %10355 = vmatprep.subr.bf16.mxu1 %v15047_v62  ;;  %v14903_v62 = vcombine.high %v5683_v52, %v5695_v54  ;;  %v6055_v4 = vld [vmem:[#allocation14 + $0x17c8] sm:$0xff] }
 0x905   : > { %10315 = vmatpush1.bf16.msra.mxu0 %v14662_v59  ;;  %v6043_v59 = vld [vmem:[#allocation14 + $0x1768] sm:$0xff] }
 0x906   : > { %10356 = vmatpush1.bf16.msra.mxu1 %v15046_v6  ;;  %v10023_v29 = vpop.f32.mrf.mxu0  ;;  %v10064_v12 = vpop.f32.mrf.mxu1  ;;  %10316 = vmatprep.subr.bf16.mxu0 %v14639_v44  ;;  %v14902_v6 = vcombine.low %v5683_v52, %v5695_v54  ;;  %v14879_v44 = vcombine.high %v5659_v20, %v5671_v1  ;;  %v6019_v7 = vld [vmem:[#allocation14 + $0x16a8] sm:$0xff]  ;;  %v15262_v9 = vcombine.low %v6043_v59, %v6055_v4 }
 0x907   : > { %10357 = vmatprep.subr.bf16.mxu1 %v15023_v19  ;;  %v15263_v19 = vcombine.high %v6043_v59, %v6055_v4  ;;  %v6031_v47 = vld [vmem:[#allocation14 + $0x1708] sm:$0xff] }
 0x908   : > { %v15239_v29 = vcombine.high %v6019_v7, %v6031_v47  ;;  %v5611_v12 = vld [vmem:[#allocation14 + $0x9e8] sm:$0xff]  ;;  %v15238_v16 = vcombine.low %v6019_v7, %v6031_v47 }
 0x909   : > { %10317 = vmatpush1.bf16.msra.mxu0 %v14638_v10  ;;  %v14855_v10 = vcombine.high %v5635_v43, %v5647_v45 }
 0x90a   : > { %10358 = vmatpush1.bf16.msra.mxu1 %v15022_v13  ;;  %10318 = vmatprep.subr.bf16.mxu0 %v14615_v14  ;;  %v5623_v13 = vld [vmem:[#allocation14 + $0xa48] sm:$0xff] }
 0x90b   : > { %10359 = vmatprep.subr.bf16.mxu1 %v14999_v22  ;;  %v5995_v14 = vld [vmem:[#allocation14 + $0x15e8] sm:$0xff]  ;;  %v14831_v23 = vcombine.high %v5611_v12, %v5623_v13  ;;  %v14830_v31 = vcombine.low %v5611_v12, %v5623_v13 }
 0x90c   : > { %v6007_v22 = vld [vmem:[#allocation14 + $0x1648] sm:$0xff] }
 0x90d   : > { %10319 = vmatpush1.bf16.msra.mxu0 %v14614_v18  ;;  %v15215_v17 = vcombine.high %v5995_v14, %v6007_v22  ;;  %v5587_v18 = vld [vmem:[#allocation14 + $0x928] sm:$0xff]  ;;  %v15214_v32 = vcombine.low %v5995_v14, %v6007_v22 }
 0x90e   : > { %10360 = vmatpush1.bf16.msra.mxu1 %v14998_v25  ;;  %10320 = vmatprep.subr.bf16.mxu0 %v14591_v27  ;;  %v5599_v25 = vld [vmem:[#allocation14 + $0x988] sm:$0xff] }
 0x90f   : > { %10361 = vmatprep.subr.bf16.mxu1 %v14975_v28  ;;  %v5971_v27 = vld [vmem:[#allocation14 + $0x1528] sm:$0xff]  ;;  %v14807_v33 = vcombine.high %v5587_v18, %v5599_v25  ;;  %v14806_v39 = vcombine.low %v5587_v18, %v5599_v25  ;;  %v5840_v18 = vld [vmem:[#allocation14 + $0x1110] sm:$0xff] }
 0x910   : > { %v5983_v28 = vld [vmem:[#allocation14 + $0x1588] sm:$0xff] }
 0x911   : > { %10321 = vmatpush1.bf16.msra.mxu0 %v14590_v35  ;;  %v15191_v34 = vcombine.high %v5971_v27, %v5983_v28  ;;  %v5563_v35 = vld [vmem:[#allocation14 + $0x868] sm:$0xff]  ;;  %v15190_v41 = vcombine.low %v5971_v27, %v5983_v28  ;;  %v5420_v28 = vld [vmem:[#allocation14 + $0x3f0] sm:$0xff] }
 0x912   : > { %10362 = vmatpush1.bf16.msra.mxu1 %v14974_v36  ;;  %10322 = vmatprep.subr.bf16.mxu0 %v14567_v37  ;;  %v5575_v36 = vld [vmem:[#allocation14 + $0x8c8] sm:$0xff] }
 0x913   : > { %10363 = vmatprep.subr.bf16.mxu1 %v14951_v38  ;;  %v5947_v37 = vld [vmem:[#allocation14 + $0x1468] sm:$0xff]  ;;  %v14783_v60 = vcombine.high %v5563_v35, %v5575_v36  ;;  %v14782_v11 = vcombine.low %v5563_v35, %v5575_v36  ;;  %v5816_v35 = vld [vmem:[#allocation14 + $0x1050] sm:$0xff] }
 0x914   : > { %v5959_v38 = vld [vmem:[#allocation14 + $0x14c8] sm:$0xff] }
 0x915   : > { %10323 = vmatpush1.bf16.msra.mxu0 %v14566_v49  ;;  %v15167_v2 = vcombine.high %v5947_v37, %v5959_v38  ;;  %v5539_v49 = vld [vmem:[#allocation14 + $0x7a8] sm:$0xff]  ;;  %v15166_v30 = vcombine.low %v5947_v37, %v5959_v38 }
 0x916   : > { %10364 = vmatpush1.bf16.msra.mxu1 %v14950_v50  ;;  %10324 = vmatprep.subr.bf16.mxu0 %v14543_v3  ;;  %v5551_v50 = vld [vmem:[#allocation14 + $0x808] sm:$0xff] }
 0x917   : > { %10365 = vmatprep.subr.bf16.mxu1 %v14927_v61  ;;  %v5923_v3 = vld [vmem:[#allocation14 + $0x13a8] sm:$0xff]  ;;  %v14759_v52 = vcombine.high %v5539_v49, %v5551_v50  ;;  %v14758_v20 = vcombine.low %v5539_v49, %v5551_v50  ;;  %v5396_v50 = vld [vmem:[#allocation14 + $0x330] sm:$0xff] }
 0x918   : > { %v5935_v61 = vld [vmem:[#allocation14 + $0x1408] sm:$0xff] }
 0x919   : > { %10325 = vmatpush1.bf16.msra.mxu0 %v14542_v46  ;;  %v15143_v54 = vcombine.high %v5923_v3, %v5935_v61  ;;  %v5515_v46 = vld [vmem:[#allocation14 + $0x6e8] sm:$0xff]  ;;  %v15142_v1 = vcombine.low %v5923_v3, %v5935_v61  ;;  %v5408_v3 = vld [vmem:[#allocation14 + $0x390] sm:$0xff] }
 0x91a   : > { %10366 = vmatpush1.bf16.msra.mxu1 %v14926_v55  ;;  %10326 = vmatprep.subr.bf16.mxu0 %v14519_v56  ;;  %v5527_v55 = vld [vmem:[#allocation14 + $0x748] sm:$0xff] }
 0x91b   : > { %10367 = vmatprep.subr.bf16.mxu1 %v14903_v62  ;;  %v5899_v56 = vld [vmem:[#allocation14 + $0x12e8] sm:$0xff]  ;;  %v14735_v59 = vcombine.high %v5515_v46, %v5527_v55  ;;  %v14734_v43 = vcombine.low %v5515_v46, %v5527_v55 }
 0x91c   : > { %v5911_v62 = vld [vmem:[#allocation14 + $0x1348] sm:$0xff] }
 0x91d   : > { %10327 = vmatpush1.bf16.msra.mxu0 %v14518_v51  ;;  %v15119_v4 = vcombine.high %v5899_v56, %v5911_v62  ;;  %v5491_v51 = vld [vmem:[#allocation14 + $0x628] sm:$0xff]  ;;  %v15118_v45 = vcombine.low %v5899_v56, %v5911_v62  ;;  %v14617_v62 = vcombine.high %v5396_v50, %v5408_v3 }
 0x91e   : > { %10368 = vmatpush1.bf16.msra.mxu1 %v14902_v6  ;;  %10328 = vmatprep.subr.bf16.mxu0 %v14879_v44  ;;  %v5503_v6 = vld [vmem:[#allocation14 + $0x688] sm:$0xff] }
 0x91f   : > { %10369 = vmatprep.subr.bf16.mxu1 %v15263_v19  ;;  %v5875_v44 = vld [vmem:[#allocation14 + $0x1228] sm:$0xff]  ;;  %v14711_v7 = vcombine.high %v5491_v51, %v5503_v6  ;;  %v14710_v12 = vcombine.low %v5491_v51, %v5503_v6  ;;  %v5756_v51 = vld [vmem:[#allocation14 + $0xe70] sm:$0xff] }
 0x920   : > { %v5887_v19 = vld [vmem:[#allocation14 + $0x1288] sm:$0xff]  ;;  %v5768_v6 = vld [vmem:[#allocation14 + $0xed0] sm:$0xff] }
 0x921   : > { %10329 = vmatpush2.bf16.msra.mxu0 %v14878_v8  ;;  %v15095_v47 = vcombine.high %v5875_v44, %v5887_v19  ;;  %v5468_v8 = vld [vmem:[#allocation14 + $0x570] sm:$0xff]  ;;  %v15094_v13 = vcombine.low %v5875_v44, %v5887_v19  ;;  %v14616_v44 = vcombine.low %v5396_v50, %v5408_v3 }
 0x922   : > { %10370 = vmatpush2.bf16.msra.mxu1 %v15262_v9  ;;  %10330 = vmatprep.subr.bf16.mxu0 %v14855_v10  ;;  %v5480_v9 = vld [vmem:[#allocation14 + $0x5d0] sm:$0xff] }
 0x923   : > { %10371 = vmatprep.subr.bf16.mxu1 %v15239_v29  ;;  %v5852_v10 = vld [vmem:[#allocation14 + $0x1170] sm:$0xff]  ;;  %v14689_v14 = vcombine.high %v5468_v8, %v5480_v9 }
 0x924   : > { %v5864_v29 = vld [vmem:[#allocation14 + $0x11d0] sm:$0xff] }
 0x925   : > { %10331 = vmatpush2.bf16.msra.mxu0 %v14854_v15  ;;  %v15073_v22 = vcombine.high %v5852_v10, %v5864_v29  ;;  %v5444_v15 = vld [vmem:[#allocation14 + $0x4b0] sm:$0xff]  ;;  %v15072_v25 = vcombine.low %v5852_v10, %v5864_v29  ;;  %v14976_v29 = vcombine.low %v5756_v51, %v5768_v6 }
 0x926   : > { %10372 = vmatpush2.bf16.msra.mxu1 %v15238_v16  ;;  %10332 = vmatprep.subr.bf16.mxu0 %v14831_v23  ;;  %v5456_v16 = vld [vmem:[#allocation14 + $0x510] sm:$0xff]  ;;  %v14688_v23 = vcombine.low %v5468_v8, %v5480_v9 }
 0x927   : > { %10373 = vmatprep.subr.bf16.mxu1 %v15215_v17  ;;  %v5828_v17 = vld [vmem:[#allocation14 + $0x10b0] sm:$0xff]  ;;  %v14665_v27 = vcombine.high %v5444_v15, %v5456_v16  ;;  %v14664_v37 = vcombine.low %v5444_v15, %v5456_v16 }
 0x928   : > { %v5732_v8 = vld [vmem:[#allocation14 + $0xdb0] sm:$0xff] }
 0x929   : > { %10333 = vmatpush2.bf16.msra.mxu0 %v14830_v31  ;;  %v5432_v31 = vld [vmem:[#allocation14 + $0x450] sm:$0xff] }
 0x92a   : > { %10374 = vmatpush2.bf16.msra.mxu1 %v15214_v32  ;;  %10334 = vmatprep.subr.bf16.mxu0 %v14807_v33  ;;  %v15049_v33 = vcombine.high %v5828_v17, %v5840_v18  ;;  %v14640_v46 = vcombine.low %v5420_v28, %v5432_v31  ;;  %v5744_v9 = vld [vmem:[#allocation14 + $0xe10] sm:$0xff] }
 0x92b   : > { %10375 = vmatprep.subr.bf16.mxu1 %v15191_v34  ;;  %v5804_v34 = vld [vmem:[#allocation14 + $0xff0] sm:$0xff] }
 0x92c   : > { %v15025_v49 = vcombine.high %v5804_v34, %v5816_v35  ;;  %v15024_v56 = vcombine.low %v5804_v34, %v5816_v35  ;;  %v5708_v15 = vld [vmem:[#allocation14 + $0xcf0] sm:$0xff] }
 0x92d   : > { %10335 = vmatpush2.bf16.msra.mxu0 %v14806_v39  ;;  %v5720_v16 = vld [vmem:[#allocation14 + $0xd50] sm:$0xff] }
 0x92e   : > { %10376 = vmatpush2.bf16.msra.mxu1 %v15190_v41  ;;  %10336 = vmatprep.subr.bf16.mxu0 %v14783_v60  ;;  %v15048_v41 = vcombine.low %v5828_v17, %v5840_v18  ;;  %v14641_v60 = vcombine.high %v5420_v28, %v5432_v31  ;;  %v14952_v17 = vcombine.low %v5732_v8, %v5744_v9  ;;  %v5312_v28 = vld [vmem:[#allocation14 + $0x90] sm:$0xff] }
 0x92f   : > { %10377 = vmatprep.subr.bf16.mxu1 %v15167_v2  ;;  %v5684_v31 = vld [vmem:[#allocation14 + $0xc30] sm:$0xff]  ;;  %v14928_v34 = vcombine.low %v5708_v15, %v5720_v16 }
 0x931   : > { %10337 = vmatpush2.bf16.msra.mxu0 %v14782_v11 }
 0x932   : > { %10378 = vmatpush2.bf16.msra.mxu1 %v15166_v30  ;;  %10338 = vmatprep.subr.bf16.mxu0 %v14759_v52  ;;  %v5780_v30 = vld [vmem:[#allocation14 + $0xf30] sm:$0xff] }
 0x933   : > { %10379 = vmatprep.subr.bf16.mxu1 %v15143_v54  ;;  %v5792_v52 = vld [vmem:[#allocation14 + $0xf90] sm:$0xff] }
 0x934   : > { %v15000_v19 = vcombine.low %v5780_v30, %v5792_v52 }
 0x935   : > { %10339 = vmatpush2.bf16.msra.mxu0 %v14758_v20 }
 0x936   : > { %10380 = vmatpush2.bf16.msra.mxu1 %v15142_v1  ;;  %10340 = vmatprep.subr.bf16.mxu0 %v14735_v59  ;;  %v15001_v1 = vcombine.high %v5780_v30, %v5792_v52  ;;  %v5372_v59 = vld [vmem:[#allocation14 + $0x270] sm:$0xff] }
 0x937   : > { %10381 = vmatprep.subr.bf16.mxu1 %v15119_v4  ;;  %v5384_v4 = vld [vmem:[#allocation14 + $0x2d0] sm:$0xff] }
 0x938   : > { %v14592_v10 = vcombine.low %v5372_v59, %v5384_v4  ;;  %v5648_v30 = vld [vmem:[#allocation14 + $0xb10] sm:$0xff] }
 0x939   : > { %10341 = vmatpush2.bf16.msra.mxu0 %v14734_v43  ;;  %v14593_v43 = vcombine.high %v5372_v59, %v5384_v4  ;;  %v6020_v52 = vld [vmem:[#allocation14 + $0x16b0] sm:$0xff] }
 0x93a   : > { %10382 = vmatpush2.bf16.msra.mxu1 %v15118_v45  ;;  %10342 = vmatprep.subr.bf16.mxu0 %v14711_v7  ;;  %v14977_v45 = vcombine.high %v5756_v51, %v5768_v6  ;;  %v5348_v7 = vld [vmem:[#allocation14 + $0x1b0] sm:$0xff] }
 0x93b   : > { %10383 = vmatprep.subr.bf16.mxu1 %v15095_v47  ;;  %v5360_v47 = vld [vmem:[#allocation14 + $0x210] sm:$0xff] }
 0x93c   : > { %v5996_v59 = vld [vmem:[#allocation14 + $0x15f0] sm:$0xff] }
 0x93d   : > { %10343 = vmatpush2.bf16.msra.mxu0 %v14710_v12  ;;  %v14569_v12 = vcombine.high %v5348_v7, %v5360_v47  ;;  %v6008_v4 = vld [vmem:[#allocation14 + $0x1650] sm:$0xff] }
 0x93e   : > { %10384 = vmatpush2.bf16.msra.mxu1 %v15094_v13  ;;  %10394 = vmatprep.subr.bf16.mxu0 %v14689_v14  ;;  %v14953_v13 = vcombine.high %v5732_v8, %v5744_v9  ;;  %v5324_v14 = vld [vmem:[#allocation14 + $0xf0] sm:$0xff]  ;;  %v15216_v9 = vcombine.low %v5996_v59, %v6008_v4 }
 0x93f   : > { %10435 = vmatprep.subr.bf16.mxu1 %v15073_v22  ;;  %v5336_v22 = vld [vmem:[#allocation14 + $0x150] sm:$0xff] }
 0x940   : > { %v10100_v32 = vpop.f32.mrf.mxu0  ;;  %10345 = vmatmul.mubr.bf16.vlgmr.msra.gmra.mxu0 %v18184_v42  ;;  %v14545_v18 = vcombine.high %v5324_v14, %v5336_v22 }
 0x941   : > { %v10141_v36 = vpop.f32.mrf.mxu1  ;;  %10386 = vmatmul.mubr.bf16.vlgmr.msra.gmra.mxu1 %v18188_v26  ;;  %10395 = vmatpush1.bf16.msra.mxu0 %v14688_v23  ;;  %v14568_v23 = vcombine.low %v5348_v7, %v5360_v47  ;;  %v5972_v7 = vld [vmem:[#allocation14 + $0x1530] sm:$0xff] }
 0x942   : > { %v18224_v38 = vadd.f32 %v10141_v36, %v10100_v32  ;;  %10426 = vmatprep.mubr.bf16.mxu0 %v18186_v21  ;;  %10436 = vmatpush1.bf16.msra.mxu1 %v15072_v25  ;;  %v10102_v39 = vpop.f32.mrf.mxu0  ;;  %v14929_v25 = vcombine.high %v5708_v15, %v5720_v16  ;;  %v5696_v32 = vld [vmem:[#allocation14 + $0xc90] sm:$0xff] }
 0x943   : > { %10467 = vmatprep.mubr.bf16.mxu1 %v18190_v24  ;;  %v10143_v2 = vpop.f32.mrf.mxu1  ;;  %10396 = vmatprep.subr.bf16.mxu0 %v14665_v27  ;;  %v5300_v27 = vld [vmem:[#allocation14 + $0x30] sm:$0xff]  ;;  %v14905_v36 = vcombine.high %v5684_v31, %v5696_v32 }
 0x944   : > { %v18228_v61 = vadd.f32 %v10143_v2, %v10102_v39  ;;  %v10104_v11 = vpop.f32.mrf.mxu0  ;;  %10437 = vmatprep.subr.bf16.mxu1 %v15049_v33  ;;  %v14544_v33 = vcombine.low %v5324_v14, %v5336_v22  ;;  %v14521_v35 = vcombine.high %v5300_v27, %v5312_v28  ;;  %v5672_v39 = vld [vmem:[#allocation14 + $0xbd0] sm:$0xff]  ;;  %v14520_v2 = vcombine.low %v5300_v27, %v5312_v28 }
 0x945   : > { %v10145_v54 = vpop.f32.mrf.mxu1  ;;  %10397 = vmatpush1.bf16.msra.mxu0 %v14664_v37  ;;  %v5660_v37 = vld [vmem:[#allocation14 + $0xb70] sm:$0xff] }
 0x946   : > { %10438 = vmatpush1.bf16.msra.mxu1 %v15048_v41  ;;  %v10105_v55 = vpop.f32.mrf.mxu0  ;;  %10398 = vmatprep.subr.bf16.mxu0 %v14641_v60  ;;  %v6044_v41 = vld [vmem:[#allocation14 + $0x1770] sm:$0xff]  ;;  %v14881_v50 = vcombine.high %v5660_v37, %v5672_v39 }
 0x947   : > { %v10146_v20 = vpop.f32.mrf.mxu1  ;;  %10439 = vmatprep.subr.bf16.mxu1 %v15025_v49  ;;  %v6056_v60 = vld [vmem:[#allocation14 + $0x17d0] sm:$0xff]  ;;  %v14904_v49 = vcombine.low %v5684_v31, %v5696_v32 }
 0x948   : > { %v15265_v3 = vcombine.high %v6044_v41, %v6056_v60  ;;  %v5636_v11 = vld [vmem:[#allocation14 + $0xab0] sm:$0xff]  ;;  %v15264_v55 = vcombine.low %v6044_v41, %v6056_v60 }
 0x949   : > { %10399 = vmatpush1.bf16.msra.mxu0 %v14640_v46  ;;  %v6032_v54 = vld [vmem:[#allocation14 + $0x1710] sm:$0xff]  ;;  %v14880_v46 = vcombine.low %v5660_v37, %v5672_v39  ;;  %v14856_v51 = vcombine.low %v5636_v11, %v5648_v30 }
 0x94a   : > { %10440 = vmatpush1.bf16.msra.mxu1 %v15024_v56  ;;  %10400 = vmatprep.subr.bf16.mxu0 %v14617_v62  ;;  %v14857_v56 = vcombine.high %v5636_v11, %v5648_v30  ;;  %v15241_v62 = vcombine.high %v6020_v52, %v6032_v54  ;;  %v5612_v20 = vld [vmem:[#allocation14 + $0x9f0] sm:$0xff]  ;;  %v15240_v6 = vcombine.low %v6020_v52, %v6032_v54 }
 0x94b   : > { %10441 = vmatprep.subr.bf16.mxu1 %v15001_v1  ;;  %v5624_v1 = vld [vmem:[#allocation14 + $0xa50] sm:$0xff] }
 0x94c   : > { %v5984_v47 = vld [vmem:[#allocation14 + $0x1590] sm:$0xff]  ;;  %v14832_v8 = vcombine.low %v5612_v20, %v5624_v1 }
 0x94d   : > { %10401 = vmatpush1.bf16.msra.mxu0 %v14616_v44  ;;  %v14833_v44 = vcombine.high %v5612_v20, %v5624_v1  ;;  %v5948_v14 = vld [vmem:[#allocation14 + $0x1470] sm:$0xff]  ;;  %v15192_v16 = vcombine.low %v5972_v7, %v5984_v47  ;;  %v5853_v20 = vld [vmem:[#allocation14 + $0x1178] sm:$0xff] }
 0x94e   : > { %10442 = vmatpush1.bf16.msra.mxu1 %v15000_v19  ;;  %10402 = vmatprep.subr.bf16.mxu0 %v14593_v43  ;;  %v15217_v19 = vcombine.high %v5996_v59, %v6008_v4  ;;  %v5588_v43 = vld [vmem:[#allocation14 + $0x930] sm:$0xff]  ;;  %v5865_v1 = vld [vmem:[#allocation14 + $0x11d8] sm:$0xff] }
 0x94f   : > { %10443 = vmatprep.subr.bf16.mxu1 %v14977_v45  ;;  %v5600_v45 = vld [vmem:[#allocation14 + $0x990] sm:$0xff] }
 0x950   : > { %v5960_v22 = vld [vmem:[#allocation14 + $0x14d0] sm:$0xff]  ;;  %v14808_v15 = vcombine.low %v5588_v43, %v5600_v45 }
 0x951   : > { %10403 = vmatpush1.bf16.msra.mxu0 %v14592_v10  ;;  %v14809_v10 = vcombine.high %v5588_v43, %v5600_v45  ;;  %v5924_v27 = vld [vmem:[#allocation14 + $0x13b0] sm:$0xff]  ;;  %v15168_v32 = vcombine.low %v5948_v14, %v5960_v22  ;;  %v5829_v45 = vld [vmem:[#allocation14 + $0x10b8] sm:$0xff] }
 0x952   : > { %10444 = vmatpush1.bf16.msra.mxu1 %v14976_v29  ;;  %10404 = vmatprep.subr.bf16.mxu0 %v14569_v12  ;;  %v15193_v29 = vcombine.high %v5972_v7, %v5984_v47  ;;  %v5564_v12 = vld [vmem:[#allocation14 + $0x870] sm:$0xff]  ;;  %v5841_v7 = vld [vmem:[#allocation14 + $0x1118] sm:$0xff]  ;;  %v15074_v47 = vcombine.low %v5853_v20, %v5865_v1 }
 0x953   : > { %10445 = vmatprep.subr.bf16.mxu1 %v14953_v13  ;;  %v5576_v13 = vld [vmem:[#allocation14 + $0x8d0] sm:$0xff] }
 0x954   : > { %v5936_v28 = vld [vmem:[#allocation14 + $0x1410] sm:$0xff]  ;;  %v14784_v31 = vcombine.low %v5564_v12, %v5576_v13 }
 0x955   : > { %10405 = vmatpush1.bf16.msra.mxu0 %v14568_v23  ;;  %v14785_v23 = vcombine.high %v5564_v12, %v5576_v13  ;;  %v5900_v37 = vld [vmem:[#allocation14 + $0x12f0] sm:$0xff]  ;;  %v15144_v60 = vcombine.low %v5924_v27, %v5936_v28  ;;  %v15051_v12 = vcombine.high %v5829_v45, %v5841_v7  ;;  %v5805_v13 = vld [vmem:[#allocation14 + $0xff8] sm:$0xff] }
 0x956   : > { %10446 = vmatpush1.bf16.msra.mxu1 %v14952_v17  ;;  %10406 = vmatprep.subr.bf16.mxu0 %v14545_v18  ;;  %v15169_v17 = vcombine.high %v5948_v14, %v5960_v22  ;;  %v5540_v18 = vld [vmem:[#allocation14 + $0x7b0] sm:$0xff]  ;;  %v5817_v14 = vld [vmem:[#allocation14 + $0x1058] sm:$0xff] }
 0x957   : > { %10447 = vmatprep.subr.bf16.mxu1 %v14929_v25  ;;  %v5552_v25 = vld [vmem:[#allocation14 + $0x810] sm:$0xff] }
 0x958   : > { %v5912_v39 = vld [vmem:[#allocation14 + $0x1350] sm:$0xff]  ;;  %v14760_v41 = vcombine.low %v5540_v18, %v5552_v25 }
 0x959   : > { %10407 = vmatpush1.bf16.msra.mxu0 %v14544_v33  ;;  %v14761_v33 = vcombine.high %v5540_v18, %v5552_v25  ;;  %v5876_v11 = vld [vmem:[#allocation14 + $0x1230] sm:$0xff]  ;;  %v15120_v54 = vcombine.low %v5900_v37, %v5912_v39 }
 0x95a   : > { %10448 = vmatpush1.bf16.msra.mxu1 %v14928_v34  ;;  %10408 = vmatprep.subr.bf16.mxu0 %v14521_v35  ;;  %v15145_v34 = vcombine.high %v5924_v27, %v5936_v28  ;;  %v5516_v35 = vld [vmem:[#allocation14 + $0x6f0] sm:$0xff]  ;;  %v15027_v27 = vcombine.high %v5805_v13, %v5817_v14  ;;  %v5397_v28 = vld [vmem:[#allocation14 + $0x338] sm:$0xff] }
 0x95b   : > { %10449 = vmatprep.subr.bf16.mxu1 %v14905_v36  ;;  %v5528_v36 = vld [vmem:[#allocation14 + $0x750] sm:$0xff] }
 0x95c   : > { %v5888_v30 = vld [vmem:[#allocation14 + $0x1290] sm:$0xff]  ;;  %v14736_v52 = vcombine.low %v5516_v35, %v5528_v36 }
 0x95d   : > { %10409 = vmatpush1.bf16.msra.mxu0 %v14520_v2  ;;  %v14737_v2 = vcombine.high %v5516_v35, %v5528_v36  ;;  %v15096_v4 = vcombine.low %v5876_v11, %v5888_v30  ;;  %v5793_v35 = vld [vmem:[#allocation14 + $0xf98] sm:$0xff] }
 0x95e   : > { %10450 = vmatpush1.bf16.msra.mxu1 %v14904_v49  ;;  %10410 = vmatprep.subr.bf16.mxu0 %v14881_v50  ;;  %v15121_v49 = vcombine.high %v5900_v37, %v5912_v39  ;;  %v5492_v50 = vld [vmem:[#allocation14 + $0x630] sm:$0xff] }
 0x95f   : > { %10451 = vmatprep.subr.bf16.mxu1 %v15265_v3  ;;  %v5504_v3 = vld [vmem:[#allocation14 + $0x690] sm:$0xff] }
 0x960   : > { %v14712_v59 = vcombine.low %v5492_v50, %v5504_v3 }
 0x961   : > { %10411 = vmatpush2.bf16.msra.mxu0 %v14880_v46  ;;  %v14713_v46 = vcombine.high %v5492_v50, %v5504_v3  ;;  %v5373_v50 = vld [vmem:[#allocation14 + $0x278] sm:$0xff] }
 0x962   : > { %10452 = vmatpush2.bf16.msra.mxu1 %v15264_v55  ;;  %10412 = vmatprep.subr.bf16.mxu0 %v14857_v56  ;;  %v15097_v55 = vcombine.high %v5876_v11, %v5888_v30  ;;  %v5469_v56 = vld [vmem:[#allocation14 + $0x578] sm:$0xff] }
 0x963   : > { %10453 = vmatprep.subr.bf16.mxu1 %v15241_v62  ;;  %v5481_v62 = vld [vmem:[#allocation14 + $0x5d8] sm:$0xff] }
 0x964   : > { %v14690_v43 = vcombine.low %v5469_v56, %v5481_v62  ;;  %v5385_v3 = vld [vmem:[#allocation14 + $0x2d8] sm:$0xff] }
 0x965   : > { %10413 = vmatpush2.bf16.msra.mxu0 %v14856_v51  ;;  %v14691_v51 = vcombine.high %v5469_v56, %v5481_v62  ;;  %v5757_v11 = vld [vmem:[#allocation14 + $0xe78] sm:$0xff] }
 0x966   : > { %10454 = vmatpush2.bf16.msra.mxu1 %v15240_v6  ;;  %10414 = vmatprep.subr.bf16.mxu0 %v14833_v44  ;;  %v15075_v6 = vcombine.high %v5853_v20, %v5865_v1  ;;  %v5445_v44 = vld [vmem:[#allocation14 + $0x4b8] sm:$0xff] }
 0x967   : > { %10455 = vmatprep.subr.bf16.mxu1 %v15217_v19  ;;  %v5457_v19 = vld [vmem:[#allocation14 + $0x518] sm:$0xff] }
 0x968   : > { %v5769_v30 = vld [vmem:[#allocation14 + $0xed8] sm:$0xff] }
 0x969   : > { %10415 = vmatpush2.bf16.msra.mxu0 %v14832_v8  ;;  %v14667_v8 = vcombine.high %v5445_v44, %v5457_v19  ;;  %v5349_v56 = vld [vmem:[#allocation14 + $0x1b8] sm:$0xff] }
 0x96a   : > { %10456 = vmatpush2.bf16.msra.mxu1 %v15216_v9  ;;  %10416 = vmatprep.subr.bf16.mxu0 %v14809_v10  ;;  %v5421_v9 = vld [vmem:[#allocation14 + $0x3f8] sm:$0xff] }
 0x96b   : > { %10457 = vmatprep.subr.bf16.mxu1 %v15193_v29  ;;  %v5433_v10 = vld [vmem:[#allocation14 + $0x458] sm:$0xff] }
 0x96c   : > { %v14643_v18 = vcombine.high %v5421_v9, %v5433_v10  ;;  %v14642_v37 = vcombine.low %v5421_v9, %v5433_v10  ;;  %v5361_v62 = vld [vmem:[#allocation14 + $0x218] sm:$0xff] }
 0x96d   : > { %10417 = vmatpush2.bf16.msra.mxu0 %v14808_v15  ;;  %v14666_v15 = vcombine.low %v5445_v44, %v5457_v19  ;;  %v5733_v20 = vld [vmem:[#allocation14 + $0xdb8] sm:$0xff] }
 0x96e   : > { %10458 = vmatpush2.bf16.msra.mxu1 %v15192_v16  ;;  %10418 = vmatprep.subr.bf16.mxu0 %v14785_v23  ;;  %v5745_v1 = vld [vmem:[#allocation14 + $0xe18] sm:$0xff] }
 0x96f   : > { %10459 = vmatprep.subr.bf16.mxu1 %v15169_v17  ;;  %v15050_v17 = vcombine.low %v5829_v45, %v5841_v7  ;;  %v5325_v44 = vld [vmem:[#allocation14 + $0xf8] sm:$0xff]  ;;  %v14570_v7 = vcombine.low %v5349_v56, %v5361_v62 }
 0x970   : > { %v5337_v19 = vld [vmem:[#allocation14 + $0x158] sm:$0xff] }
 0x971   : > { %10419 = vmatpush2.bf16.msra.mxu0 %v14784_v31  ;;  %v5409_v31 = vld [vmem:[#allocation14 + $0x398] sm:$0xff] }
 0x972   : > { %10460 = vmatpush2.bf16.msra.mxu1 %v15168_v32  ;;  %10420 = vmatprep.subr.bf16.mxu0 %v14761_v33  ;;  %v5721_v45 = vld [vmem:[#allocation14 + $0xd58] sm:$0xff] }
 0x973   : > { %10461 = vmatprep.subr.bf16.mxu1 %v15145_v34  ;;  %v5781_v34 = vld [vmem:[#allocation14 + $0xf38] sm:$0xff] }
 0x974   : > { %v5301_v10 = vld [vmem:[#allocation14 + $0x38] sm:$0xff] }
 0x975   : > { %10421 = vmatpush2.bf16.msra.mxu0 %v14760_v41  ;;  %v15026_v41 = vcombine.low %v5805_v13, %v5817_v14  ;;  %v5697_v13 = vld [vmem:[#allocation14 + $0xc98] sm:$0xff]  ;;  %v14546_v14 = vcombine.low %v5325_v44, %v5337_v19 }
 0x976   : > { %10462 = vmatpush2.bf16.msra.mxu1 %v15144_v60  ;;  %10422 = vmatprep.subr.bf16.mxu0 %v14737_v2  ;;  %v14619_v60 = vcombine.high %v5397_v28, %v5409_v31 }
 0x977   : > { %10463 = vmatprep.subr.bf16.mxu1 %v15121_v49  ;;  %v15003_v49 = vcombine.high %v5781_v34, %v5793_v35 }
 0x979   : > { %10423 = vmatpush2.bf16.msra.mxu0 %v14736_v52  ;;  %v14618_v52 = vcombine.low %v5397_v28, %v5409_v31 }
 0x97a   : > { %10464 = vmatpush2.bf16.msra.mxu1 %v15120_v54  ;;  %10424 = vmatprep.subr.bf16.mxu0 %v14713_v46  ;;  %v15002_v54 = vcombine.low %v5781_v34, %v5793_v35  ;;  %v14595_v46 = vcombine.high %v5373_v50, %v5385_v3  ;;  %v5637_v35 = vld [vmem:[#allocation14 + $0xab8] sm:$0xff] }
 0x97b   : > { %10465 = vmatprep.subr.bf16.mxu1 %v15097_v55  ;;  %v14979_v55 = vcombine.high %v5757_v11, %v5769_v30 }
 0x97d   : > { %10425 = vmatpush2.bf16.msra.mxu0 %v14712_v59  ;;  %v14594_v59 = vcombine.low %v5373_v50, %v5385_v3  ;;  %v5613_v50 = vld [vmem:[#allocation14 + $0x9f8] sm:$0xff] }
 0x97e   : > { %10466 = vmatpush2.bf16.msra.mxu1 %v15096_v4  ;;  %10476 = vmatprep.subr.bf16.mxu0 %v14691_v51  ;;  %v14978_v4 = vcombine.low %v5757_v11, %v5769_v30  ;;  %v14571_v51 = vcombine.high %v5349_v56, %v5361_v62  ;;  %v5625_v3 = vld [vmem:[#allocation14 + $0xa58] sm:$0xff] }
 0x97f   : > { %10517 = vmatprep.subr.bf16.mxu1 %v15075_v6  ;;  %v14955_v6 = vcombine.high %v5733_v20, %v5745_v1  ;;  %v5997_v11 = vld [vmem:[#allocation14 + $0x15f8] sm:$0xff] }
 0x980   : > { %v10182_v29 = vpop.f32.mrf.mxu0  ;;  %10427 = vmatmul.mubr.bf16.vlgmr.msra.gmra.mxu0 %v18184_v42  ;;  %v6009_v30 = vld [vmem:[#allocation14 + $0x1658] sm:$0xff] }
 0x981   : > { %v10223_v22 = vpop.f32.mrf.mxu1  ;;  %10468 = vmatmul.mubr.bf16.vlgmr.msra.gmra.mxu1 %v18188_v26  ;;  %10477 = vmatpush1.bf16.msra.mxu0 %v14690_v43  ;;  %v5709_v43 = vld [vmem:[#allocation14 + $0xcf8] sm:$0xff] }
 0x982   : > { %v18232_v16 = vadd.f32 %v10223_v22, %v10182_v29  ;;  %10508 = vmatprep.mubr.bf16.mxu0 %v18186_v21  ;;  %10518 = vmatpush1.bf16.msra.mxu1 %v15074_v47  ;;  %v10184_v23 = vpop.f32.mrf.mxu0  ;;  %v14954_v47 = vcombine.low %v5733_v20, %v5745_v1  ;;  %v14931_v9 = vcombine.high %v5709_v43, %v5721_v45  ;;  %v5313_v29 = vld [vmem:[#allocation14 + $0x98] sm:$0xff] }
 0x983   : > { %10549 = vmatprep.mubr.bf16.mxu1 %v18190_v24  ;;  %v10225_v25 = vpop.f32.mrf.mxu1  ;;  %10478 = vmatprep.subr.bf16.mxu0 %v14667_v8  ;;  %v14547_v8 = vcombine.high %v5325_v44, %v5337_v19  ;;  %v14930_v22 = vcombine.low %v5709_v43, %v5721_v45  ;;  %v14522_v28 = vcombine.low %v5301_v10, %v5313_v29  ;;  %v5589_v56 = vld [vmem:[#allocation14 + $0x938] sm:$0xff] }
 0x984   : > { %v18236_v32 = vadd.f32 %v10225_v25, %v10184_v23  ;;  %v10186_v33 = vpop.f32.mrf.mxu0  ;;  %10519 = vmatprep.subr.bf16.mxu1 %v15051_v12  ;;  %v5685_v12 = vld [vmem:[#allocation14 + $0xc38] sm:$0xff] }
 0x985   : > { %v10227_v36 = vpop.f32.mrf.mxu1  ;;  %10479 = vmatpush1.bf16.msra.mxu0 %v14666_v15  ;;  %v14523_v15 = vcombine.high %v5301_v10, %v5313_v29  ;;  %v14907_v23 = vcombine.high %v5685_v12, %v5697_v13  ;;  %v6045_v25 = vld [vmem:[#allocation14 + $0x1778] sm:$0xff]  ;;  %v14906_v31 = vcombine.low %v5685_v12, %v5697_v13 }
 0x986   : > { %10520 = vmatpush1.bf16.msra.mxu1 %v15050_v17  ;;  %v10187_v39 = vpop.f32.mrf.mxu0  ;;  %10480 = vmatprep.subr.bf16.mxu0 %v14643_v18  ;;  %v5661_v17 = vld [vmem:[#allocation14 + $0xb78] sm:$0xff] }
 0x987   : > { %v10228_v2 = vpop.f32.mrf.mxu1  ;;  %10521 = vmatprep.subr.bf16.mxu1 %v15027_v27  ;;  %v5673_v18 = vld [vmem:[#allocation14 + $0xbd8] sm:$0xff] }
 0x988   : > { %v6057_v27 = vld [vmem:[#allocation14 + $0x17d8] sm:$0xff]  ;;  %v14883_v33 = vcombine.high %v5661_v17, %v5673_v18 }
 0x989   : > { %10481 = vmatpush1.bf16.msra.mxu0 %v14642_v37  ;;  %v15267_v34 = vcombine.high %v6045_v25, %v6057_v27  ;;  %v5649_v36 = vld [vmem:[#allocation14 + $0xb18] sm:$0xff] }
 0x98a   : > { %10522 = vmatpush1.bf16.msra.mxu1 %v15026_v41  ;;  %10482 = vmatprep.subr.bf16.mxu0 %v14619_v60  ;;  %v6021_v37 = vld [vmem:[#allocation14 + $0x16b8] sm:$0xff]  ;;  %v14882_v41 = vcombine.low %v5661_v17, %v5673_v18  ;;  %v15266_v60 = vcombine.low %v6045_v25, %v6057_v27  ;;  %v14859_v2 = vcombine.high %v5637_v35, %v5649_v36 }
 0x98b   : > { %10523 = vmatprep.subr.bf16.mxu1 %v15003_v49  ;;  %v6033_v39 = vld [vmem:[#allocation14 + $0x1718] sm:$0xff] }
 0x98c   : > { %v15243_v49 = vcombine.high %v6021_v37, %v6033_v39  ;;  %v5601_v62 = vld [vmem:[#allocation14 + $0x998] sm:$0xff] }
 0x98d   : > { %10483 = vmatpush1.bf16.msra.mxu0 %v14618_v52  ;;  %v14858_v52 = vcombine.low %v5637_v35, %v5649_v36  ;;  %v5973_v20 = vld [vmem:[#allocation14 + $0x1538] sm:$0xff] }
 0x98e   : > { %10524 = vmatpush1.bf16.msra.mxu1 %v15002_v54  ;;  %10484 = vmatprep.subr.bf16.mxu0 %v14595_v46  ;;  %v15242_v54 = vcombine.low %v6021_v37, %v6033_v39  ;;  %v14835_v46 = vcombine.high %v5613_v50, %v5625_v3  ;;  %v5985_v1 = vld [vmem:[#allocation14 + $0x1598] sm:$0xff] }
 0x98f   : > { %10525 = vmatprep.subr.bf16.mxu1 %v14979_v55  ;;  %v15219_v55 = vcombine.high %v5997_v11, %v6009_v30  ;;  %v5565_v44 = vld [vmem:[#allocation14 + $0x878] sm:$0xff] }
 0x990   : > { %v5577_v19 = vld [vmem:[#allocation14 + $0x8d8] sm:$0xff] }
 0x991   : > { %10485 = vmatpush1.bf16.msra.mxu0 %v14594_v59  ;;  %v14834_v59 = vcombine.low %v5613_v50, %v5625_v3  ;;  %v5949_v43 = vld [vmem:[#allocation14 + $0x1478] sm:$0xff]  ;;  %v5470_v50 = vld [vmem:[#allocation14 + $0x580] sm:$0xff] }
 0x992   : > { %10526 = vmatpush1.bf16.msra.mxu1 %v14978_v4  ;;  %10486 = vmatprep.subr.bf16.mxu0 %v14571_v51  ;;  %v15218_v4 = vcombine.low %v5997_v11, %v6009_v30  ;;  %v14811_v51 = vcombine.high %v5589_v56, %v5601_v62  ;;  %v5961_v45 = vld [vmem:[#allocation14 + $0x14d8] sm:$0xff]  ;;  %v5482_v3 = vld [vmem:[#allocation14 + $0x5e0] sm:$0xff] }
 0x993   : > { %10527 = vmatprep.subr.bf16.mxu1 %v14955_v6  ;;  %v15195_v6 = vcombine.high %v5973_v20, %v5985_v1  ;;  %v5541_v10 = vld [vmem:[#allocation14 + $0x7b8] sm:$0xff]  ;;  %v5854_v11 = vld [vmem:[#allocation14 + $0x1180] sm:$0xff] }
 0x994   : > { %v5553_v29 = vld [vmem:[#allocation14 + $0x818] sm:$0xff]  ;;  %v5866_v30 = vld [vmem:[#allocation14 + $0x11e0] sm:$0xff] }
 0x995   : > { %10487 = vmatpush1.bf16.msra.mxu0 %v14570_v7  ;;  %v14810_v7 = vcombine.low %v5589_v56, %v5601_v62  ;;  %v5925_v12 = vld [vmem:[#allocation14 + $0x13b8] sm:$0xff]  ;;  %v5446_v56 = vld [vmem:[#allocation14 + $0x4c0] sm:$0xff] }
 0x996   : > { %10528 = vmatpush1.bf16.msra.mxu1 %v14954_v47  ;;  %10488 = vmatprep.subr.bf16.mxu0 %v14547_v8  ;;  %v15194_v47 = vcombine.low %v5973_v20, %v5985_v1  ;;  %v14787_v8 = vcombine.high %v5565_v44, %v5577_v19  ;;  %v5937_v13 = vld [vmem:[#allocation14 + $0x1418] sm:$0xff]  ;;  %v5458_v62 = vld [vmem:[#allocation14 + $0x520] sm:$0xff]  ;;  %v14692_v20 = vcombine.low %v5470_v50, %v5482_v3 }
 0x997   : > { %10529 = vmatprep.subr.bf16.mxu1 %v14931_v9  ;;  %v15171_v9 = vcombine.high %v5949_v43, %v5961_v45  ;;  %v5517_v17 = vld [vmem:[#allocation14 + $0x6f8] sm:$0xff]  ;;  %v5830_v1 = vld [vmem:[#allocation14 + $0x10c0] sm:$0xff] }
 0x998   : > { %v5529_v18 = vld [vmem:[#allocation14 + $0x758] sm:$0xff] }
 0x999   : > { %10489 = vmatpush1.bf16.msra.mxu0 %v14546_v14  ;;  %v14786_v14 = vcombine.low %v5565_v44, %v5577_v19  ;;  %v5901_v25 = vld [vmem:[#allocation14 + $0x12f8] sm:$0xff]  ;;  %v5434_v44 = vld [vmem:[#allocation14 + $0x460] sm:$0xff] }
 0x99a   : > { %10530 = vmatpush1.bf16.msra.mxu1 %v14930_v22  ;;  %10490 = vmatprep.subr.bf16.mxu0 %v14523_v15  ;;  %v15170_v22 = vcombine.low %v5949_v43, %v5961_v45  ;;  %v14763_v15 = vcombine.high %v5541_v10, %v5553_v29  ;;  %v5913_v27 = vld [vmem:[#allocation14 + $0x1358] sm:$0xff]  ;;  %v5806_v45 = vld [vmem:[#allocation14 + $0x1000] sm:$0xff] }
 0x99b   : > { %10531 = vmatprep.subr.bf16.mxu1 %v14907_v23  ;;  %v15147_v23 = vcombine.high %v5925_v12, %v5937_v13  ;;  %v5493_v35 = vld [vmem:[#allocation14 + $0x638] sm:$0xff] }
 0x99c   : > { %v5505_v36 = vld [vmem:[#allocation14 + $0x698] sm:$0xff] }
 0x99d   : > { %10491 = vmatpush1.bf16.msra.mxu0 %v14522_v28  ;;  %v14762_v28 = vcombine.low %v5541_v10, %v5553_v29  ;;  %v5877_v37 = vld [vmem:[#allocation14 + $0x1238] sm:$0xff] }
 0x99e   : > { %10532 = vmatpush1.bf16.msra.mxu1 %v14906_v31  ;;  %10492 = vmatprep.subr.bf16.mxu0 %v14883_v33  ;;  %v15146_v31 = vcombine.low %v5925_v12, %v5937_v13  ;;  %v14739_v33 = vcombine.high %v5517_v17, %v5529_v18  ;;  %v5889_v39 = vld [vmem:[#allocation14 + $0x1298] sm:$0xff] }
 0x99f   : > { %10533 = vmatprep.subr.bf16.mxu1 %v15267_v34  ;;  %v15123_v34 = vcombine.high %v5901_v25, %v5913_v27 }
 0x9a1   : > { %10493 = vmatpush2.bf16.msra.mxu0 %v14882_v41  ;;  %v14738_v41 = vcombine.low %v5517_v17, %v5529_v18  ;;  %v5782_v18 = vld [vmem:[#allocation14 + $0xf40] sm:$0xff] }
 0x9a2   : > { %10534 = vmatpush2.bf16.msra.mxu1 %v15266_v60  ;;  %10494 = vmatprep.subr.bf16.mxu0 %v14859_v2  ;;  %v15122_v60 = vcombine.low %v5901_v25, %v5913_v27  ;;  %v14715_v2 = vcombine.high %v5493_v35, %v5505_v36  ;;  %v5794_v25 = vld [vmem:[#allocation14 + $0xfa0] sm:$0xff] }
 0x9a3   : > { %10535 = vmatprep.subr.bf16.mxu1 %v15243_v49  ;;  %v15099_v49 = vcombine.high %v5877_v37, %v5889_v39 }
 0x9a5   : > { %10495 = vmatpush2.bf16.msra.mxu0 %v14858_v52  ;;  %v14714_v52 = vcombine.low %v5493_v35, %v5505_v36  ;;  %v15005_v36 = vcombine.high %v5782_v18, %v5794_v25 }
 0x9a6   : > { %10536 = vmatpush2.bf16.msra.mxu1 %v15242_v54  ;;  %10496 = vmatprep.subr.bf16.mxu0 %v14835_v46  ;;  %v15098_v54 = vcombine.low %v5877_v37, %v5889_v39  ;;  %v14693_v46 = vcombine.high %v5470_v50, %v5482_v3  ;;  %v5374_v37 = vld [vmem:[#allocation14 + $0x280] sm:$0xff] }
 0x9a7   : > { %10537 = vmatprep.subr.bf16.mxu1 %v15219_v55  ;;  %v15077_v55 = vcombine.high %v5854_v11, %v5866_v30  ;;  %v5386_v39 = vld [vmem:[#allocation14 + $0x2e0] sm:$0xff] }
 0x9a8   : > { %v14597_v50 = vcombine.high %v5374_v37, %v5386_v39 }
 0x9a9   : > { %10497 = vmatpush2.bf16.msra.mxu0 %v14834_v59  ;;  %v5842_v59 = vld [vmem:[#allocation14 + $0x1120] sm:$0xff] }
 0x9aa   : > { %10538 = vmatpush2.bf16.msra.mxu1 %v15218_v4  ;;  %10498 = vmatprep.subr.bf16.mxu0 %v14811_v51  ;;  %v15076_v4 = vcombine.low %v5854_v11, %v5866_v30  ;;  %v14669_v51 = vcombine.high %v5446_v56, %v5458_v62  ;;  %v15053_v43 = vcombine.high %v5830_v1, %v5842_v59  ;;  %v5350_v11 = vld [vmem:[#allocation14 + $0x1c0] sm:$0xff] }
 0x9ab   : > { %10539 = vmatprep.subr.bf16.mxu1 %v15195_v6  ;;  %v5422_v6 = vld [vmem:[#allocation14 + $0x400] sm:$0xff]  ;;  %v15052_v29 = vcombine.low %v5830_v1, %v5842_v59 }
 0x9ac   : > { %v14645_v12 = vcombine.high %v5422_v6, %v5434_v44  ;;  %v5362_v30 = vld [vmem:[#allocation14 + $0x220] sm:$0xff] }
 0x9ad   : > { %10499 = vmatpush2.bf16.msra.mxu0 %v14810_v7  ;;  %v5818_v7 = vld [vmem:[#allocation14 + $0x1060] sm:$0xff] }
 0x9ae   : > { %10540 = vmatpush2.bf16.msra.mxu1 %v15194_v47  ;;  %10500 = vmatprep.subr.bf16.mxu0 %v14787_v8  ;;  %v14668_v8 = vcombine.low %v5446_v56, %v5458_v62  ;;  %v14573_v56 = vcombine.high %v5350_v11, %v5362_v30  ;;  %v5338_v1 = vld [vmem:[#allocation14 + $0x160] sm:$0xff] }
 0x9af   : > { %10541 = vmatprep.subr.bf16.mxu1 %v15171_v9  ;;  %v5710_v59 = vld [vmem:[#allocation14 + $0xd00] sm:$0xff] }
 0x9b1   : > { %10501 = vmatpush2.bf16.msra.mxu0 %v14786_v14  ;;  %v15029_v14 = vcombine.high %v5806_v45, %v5818_v7 }
 0x9b2   : > { %10542 = vmatpush2.bf16.msra.mxu1 %v15170_v22  ;;  %10502 = vmatprep.subr.bf16.mxu0 %v14763_v15  ;;  %v5398_v22 = vld [vmem:[#allocation14 + $0x340] sm:$0xff] }
 0x9b3   : > { %10543 = vmatprep.subr.bf16.mxu1 %v15147_v23  ;;  %v5410_v15 = vld [vmem:[#allocation14 + $0x3a0] sm:$0xff] }
 0x9b5   : > { %10503 = vmatpush2.bf16.msra.mxu0 %v14762_v28  ;;  %v14644_v28 = vcombine.low %v5422_v6, %v5434_v44 }
 0x9b6   : > { %10544 = vmatpush2.bf16.msra.mxu1 %v15146_v31  ;;  %10504 = vmatprep.subr.bf16.mxu0 %v14739_v33  ;;  %v15028_v33 = vcombine.low %v5806_v45, %v5818_v7  ;;  %v5314_v45 = vld [vmem:[#allocation14 + $0xa0] sm:$0xff] }
 0x9b7   : > { %10545 = vmatprep.subr.bf16.mxu1 %v15123_v34  ;;  %v14621_v34 = vcombine.high %v5398_v22, %v5410_v15  ;;  %v5686_v7 = vld [vmem:[#allocation14 + $0xc40] sm:$0xff] }
 0x9b9   : > { %10505 = vmatpush2.bf16.msra.mxu0 %v14738_v41  ;;  %v5758_v41 = vld [vmem:[#allocation14 + $0xe80] sm:$0xff] }
 0x9ba   : > { %10546 = vmatpush2.bf16.msra.mxu1 %v15122_v60  ;;  %10506 = vmatprep.subr.bf16.mxu0 %v14715_v2  ;;  %v5770_v60 = vld [vmem:[#allocation14 + $0xee0] sm:$0xff]  ;;  %v14620_v2 = vcombine.low %v5398_v22, %v5410_v15 }
 0x9bb   : > { %10547 = vmatprep.subr.bf16.mxu1 %v15099_v49  ;;  %v15004_v49 = vcombine.low %v5782_v18, %v5794_v25  ;;  %v14981_v3 = vcombine.high %v5758_v41, %v5770_v60  ;;  %v6046_v22 = vld [vmem:[#allocation14 + $0x1780] sm:$0xff] }
 0x9bc   : > { %v6058_v15 = vld [vmem:[#allocation14 + $0x17e0] sm:$0xff] }
 0x9bd   : > { %10507 = vmatpush2.bf16.msra.mxu0 %v14714_v52  ;;  %v5734_v52 = vld [vmem:[#allocation14 + $0xdc0] sm:$0xff] }
 0x9be   : > { %10548 = vmatpush2.bf16.msra.mxu1 %v15098_v54  ;;  %10558 = vmatprep.subr.bf16.mxu0 %v14693_v46  ;;  %v5746_v54 = vld [vmem:[#allocation14 + $0xe20] sm:$0xff]  ;;  %v14596_v46 = vcombine.low %v5374_v37, %v5386_v39 }
 0x9bf   : > { %10599 = vmatprep.subr.bf16.mxu1 %v15077_v55  ;;  %v14980_v55 = vcombine.low %v5758_v41, %v5770_v60  ;;  %v14957_v62 = vcombine.high %v5734_v52, %v5746_v54  ;;  %v14956_v6 = vcombine.low %v5734_v52, %v5746_v54  ;;  %v5614_v41 = vld [vmem:[#allocation14 + $0xa00] sm:$0xff] }
 0x9c0   : > { %v10264_v19 = vpop.f32.mrf.mxu0  ;;  %10509 = vmatmul.mubr.bf16.vlgmr.msra.gmra.mxu0 %v18184_v42  ;;  %v5626_v60 = vld [vmem:[#allocation14 + $0xa60] sm:$0xff] }
 0x9c1   : > { %v10305_v47 = vpop.f32.mrf.mxu1  ;;  %10550 = vmatmul.mubr.bf16.vlgmr.msra.gmra.mxu1 %v18188_v26  ;;  %10559 = vmatpush1.bf16.msra.mxu0 %v14692_v20  ;;  %v5326_v20 = vld [vmem:[#allocation14 + $0x100] sm:$0xff] }
 0x9c2   : > { %v18240_v9 = vadd.f32 %v10305_v47, %v10264_v19  ;;  %10590 = vmatprep.mubr.bf16.mxu0 %v18186_v21  ;;  %10600 = vmatpush1.bf16.msra.mxu1 %v15076_v4  ;;  %v10266_v10 = vpop.f32.mrf.mxu0  ;;  %v5722_v4 = vld [vmem:[#allocation14 + $0xd60] sm:$0xff]  ;;  %v14549_v44 = vcombine.high %v5326_v20, %v5338_v1 }
 0x9c3   : > { %10631 = vmatprep.mubr.bf16.mxu1 %v18190_v24  ;;  %v10307_v13 = vpop.f32.mrf.mxu1  ;;  %10560 = vmatprep.subr.bf16.mxu0 %v14669_v51  ;;  %v14572_v51 = vcombine.low %v5350_v11, %v5362_v30  ;;  %v14933_v19 = vcombine.high %v5710_v59, %v5722_v4  ;;  %v5698_v47 = vld [vmem:[#allocation14 + $0xca0] sm:$0xff]  ;;  %v14837_v11 = vcombine.high %v5614_v41, %v5626_v60 }
 0x9c4   : > { %v18244_v23 = vadd.f32 %v10307_v13, %v10266_v10  ;;  %v10268_v17 = vpop.f32.mrf.mxu0  ;;  %10601 = vmatprep.subr.bf16.mxu1 %v15053_v43  ;;  %v5302_v43 = vld [vmem:[#allocation14 + $0x40] sm:$0xff]  ;;  %v14932_v10 = vcombine.low %v5710_v59, %v5722_v4  ;;  %v14908_v18 = vcombine.low %v5686_v7, %v5698_v47 }
 0x9c5   : > { %v10309_v27 = vpop.f32.mrf.mxu1  ;;  %10561 = vmatpush1.bf16.msra.mxu0 %v14668_v8  ;;  %v14548_v8 = vcombine.low %v5326_v20, %v5338_v1  ;;  %v5662_v13 = vld [vmem:[#allocation14 + $0xb80] sm:$0xff]  ;;  %v14524_v17 = vcombine.low %v5302_v43, %v5314_v45 }
 0x9c6   : > { %10602 = vmatpush1.bf16.msra.mxu1 %v15052_v29  ;;  %v10269_v31 = vpop.f32.mrf.mxu0  ;;  %10562 = vmatprep.subr.bf16.mxu0 %v14645_v12  ;;  %v14525_v29 = vcombine.high %v5302_v43, %v5314_v45  ;;  %v14909_v12 = vcombine.high %v5686_v7, %v5698_v47  ;;  %v15269_v27 = vcombine.high %v6046_v22, %v6058_v15  ;;  %v5590_v52 = vld [vmem:[#allocation14 + $0x940] sm:$0xff] }
 0x9c7   : > { %v10310_v35 = vpop.f32.mrf.mxu1  ;;  %10603 = vmatprep.subr.bf16.mxu1 %v15029_v14  ;;  %v5674_v14 = vld [vmem:[#allocation14 + $0xbe0] sm:$0xff] }
 0x9c8   : > { %v14885_v25 = vcombine.high %v5662_v13, %v5674_v14  ;;  %v5650_v31 = vld [vmem:[#allocation14 + $0xb20] sm:$0xff]  ;;  %v14884_v35 = vcombine.low %v5662_v13, %v5674_v14 }
 0x9c9   : > { %10563 = vmatpush1.bf16.msra.mxu0 %v14644_v28  ;;  %v5638_v28 = vld [vmem:[#allocation14 + $0xac0] sm:$0xff] }
 0x9ca   : > { %10604 = vmatpush1.bf16.msra.mxu1 %v15028_v33  ;;  %10564 = vmatprep.subr.bf16.mxu0 %v14621_v34  ;;  %v6022_v33 = vld [vmem:[#allocation14 + $0x16c0] sm:$0xff]  ;;  %v14861_v37 = vcombine.high %v5638_v28, %v5650_v31 }
 0x9cb   : > { %10605 = vmatprep.subr.bf16.mxu1 %v15005_v36  ;;  %v6034_v34 = vld [vmem:[#allocation14 + $0x1720] sm:$0xff]  ;;  %v15268_v36 = vcombine.low %v6046_v22, %v6058_v15 }
 0x9cc   : > { %v15245_v39 = vcombine.high %v6022_v33, %v6034_v34  ;;  %v5602_v54 = vld [vmem:[#allocation14 + $0x9a0] sm:$0xff] }
 0x9cd   : > { %10565 = vmatpush1.bf16.msra.mxu0 %v14620_v2  ;;  %v5998_v2 = vld [vmem:[#allocation14 + $0x1600] sm:$0xff]  ;;  %v14813_v20 = vcombine.high %v5590_v52, %v5602_v54 }
 0x9ce   : > { %10606 = vmatpush1.bf16.msra.mxu1 %v15004_v49  ;;  %10566 = vmatprep.subr.bf16.mxu0 %v14597_v50  ;;  %v6010_v49 = vld [vmem:[#allocation14 + $0x1660] sm:$0xff]  ;;  %v14860_v50 = vcombine.low %v5638_v28, %v5650_v31 }
 0x9cf   : > { %10607 = vmatprep.subr.bf16.mxu1 %v14981_v3  ;;  %v15244_v3 = vcombine.low %v6022_v33, %v6034_v34  ;;  %v15221_v30 = vcombine.high %v5998_v2, %v6010_v49  ;;  %v5566_v59 = vld [vmem:[#allocation14 + $0x880] sm:$0xff] }
 0x9d0   : > { %v5578_v4 = vld [vmem:[#allocation14 + $0x8e0] sm:$0xff] }
 0x9d1   : > { %10567 = vmatpush1.bf16.msra.mxu0 %v14596_v46  ;;  %v5974_v46 = vld [vmem:[#allocation14 + $0x1540] sm:$0xff]  ;;  %v14789_v43 = vcombine.high %v5566_v59, %v5578_v4 }
 0x9d2   : > { %10608 = vmatpush1.bf16.msra.mxu1 %v14980_v55  ;;  %10568 = vmatprep.subr.bf16.mxu0 %v14573_v56  ;;  %v5986_v55 = vld [vmem:[#allocation14 + $0x15a0] sm:$0xff]  ;;  %v14836_v56 = vcombine.low %v5614_v41, %v5626_v60 }
 0x9d3   : > { %10609 = vmatprep.subr.bf16.mxu1 %v14957_v62  ;;  %v15220_v62 = vcombine.low %v5998_v2, %v6010_v49  ;;  %v15197_v1 = vcombine.high %v5974_v46, %v5986_v55  ;;  %v5542_v7 = vld [vmem:[#allocation14 + $0x7c0] sm:$0xff]  ;;  %v5471_v2 = vld [vmem:[#allocation14 + $0x588] sm:$0xff] }
 0x9d4   : > { %v5554_v47 = vld [vmem:[#allocation14 + $0x820] sm:$0xff]  ;;  %v5483_v49 = vld [vmem:[#allocation14 + $0x5e8] sm:$0xff] }
 0x9d5   : > { %10569 = vmatpush1.bf16.msra.mxu0 %v14572_v51  ;;  %v5950_v51 = vld [vmem:[#allocation14 + $0x1480] sm:$0xff]  ;;  %v14765_v13 = vcombine.high %v5542_v7, %v5554_v47 }
 0x9d6   : > { %10610 = vmatpush1.bf16.msra.mxu1 %v14956_v6  ;;  %10570 = vmatprep.subr.bf16.mxu0 %v14549_v44  ;;  %v5962_v6 = vld [vmem:[#allocation14 + $0x14e0] sm:$0xff]  ;;  %v14812_v44 = vcombine.low %v5590_v52, %v5602_v54  ;;  %v14695_v52 = vcombine.high %v5471_v2, %v5483_v49 }
 0x9d7   : > { %10611 = vmatprep.subr.bf16.mxu1 %v14933_v19  ;;  %v15196_v19 = vcombine.low %v5974_v46, %v5986_v55  ;;  %v15173_v45 = vcombine.high %v5950_v51, %v5962_v6  ;;  %v5518_v22 = vld [vmem:[#allocation14 + $0x700] sm:$0xff]  ;;  %v5447_v46 = vld [vmem:[#allocation14 + $0x4c8] sm:$0xff] }
 0x9d8   : > { %v5530_v15 = vld [vmem:[#allocation14 + $0x760] sm:$0xff]  ;;  %v5459_v55 = vld [vmem:[#allocation14 + $0x528] sm:$0xff] }
 0x9d9   : > { %10571 = vmatpush1.bf16.msra.mxu0 %v14548_v8  ;;  %v5926_v8 = vld [vmem:[#allocation14 + $0x13c0] sm:$0xff]  ;;  %v14741_v28 = vcombine.high %v5518_v22, %v5530_v15 }
 0x9da   : > { %10612 = vmatpush1.bf16.msra.mxu1 %v14932_v10  ;;  %10572 = vmatprep.subr.bf16.mxu0 %v14525_v29  ;;  %v5938_v10 = vld [vmem:[#allocation14 + $0x1420] sm:$0xff]  ;;  %v14788_v29 = vcombine.low %v5566_v59, %v5578_v4  ;;  %v14671_v59 = vcombine.high %v5447_v46, %v5459_v55  ;;  %v5423_v4 = vld [vmem:[#allocation14 + $0x408] sm:$0xff] }
 0x9db   : > { %10613 = vmatprep.subr.bf16.mxu1 %v14909_v12  ;;  %v15172_v12 = vcombine.low %v5950_v51, %v5962_v6  ;;  %v15149_v14 = vcombine.high %v5926_v8, %v5938_v10  ;;  %v5494_v33 = vld [vmem:[#allocation14 + $0x640] sm:$0xff]  ;;  %v5435_v51 = vld [vmem:[#allocation14 + $0x468] sm:$0xff] }
 0x9dc   : > { %v5506_v34 = vld [vmem:[#allocation14 + $0x6a0] sm:$0xff] }
 0x9dd   : > { %10573 = vmatpush1.bf16.msra.mxu0 %v14524_v17  ;;  %v5902_v17 = vld [vmem:[#allocation14 + $0x1300] sm:$0xff]  ;;  %v14717_v41 = vcombine.high %v5494_v33, %v5506_v34 }
 0x9de   : > { %10614 = vmatpush1.bf16.msra.mxu1 %v14908_v18  ;;  %10574 = vmatprep.subr.bf16.mxu0 %v14885_v25  ;;  %v5914_v18 = vld [vmem:[#allocation14 + $0x1360] sm:$0xff]  ;;  %v14764_v25 = vcombine.low %v5542_v7, %v5554_v47  ;;  %v14670_v7 = vcombine.low %v5447_v46, %v5459_v55 }
 0x9df   : > { %10615 = vmatprep.subr.bf16.mxu1 %v15269_v27  ;;  %v15148_v27 = vcombine.low %v5926_v8, %v5938_v10  ;;  %v15125_v31 = vcombine.high %v5902_v17, %v5914_v18 }
 0x9e1   : > { %10575 = vmatpush2.bf16.msra.mxu0 %v14884_v35  ;;  %v5878_v35 = vld [vmem:[#allocation14 + $0x1240] sm:$0xff] }
 0x9e2   : > { %10616 = vmatpush2.bf16.msra.mxu1 %v15268_v36  ;;  %10576 = vmatprep.subr.bf16.mxu0 %v14861_v37  ;;  %v5890_v36 = vld [vmem:[#allocation14 + $0x12a0] sm:$0xff]  ;;  %v14740_v37 = vcombine.low %v5518_v22, %v5530_v15  ;;  %v5411_v22 = vld [vmem:[#allocation14 + $0x3a8] sm:$0xff] }
 0x9e3   : > { %10617 = vmatprep.subr.bf16.mxu1 %v15245_v39  ;;  %v15124_v39 = vcombine.low %v5902_v17, %v5914_v18  ;;  %v15101_v60 = vcombine.high %v5878_v35, %v5890_v36  ;;  %v5783_v18 = vld [vmem:[#allocation14 + $0xf48] sm:$0xff] }
 0x9e5   : > { %10577 = vmatpush2.bf16.msra.mxu0 %v14860_v50  ;;  %v5855_v50 = vld [vmem:[#allocation14 + $0x1188] sm:$0xff] }
 0x9e6   : > { %10618 = vmatpush2.bf16.msra.mxu1 %v15244_v3  ;;  %10578 = vmatprep.subr.bf16.mxu0 %v14837_v11  ;;  %v5867_v3 = vld [vmem:[#allocation14 + $0x11e8] sm:$0xff]  ;;  %v14716_v11 = vcombine.low %v5494_v33, %v5506_v34 }
 0x9e7   : > { %10619 = vmatprep.subr.bf16.mxu1 %v15221_v30  ;;  %v15100_v30 = vcombine.low %v5878_v35, %v5890_v36  ;;  %v15079_v54 = vcombine.high %v5855_v50, %v5867_v3 }
 0x9e9   : > { %10579 = vmatpush2.bf16.msra.mxu0 %v14836_v56  ;;  %v14694_v56 = vcombine.low %v5471_v2, %v5483_v49 }
 0x9ea   : > { %10620 = vmatpush2.bf16.msra.mxu1 %v15220_v62  ;;  %10580 = vmatprep.subr.bf16.mxu0 %v14813_v20  ;;  %v5831_v62 = vld [vmem:[#allocation14 + $0x10c8] sm:$0xff] }
 0x9eb   : > { %10621 = vmatprep.subr.bf16.mxu1 %v15197_v1  ;;  %v5843_v20 = vld [vmem:[#allocation14 + $0x1128] sm:$0xff]  ;;  %v15078_v1 = vcombine.low %v5855_v50, %v5867_v3 }
 0x9ec   : > { %v15054_v10 = vcombine.low %v5831_v62, %v5843_v20 }
 0x9ed   : > { %10581 = vmatpush2.bf16.msra.mxu0 %v14812_v44  ;;  %v15055_v44 = vcombine.high %v5831_v62, %v5843_v20  ;;  %v5327_v20 = vld [vmem:[#allocation14 + $0x108] sm:$0xff] }
 0x9ee   : > { %10622 = vmatpush2.bf16.msra.mxu1 %v15196_v19  ;;  %10582 = vmatprep.subr.bf16.mxu0 %v14789_v43  ;;  %v5807_v19 = vld [vmem:[#allocation14 + $0x1008] sm:$0xff] }
 0x9ef   : > { %10623 = vmatprep.subr.bf16.mxu1 %v15173_v45  ;;  %v5819_v43 = vld [vmem:[#allocation14 + $0x1068] sm:$0xff] }
 0x9f0   : > { %v15030_v33 = vcombine.low %v5807_v19, %v5819_v43 }
 0x9f1   : > { %10583 = vmatpush2.bf16.msra.mxu0 %v14788_v29  ;;  %v14647_v29 = vcombine.high %v5423_v4, %v5435_v51 }
 0x9f2   : > { %10624 = vmatpush2.bf16.msra.mxu1 %v15172_v12  ;;  %10584 = vmatprep.subr.bf16.mxu0 %v14765_v13  ;;  %v15031_v13 = vcombine.high %v5807_v19, %v5819_v43  ;;  %v5303_v43 = vld [vmem:[#allocation14 + $0x48] sm:$0xff] }
 0x9f3   : > { %10625 = vmatprep.subr.bf16.mxu1 %v15149_v14  ;;  %v5399_v14 = vld [vmem:[#allocation14 + $0x348] sm:$0xff] }
 0x9f4   : > { %v14623_v34 = vcombine.high %v5399_v14, %v5411_v22  ;;  %v14622_v2 = vcombine.low %v5399_v14, %v5411_v22  ;;  %v5663_v14 = vld [vmem:[#allocation14 + $0xb88] sm:$0xff] }
 0x9f5   : > { %10585 = vmatpush2.bf16.msra.mxu0 %v14764_v25  ;;  %v5795_v25 = vld [vmem:[#allocation14 + $0xfa8] sm:$0xff] }
 0x9f6   : > { %10626 = vmatpush2.bf16.msra.mxu1 %v15148_v27  ;;  %10586 = vmatprep.subr.bf16.mxu0 %v14741_v28  ;;  %v14646_v28 = vcombine.low %v5423_v4, %v5435_v51  ;;  %v15007_v36 = vcombine.high %v5783_v18, %v5795_v25  ;;  %v15006_v49 = vcombine.low %v5783_v18, %v5795_v25  ;;  %v5723_v4 = vld [vmem:[#allocation14 + $0xd68] sm:$0xff]  ;;  %v15276_v25 = vmul.f32 -1.442695, %v18208_v40 }
 0x9f7   : > { %10627 = vmatprep.subr.bf16.mxu1 %v15125_v31  ;;  %v5675_v22 = vld [vmem:[#allocation14 + $0xbe8] sm:$0xff] }
 0x9f8   : > { %v6059_v18 = vld [vmem:[#allocation14 + $0x17e8] sm:$0xff]  ;;  %17245 = vpow2.f32 %v15276_v25 }
 0x9f9   : > { %10587 = vmatpush2.bf16.msra.mxu0 %v14740_v37  ;;  %v5375_v37 = vld [vmem:[#allocation14 + $0x288] sm:$0xff] }
 0x9fa   : > { %10628 = vmatpush2.bf16.msra.mxu1 %v15124_v39  ;;  %10588 = vmatprep.subr.bf16.mxu0 %v14717_v41  ;;  %v5387_v39 = vld [vmem:[#allocation14 + $0x2e8] sm:$0xff] }
 0x9fb   : > { %10629 = vmatprep.subr.bf16.mxu1 %v15101_v60  ;;  %v5759_v41 = vld [vmem:[#allocation14 + $0xe88] sm:$0xff]  ;;  %v14599_v50 = vcombine.high %v5375_v37, %v5387_v39  ;;  %v14598_v46 = vcombine.low %v5375_v37, %v5387_v39 }
 0x9fc   : > { %v5771_v60 = vld [vmem:[#allocation14 + $0xee8] sm:$0xff] }
 0x9fd   : > { %10589 = vmatpush2.bf16.msra.mxu0 %v14716_v11  ;;  %v14983_v3 = vcombine.high %v5759_v41, %v5771_v60  ;;  %v5351_v11 = vld [vmem:[#allocation14 + $0x1c8] sm:$0xff]  ;;  %v14982_v55 = vcombine.low %v5759_v41, %v5771_v60  ;;  %v14886_v41 = vcombine.low %v5663_v14, %v5675_v22 }
 0x9fe   : > { %10630 = vmatpush2.bf16.msra.mxu1 %v15100_v30  ;;  %10640 = vmatprep.subr.bf16.mxu0 %v14695_v52  ;;  %v5363_v30 = vld [vmem:[#allocation14 + $0x228] sm:$0xff] }
 0x9ff   : > { %10681 = vmatprep.subr.bf16.mxu1 %v15079_v54  ;;  %v5735_v52 = vld [vmem:[#allocation14 + $0xdc8] sm:$0xff]  ;;  %v14574_v51 = vcombine.low %v5351_v11, %v5363_v30 }
 0xa00   : > { %v10346_v6 = vpop.f32.mrf.mxu0  ;;  %10591 = vmatmul.mubr.bf16.vlgmr.msra.gmra.mxu0 %v18184_v42  ;;  %v5747_v54 = vld [vmem:[#allocation14 + $0xe28] sm:$0xff] }
 0xa01   : > { %v10387_v45 = vpop.f32.mrf.mxu1  ;;  %10632 = vmatmul.mubr.bf16.vlgmr.msra.gmra.mxu1 %v18188_v26  ;;  %10641 = vmatpush1.bf16.msra.mxu0 %v14694_v56  ;;  %v14575_v56 = vcombine.high %v5351_v11, %v5363_v30  ;;  %v14959_v62 = vcombine.high %v5735_v52, %v5747_v54  ;;  %v6023_v37 = vld [vmem:[#allocation14 + $0x16c8] sm:$0xff] }
 0xa02   : > { %v18248_v47 = vadd.f32 %v10387_v45, %v10346_v6  ;;  %10672 = vmatprep.mubr.bf16.mxu0 %v18186_v21  ;;  %10682 = vmatpush1.bf16.msra.mxu1 %v15078_v1  ;;  %v10348_v8 = vpop.f32.mrf.mxu0  ;;  %v5339_v1 = vld [vmem:[#allocation14 + $0x168] sm:$0xff]  ;;  %v14958_v6 = vcombine.low %v5735_v52, %v5747_v54 }
 0xa03   : > { %10713 = vmatprep.mubr.bf16.mxu1 %v18190_v24  ;;  %v10389_v12 = vpop.f32.mrf.mxu1  ;;  %10642 = vmatprep.subr.bf16.mxu0 %v14671_v59  ;;  %v5711_v59 = vld [vmem:[#allocation14 + $0xd08] sm:$0xff] }
 0xa04   : > { %v18252_v15 = vadd.f32 %v10389_v12, %v10348_v8  ;;  %v10350_v17 = vpop.f32.mrf.mxu0  ;;  %10683 = vmatprep.subr.bf16.mxu1 %v15055_v44  ;;  %v14551_v44 = vcombine.high %v5327_v20, %v5339_v1  ;;  %v14935_v19 = vcombine.high %v5711_v59, %v5723_v4  ;;  %v5315_v45 = vld [vmem:[#allocation14 + $0xa8] sm:$0xff] }
 0xa05   : > { %v10391_v27 = vpop.f32.mrf.mxu1  ;;  %10643 = vmatpush1.bf16.msra.mxu0 %v14670_v7  ;;  %v5687_v7 = vld [vmem:[#allocation14 + $0xc48] sm:$0xff]  ;;  %v14527_v12 = vcombine.high %v5303_v43, %v5315_v45 }
 0xa06   : > { %10684 = vmatpush1.bf16.msra.mxu1 %v15054_v10  ;;  %v10351_v31 = vpop.f32.mrf.mxu0  ;;  %10644 = vmatprep.subr.bf16.mxu0 %v14647_v29  ;;  %v5699_v8 = vld [vmem:[#allocation14 + $0xca8] sm:$0xff]  ;;  %v14550_v10 = vcombine.low %v5327_v20, %v5339_v1  ;;  %v14934_v29 = vcombine.low %v5711_v59, %v5723_v4  ;;  %v14526_v27 = vcombine.low %v5303_v43, %v5315_v45 }
 0xa07   : > { %v10392_v35 = vpop.f32.mrf.mxu1  ;;  %10685 = vmatprep.subr.bf16.mxu1 %v15031_v13  ;;  %v14911_v13 = vcombine.high %v5687_v7, %v5699_v8  ;;  %v6047_v17 = vld [vmem:[#allocation14 + $0x1788] sm:$0xff]  ;;  %v14887_v31 = vcombine.high %v5663_v14, %v5675_v22 }
 0xa08   : > { %v5651_v35 = vld [vmem:[#allocation14 + $0xb28] sm:$0xff]  ;;  %v15270_v60 = vcombine.low %v6047_v17, %v6059_v18 }
 0xa09   : > { %10645 = vmatpush1.bf16.msra.mxu0 %v14646_v28  ;;  %v14910_v28 = vcombine.low %v5687_v7, %v5699_v8  ;;  %v6035_v39 = vld [vmem:[#allocation14 + $0x1728] sm:$0xff]  ;;  %v17246_v8 = vpop.eup %17245 }
 0xa0a   : > { %10686 = vmatpush1.bf16.msra.mxu1 %v15030_v33  ;;  %10646 = vmatprep.subr.bf16.mxu0 %v14623_v34  ;;  %v15271_v33 = vcombine.high %v6047_v17, %v6059_v18  ;;  %v5639_v34 = vld [vmem:[#allocation14 + $0xac8] sm:$0xff]  ;;  %v15246_v54 = vcombine.low %v6023_v37, %v6035_v39  ;;  %v10922_v25 = vadd.f32 1.0, %v17246_v8 }
 0xa0b   : > { %10687 = vmatprep.subr.bf16.mxu1 %v15007_v36  ;;  %v15277_v36 = vmul.f32 -1.442695, %v18212_v48  ;;  %v5999_v11 = vld [vmem:[#allocation14 + $0x1608] sm:$0xff]  ;;  %v14862_v52 = vcombine.low %v5639_v34, %v5651_v35 }
 0xa0c   : > { %v6011_v30 = vld [vmem:[#allocation14 + $0x1668] sm:$0xff] }
 0xa0d   : > { %10647 = vmatpush1.bf16.msra.mxu0 %v14622_v2  ;;  %v14863_v2 = vcombine.high %v5639_v34, %v5651_v35  ;;  %17247 = vpow2.f32 %v15277_v36  ;;  %v5975_v20 = vld [vmem:[#allocation14 + $0x1548] sm:$0xff]  ;;  %v15222_v4 = vcombine.low %v5999_v11, %v6011_v30 }
 0xa0e   : > { %10688 = vmatpush1.bf16.msra.mxu1 %v15006_v49  ;;  %10648 = vmatprep.subr.bf16.mxu0 %v14599_v50  ;;  %v15247_v49 = vcombine.high %v6023_v37, %v6035_v39  ;;  %v5615_v50 = vld [vmem:[#allocation14 + $0xa08] sm:$0xff]  ;;  %17249 = vrcp.f32 %v10922_v25 }
 0xa0f   : > { %10689 = vmatprep.subr.bf16.mxu1 %v14983_v3  ;;  %v5627_v3 = vld [vmem:[#allocation14 + $0xa68] sm:$0xff] }
 0xa10   : > { %v5987_v1 = vld [vmem:[#allocation14 + $0x15a8] sm:$0xff]  ;;  %v14838_v59 = vcombine.low %v5615_v50, %v5627_v3 }
 0xa11   : > { %10649 = vmatpush1.bf16.msra.mxu0 %v14598_v46  ;;  %v14839_v46 = vcombine.high %v5615_v50, %v5627_v3  ;;  %v5951_v43 = vld [vmem:[#allocation14 + $0x1488] sm:$0xff] }
 0xa12   : > { %10690 = vmatpush1.bf16.msra.mxu1 %v14982_v55  ;;  %10650 = vmatprep.subr.bf16.mxu0 %v14575_v56  ;;  %v15223_v55 = vcombine.high %v5999_v11, %v6011_v30  ;;  %v5591_v56 = vld [vmem:[#allocation14 + $0x948] sm:$0xff] }
 0xa13   : > { %10691 = vmatprep.subr.bf16.mxu1 %v14959_v62  ;;  %v5603_v62 = vld [vmem:[#allocation14 + $0x9a8] sm:$0xff] }
 0xa14   : > { %v5963_v45 = vld [vmem:[#allocation14 + $0x14e8] sm:$0xff]  ;;  %v14814_v7 = vcombine.low %v5591_v56, %v5603_v62 }
 0xa15   : > { %10651 = vmatpush1.bf16.msra.mxu0 %v14574_v51  ;;  %v14815_v51 = vcombine.high %v5591_v56, %v5603_v62  ;;  %v5555_v14 = vld [vmem:[#allocation14 + $0x828] sm:$0xff]  ;;  %v5472_v56 = vld [vmem:[#allocation14 + $0x590] sm:$0xff] }
 0xa16   : > { %10692 = vmatpush1.bf16.msra.mxu1 %v14958_v6  ;;  %10652 = vmatprep.subr.bf16.mxu0 %v14551_v44  ;;  %v15199_v6 = vcombine.high %v5975_v20, %v5987_v1  ;;  %v5567_v44 = vld [vmem:[#allocation14 + $0x888] sm:$0xff]  ;;  %v5484_v62 = vld [vmem:[#allocation14 + $0x5f0] sm:$0xff] }
 0xa17   : > { %10693 = vmatprep.subr.bf16.mxu1 %v14935_v19  ;;  %v5579_v19 = vld [vmem:[#allocation14 + $0x8e8] sm:$0xff] }
 0xa18   : > { %v5927_v22 = vld [vmem:[#allocation14 + $0x13c8] sm:$0xff] }
 0xa19   : > { %10653 = vmatpush1.bf16.msra.mxu0 %v14550_v10  ;;  %v15198_v10 = vcombine.low %v5975_v20, %v5987_v1  ;;  %v5939_v17 = vld [vmem:[#allocation14 + $0x1428] sm:$0xff]  ;;  %v5856_v20 = vld [vmem:[#allocation14 + $0x1190] sm:$0xff] }
 0xa1a   : > { %10694 = vmatpush1.bf16.msra.mxu1 %v14934_v29  ;;  %10654 = vmatprep.subr.bf16.mxu0 %v14527_v12  ;;  %v14791_v29 = vcombine.high %v5567_v44, %v5579_v19  ;;  %v15175_v12 = vcombine.high %v5951_v43, %v5963_v45  ;;  %v17248_v18 = vpop.eup %17247  ;;  %v5519_v34 = vld [vmem:[#allocation14 + $0x708] sm:$0xff]  ;;  %v5868_v1 = vld [vmem:[#allocation14 + $0x11f0] sm:$0xff] }
 0xa1b   : > { %10695 = vmatprep.subr.bf16.mxu1 %v14911_v13  ;;  %v5543_v13 = vld [vmem:[#allocation14 + $0x7c8] sm:$0xff]  ;;  %v10923_v36 = vadd.f32 1.0, %v17248_v18  ;;  %v17250_v8 = vpop.eup %17249  ;;  %v5820_v18 = vld [vmem:[#allocation14 + $0x1070] sm:$0xff] }
 0xa1c   : > { %v5531_v35 = vld [vmem:[#allocation14 + $0x768] sm:$0xff] }
 0xa1d   : > { %10655 = vmatpush1.bf16.msra.mxu0 %v14526_v27  ;;  %v14790_v27 = vcombine.low %v5567_v44, %v5579_v19  ;;  %v5903_v37 = vld [vmem:[#allocation14 + $0x1308] sm:$0xff]  ;;  %17251 = vrcp.f32 %v10923_v36  ;;  %v5448_v44 = vld [vmem:[#allocation14 + $0x4d0] sm:$0xff] }
 0xa1e   : > { %10696 = vmatpush1.bf16.msra.mxu1 %v14910_v28  ;;  %10656 = vmatprep.subr.bf16.mxu0 %v14887_v31  ;;  %v15174_v28 = vcombine.low %v5951_v43, %v5963_v45  ;;  %v14767_v31 = vcombine.high %v5543_v13, %v5555_v14  ;;  %v5915_v39 = vld [vmem:[#allocation14 + $0x1368] sm:$0xff]  ;;  %v5460_v19 = vld [vmem:[#allocation14 + $0x530] sm:$0xff]  ;;  %v14696_v43 = vcombine.low %v5472_v56, %v5484_v62 }
 0xa1f   : > { %10697 = vmatprep.subr.bf16.mxu1 %v15271_v33  ;;  %v15151_v33 = vcombine.high %v5927_v22, %v5939_v17  ;;  %v5495_v50 = vld [vmem:[#allocation14 + $0x648] sm:$0xff]  ;;  %v5832_v45 = vld [vmem:[#allocation14 + $0x10d0] sm:$0xff] }
 0xa20   : > { %v5507_v3 = vld [vmem:[#allocation14 + $0x6a8] sm:$0xff] }
 0xa21   : > { %10657 = vmatpush2.bf16.msra.mxu0 %v14886_v41  ;;  %v14766_v41 = vcombine.low %v5543_v13, %v5555_v14  ;;  %v5879_v11 = vld [vmem:[#allocation14 + $0x1248] sm:$0xff]  ;;  %v5436_v13 = vld [vmem:[#allocation14 + $0x470] sm:$0xff] }
 0xa22   : > { %10698 = vmatpush2.bf16.msra.mxu1 %v15270_v60  ;;  %10658 = vmatprep.subr.bf16.mxu0 %v14863_v2  ;;  %v15150_v60 = vcombine.low %v5927_v22, %v5939_v17  ;;  %v14743_v2 = vcombine.high %v5519_v34, %v5531_v35  ;;  %v5891_v30 = vld [vmem:[#allocation14 + $0x12a8] sm:$0xff]  ;;  %v5808_v17 = vld [vmem:[#allocation14 + $0x1010] sm:$0xff] }
 0xa23   : > { %10699 = vmatprep.subr.bf16.mxu1 %v15247_v49  ;;  %v15127_v49 = vcombine.high %v5903_v37, %v5915_v39 }
 0xa25   : > { %10659 = vmatpush2.bf16.msra.mxu0 %v14862_v52  ;;  %v14742_v52 = vcombine.low %v5519_v34, %v5531_v35 }
 0xa26   : > { %10700 = vmatpush2.bf16.msra.mxu1 %v15246_v54  ;;  %10660 = vmatprep.subr.bf16.mxu0 %v14839_v46  ;;  %v15126_v54 = vcombine.low %v5903_v37, %v5915_v39  ;;  %v14719_v46 = vcombine.high %v5495_v50, %v5507_v3  ;;  %v15033_v39 = vcombine.high %v5808_v17, %v5820_v18 }
 0xa27   : > { %10701 = vmatprep.subr.bf16.mxu1 %v15223_v55  ;;  %v15103_v55 = vcombine.high %v5879_v11, %v5891_v30 }
 0xa29   : > { %10661 = vmatpush2.bf16.msra.mxu0 %v14838_v59  ;;  %v14718_v59 = vcombine.low %v5495_v50, %v5507_v3  ;;  %v5784_v3 = vld [vmem:[#allocation14 + $0xf50] sm:$0xff] }
 0xa2a   : > { %10702 = vmatpush2.bf16.msra.mxu1 %v15222_v4  ;;  %10662 = vmatprep.subr.bf16.mxu0 %v14815_v51  ;;  %v15102_v4 = vcombine.low %v5879_v11, %v5891_v30  ;;  %v14697_v51 = vcombine.high %v5472_v56, %v5484_v62  ;;  %v17252_v25 = vpop.eup %17251  ;;  %v5796_v11 = vld [vmem:[#allocation14 + $0xfb0] sm:$0xff] }
 0xa2b   : > { %10703 = vmatprep.subr.bf16.mxu1 %v15199_v6  ;;  %v15081_v6 = vcombine.high %v5856_v20, %v5868_v1 }
 0xa2d   : > { %10663 = vmatpush2.bf16.msra.mxu0 %v14814_v7  ;;  %v5844_v7 = vld [vmem:[#allocation14 + $0x1130] sm:$0xff] }
 0xa2e   : > { %10704 = vmatpush2.bf16.msra.mxu1 %v15198_v10  ;;  %10664 = vmatprep.subr.bf16.mxu0 %v14791_v29  ;;  %v15080_v10 = vcombine.low %v5856_v20, %v5868_v1  ;;  %v14673_v29 = vcombine.high %v5448_v44, %v5460_v19  ;;  %v15057_v22 = vcombine.high %v5832_v45, %v5844_v7  ;;  %v5376_v20 = vld [vmem:[#allocation14 + $0x290] sm:$0xff] }
 0xa2f   : > { %10705 = vmatprep.subr.bf16.mxu1 %v15175_v12  ;;  %v5424_v12 = vld [vmem:[#allocation14 + $0x410] sm:$0xff]  ;;  %v15056_v35 = vcombine.low %v5832_v45, %v5844_v7 }
 0xa30   : > { %v14649_v36 = vcombine.high %v5424_v12, %v5436_v13  ;;  %v5388_v1 = vld [vmem:[#allocation14 + $0x2f0] sm:$0xff] }
 0xa31   : > { %10665 = vmatpush2.bf16.msra.mxu0 %v14790_v27  ;;  %v10958_v27 = vmul.f32 %v17250_v8, %v18208_v40  ;;  %v10959_v40 = vmul.f32 %v17252_v25, %v18212_v48  ;;  %v15009_v48 = vcombine.high %v5784_v3, %v5796_v11  ;;  %v5364_v45 = vld [vmem:[#allocation14 + $0x230] sm:$0xff] }
 0xa32   : > { %10706 = vmatpush2.bf16.msra.mxu1 %v15174_v28  ;;  %10666 = vmatprep.subr.bf16.mxu0 %v14767_v31  ;;  %v14672_v31 = vcombine.low %v5448_v44, %v5460_v19  ;;  %v14601_v44 = vcombine.high %v5376_v20, %v5388_v1  ;;  %v5736_v7 = vld [vmem:[#allocation14 + $0xdd0] sm:$0xff] }
 0xa33   : > { %10707 = vmatprep.subr.bf16.mxu1 %v15151_v33  ;;  %v5748_v8 = vld [vmem:[#allocation14 + $0xe30] sm:$0xff] }
 0xa35   : > { %10667 = vmatpush2.bf16.msra.mxu0 %v14766_v41  ;;  %v5400_v41 = vld [vmem:[#allocation14 + $0x350] sm:$0xff] }
 0xa36   : > { %10708 = vmatpush2.bf16.msra.mxu1 %v15150_v60  ;;  %10668 = vmatprep.subr.bf16.mxu0 %v14743_v2  ;;  %v5412_v60 = vld [vmem:[#allocation14 + $0x3b0] sm:$0xff] }
 0xa37   : > { %10709 = vmatprep.subr.bf16.mxu1 %v15127_v49  ;;  %v14625_v56 = vcombine.high %v5400_v41, %v5412_v60 }
 0xa39   : > { %10669 = vmatpush2.bf16.msra.mxu0 %v14742_v52  ;;  %v14648_v52 = vcombine.low %v5424_v12, %v5436_v13  ;;  %v14961_v13 = vcombine.high %v5736_v7, %v5748_v8 }
 0xa3a   : > { %10710 = vmatpush2.bf16.msra.mxu1 %v15126_v54  ;;  %10670 = vmatprep.subr.bf16.mxu0 %v14719_v46 }
 0xa3b   : > { %10711 = vmatprep.subr.bf16.mxu1 %v15103_v55  ;;  %v15032_v55 = vcombine.low %v5808_v17, %v5820_v18  ;;  %v5712_v17 = vld [vmem:[#allocation14 + $0xd10] sm:$0xff] }
 0xa3c   : > { %v5724_v18 = vld [vmem:[#allocation14 + $0xd70] sm:$0xff] }
 0xa3d   : > { %10671 = vmatpush2.bf16.msra.mxu0 %v14718_v59  ;;  %v5760_v59 = vld [vmem:[#allocation14 + $0xe90] sm:$0xff] }
 0xa3e   : > { %10712 = vmatpush2.bf16.msra.mxu1 %v15102_v4  ;;  %10722 = vmatprep.subr.bf16.mxu0 %v14697_v51  ;;  %v5772_v4 = vld [vmem:[#allocation14 + $0xef0] sm:$0xff]  ;;  %v14624_v51 = vcombine.low %v5400_v41, %v5412_v60 }
 0xa3f   : > { %10763 = vmatprep.subr.bf16.mxu1 %v15081_v6  ;;  %v15008_v6 = vcombine.low %v5784_v3, %v5796_v11  ;;  %v14985_v19 = vcombine.high %v5760_v59, %v5772_v4  ;;  %v6060_v3 = vld [vmem:[#allocation14 + $0x17f0] sm:$0xff]  ;;  %v15278_v11 = vmul.f32 -1.442695, %v18215_v63 }
 0xa40   : > { %v10428_v14 = vpop.f32.mrf.mxu0  ;;  %10673 = vmatmul.mubr.bf16.vlgmr.msra.gmra.mxu0 %v18184_v42 }
 0xa41   : > { %v10469_v28 = vpop.f32.mrf.mxu1  ;;  %10714 = vmatmul.mubr.bf16.vlgmr.msra.gmra.mxu1 %v18188_v26  ;;  %10723 = vmatpush1.bf16.msra.mxu0 %v14696_v43  ;;  %v5352_v43 = vld [vmem:[#allocation14 + $0x1d0] sm:$0xff]  ;;  %17253 = vpow2.f32 %v15278_v11 }
 0xa42   : > { %v10470_v33 = vadd.f32 %v10469_v28, %v10428_v14  ;;  %10754 = vmatprep.mubr.bf16.mxu0 %v18186_v21  ;;  %10764 = vmatpush1.bf16.msra.mxu1 %v15080_v10  ;;  %v10430_v34 = vpop.f32.mrf.mxu0  ;;  %v14600_v10 = vcombine.low %v5376_v20, %v5388_v1  ;;  %v14577_v12 = vcombine.high %v5352_v43, %v5364_v45  ;;  %v5328_v14 = vld [vmem:[#allocation14 + $0x110] sm:$0xff] }
 0xa43   : > { %10795 = vmatprep.mubr.bf16.mxu1 %v18190_v24  ;;  %v10471_v37 = vpop.f32.mrf.mxu1  ;;  %10724 = vmatprep.subr.bf16.mxu0 %v14673_v29  ;;  %v14984_v29 = vcombine.low %v5760_v59, %v5772_v4  ;;  %v14576_v25 = vcombine.low %v5352_v43, %v5364_v45  ;;  %v6036_v20 = vld [vmem:[#allocation14 + $0x1730] sm:$0xff] }
 0xa44   : > { %v18262_v2 = vmul.f32 %v10958_v27, %v10470_v33  ;;  %v10472_v49 = vadd.f32 %v10471_v37, %v10430_v34  ;;  %v10432_v50 = vpop.f32.mrf.mxu0  ;;  %10765 = vmatprep.subr.bf16.mxu1 %v15057_v22  ;;  %v5340_v22 = vld [vmem:[#allocation14 + $0x170] sm:$0xff]  ;;  %v14960_v27 = vcombine.low %v5736_v7, %v5748_v8 }
 0xa45   : > { %v10473_v30 = vpop.f32.mrf.mxu1  ;;  %10725 = vmatpush1.bf16.msra.mxu0 %v14672_v31  ;;  %v14553_v28 = vcombine.high %v5328_v14, %v5340_v22  ;;  %v14937_v31 = vcombine.high %v5712_v17, %v5724_v18  ;;  %v5304_v33 = vld [vmem:[#allocation14 + $0x50] sm:$0xff]  ;;  %v14552_v37 = vcombine.low %v5328_v14, %v5340_v22 }
 0xa46   : > { %v18264_v54 = vmul.f32 %v10959_v40, %v10472_v49  ;;  %10766 = vmatpush1.bf16.msra.mxu1 %v15056_v35  ;;  %v10433_v46 = vpop.f32.mrf.mxu0  ;;  %10726 = vmatprep.subr.bf16.mxu0 %v14649_v36  ;;  %v5316_v34 = vld [vmem:[#allocation14 + $0xb0] sm:$0xff] }
 0xa47   : > { %v10474_v62 = vpop.f32.mrf.mxu1  ;;  %10767 = vmatprep.subr.bf16.mxu1 %v15033_v39  ;;  %v5688_v35 = vld [vmem:[#allocation14 + $0xc50] sm:$0xff]  ;;  %v14936_v39 = vcombine.low %v5712_v17, %v5724_v18  ;;  %v14529_v41 = vcombine.high %v5304_v33, %v5316_v34  ;;  %v14528_v30 = vcombine.low %v5304_v33, %v5316_v34 }
 0xa48   : > { %v5700_v36 = vld [vmem:[#allocation14 + $0xcb0] sm:$0xff] }
 0xa49   : > { %10727 = vmatpush1.bf16.msra.mxu0 %v14648_v52  ;;  %v14913_v60 = vcombine.high %v5688_v35, %v5700_v36  ;;  %v5664_v40 = vld [vmem:[#allocation14 + $0xb90] sm:$0xff]  ;;  %v14912_v52 = vcombine.low %v5688_v35, %v5700_v36 }
 0xa4a   : > { %10768 = vmatpush1.bf16.msra.mxu1 %v15032_v55  ;;  %10728 = vmatprep.subr.bf16.mxu0 %v14625_v56  ;;  %v5676_v49 = vld [vmem:[#allocation14 + $0xbf0] sm:$0xff] }
 0xa4b   : > { %10769 = vmatprep.subr.bf16.mxu1 %v15009_v48  ;;  %v6048_v50 = vld [vmem:[#allocation14 + $0x1790] sm:$0xff]  ;;  %v14889_v46 = vcombine.high %v5664_v40, %v5676_v49  ;;  %v14888_v1 = vcombine.low %v5664_v40, %v5676_v49 }
 0xa4c   : > { %v15273_v55 = vcombine.high %v6048_v50, %v6060_v3  ;;  %v5640_v56 = vld [vmem:[#allocation14 + $0xad0] sm:$0xff]  ;;  %v15272_v59 = vcombine.low %v6048_v50, %v6060_v3 }
 0xa4d   : > { %10729 = vmatpush1.bf16.msra.mxu0 %v14624_v51  ;;  %v5652_v62 = vld [vmem:[#allocation14 + $0xb30] sm:$0xff] }
 0xa4e   : > { %10770 = vmatpush1.bf16.msra.mxu1 %v15008_v6  ;;  %10730 = vmatprep.subr.bf16.mxu0 %v14601_v44  ;;  %v6024_v48 = vld [vmem:[#allocation14 + $0x16d0] sm:$0xff]  ;;  %v14865_v4 = vcombine.high %v5640_v56, %v5652_v62  ;;  %v14864_v45 = vcombine.low %v5640_v56, %v5652_v62  ;;  %v17254_v35 = vpop.eup %17253 }
 0xa4f   : > { %10771 = vmatprep.subr.bf16.mxu1 %v14985_v19  ;;  %v15249_v51 = vcombine.high %v6024_v48, %v6036_v20  ;;  %v5616_v6 = vld [vmem:[#allocation14 + $0xa10] sm:$0xff]  ;;  %v15248_v7 = vcombine.low %v6024_v48, %v6036_v20  ;;  %v10924_v50 = vadd.f32 1.0, %v17254_v35 }
 0xa50   : > { %v5628_v44 = vld [vmem:[#allocation14 + $0xa70] sm:$0xff] }
 0xa51   : > { %10731 = vmatpush1.bf16.msra.mxu0 %v14600_v10  ;;  %v6000_v19 = vld [vmem:[#allocation14 + $0x1610] sm:$0xff]  ;;  %v14841_v8 = vcombine.high %v5616_v6, %v5628_v44  ;;  %v14840_v22 = vcombine.low %v5616_v6, %v5628_v44  ;;  %17255 = vrcp.f32 %v10924_v50 }
 0xa52   : > { %10772 = vmatpush1.bf16.msra.mxu1 %v14984_v29  ;;  %10732 = vmatprep.subr.bf16.mxu0 %v14577_v12  ;;  %v6012_v43 = vld [vmem:[#allocation14 + $0x1670] sm:$0xff] }
 0xa53   : > { %10773 = vmatprep.subr.bf16.mxu1 %v14961_v13  ;;  %v15225_v10 = vcombine.high %v6000_v19, %v6012_v43  ;;  %v5592_v29 = vld [vmem:[#allocation14 + $0x950] sm:$0xff]  ;;  %v15224_v17 = vcombine.low %v6000_v19, %v6012_v43 }
 0xa54   : > { %v5604_v12 = vld [vmem:[#allocation14 + $0x9b0] sm:$0xff] }
 0xa55   : > { %10733 = vmatpush1.bf16.msra.mxu0 %v14576_v25  ;;  %v5976_v13 = vld [vmem:[#allocation14 + $0x1550] sm:$0xff]  ;;  %v14817_v18 = vcombine.high %v5592_v29, %v5604_v12  ;;  %v14816_v34 = vcombine.low %v5592_v29, %v5604_v12  ;;  %v5857_v29 = vld [vmem:[#allocation14 + $0x1198] sm:$0xff] }
 0xa56   : > { %10774 = vmatpush1.bf16.msra.mxu1 %v14960_v27  ;;  %10734 = vmatprep.subr.bf16.mxu0 %v14553_v28  ;;  %v5988_v14 = vld [vmem:[#allocation14 + $0x15b0] sm:$0xff]  ;;  %v5869_v12 = vld [vmem:[#allocation14 + $0x11f8] sm:$0xff] }
 0xa57   : > { %10775 = vmatprep.subr.bf16.mxu1 %v14937_v31  ;;  %v15201_v25 = vcombine.high %v5976_v13, %v5988_v14  ;;  %v5568_v27 = vld [vmem:[#allocation14 + $0x890] sm:$0xff]  ;;  %v15200_v36 = vcombine.low %v5976_v13, %v5988_v14 }
 0xa58   : > { %v5580_v28 = vld [vmem:[#allocation14 + $0x8f0] sm:$0xff] }
 0xa59   : > { %10735 = vmatpush1.bf16.msra.mxu0 %v14552_v37  ;;  %v5952_v31 = vld [vmem:[#allocation14 + $0x1490] sm:$0xff]  ;;  %v14793_v37 = vcombine.high %v5568_v27, %v5580_v28  ;;  %v14792_v3 = vcombine.low %v5568_v27, %v5580_v28  ;;  %v5833_v28 = vld [vmem:[#allocation14 + $0x10d8] sm:$0xff] }
 0xa5a   : > { %10776 = vmatpush1.bf16.msra.mxu1 %v14936_v39  ;;  %10736 = vmatprep.subr.bf16.mxu0 %v14529_v41  ;;  %v5964_v33 = vld [vmem:[#allocation14 + $0x14f0] sm:$0xff] }
 0xa5b   : > { %10777 = vmatprep.subr.bf16.mxu1 %v14913_v60  ;;  %v15177_v39 = vcombine.high %v5952_v31, %v5964_v33  ;;  %v5544_v41 = vld [vmem:[#allocation14 + $0x7d0] sm:$0xff]  ;;  %v15176_v11 = vcombine.low %v5952_v31, %v5964_v33  ;;  %v5845_v31 = vld [vmem:[#allocation14 + $0x1138] sm:$0xff] }
 0xa5c   : > { %v5556_v60 = vld [vmem:[#allocation14 + $0x830] sm:$0xff] }
 0xa5d   : > { %10737 = vmatpush1.bf16.msra.mxu0 %v14528_v30  ;;  %v5928_v40 = vld [vmem:[#allocation14 + $0x13d0] sm:$0xff]  ;;  %v14769_v30 = vcombine.high %v5544_v41, %v5556_v60  ;;  %v14768_v48 = vcombine.low %v5544_v41, %v5556_v60  ;;  %v15059_v41 = vcombine.high %v5833_v28, %v5845_v31  ;;  %v5809_v60 = vld [vmem:[#allocation14 + $0x1018] sm:$0xff] }
 0xa5e   : > { %10778 = vmatpush1.bf16.msra.mxu1 %v14912_v52  ;;  %10738 = vmatprep.subr.bf16.mxu0 %v14889_v46  ;;  %v5940_v49 = vld [vmem:[#allocation14 + $0x1430] sm:$0xff]  ;;  %v17256_v33 = vpop.eup %17255 }
 0xa5f   : > { %10779 = vmatprep.subr.bf16.mxu1 %v15273_v55  ;;  %v15153_v52 = vcombine.high %v5928_v40, %v5940_v49  ;;  %v5520_v46 = vld [vmem:[#allocation14 + $0x710] sm:$0xff]  ;;  %v15152_v20 = vcombine.low %v5928_v40, %v5940_v49  ;;  %v5821_v40 = vld [vmem:[#allocation14 + $0x1078] sm:$0xff]  ;;  %v10960_v49 = vmul.f32 %v17256_v33, %v18215_v63 }
 0xa60   : > { %v5532_v55 = vld [vmem:[#allocation14 + $0x770] sm:$0xff]  ;;  %v5401_v63 = vld [vmem:[#allocation14 + $0x358] sm:$0xff] }
 0xa61   : > { %10739 = vmatpush2.bf16.msra.mxu0 %v14888_v1  ;;  %v5904_v56 = vld [vmem:[#allocation14 + $0x1310] sm:$0xff]  ;;  %v14745_v1 = vcombine.high %v5520_v46, %v5532_v55  ;;  %v14744_v19 = vcombine.low %v5520_v46, %v5532_v55  ;;  %v5329_v33 = vld [vmem:[#allocation14 + $0x118] sm:$0xff] }
 0xa62   : > { %10780 = vmatpush2.bf16.msra.mxu1 %v15272_v59  ;;  %10740 = vmatprep.subr.bf16.mxu0 %v14865_v4  ;;  %v5916_v62 = vld [vmem:[#allocation14 + $0x1370] sm:$0xff] }
 0xa63   : > { %10781 = vmatprep.subr.bf16.mxu1 %v15249_v51  ;;  %v15129_v59 = vcombine.high %v5904_v56, %v5916_v62  ;;  %v5496_v4 = vld [vmem:[#allocation14 + $0x650] sm:$0xff]  ;;  %v15128_v43 = vcombine.low %v5904_v56, %v5916_v62  ;;  %v15035_v56 = vcombine.high %v5809_v60, %v5821_v40  ;;  %v5413_v62 = vld [vmem:[#allocation14 + $0x3b8] sm:$0xff] }
 0xa64   : > { %v5508_v51 = vld [vmem:[#allocation14 + $0x6b0] sm:$0xff] }
 0xa65   : > { %10741 = vmatpush2.bf16.msra.mxu0 %v14864_v45  ;;  %v5880_v6 = vld [vmem:[#allocation14 + $0x1250] sm:$0xff]  ;;  %v14721_v45 = vcombine.high %v5496_v4, %v5508_v51  ;;  %v14720_v13 = vcombine.low %v5496_v4, %v5508_v51 }
 0xa66   : > { %10782 = vmatpush2.bf16.msra.mxu1 %v15248_v7  ;;  %10742 = vmatprep.subr.bf16.mxu0 %v14841_v8  ;;  %v5892_v44 = vld [vmem:[#allocation14 + $0x12b0] sm:$0xff]  ;;  %v5473_v8 = vld [vmem:[#allocation14 + $0x598] sm:$0xff] }
 0xa67   : > { %10783 = vmatprep.subr.bf16.mxu1 %v15225_v10  ;;  %v15105_v7 = vcombine.high %v5880_v6, %v5892_v44  ;;  %v5485_v10 = vld [vmem:[#allocation14 + $0x5f8] sm:$0xff]  ;;  %v15104_v14 = vcombine.low %v5880_v6, %v5892_v44  ;;  %v15034_v6 = vcombine.low %v5809_v60, %v5821_v40  ;;  %v15279_v60 = vmul.f32 -1.442695, %v18220_v5 }
 0xa68   : > { %v14698_v27 = vcombine.low %v5473_v8, %v5485_v10 }
 0xa69   : > { %10743 = vmatpush2.bf16.msra.mxu0 %v14840_v22  ;;  %v14699_v22 = vcombine.high %v5473_v8, %v5485_v10  ;;  %v5773_v8 = vld [vmem:[#allocation14 + $0xef8] sm:$0xff]  ;;  %v14626_v10 = vcombine.low %v5401_v63, %v5413_v62  ;;  %17257 = vpow2.f32 %v15279_v60 }
 0xa6a   : > { %10784 = vmatpush2.bf16.msra.mxu1 %v15224_v17  ;;  %10744 = vmatprep.subr.bf16.mxu0 %v14817_v18  ;;  %v15083_v17 = vcombine.high %v5857_v29, %v5869_v12  ;;  %v5449_v18 = vld [vmem:[#allocation14 + $0x4d8] sm:$0xff] }
 0xa6b   : > { %10785 = vmatprep.subr.bf16.mxu1 %v15201_v25  ;;  %v5461_v25 = vld [vmem:[#allocation14 + $0x538] sm:$0xff] }
 0xa6c   : > { %v14675_v35 = vcombine.high %v5449_v18, %v5461_v25 }
 0xa6d   : > { %10745 = vmatpush2.bf16.msra.mxu0 %v14816_v34  ;;  %v15082_v34 = vcombine.low %v5857_v29, %v5869_v12 }
 0xa6e   : > { %10786 = vmatpush2.bf16.msra.mxu1 %v15200_v36  ;;  %10746 = vmatprep.subr.bf16.mxu0 %v14793_v37  ;;  %v5425_v36 = vld [vmem:[#allocation14 + $0x418] sm:$0xff] }
 0xa6f   : > { %10787 = vmatprep.subr.bf16.mxu1 %v15177_v39  ;;  %v5437_v37 = vld [vmem:[#allocation14 + $0x478] sm:$0xff] }
 0xa70   : > { %v14651_v46 = vcombine.high %v5425_v36, %v5437_v37  ;;  %v14650_v4 = vcombine.low %v5425_v36, %v5437_v37  ;;  %v5725_v36 = vld [vmem:[#allocation14 + $0xd78] sm:$0xff] }
 0xa71   : > { %10747 = vmatpush2.bf16.msra.mxu0 %v14792_v3  ;;  %v14674_v3 = vcombine.low %v5449_v18, %v5461_v25  ;;  %v5749_v18 = vld [vmem:[#allocation14 + $0xe38] sm:$0xff] }
 0xa72   : > { %10788 = vmatpush2.bf16.msra.mxu1 %v15176_v11  ;;  %10748 = vmatprep.subr.bf16.mxu0 %v14769_v30 }
 0xa73   : > { %10789 = vmatprep.subr.bf16.mxu1 %v15153_v52  ;;  %v15058_v52 = vcombine.low %v5833_v28, %v5845_v31 }
 0xa75   : > { %10749 = vmatpush2.bf16.msra.mxu0 %v14768_v48 }
 0xa76   : > { %10790 = vmatpush2.bf16.msra.mxu1 %v15152_v20  ;;  %10750 = vmatprep.subr.bf16.mxu0 %v14745_v1  ;;  %v5785_v1 = vld [vmem:[#allocation14 + $0xf58] sm:$0xff] }
 0xa77   : > { %10791 = vmatprep.subr.bf16.mxu1 %v15129_v59  ;;  %v5797_v59 = vld [vmem:[#allocation14 + $0xfb8] sm:$0xff] }
 0xa78   : > { %v15010_v29 = vcombine.low %v5785_v1, %v5797_v59 }
 0xa79   : > { %10751 = vmatpush2.bf16.msra.mxu0 %v14744_v19  ;;  %v15011_v19 = vcombine.high %v5785_v1, %v5797_v59  ;;  %v6049_v1 = vld [vmem:[#allocation14 + $0x1798] sm:$0xff] }
 0xa7a   : > { %10792 = vmatpush2.bf16.msra.mxu1 %v15128_v43  ;;  %10752 = vmatprep.subr.bf16.mxu0 %v14721_v45  ;;  %v5377_v43 = vld [vmem:[#allocation14 + $0x298] sm:$0xff] }
 0xa7b   : > { %10793 = vmatprep.subr.bf16.mxu1 %v15105_v7  ;;  %v5389_v45 = vld [vmem:[#allocation14 + $0x2f8] sm:$0xff] }
 0xa7c   : > { %v5761_v7 = vld [vmem:[#allocation14 + $0xe98] sm:$0xff]  ;;  %v14603_v12 = vcombine.high %v5377_v43, %v5389_v45  ;;  %v14602_v25 = vcombine.low %v5377_v43, %v5389_v45 }
 0xa7d   : > { %10753 = vmatpush2.bf16.msra.mxu0 %v14720_v13  ;;  %v14987_v13 = vcombine.high %v5761_v7, %v5773_v8  ;;  %v6061_v59 = vld [vmem:[#allocation14 + $0x17f8] sm:$0xff] }
 0xa7e   : > { %10794 = vmatpush2.bf16.msra.mxu1 %v15104_v14  ;;  %10804 = vmatprep.subr.bf16.mxu0 %v14699_v22  ;;  %v5353_v14 = vld [vmem:[#allocation14 + $0x1d8] sm:$0xff] }
 0xa7f   : > { %10845 = vmatprep.subr.bf16.mxu1 %v15083_v17  ;;  %v5365_v22 = vld [vmem:[#allocation14 + $0x238] sm:$0xff] }
 0xa80   : > { %v10510_v39 = vpop.f32.mrf.mxu0  ;;  %10755 = vmatmul.mubr.bf16.vlgmr.msra.gmra.mxu0 %v18184_v42  ;;  %v5737_v17 = vld [vmem:[#allocation14 + $0xdd8] sm:$0xff]  ;;  %v14579_v28 = vcombine.high %v5353_v14, %v5365_v22  ;;  %v14578_v37 = vcombine.low %v5353_v14, %v5365_v22 }
 0xa81   : > { %v10551_v50 = vpop.f32.mrf.mxu1  ;;  %10796 = vmatmul.mubr.bf16.vlgmr.msra.gmra.mxu1 %v18188_v26  ;;  %10805 = vmatpush1.bf16.msra.mxu0 %v14698_v27  ;;  %v14986_v27 = vcombine.low %v5761_v7, %v5773_v8  ;;  %v14963_v31 = vcombine.high %v5737_v17, %v5749_v18  ;;  %v6025_v43 = vld [vmem:[#allocation14 + $0x16d8] sm:$0xff]  ;;  %v15274_v8 = vcombine.low %v6049_v1, %v6061_v59 }
 0xa82   : > { %v10552_v11 = vadd.f32 %v10551_v50, %v10510_v39  ;;  %10836 = vmatprep.mubr.bf16.mxu0 %v18186_v21  ;;  %10846 = vmatpush1.bf16.msra.mxu1 %v15082_v34  ;;  %v18271_v30 = vpop.f32.mrf.mxu0  ;;  %v5341_v34 = vld [vmem:[#allocation14 + $0x178] sm:$0xff]  ;;  %v14962_v39 = vcombine.low %v5737_v17, %v5749_v18 }
 0xa83   : > { %10877 = vmatprep.mubr.bf16.mxu1 %v18190_v24  ;;  %v18274_v55 = vpop.f32.mrf.mxu1  ;;  %10806 = vmatprep.subr.bf16.mxu0 %v14675_v35  ;;  %v14627_v24 = vcombine.high %v5401_v63, %v5413_v62  ;;  %v5713_v35 = vld [vmem:[#allocation14 + $0xd18] sm:$0xff] }
 0xa84   : > { %v18276_v48 = vmul.f32 %v10960_v49, %v10552_v11  ;;  %v10514_v20 = vpop.f32.mrf.mxu0  ;;  %10847 = vmatprep.subr.bf16.mxu1 %v15059_v41  ;;  %v14555_v41 = vcombine.high %v5329_v33, %v5341_v34  ;;  %v14939_v40 = vcombine.high %v5713_v35, %v5725_v36  ;;  %v5305_v49 = vld [vmem:[#allocation14 + $0x58] sm:$0xff] }
 0xa85   : > { %v10555_v21 = vpop.f32.mrf.mxu1  ;;  %10807 = vmatpush1.bf16.msra.mxu0 %v14674_v3  ;;  %v5317_v50 = vld [vmem:[#allocation14 + $0xb8] sm:$0xff] }
 0xa86   : > { %10848 = vmatpush1.bf16.msra.mxu1 %v15058_v52  ;;  %v10515_v51 = vpop.f32.mrf.mxu0  ;;  %10808 = vmatprep.subr.bf16.mxu0 %v14651_v46  ;;  %v5689_v3 = vld [vmem:[#allocation14 + $0xc58] sm:$0xff]  ;;  %v14554_v52 = vcombine.low %v5329_v33, %v5341_v34  ;;  %v14938_v46 = vcombine.low %v5713_v35, %v5725_v36  ;;  %v14530_v21 = vcombine.low %v5305_v49, %v5317_v50  ;;  %v17258_v33 = vpop.eup %17257 }
 0xa87   : > { %v10556_v44 = vpop.f32.mrf.mxu1  ;;  %10849 = vmatprep.subr.bf16.mxu1 %v15035_v56  ;;  %v5701_v11 = vld [vmem:[#allocation14 + $0xcb8] sm:$0xff]  ;;  %v14531_v56 = vcombine.high %v5305_v49, %v5317_v50 }
 0xa88   : > { %v14915_v63 = vcombine.high %v5689_v3, %v5701_v11  ;;  %v5665_v62 = vld [vmem:[#allocation14 + $0xb98] sm:$0xff]  ;;  %v14914_v51 = vcombine.low %v5689_v3, %v5701_v11 }
 0xa89   : > { %10809 = vmatpush1.bf16.msra.mxu0 %v14650_v4  ;;  %v5677_v20 = vld [vmem:[#allocation14 + $0xbf8] sm:$0xff]  ;;  %v15280_v4 = vmul.f32 -1.442695, %v18224_v38 }
 0xa8a   : > { %10850 = vmatpush1.bf16.msra.mxu1 %v15034_v6  ;;  %10810 = vmatprep.subr.bf16.mxu0 %v14627_v24  ;;  %v14891_v6 = vcombine.high %v5665_v62, %v5677_v20  ;;  %v15275_v24 = vcombine.high %v6049_v1, %v6061_v59  ;;  %v5641_v44 = vld [vmem:[#allocation14 + $0xad8] sm:$0xff]  ;;  %v14890_v7 = vcombine.low %v5665_v62, %v5677_v20 }
 0xa8b   : > { %10851 = vmatprep.subr.bf16.mxu1 %v15011_v19  ;;  %v5653_v19 = vld [vmem:[#allocation14 + $0xb38] sm:$0xff]  ;;  %17259 = vpow2.f32 %v15280_v4 }
 0xa8c   : > { %v6037_v45 = vld [vmem:[#allocation14 + $0x1738] sm:$0xff]  ;;  %v14866_v17 = vcombine.low %v5641_v44, %v5653_v19 }
 0xa8d   : > { %10811 = vmatpush1.bf16.msra.mxu0 %v14626_v10  ;;  %v14867_v10 = vcombine.high %v5641_v44, %v5653_v19  ;;  %v6001_v14 = vld [vmem:[#allocation14 + $0x1618] sm:$0xff]  ;;  %v15250_v18 = vcombine.low %v6025_v43, %v6037_v45 }
 0xa8e   : > { %10852 = vmatpush1.bf16.msra.mxu1 %v15010_v29  ;;  %10812 = vmatprep.subr.bf16.mxu0 %v14603_v12  ;;  %v15251_v29 = vcombine.high %v6025_v43, %v6037_v45  ;;  %v5617_v12 = vld [vmem:[#allocation14 + $0xa18] sm:$0xff] }
 0xa8f   : > { %10853 = vmatprep.subr.bf16.mxu1 %v14987_v13  ;;  %v5629_v13 = vld [vmem:[#allocation14 + $0xa78] sm:$0xff] }
 0xa90   : > { %v6013_v22 = vld [vmem:[#allocation14 + $0x1678] sm:$0xff]  ;;  %v14842_v36 = vcombine.low %v5617_v12, %v5629_v13 }
 0xa91   : > { %10813 = vmatpush1.bf16.msra.mxu0 %v14602_v25  ;;  %v14843_v25 = vcombine.high %v5617_v12, %v5629_v13  ;;  %v5977_v34 = vld [vmem:[#allocation14 + $0x1558] sm:$0xff] }
 0xa92   : > { %10854 = vmatpush1.bf16.msra.mxu1 %v14986_v27  ;;  %10814 = vmatprep.subr.bf16.mxu0 %v14579_v28  ;;  %v15227_v27 = vcombine.high %v6001_v14, %v6013_v22  ;;  %v5593_v28 = vld [vmem:[#allocation14 + $0x958] sm:$0xff] }
 0xa93   : > { %10855 = vmatprep.subr.bf16.mxu1 %v14963_v31  ;;  %v5605_v31 = vld [vmem:[#allocation14 + $0x9b8] sm:$0xff] }
 0xa94   : > { %v5989_v35 = vld [vmem:[#allocation14 + $0x15b8] sm:$0xff]  ;;  %v14818_v11 = vcombine.low %v5593_v28, %v5605_v31 }
 0xa95   : > { %10815 = vmatpush1.bf16.msra.mxu0 %v14578_v37  ;;  %v15226_v37 = vcombine.low %v6001_v14, %v6013_v22  ;;  %v15203_v60 = vcombine.high %v5977_v34, %v5989_v35  ;;  %v5581_v49 = vld [vmem:[#allocation14 + $0x8f8] sm:$0xff] }
 0xa96   : > { %10856 = vmatpush1.bf16.msra.mxu1 %v14962_v39  ;;  %10816 = vmatprep.subr.bf16.mxu0 %v14555_v41  ;;  %v14819_v39 = vcombine.high %v5593_v28, %v5605_v31  ;;  %v10925_v41 = vadd.f32 1.0, %v17258_v33  ;;  %v5953_v50 = vld [vmem:[#allocation14 + $0x1498] sm:$0xff]  ;;  %v10554_v31 = vadd.f32 %v18274_v55, %v18271_v30  ;;  %v18285_v30 = vpack.c.bf16 %v18264_v54, %v18264_v54  ;;  %v16658_v54 = vld [vmem:[#allocation16 + $0x2c0] ss:$16 sps:$4 sm:$0xff]  }
 0xa97   : > { %10857 = vmatprep.subr.bf16.mxu1 %v14939_v40  ;;  %v5569_v40 = vld [vmem:[#allocation14 + $0x898] sm:$0xff] }
 0xa98   : > { %v5965_v3 = vld [vmem:[#allocation14 + $0x14f8] sm:$0xff]  ;;  %17261 = vrcp.f32 %v10925_v41  ;;  %v16649_v41 = vld [vmem:[#allocation16 + $0xe0] ss:$16 sps:$4 sm:$0xff]  }
 0xa99   : > { %10817 = vmatpush1.bf16.msra.mxu0 %v14554_v52  ;;  %v15202_v52 = vcombine.low %v5977_v34, %v5989_v35  ;;  %v5545_v62 = vld [vmem:[#allocation14 + $0x7d8] sm:$0xff]  ;;  %v16651_v35 = vld [vmem:[#allocation16 + $0xe4] ss:$16 sps:$4 sm:$0xff]  }
 0xa9a   : > { %10858 = vmatpush1.bf16.msra.mxu1 %v14938_v46  ;;  %10818 = vmatprep.subr.bf16.mxu0 %v14531_v56  ;;  %v14795_v46 = vcombine.high %v5569_v40, %v5581_v49  ;;  %v17260_v56 = vpop.eup %17259  ;;  %v5557_v20 = vld [vmem:[#allocation14 + $0x838] sm:$0xff] }
 0xa9b   : > { %10859 = vmatprep.subr.bf16.mxu1 %v14915_v63  ;;  %v15179_v63 = vcombine.high %v5953_v50, %v5965_v3  ;;  %v5929_v1 = vld [vmem:[#allocation14 + $0x13d8] sm:$0xff]  ;;  %v10926_v4 = vadd.f32 1.0, %v17260_v56 }
 0xa9c   : > { %v5941_v59 = vld [vmem:[#allocation14 + $0x1438] sm:$0xff] }
 0xa9d   : > { %10819 = vmatpush1.bf16.msra.mxu0 %v14530_v21  ;;  %v14794_v21 = vcombine.low %v5569_v40, %v5581_v49  ;;  %v5521_v44 = vld [vmem:[#allocation14 + $0x718] sm:$0xff]  ;;  %17263 = vrcp.f32 %v10926_v4  ;;  %v16657_v49 = vld [vmem:[#allocation16 + $0xc4] ss:$16 sps:$4 sm:$0xff]  }
 0xa9e   : > { %10860 = vmatpush1.bf16.msra.mxu1 %v14914_v51  ;;  %10820 = vmatprep.subr.bf16.mxu0 %v14891_v6  ;;  %v15178_v51 = vcombine.low %v5953_v50, %v5965_v3  ;;  %v14771_v6 = vcombine.high %v5545_v62, %v5557_v20  ;;  %v5533_v19 = vld [vmem:[#allocation14 + $0x778] sm:$0xff]  ;;  %v16660_v50 = vld [vmem:[#allocation16 + $0x2c4] ss:$16 sps:$4 sm:$0xff]  }
 0xa9f   : > { %10861 = vmatprep.subr.bf16.mxu1 %v15275_v24  ;;  %v15155_v24 = vcombine.high %v5929_v1, %v5941_v59  ;;  %v5905_v43 = vld [vmem:[#allocation14 + $0x1318] sm:$0xff]  ;;  %v16669_v4 = vld [vmem:[#allocation16 + $0x84] ss:$16 sps:$4 sm:$0xff]  }
 0xaa0   : > { %v5917_v45 = vld [vmem:[#allocation14 + $0x1378] sm:$0xff] }
 0xaa1   : > { %10821 = vmatpush2.bf16.msra.mxu0 %v14890_v7  ;;  %v14770_v7 = vcombine.low %v5545_v62, %v5557_v20  ;;  %v5497_v12 = vld [vmem:[#allocation14 + $0x658] sm:$0xff]  ;;  %v16666_v62 = vld [vmem:[#allocation16 + $0x2a4] ss:$16 sps:$4 sm:$0xff]  }
 0xaa2   : > { %10862 = vmatpush2.bf16.msra.mxu1 %v15274_v8  ;;  %10822 = vmatprep.subr.bf16.mxu0 %v14867_v10  ;;  %v15154_v8 = vcombine.low %v5929_v1, %v5941_v59  ;;  %v14747_v10 = vcombine.high %v5521_v44, %v5533_v19  ;;  %v5509_v13 = vld [vmem:[#allocation14 + $0x6b8] sm:$0xff] }
 0xaa3   : > { %10863 = vmatprep.subr.bf16.mxu1 %v15251_v29  ;;  %v15131_v29 = vcombine.high %v5905_v43, %v5917_v45  ;;  %v5881_v14 = vld [vmem:[#allocation14 + $0x1258] sm:$0xff]  ;;  %v14722_v33 = vcombine.low %v5497_v12, %v5509_v13 }
 0xaa4   : > { %v5893_v22 = vld [vmem:[#allocation14 + $0x12b8] sm:$0xff] }
 0xaa5   : > { %10823 = vmatpush2.bf16.msra.mxu0 %v14866_v17  ;;  %v14746_v17 = vcombine.low %v5521_v44, %v5533_v19  ;;  %v17262_v28 = vpop.eup %17261  ;;  %v15106_v34 = vcombine.low %v5881_v14, %v5893_v22  ;;  %v16670_v44 = vld [vmem:[#allocation16 + $0x280] ss:$16 sps:$4 sm:$0xff]   ;;  %v16675_v19 = vld [vmem:[#allocation16 + $0x64] ss:$16 sps:$4 sm:$0xff]  }
 0xaa6   : > { %10864 = vmatpush2.bf16.msra.mxu1 %v15250_v18  ;;  %10824 = vmatprep.subr.bf16.mxu0 %v14843_v25  ;;  %v15130_v18 = vcombine.low %v5905_v43, %v5917_v45  ;;  %v14723_v25 = vcombine.high %v5497_v12, %v5509_v13  ;;  %v16678_v43 = vld [vmem:[#allocation16 + $0x264] ss:$16 sps:$4 sm:$0xff]   ;;  %v16673_v45 = vld [vmem:[#allocation16 + $0x60] ss:$16 sps:$4 sm:$0xff]   ;;  %v15281_v12 = vmul.f32 -1.442695, %v18228_v61 }
 0xaa7   : > { %10865 = vmatprep.subr.bf16.mxu1 %v15227_v27  ;;  %v15107_v27 = vcombine.high %v5881_v14, %v5893_v22  ;;  %v16682_v13 = vld [vmem:[#allocation16 + $0x240] ss:$16 sps:$4 sm:$0xff]   ;;  %v16687_v14 = vld [vmem:[#allocation16 + $0x24] ss:$16 sps:$4 sm:$0xff]  }
 0xaa8   : > { %v16690_v22 = vld [vmem:[#allocation16 + $0x224] ss:$16 sps:$4 sm:$0xff]   ;;  %17265 = vpow2.f32 %v15281_v12 }
 0xaa9   : > { %10825 = vmatpush2.bf16.msra.mxu0 %v14842_v36  ;;  %v10961_v36 = vmul.f32 %v17262_v28, %v18220_v5  ;;  %v16691_v28 = vld [vmem:[#allocation16] ss:$16 sps:$4 sm:$0xff]  }
 0xaaa   : > { %10866 = vmatpush2.bf16.msra.mxu1 %v15226_v37  ;;  %10826 = vmatprep.subr.bf16.mxu0 %v14819_v39  ;;  %v16654_v37 = vld [vmem:[#allocation16 + $0x2e4] ss:$16 sps:$4 sm:$0xff]   ;;  %v17264_v40 = vpop.eup %17263 }
 0xaab   : > { %10867 = vmatprep.subr.bf16.mxu1 %v15203_v60  ;;  %v10973_v39 = vmul.f32 %v10961_v36, %v10554_v31  ;;  %v16652_v60 = vld [vmem:[#allocation16 + $0x2e0] ss:$16 sps:$4 sm:$0xff]  }
 0xaac   : > { %v16694_v31 = vld [vmem:[#allocation16 + $0x200] ss:$16 sps:$4 sm:$0xff]  }
 0xaad   : > { %10827 = vmatpush2.bf16.msra.mxu0 %v14818_v11  ;;  %v18288_v5 = vpack.c.bf16 %v10973_v39, %v10973_v39  ;;  %v16655_v11 = vld [vmem:[#allocation16 + $0xc0] ss:$16 sps:$4 sm:$0xff]   ;;  %v16705_v39 = vld [vmem:[#allocation16 + $0x1c4] ss:$16 sps:$4 sm:$0xff]  }
 0xaae   : > { %10868 = vmatpush2.bf16.msra.mxu1 %v15202_v52  ;;  %10828 = vmatprep.subr.bf16.mxu0 %v14795_v46  ;;  %v10962_v52 = vmul.f32 %v17264_v40, %v18224_v38  ;;  %v16661_v38 = vld [vmem:[#allocation16 + $0xa0] ss:$16 sps:$4 sm:$0xff]  }
 0xaaf   : > { %10869 = vmatprep.subr.bf16.mxu1 %v15179_v63  ;;  %v16663_v63 = vld [vmem:[#allocation16 + $0xa4] ss:$16 sps:$4 sm:$0xff]   ;;  %v16697_v36 = vld [vmem:[#allocation16 + $0x1e0] ss:$16 sps:$4 sm:$0xff]  }
 0xab0   : > { %v16706_v40 = vld [vmem:[#allocation16 + $0x3c0] ss:$16 sps:$4 sm:$0xff]  }
 0xab1   : > { %10829 = vmatpush2.bf16.msra.mxu0 %v14794_v21  ;;  %v16664_v21 = vld [vmem:[#allocation16 + $0x2a0] ss:$16 sps:$4 sm:$0xff]  }
 0xab2   : > { %10870 = vmatpush2.bf16.msra.mxu1 %v15178_v51  ;;  %10830 = vmatprep.subr.bf16.mxu0 %v14771_v6  ;;  %v16672_v6 = vld [vmem:[#allocation16 + $0x284] ss:$16 sps:$4 sm:$0xff]  }
 0xab3   : > { %10871 = vmatprep.subr.bf16.mxu1 %v15155_v24  ;;  %v16667_v24 = vld [vmem:[#allocation16 + $0x80] ss:$16 sps:$4 sm:$0xff]  }
 0xab5   : > { %10831 = vmatpush2.bf16.msra.mxu0 %v14770_v7  ;;  %v16676_v7 = vld [vmem:[#allocation16 + $0x260] ss:$16 sps:$4 sm:$0xff]  }
 0xab6   : > { %10872 = vmatpush2.bf16.msra.mxu1 %v15154_v8  ;;  %10832 = vmatprep.subr.bf16.mxu0 %v14747_v10  ;;  %v16681_v8 = vld [vmem:[#allocation16 + $0x44] ss:$16 sps:$4 sm:$0xff]  }
 0xab7   : > { %10873 = vmatprep.subr.bf16.mxu1 %v15131_v29  ;;  %v16684_v10 = vld [vmem:[#allocation16 + $0x244] ss:$16 sps:$4 sm:$0xff]   ;;  %v16679_v29 = vld [vmem:[#allocation16 + $0x40] ss:$16 sps:$4 sm:$0xff]  }
 0xab9   : > { %10833 = vmatpush2.bf16.msra.mxu0 %v14746_v17  ;;  %v16685_v17 = vld [vmem:[#allocation16 + $0x20] ss:$16 sps:$4 sm:$0xff]  }
 0xaba   : > { %10874 = vmatpush2.bf16.msra.mxu1 %v15130_v18  ;;  %10834 = vmatprep.subr.bf16.mxu0 %v14723_v25  ;;  %v16688_v18 = vld [vmem:[#allocation16 + $0x220] ss:$16 sps:$4 sm:$0xff]   ;;  %v16693_v25 = vld [vmem:[#allocation16 + $0x4] ss:$16 sps:$4 sm:$0xff]  }
 0xabb   : > { %10875 = vmatprep.subr.bf16.mxu1 %v15107_v27  ;;  %v16696_v27 = vld [vmem:[#allocation16 + $0x204] ss:$16 sps:$4 sm:$0xff]  }
 0xabd   : > { %10835 = vmatpush2.bf16.msra.mxu0 %v14722_v33  ;;  %v16699_v33 = vld [vmem:[#allocation16 + $0x1e4] ss:$16 sps:$4 sm:$0xff]  }
 0xabe   : > { %10876 = vmatpush2.bf16.msra.mxu1 %v15106_v34  ;;  %13298 = vmatprep.subr.bf16.mxu0 %v16651_v35  ;;  %v16702_v34 = vld [vmem:[#allocation16 + $0x3e4] ss:$16 sps:$4 sm:$0xff]   ;;  %v15283_v35 = vmul.f32 -1.442695, %v18236_v32 }
 0xabf   : > { %13339 = vmatprep.subr.bf16.mxu1 %v16654_v37  ;;  %v16700_v37 = vld [vmem:[#allocation16 + $0x3e0] ss:$16 sps:$4 sm:$0xff]  }
 0xac0   : > { %v10592_v55 = vpop.f32.mrf.mxu0  ;;  %10837 = vmatmul.mubr.bf16.vlgmr.msra.gmra.mxu0 %v18184_v42  ;;  %17267 = vpow2.f32 %v15283_v35 }
 0xac1   : > { %v10633_v3 = vpop.f32.mrf.mxu1  ;;  %10878 = vmatmul.mubr.bf16.vlgmr.msra.gmra.mxu1 %v18188_v26  ;;  %13299 = vmatpush1.bf16.msra.mxu0 %v16649_v41  ;;  %v16708_v41 = vld [vmem:[#allocation16 + $0x3c4] ss:$16 sps:$4 sm:$0xff]  }
 0xac2   : > { %v10634_v46 = vadd.f32 %v10633_v3, %v10592_v55  ;;  %13330 = vmatprep.mubr.bf16.mxu0 %v18285_v30  ;;  %13340 = vmatpush1.bf16.msra.mxu1 %v16652_v60  ;;  %v18293_v56 = vpop.f32.mrf.mxu0  ;;  %v16703_v60 = vld [vmem:[#allocation16 + $0x1c0] ss:$16 sps:$4 sm:$0xff]   ;;  %v17266_v55 = vpop.eup %17265 }
 0xac3   : > { %13371 = vmatprep.mubr.bf16.mxu1 %v18288_v5  ;;  %v18296_v42 = vpop.f32.mrf.mxu1  ;;  %13300 = vmatprep.subr.bf16.mxu0 %v16657_v49  ;;  %v16711_v49 = vld [vmem:[#allocation16 + $0x1a4] ss:$16 sps:$4 sm:$0xff]   ;;  %v16709_v3 = vld [vmem:[#allocation16 + $0x1a0] ss:$16 sps:$4 sm:$0xff]  }
 0xac4   : > { %v18298_v20 = vmul.f32 %v10962_v52, %v10634_v46  ;;  %v10596_v26 = vpop.f32.mrf.mxu0  ;;  %13341 = vmatprep.subr.bf16.mxu1 %v16660_v50  ;;  %v16714_v50 = vld [vmem:[#allocation16 + $0x3a4] ss:$16 sps:$4 sm:$0xff]   ;;  %v16712_v52 = vld [vmem:[#allocation16 + $0x3a0] ss:$16 sps:$4 sm:$0xff]   ;;  %v10636_v12 = vadd.f32 %v18296_v42, %v18293_v56  ;;  %v18311_v42 = vpack.c.bf16 %v18276_v48, %v18276_v48 }
 0xac5   : > { %v10637_v1 = vpop.f32.mrf.mxu1  ;;  %13301 = vmatpush1.bf16.msra.mxu0 %v16655_v11  ;;  %v10927_v11 = vadd.f32 1.0, %v17266_v55  ;;  %v16717_v46 = vld [vmem:[#allocation16 + $0x184] ss:$16 sps:$4 sm:$0xff]   ;;  %v16748_v56 = vld [vmem:[#allocation16 + $0x6e0] ss:$16 sps:$4 sm:$0xff]  }
 0xac6   : > { %13342 = vmatpush1.bf16.msra.mxu1 %v16658_v54  ;;  %v10597_v59 = vpop.f32.mrf.mxu0  ;;  %13302 = vmatprep.subr.bf16.mxu0 %v16663_v63  ;;  %v16720_v54 = vld [vmem:[#allocation16 + $0x384] ss:$16 sps:$4 sm:$0xff]   ;;  %v16715_v63 = vld [vmem:[#allocation16 + $0x180] ss:$16 sps:$4 sm:$0xff]  }
 0xac7   : > { %v10638_v51 = vpop.f32.mrf.mxu1  ;;  %13343 = vmatprep.subr.bf16.mxu1 %v16666_v62  ;;  %17269 = vrcp.f32 %v10927_v11  ;;  %v16718_v62 = vld [vmem:[#allocation16 + $0x380] ss:$16 sps:$4 sm:$0xff]   ;;  %v16723_v26 = vld [vmem:[#allocation16 + $0x164] ss:$16 sps:$4 sm:$0xff]  }
 0xac8   : > { %v16726_v1 = vld [vmem:[#allocation16 + $0x364] ss:$16 sps:$4 sm:$0xff]   ;;  %v16721_v59 = vld [vmem:[#allocation16 + $0x160] ss:$16 sps:$4 sm:$0xff]  }
 0xac9   : > { %13303 = vmatpush1.bf16.msra.mxu0 %v16661_v38  ;;  %v16732_v51 = vld [vmem:[#allocation16 + $0x344] ss:$16 sps:$4 sm:$0xff]  }
 0xaca   : > { %13344 = vmatpush1.bf16.msra.mxu1 %v16664_v21  ;;  %13304 = vmatprep.subr.bf16.mxu0 %v16669_v4  ;;  %v16724_v21 = vld [vmem:[#allocation16 + $0x360] ss:$16 sps:$4 sm:$0xff]   ;;  %v16729_v4 = vld [vmem:[#allocation16 + $0x144] ss:$16 sps:$4 sm:$0xff]  }
 0xacb   : > { %13345 = vmatprep.subr.bf16.mxu1 %v16672_v6 }
 0xacd   : > { %13305 = vmatpush1.bf16.msra.mxu0 %v16667_v24  ;;  %v17268_v38 = vpop.eup %17267  ;;  %v16727_v24 = vld [vmem:[#allocation16 + $0x140] ss:$16 sps:$4 sm:$0xff]  }
 0xace   : > { %13346 = vmatpush1.bf16.msra.mxu1 %v16670_v44  ;;  %13306 = vmatprep.subr.bf16.mxu0 %v16675_v19  ;;  %v10929_v6 = vadd.f32 1.0, %v17268_v38  ;;  %v16730_v44 = vld [vmem:[#allocation16 + $0x340] ss:$16 sps:$4 sm:$0xff]   ;;  %v16735_v19 = vld [vmem:[#allocation16 + $0x124] ss:$16 sps:$4 sm:$0xff]  }
 0xacf   : > { %13347 = vmatprep.subr.bf16.mxu1 %v16678_v43  ;;  %v16738_v43 = vld [vmem:[#allocation16 + $0x324] ss:$16 sps:$4 sm:$0xff]  }
 0xad0   : > { %17271 = vrcp.f32 %v10929_v6  ;;  %v16771_v38 = vld [vmem:[#allocation16 + $0x464] ss:$16 sps:$4 sm:$0xff]  }
 0xad1   : > { %13307 = vmatpush1.bf16.msra.mxu0 %v16673_v45  ;;  %v16733_v45 = vld [vmem:[#allocation16 + $0x120] ss:$16 sps:$4 sm:$0xff]   ;;  %v16780_v6 = vld [vmem:[#allocation16 + $0x644] ss:$16 sps:$4 sm:$0xff]  }
 0xad2   : > { %13348 = vmatpush1.bf16.msra.mxu1 %v16676_v7  ;;  %13308 = vmatprep.subr.bf16.mxu0 %v16681_v8  ;;  %v16736_v7 = vld [vmem:[#allocation16 + $0x320] ss:$16 sps:$4 sm:$0xff]   ;;  %v16741_v8 = vld [vmem:[#allocation16 + $0x104] ss:$16 sps:$4 sm:$0xff]  }
 0xad3   : > { %13349 = vmatprep.subr.bf16.mxu1 %v16684_v10 }
 0xad4   : > { %v17270_v10 = vpop.eup %17269 }
 0xad5   : > { %13309 = vmatpush1.bf16.msra.mxu0 %v16679_v29  ;;  %v16744_v29 = vld [vmem:[#allocation16 + $0x304] ss:$16 sps:$4 sm:$0xff]  }
 0xad6   : > { %13350 = vmatpush1.bf16.msra.mxu1 %v16682_v13  ;;  %13310 = vmatprep.subr.bf16.mxu0 %v16687_v14  ;;  %v16739_v13 = vld [vmem:[#allocation16 + $0x100] ss:$16 sps:$4 sm:$0xff]   ;;  %v10963_v14 = vmul.f32 %v17270_v10, %v18228_v61  ;;  %v16753_v61 = vld [vmem:[#allocation16 + $0x4c4] ss:$16 sps:$4 sm:$0xff]  }
 0xad7   : > { %13351 = vmatprep.subr.bf16.mxu1 %v16690_v22  ;;  %v16742_v22 = vld [vmem:[#allocation16 + $0x300] ss:$16 sps:$4 sm:$0xff]   ;;  %v16789_v10 = vld [vmem:[#allocation16 + $0x404] ss:$16 sps:$4 sm:$0xff]  }
 0xad9   : > { %13311 = vmatpush1.bf16.msra.mxu0 %v16685_v17  ;;  %v16747_v17 = vld [vmem:[#allocation16 + $0x4e4] ss:$16 sps:$4 sm:$0xff]  }
 0xada   : > { %13352 = vmatpush1.bf16.msra.mxu1 %v16688_v18  ;;  %13312 = vmatprep.subr.bf16.mxu0 %v16693_v25  ;;  %v16750_v18 = vld [vmem:[#allocation16 + $0x6e4] ss:$16 sps:$4 sm:$0xff]   ;;  %v10975_v25 = vmul.f32 %v10963_v14, %v10636_v12  ;;  %v16787_v12 = vld [vmem:[#allocation16 + $0x400] ss:$16 sps:$4 sm:$0xff]  }
 0xadb   : > { %13353 = vmatprep.subr.bf16.mxu1 %v16696_v27  ;;  %v16745_v27 = vld [vmem:[#allocation16 + $0x4e0] ss:$16 sps:$4 sm:$0xff]   ;;  %v16795_v14 = vld [vmem:[#allocation16 + $0x5e4] ss:$16 sps:$4 sm:$0xff]  }
 0xadd   : > { %13313 = vmatpush1.bf16.msra.mxu0 %v16691_v28  ;;  %v18307_v28 = vpack.c.bf16 %v18262_v2, %v18262_v2  ;;  %v17272_v35 = vpop.eup %17271  ;;  %v16751_v2 = vld [vmem:[#allocation16 + $0x4c0] ss:$16 sps:$4 sm:$0xff]  }
 0xade   : > { %13354 = vmatpush1.bf16.msra.mxu1 %v16694_v31  ;;  %13314 = vmatprep.subr.bf16.mxu0 %v16699_v33  ;;  %v16756_v31 = vld [vmem:[#allocation16 + $0x6c4] ss:$16 sps:$4 sm:$0xff]   ;;  %v18313_v33 = vpack.c.bf16 %v10975_v25, %v10975_v25  ;;  %v16796_v25 = vld [vmem:[#allocation16 + $0x7e0] ss:$16 sps:$4 sm:$0xff]  }
 0xadf   : > { %13355 = vmatprep.subr.bf16.mxu1 %v16702_v34 }
 0xae1   : > { %13315 = vmatpush2.bf16.msra.mxu0 %v16697_v36 }
 0xae2   : > { %13356 = vmatpush2.bf16.msra.mxu1 %v16700_v37  ;;  %13316 = vmatprep.subr.bf16.mxu0 %v16705_v39  ;;  %v16754_v37 = vld [vmem:[#allocation16 + $0x6c0] ss:$16 sps:$4 sm:$0xff]   ;;  %v16759_v39 = vld [vmem:[#allocation16 + $0x4a4] ss:$16 sps:$4 sm:$0xff]  }
 0xae3   : > { %13357 = vmatprep.subr.bf16.mxu1 %v16708_v41 }
 0xae5   : > { %13317 = vmatpush2.bf16.msra.mxu0 %v16703_v60  ;;  %v16762_v60 = vld [vmem:[#allocation16 + $0x6a4] ss:$16 sps:$4 sm:$0xff]  }
 0xae6   : > { %13358 = vmatpush2.bf16.msra.mxu1 %v16706_v40  ;;  %13318 = vmatprep.subr.bf16.mxu0 %v16711_v49  ;;  %v10965_v40 = vmul.f32 %v17272_v35, %v18236_v32  ;;  %v16766_v32 = vld [vmem:[#allocation16 + $0x680] ss:$16 sps:$4 sm:$0xff]  }
 0xae7   : > { %13359 = vmatprep.subr.bf16.mxu1 %v16714_v50  ;;  %v16802_v35 = vld [vmem:[#allocation16 + $0x7c0] ss:$16 sps:$4 sm:$0xff]  }
 0xae9   : > { %13319 = vmatpush2.bf16.msra.mxu0 %v16709_v3  ;;  %v16757_v3 = vld [vmem:[#allocation16 + $0x4a0] ss:$16 sps:$4 sm:$0xff]  }
 0xaea   : > { %13360 = vmatpush2.bf16.msra.mxu1 %v16712_v52  ;;  %13320 = vmatprep.subr.bf16.mxu0 %v16717_v46  ;;  %v16760_v46 = vld [vmem:[#allocation16 + $0x6a0] ss:$16 sps:$4 sm:$0xff]  }
 0xaeb   : > { %13361 = vmatprep.subr.bf16.mxu1 %v16720_v54 }
 0xaed   : > { %13321 = vmatpush2.bf16.msra.mxu0 %v16715_v63  ;;  %v16765_v63 = vld [vmem:[#allocation16 + $0x484] ss:$16 sps:$4 sm:$0xff]  }
 0xaee   : > { %13362 = vmatpush2.bf16.msra.mxu1 %v16718_v62  ;;  %13322 = vmatprep.subr.bf16.mxu0 %v16723_v26  ;;  %v16768_v62 = vld [vmem:[#allocation16 + $0x684] ss:$16 sps:$4 sm:$0xff]  }
 0xaef   : > { %13363 = vmatprep.subr.bf16.mxu1 %v16726_v1  ;;  %v16763_v1 = vld [vmem:[#allocation16 + $0x480] ss:$16 sps:$4 sm:$0xff]  }
 0xaf1   : > { %13323 = vmatpush2.bf16.msra.mxu0 %v16721_v59  ;;  %v16774_v59 = vld [vmem:[#allocation16 + $0x664] ss:$16 sps:$4 sm:$0xff]  }
 0xaf2   : > { %13364 = vmatpush2.bf16.msra.mxu1 %v16724_v21  ;;  %13324 = vmatprep.subr.bf16.mxu0 %v16729_v4  ;;  %v16769_v21 = vld [vmem:[#allocation16 + $0x460] ss:$16 sps:$4 sm:$0xff]  }
 0xaf3   : > { %13365 = vmatprep.subr.bf16.mxu1 %v16732_v51  ;;  %v16772_v4 = vld [vmem:[#allocation16 + $0x660] ss:$16 sps:$4 sm:$0xff]   ;;  %v16777_v51 = vld [vmem:[#allocation16 + $0x444] ss:$16 sps:$4 sm:$0xff]  }
 0xaf5   : > { %13325 = vmatpush2.bf16.msra.mxu0 %v16727_v24  ;;  %v15282_v24 = vmul.f32 -1.442695, %v18232_v16 }
 0xaf6   : > { %13366 = vmatpush2.bf16.msra.mxu1 %v16730_v44  ;;  %13326 = vmatprep.subr.bf16.mxu0 %v16735_v19  ;;  %v16775_v44 = vld [vmem:[#allocation16 + $0x440] ss:$16 sps:$4 sm:$0xff]  }
 0xaf7   : > { %13367 = vmatprep.subr.bf16.mxu1 %v16738_v43  ;;  %v16778_v19 = vld [vmem:[#allocation16 + $0x640] ss:$16 sps:$4 sm:$0xff]   ;;  %v16783_v43 = vld [vmem:[#allocation16 + $0x424] ss:$16 sps:$4 sm:$0xff]   ;;  %17273 = vpow2.f32 %v15282_v24 }
 0xaf9   : > { %13327 = vmatpush2.bf16.msra.mxu0 %v16733_v45  ;;  %v16786_v45 = vld [vmem:[#allocation16 + $0x624] ss:$16 sps:$4 sm:$0xff]  }
 0xafa   : > { %13368 = vmatpush2.bf16.msra.mxu1 %v16736_v7  ;;  %13328 = vmatprep.subr.bf16.mxu0 %v16741_v8  ;;  %v16781_v7 = vld [vmem:[#allocation16 + $0x420] ss:$16 sps:$4 sm:$0xff]  }
 0xafb   : > { %13369 = vmatprep.subr.bf16.mxu1 %v16744_v29  ;;  %v16784_v8 = vld [vmem:[#allocation16 + $0x620] ss:$16 sps:$4 sm:$0xff]   ;;  %v16792_v29 = vld [vmem:[#allocation16 + $0x604] ss:$16 sps:$4 sm:$0xff]  }
 0xafd   : > { %13329 = vmatpush2.bf16.msra.mxu0 %v16739_v13  ;;  %v16790_v13 = vld [vmem:[#allocation16 + $0x600] ss:$16 sps:$4 sm:$0xff]  }
 0xafe   : > { %13370 = vmatpush2.bf16.msra.mxu1 %v16742_v22  ;;  %13380 = vmatprep.subr.bf16.mxu0 %v16747_v17  ;;  %v16798_v22 = vld [vmem:[#allocation16 + $0x7e4] ss:$16 sps:$4 sm:$0xff]   ;;  %v15285_v17 = vmul.f32 -1.442695, %v18244_v23 }
 0xaff   : > { %13421 = vmatprep.subr.bf16.mxu1 %v16750_v18  ;;  %v16793_v18 = vld [vmem:[#allocation16 + $0x5e0] ss:$16 sps:$4 sm:$0xff]  }
 0xb00   : > { %v18315_v34 = vpop.f32.mrf.mxu0  ;;  %13331 = vmatmul.mubr.bf16.vlgmr.msra.gmra.mxu0 %v18307_v28  ;;  %17275 = vpow2.f32 %v15285_v17 }
 0xb01   : > { %v18318_v36 = vpop.f32.mrf.mxu1  ;;  %13372 = vmatmul.mubr.bf16.vlgmr.msra.gmra.mxu1 %v18311_v42  ;;  %13381 = vmatpush1.bf16.msra.mxu0 %v16745_v27  ;;  %v16801_v27 = vld [vmem:[#allocation16 + $0x5c4] ss:$16 sps:$4 sm:$0xff]  }
 0xb02   : > { %13412 = vmatprep.mubr.bf16.mxu0 %v18313_v33  ;;  %13422 = vmatpush1.bf16.msra.mxu1 %v16748_v56  ;;  %v10676_v48 = vpop.f32.mrf.mxu0  ;;  %v16804_v56 = vld [vmem:[#allocation16 + $0x7c4] ss:$16 sps:$4 sm:$0xff]   ;;  %v10716_v24 = vadd.f32 %v18318_v36, %v18315_v34  ;;  %v16850_v36 = vld [vmem:[#allocation16 + $0xae0] ss:$16 sps:$4 sm:$0xff]  }
 0xb03   : > { %v10717_v41 = vpop.f32.mrf.mxu1  ;;  %13382 = vmatprep.subr.bf16.mxu0 %v16753_v61  ;;  %13423 = vmatprep.subr.bf16.mxu1 %v16756_v31  ;;  %v16799_v61 = vld [vmem:[#allocation16 + $0x5c0] ss:$16 sps:$4 sm:$0xff]   ;;  %v16846_v34 = vld [vmem:[#allocation16 + $0x8c4] ss:$16 sps:$4 sm:$0xff]  }
 0xb04   : > { %v10718_v49 = vadd.f32 %v10717_v41, %v10676_v48  ;;  %v10678_v55 = vpop.f32.mrf.mxu0  ;;  %v17274_v31 = vpop.eup %17273  ;;  %v16810_v48 = vld [vmem:[#allocation16 + $0x7a4] ss:$16 sps:$4 sm:$0xff]   ;;  %v16808_v41 = vld [vmem:[#allocation16 + $0x7a0] ss:$16 sps:$4 sm:$0xff]  }
 0xb05   : > { %v10719_v50 = vpop.f32.mrf.mxu1  ;;  %13383 = vmatpush1.bf16.msra.mxu0 %v16751_v2  ;;  %v16807_v2 = vld [vmem:[#allocation16 + $0x5a4] ss:$16 sps:$4 sm:$0xff]   ;;  %v16814_v55 = vld [vmem:[#allocation16 + $0x780] ss:$16 sps:$4 sm:$0xff]  }
 0xb06   : > { %v10977_v11 = vmul.f32 %v10965_v40, %v10718_v49  ;;  %13424 = vmatpush1.bf16.msra.mxu1 %v16754_v37  ;;  %v10679_v52 = vpop.f32.mrf.mxu0  ;;  %13384 = vmatprep.subr.bf16.mxu0 %v16759_v39  ;;  %v10928_v37 = vadd.f32 1.0, %v17274_v31  ;;  %v16805_v39 = vld [vmem:[#allocation16 + $0x5a0] ss:$16 sps:$4 sm:$0xff]   ;;  %v16816_v40 = vld [vmem:[#allocation16 + $0x784] ss:$16 sps:$4 sm:$0xff]  }
 0xb07   : > { %v10720_v54 = vpop.f32.mrf.mxu1  ;;  %13425 = vmatprep.subr.bf16.mxu1 %v16762_v60  ;;  %v16813_v60 = vld [vmem:[#allocation16 + $0x584] ss:$16 sps:$4 sm:$0xff]   ;;  %v16811_v49 = vld [vmem:[#allocation16 + $0x580] ss:$16 sps:$4 sm:$0xff]  }
 0xb08   : > { %v18323_v26 = vpack.c.bf16 %v10977_v11, %v10977_v11  ;;  %17277 = vrcp.f32 %v10928_v37  ;;  %v16819_v50 = vld [vmem:[#allocation16 + $0x564] ss:$16 sps:$4 sm:$0xff]   ;;  %v16817_v52 = vld [vmem:[#allocation16 + $0x560] ss:$16 sps:$4 sm:$0xff]  }
 0xb09   : > { %13385 = vmatpush1.bf16.msra.mxu0 %v16757_v3  ;;  %v16822_v3 = vld [vmem:[#allocation16 + $0x764] ss:$16 sps:$4 sm:$0xff]   ;;  %v16847_v37 = vld [vmem:[#allocation16 + $0x8a0] ss:$16 sps:$4 sm:$0xff]  }
 0xb0a   : > { %13426 = vmatpush1.bf16.msra.mxu1 %v16760_v46  ;;  %13453 = vmatprep.mubr.bf16.mxu1 %v18323_v26  ;;  %v16820_v46 = vld [vmem:[#allocation16 + $0x760] ss:$16 sps:$4 sm:$0xff]   ;;  %v16825_v54 = vld [vmem:[#allocation16 + $0x544] ss:$16 sps:$4 sm:$0xff]  }
 0xb0b   : > { %13386 = vmatprep.subr.bf16.mxu0 %v16765_v63  ;;  %13427 = vmatprep.subr.bf16.mxu1 %v16768_v62  ;;  %v16828_v63 = vld [vmem:[#allocation16 + $0x744] ss:$16 sps:$4 sm:$0xff]  }
 0xb0d   : > { %13387 = vmatpush1.bf16.msra.mxu0 %v16763_v1  ;;  %v17276_v11 = vpop.eup %17275  ;;  %v16823_v1 = vld [vmem:[#allocation16 + $0x540] ss:$16 sps:$4 sm:$0xff]  }
 0xb0e   : > { %13428 = vmatpush1.bf16.msra.mxu1 %v16766_v32  ;;  %13388 = vmatprep.subr.bf16.mxu0 %v16771_v38  ;;  %v10931_v62 = vadd.f32 1.0, %v17276_v11  ;;  %v16826_v32 = vld [vmem:[#allocation16 + $0x740] ss:$16 sps:$4 sm:$0xff]   ;;  %v16831_v38 = vld [vmem:[#allocation16 + $0x524] ss:$16 sps:$4 sm:$0xff]  }
 0xb0f   : > { %13429 = vmatprep.subr.bf16.mxu1 %v16774_v59  ;;  %v16834_v59 = vld [vmem:[#allocation16 + $0x724] ss:$16 sps:$4 sm:$0xff]   ;;  %v16868_v11 = vld [vmem:[#allocation16 + $0xa80] ss:$16 sps:$4 sm:$0xff]  }
 0xb10   : > { %17279 = vrcp.f32 %v10931_v62  ;;  %v15284_v62 = vmul.f32 -1.442695, %v18240_v9 }
 0xb11   : > { %13389 = vmatpush1.bf16.msra.mxu0 %v16769_v21  ;;  %v16829_v21 = vld [vmem:[#allocation16 + $0x520] ss:$16 sps:$4 sm:$0xff]  }
 0xb12   : > { %13430 = vmatpush1.bf16.msra.mxu1 %v16772_v4  ;;  %13390 = vmatprep.subr.bf16.mxu0 %v16777_v51  ;;  %v16832_v51 = vld [vmem:[#allocation16 + $0x720] ss:$16 sps:$4 sm:$0xff]   ;;  %17281 = vpow2.f32 %v15284_v62 }
 0xb13   : > { %13431 = vmatprep.subr.bf16.mxu1 %v16780_v6  ;;  %v16837_v6 = vld [vmem:[#allocation16 + $0x504] ss:$16 sps:$4 sm:$0xff]  }
 0xb15   : > { %13391 = vmatpush1.bf16.msra.mxu0 %v16775_v44  ;;  %v17278_v4 = vpop.eup %17277  ;;  %v16840_v44 = vld [vmem:[#allocation16 + $0x704] ss:$16 sps:$4 sm:$0xff]  }
 0xb16   : > { %13432 = vmatpush1.bf16.msra.mxu1 %v16778_v19  ;;  %13392 = vmatprep.subr.bf16.mxu0 %v16783_v43  ;;  %v10964_v19 = vmul.f32 %v17278_v4, %v18232_v16  ;;  %v16835_v43 = vld [vmem:[#allocation16 + $0x500] ss:$16 sps:$4 sm:$0xff]  }
 0xb17   : > { %13433 = vmatprep.subr.bf16.mxu1 %v16786_v45  ;;  %v16838_v45 = vld [vmem:[#allocation16 + $0x700] ss:$16 sps:$4 sm:$0xff]  }
 0xb18   : > { %v16871_v4 = vld [vmem:[#allocation16 + $0x820] ss:$16 sps:$4 sm:$0xff]  }
 0xb19   : > { %13393 = vmatpush1.bf16.msra.mxu0 %v16781_v7  ;;  %v16843_v7 = vld [vmem:[#allocation16 + $0x8e4] ss:$16 sps:$4 sm:$0xff]  }
 0xb1a   : > { %13434 = vmatpush1.bf16.msra.mxu1 %v16784_v8  ;;  %13394 = vmatprep.subr.bf16.mxu0 %v16789_v10  ;;  %v10976_v8 = vmul.f32 %v10964_v19, %v10716_v24  ;;  %v16852_v10 = vld [vmem:[#allocation16 + $0xae4] ss:$16 sps:$4 sm:$0xff]  }
 0xb1b   : > { %13435 = vmatprep.subr.bf16.mxu1 %v16792_v29  ;;  %v16841_v29 = vld [vmem:[#allocation16 + $0x8e0] ss:$16 sps:$4 sm:$0xff]   ;;  %v16894_v24 = vld [vmem:[#allocation16 + $0xa04] ss:$16 sps:$4 sm:$0xff]  }
 0xb1c   : > { %v18335_v16 = vpack.c.bf16 %v10976_v8, %v10976_v8  ;;  %v16885_v19 = vld [vmem:[#allocation16 + $0x9e4] ss:$16 sps:$4 sm:$0xff]  }
 0xb1d   : > { %13395 = vmatpush1.bf16.msra.mxu0 %v16787_v12  ;;  %v18333_v12 = vpack.c.bf16 %v18298_v20, %v18298_v20  ;;  %v16844_v20 = vld [vmem:[#allocation16 + $0x8c0] ss:$16 sps:$4 sm:$0xff]   ;;  %v16900_v8 = vld [vmem:[#allocation16 + $0xbe4] ss:$16 sps:$4 sm:$0xff]  }
 0xb1e   : > { %13436 = vmatpush1.bf16.msra.mxu1 %v16790_v13  ;;  %13396 = vmatprep.subr.bf16.mxu0 %v16795_v14  ;;  %v16858_v13 = vld [vmem:[#allocation16 + $0xac4] ss:$16 sps:$4 sm:$0xff]  }
 0xb1f   : > { %13437 = vmatprep.subr.bf16.mxu1 %v16798_v22  ;;  %v17280_v22 = vpop.eup %17279 }
 0xb20   : > { %v10967_v31 = vmul.f32 %v17280_v22, %v18244_v23  ;;  %v16861_v23 = vld [vmem:[#allocation16 + $0x864] ss:$16 sps:$4 sm:$0xff]   ;;  %v16889_v22 = vld [vmem:[#allocation16 + $0x9c0] ss:$16 sps:$4 sm:$0xff]  }
 0xb21   : > { %13397 = vmatpush2.bf16.msra.mxu0 %v16793_v18 }
 0xb22   : > { %13438 = vmatpush2.bf16.msra.mxu1 %v16796_v25  ;;  %13398 = vmatprep.subr.bf16.mxu0 %v16801_v27  ;;  %v16849_v25 = vld [vmem:[#allocation16 + $0x8a4] ss:$16 sps:$4 sm:$0xff]   ;;  %v16856_v27 = vld [vmem:[#allocation16 + $0xac0] ss:$16 sps:$4 sm:$0xff]  }
 0xb23   : > { %13439 = vmatprep.subr.bf16.mxu1 %v16804_v56 }
 0xb25   : > { %13399 = vmatpush2.bf16.msra.mxu0 %v16799_v61  ;;  %v16864_v61 = vld [vmem:[#allocation16 + $0xaa4] ss:$16 sps:$4 sm:$0xff]  }
 0xb26   : > { %13440 = vmatpush2.bf16.msra.mxu1 %v16802_v35  ;;  %13400 = vmatprep.subr.bf16.mxu0 %v16807_v2 }
 0xb27   : > { %13441 = vmatprep.subr.bf16.mxu1 %v16810_v48 }
 0xb29   : > { %13401 = vmatpush2.bf16.msra.mxu0 %v16805_v39 }
 0xb2a   : > { %13442 = vmatpush2.bf16.msra.mxu1 %v16808_v41  ;;  %13402 = vmatprep.subr.bf16.mxu0 %v16813_v60  ;;  %v16855_v60 = vld [vmem:[#allocation16 + $0x884] ss:$16 sps:$4 sm:$0xff]  }
 0xb2b   : > { %13443 = vmatprep.subr.bf16.mxu1 %v16816_v40 }
 0xb2d   : > { %13403 = vmatpush2.bf16.msra.mxu0 %v16811_v49  ;;  %v16862_v49 = vld [vmem:[#allocation16 + $0xaa0] ss:$16 sps:$4 sm:$0xff]  }
 0xb2e   : > { %13444 = vmatpush2.bf16.msra.mxu1 %v16814_v55  ;;  %13404 = vmatprep.subr.bf16.mxu0 %v16819_v50  ;;  %v16870_v50 = vld [vmem:[#allocation16 + $0xa84] ss:$16 sps:$4 sm:$0xff]  }
 0xb2f   : > { %13445 = vmatprep.subr.bf16.mxu1 %v16822_v3  ;;  %v16853_v3 = vld [vmem:[#allocation16 + $0x880] ss:$16 sps:$4 sm:$0xff]  }
 0xb31   : > { %13405 = vmatpush2.bf16.msra.mxu0 %v16817_v52  ;;  %v16876_v52 = vld [vmem:[#allocation16 + $0xa64] ss:$16 sps:$4 sm:$0xff]  }
 0xb32   : > { %13446 = vmatpush2.bf16.msra.mxu1 %v16820_v46  ;;  %13406 = vmatprep.subr.bf16.mxu0 %v16825_v54  ;;  %v16859_v46 = vld [vmem:[#allocation16 + $0x860] ss:$16 sps:$4 sm:$0xff]   ;;  %v16867_v54 = vld [vmem:[#allocation16 + $0x844] ss:$16 sps:$4 sm:$0xff]  }
 0xb33   : > { %13447 = vmatprep.subr.bf16.mxu1 %v16828_v63  ;;  %v16874_v63 = vld [vmem:[#allocation16 + $0xa60] ss:$16 sps:$4 sm:$0xff]  }
 0xb35   : > { %13407 = vmatpush2.bf16.msra.mxu0 %v16823_v1  ;;  %v16882_v1 = vld [vmem:[#allocation16 + $0xa44] ss:$16 sps:$4 sm:$0xff]  }
 0xb36   : > { %13448 = vmatpush2.bf16.msra.mxu1 %v16826_v32  ;;  %13408 = vmatprep.subr.bf16.mxu0 %v16831_v38  ;;  %v16865_v32 = vld [vmem:[#allocation16 + $0x840] ss:$16 sps:$4 sm:$0xff]   ;;  %v16873_v38 = vld [vmem:[#allocation16 + $0x824] ss:$16 sps:$4 sm:$0xff]  }
 0xb37   : > { %13449 = vmatprep.subr.bf16.mxu1 %v16834_v59  ;;  %v16880_v59 = vld [vmem:[#allocation16 + $0xa40] ss:$16 sps:$4 sm:$0xff]  }
 0xb39   : > { %13409 = vmatpush2.bf16.msra.mxu0 %v16829_v21  ;;  %v16888_v21 = vld [vmem:[#allocation16 + $0xa24] ss:$16 sps:$4 sm:$0xff]  }
 0xb3a   : > { %13450 = vmatpush2.bf16.msra.mxu1 %v16832_v51  ;;  %13410 = vmatprep.subr.bf16.mxu0 %v16837_v6  ;;  %v16879_v51 = vld [vmem:[#allocation16 + $0x804] ss:$16 sps:$4 sm:$0xff]   ;;  %v16886_v6 = vld [vmem:[#allocation16 + $0xa20] ss:$16 sps:$4 sm:$0xff]  }
 0xb3b   : > { %13451 = vmatprep.subr.bf16.mxu1 %v16840_v44  ;;  %v16877_v44 = vld [vmem:[#allocation16 + $0x800] ss:$16 sps:$4 sm:$0xff]  }
 0xb3d   : > { %13411 = vmatpush2.bf16.msra.mxu0 %v16835_v43  ;;  %v15286_v43 = vmul.f32 -1.442695, %v18248_v47 }
 0xb3e   : > { %13452 = vmatpush2.bf16.msra.mxu1 %v16838_v45  ;;  %13462 = vmatprep.subr.bf16.mxu0 %v16843_v7  ;;  %v16892_v45 = vld [vmem:[#allocation16 + $0xa00] ss:$16 sps:$4 sm:$0xff]   ;;  %v15287_v7 = vmul.f32 -1.442695, %v18252_v15 }
 0xb3f   : > { %13503 = vmatprep.subr.bf16.mxu1 %v16852_v10  ;;  %v16883_v10 = vld [vmem:[#allocation16 + $0x9e0] ss:$16 sps:$4 sm:$0xff]   ;;  %17283 = vpow2.f32 %v15286_v43  ;;  %v16931_v43 = vld [vmem:[#allocation16 + $0xe8] ss:$16 sps:$4 sm:$0xff]  }
 0xb40   : > { %v18337_v14 = vpop.f32.mrf.mxu0  ;;  %13413 = vmatmul.mubr.bf16.vlgmr.msra.gmra.mxu0 %v18333_v12  ;;  %17285 = vpow2.f32 %v15287_v7 }
 0xb41   : > { %v18340_v17 = vpop.f32.mrf.mxu1  ;;  %13454 = vmatmul.mubr.bf16.vlgmr.msra.gmra.mxu1 %v18335_v16  ;;  %13463 = vmatpush1.bf16.msra.mxu0 %v16841_v29  ;;  %v16891_v29 = vld [vmem:[#allocation16 + $0x9c4] ss:$16 sps:$4 sm:$0xff]  }
 0xb42   : > { %v10758_v18 = vpop.f32.mrf.mxu0  ;;  %13464 = vmatprep.subr.bf16.mxu0 %v16846_v34  ;;  %13504 = vmatpush1.bf16.msra.mxu1 %v16850_v36  ;;  %v16898_v34 = vld [vmem:[#allocation16 + $0xbe0] ss:$16 sps:$4 sm:$0xff]   ;;  %v16906_v36 = vld [vmem:[#allocation16 + $0xbc4] ss:$16 sps:$4 sm:$0xff]  }
 0xb43   : > { %v10799_v56 = vpop.f32.mrf.mxu1  ;;  %13505 = vmatprep.subr.bf16.mxu1 %v16858_v13  ;;  %v17282_v13 = vpop.eup %17281 }
 0xb44   : > { %v10800_v35 = vadd.f32 %v10799_v56, %v10758_v18  ;;  %v10760_v2 = vpop.f32.mrf.mxu0  ;;  %v16904_v18 = vld [vmem:[#allocation16 + $0xbc0] ss:$16 sps:$4 sm:$0xff]  }
 0xb45   : > { %v10801_v48 = vpop.f32.mrf.mxu1  ;;  %13465 = vmatpush1.bf16.msra.mxu0 %v16844_v20  ;;  %v16897_v20 = vld [vmem:[#allocation16 + $0x9a4] ss:$16 sps:$4 sm:$0xff]   ;;  %v16895_v56 = vld [vmem:[#allocation16 + $0x9a0] ss:$16 sps:$4 sm:$0xff]  }
 0xb46   : > { %v10979_v39 = vmul.f32 %v10967_v31, %v10800_v35  ;;  %v10761_v41 = vpop.f32.mrf.mxu0  ;;  %13466 = vmatprep.subr.bf16.mxu0 %v16849_v25  ;;  %13506 = vmatpush1.bf16.msra.mxu1 %v16856_v27  ;;  %v10930_v25 = vadd.f32 1.0, %v17282_v13  ;;  %v16912_v27 = vld [vmem:[#allocation16 + $0xba4] ss:$16 sps:$4 sm:$0xff]   ;;  %v16910_v31 = vld [vmem:[#allocation16 + $0xba0] ss:$16 sps:$4 sm:$0xff]  }
 0xb47   : > { %v10802_v40 = vpop.f32.mrf.mxu1  ;;  %13507 = vmatprep.subr.bf16.mxu1 %v16864_v61  ;;  %v16903_v61 = vld [vmem:[#allocation16 + $0x984] ss:$16 sps:$4 sm:$0xff]   ;;  %v16901_v2 = vld [vmem:[#allocation16 + $0x980] ss:$16 sps:$4 sm:$0xff]  }
 0xb48   : > { %v18344_v55 = vpack.c.bf16 %v10979_v39, %v10979_v39  ;;  %17287 = vrcp.f32 %v10930_v25  ;;  %v16918_v35 = vld [vmem:[#allocation16 + $0xb84] ss:$16 sps:$4 sm:$0xff]   ;;  %v16907_v40 = vld [vmem:[#allocation16 + $0x960] ss:$16 sps:$4 sm:$0xff]  }
 0xb49   : > { %13467 = vmatpush1.bf16.msra.mxu0 %v16847_v37  ;;  %v16909_v48 = vld [vmem:[#allocation16 + $0x964] ss:$16 sps:$4 sm:$0xff]   ;;  %v16916_v37 = vld [vmem:[#allocation16 + $0xb80] ss:$16 sps:$4 sm:$0xff]  }
 0xb4a   : > { %13494 = vmatprep.mubr.bf16.mxu0 %v18344_v55  ;;  %13468 = vmatprep.subr.bf16.mxu0 %v16855_v60  ;;  %v16924_v41 = vld [vmem:[#allocation16 + $0xb64] ss:$16 sps:$4 sm:$0xff]  }
 0xb4b   : > { %13508 = vmatpush1.bf16.msra.mxu1 %v16862_v49  ;;  %v16915_v49 = vld [vmem:[#allocation16 + $0x944] ss:$16 sps:$4 sm:$0xff]  }
 0xb4c   : > { %13509 = vmatprep.subr.bf16.mxu1 %v16870_v50  ;;  %v17284_v39 = vpop.eup %17283 }
 0xb4d   : > { %13469 = vmatpush1.bf16.msra.mxu0 %v16853_v3  ;;  %v17286_v60 = vpop.eup %17285  ;;  %v10932_v50 = vadd.f32 1.0, %v17284_v39  ;;  %v16922_v3 = vld [vmem:[#allocation16 + $0xb60] ss:$16 sps:$4 sm:$0xff]  }
 0xb4e   : > { %13470 = vmatprep.subr.bf16.mxu0 %v16861_v23  ;;  %v10933_v23 = vadd.f32 1.0, %v17286_v60  ;;  %v16952_v60 = vld [vmem:[#allocation16 + $0x2c8] ss:$16 sps:$4 sm:$0xff]  }
 0xb4f   : > { %13510 = vmatpush1.bf16.msra.mxu1 %v16868_v11  ;;  %v16930_v11 = vld [vmem:[#allocation16 + $0xb44] ss:$16 sps:$4 sm:$0xff]   ;;  %17289 = vrcp.f32 %v10932_v50  ;;  %v16963_v50 = vld [vmem:[#allocation16 + $0x4c] ss:$16 sps:$4 sm:$0xff]  }
 0xb50   : > { %13511 = vmatprep.subr.bf16.mxu1 %v16876_v52  ;;  %v16913_v52 = vld [vmem:[#allocation16 + $0x940] ss:$16 sps:$4 sm:$0xff]   ;;  %17291 = vrcp.f32 %v10933_v23  ;;  %v16961_v23 = vld [vmem:[#allocation16 + $0x48] ss:$16 sps:$4 sm:$0xff]  }
 0xb51   : > { %13471 = vmatpush1.bf16.msra.mxu0 %v16859_v46  ;;  %v16921_v46 = vld [vmem:[#allocation16 + $0x924] ss:$16 sps:$4 sm:$0xff]  }
 0xb52   : > { %13472 = vmatprep.subr.bf16.mxu0 %v16867_v54  ;;  %v16928_v54 = vld [vmem:[#allocation16 + $0xb40] ss:$16 sps:$4 sm:$0xff]  }
 0xb53   : > { %13512 = vmatpush1.bf16.msra.mxu1 %v16874_v63  ;;  %v16936_v63 = vld [vmem:[#allocation16 + $0xb24] ss:$16 sps:$4 sm:$0xff]  }
 0xb54   : > { %13513 = vmatprep.subr.bf16.mxu1 %v16882_v1  ;;  %v16919_v1 = vld [vmem:[#allocation16 + $0x920] ss:$16 sps:$4 sm:$0xff]  }
 0xb55   : > { %13473 = vmatpush1.bf16.msra.mxu0 %v16865_v32  ;;  %v17288_v62 = vpop.eup %17287  ;;  %v10798_v32 = vadd.f32 %v18340_v17, %v18337_v14  ;;  %v16939_v17 = vld [vmem:[#allocation16 + $0xcc] ss:$16 sps:$4 sm:$0xff]  }
 0xb56   : > { %13474 = vmatprep.subr.bf16.mxu0 %v16873_v38  ;;  %v16927_v38 = vld [vmem:[#allocation16 + $0x904] ss:$16 sps:$4 sm:$0xff]  }
 0xb57   : > { %13514 = vmatpush1.bf16.msra.mxu1 %v16880_v59  ;;  %v16934_v59 = vld [vmem:[#allocation16 + $0xb20] ss:$16 sps:$4 sm:$0xff]  }
 0xb58   : > { %13515 = vmatprep.subr.bf16.mxu1 %v16888_v21  ;;  %v10966_v21 = vmul.f32 %v17288_v62, %v18240_v9  ;;  %v16970_v62 = vld [vmem:[#allocation16 + $0x268] ss:$16 sps:$4 sm:$0xff]  }
 0xb59   : > { %13475 = vmatpush1.bf16.msra.mxu0 %v16871_v4  ;;  %v16942_v4 = vld [vmem:[#allocation16 + $0xb04] ss:$16 sps:$4 sm:$0xff]  }
 0xb5a   : > { %13476 = vmatprep.subr.bf16.mxu0 %v16879_v51  ;;  %v16925_v51 = vld [vmem:[#allocation16 + $0x900] ss:$16 sps:$4 sm:$0xff]  }
 0xb5b   : > { %13516 = vmatpush1.bf16.msra.mxu1 %v16886_v6  ;;  %v10978_v6 = vmul.f32 %v10966_v21, %v10798_v32  ;;  %v16978_v32 = vld [vmem:[#allocation16 + $0x24c] ss:$16 sps:$4 sm:$0xff]   ;;  %v16979_v21 = vld [vmem:[#allocation16 + $0x1e8] ss:$16 sps:$4 sm:$0xff]  }
 0xb5c   : > { %13517 = vmatprep.subr.bf16.mxu1 %v16894_v24  ;;  %v16933_v24 = vld [vmem:[#allocation16 + $0xec] ss:$16 sps:$4 sm:$0xff]  }
 0xb5d   : > { %13477 = vmatpush1.bf16.msra.mxu0 %v16877_v44  ;;  %v16940_v44 = vld [vmem:[#allocation16 + $0xb00] ss:$16 sps:$4 sm:$0xff]   ;;  %v18353_v14 = vpack.c.bf16 %v10978_v6, %v10978_v6  ;;  %v16982_v6 = vld [vmem:[#allocation16 + $0x228] ss:$16 sps:$4 sm:$0xff]  }
 0xb5e   : > { %13478 = vmatprep.subr.bf16.mxu0 %v16885_v19  ;;  %v16948_v19 = vld [vmem:[#allocation16 + $0x2ec] ss:$16 sps:$4 sm:$0xff]  }
 0xb5f   : > { %13518 = vmatpush1.bf16.msra.mxu1 %v16892_v45  ;;  %v17290_v45 = vpop.eup %17289 }
 0xb60   : > { %13519 = vmatprep.subr.bf16.mxu1 %v16900_v8  ;;  %v17292_v7 = vpop.eup %17291  ;;  %v10968_v13 = vmul.f32 %v17290_v45, %v18248_v47  ;;  %v16949_v47 = vld [vmem:[#allocation16 + $0x88] ss:$16 sps:$4 sm:$0xff]   ;;  %v16996_v45 = vld [vmem:[#allocation16 + $0x3ec] ss:$16 sps:$4 sm:$0xff]  }
 0xb61   : > { %13479 = vmatpush2.bf16.msra.mxu0 %v16883_v10  ;;  %v16937_v10 = vld [vmem:[#allocation16 + $0xc8] ss:$16 sps:$4 sm:$0xff]  }
 0xb62   : > { %13480 = vmatprep.subr.bf16.mxu0 %v16891_v29 }
 0xb63   : > { %13520 = vmatpush2.bf16.msra.mxu1 %v16898_v34 }
 0xb64   : > { %13521 = vmatprep.subr.bf16.mxu1 %v16906_v36  ;;  %v16945_v36 = vld [vmem:[#allocation16 + $0xac] ss:$16 sps:$4 sm:$0xff]  }
 0xb65   : > { %13481 = vmatpush2.bf16.msra.mxu0 %v16889_v22 }
 0xb66   : > { %13482 = vmatprep.subr.bf16.mxu0 %v16897_v20  ;;  %v10969_v20 = vmul.f32 %v17292_v7, %v18252_v15  ;;  %v16957_v15 = vld [vmem:[#allocation16 + $0x6c] ss:$16 sps:$4 sm:$0xff]   ;;  %v16994_v7 = vld [vmem:[#allocation16 + $0x3e8] ss:$16 sps:$4 sm:$0xff]  }
 0xb67   : > { %13522 = vmatpush2.bf16.msra.mxu1 %v16904_v18 }
 0xb68   : > { %13523 = vmatprep.subr.bf16.mxu1 %v16912_v27 }
 0xb69   : > { %13483 = vmatpush2.bf16.msra.mxu0 %v16895_v56 }
 0xb6a   : > { %13484 = vmatprep.subr.bf16.mxu0 %v16903_v61  ;;  %v16943_v61 = vld [vmem:[#allocation16 + $0xa8] ss:$16 sps:$4 sm:$0xff]  }
 0xb6b   : > { %13524 = vmatpush2.bf16.msra.mxu1 %v16910_v31 }
 0xb6c   : > { %13525 = vmatprep.subr.bf16.mxu1 %v16918_v35 }
 0xb6d   : > { %13485 = vmatpush2.bf16.msra.mxu0 %v16901_v2 }
 0xb6e   : > { %13486 = vmatprep.subr.bf16.mxu0 %v16909_v48 }
 0xb6f   : > { %13526 = vmatpush2.bf16.msra.mxu1 %v16916_v37  ;;  %v16946_v37 = vld [vmem:[#allocation16 + $0x2e8] ss:$16 sps:$4 sm:$0xff]  }
 0xb70   : > { %13527 = vmatprep.subr.bf16.mxu1 %v16924_v41  ;;  %v16954_v41 = vld [vmem:[#allocation16 + $0x2cc] ss:$16 sps:$4 sm:$0xff]  }
 0xb71   : > { %13487 = vmatpush2.bf16.msra.mxu0 %v16907_v40  ;;  %v16955_v40 = vld [vmem:[#allocation16 + $0x68] ss:$16 sps:$4 sm:$0xff]  }
 0xb72   : > { %13488 = vmatprep.subr.bf16.mxu0 %v16915_v49  ;;  %v16960_v49 = vld [vmem:[#allocation16 + $0x2ac] ss:$16 sps:$4 sm:$0xff]  }
 0xb73   : > { %13528 = vmatpush2.bf16.msra.mxu1 %v16922_v3  ;;  %v16958_v3 = vld [vmem:[#allocation16 + $0x2a8] ss:$16 sps:$4 sm:$0xff]  }
 0xb74   : > { %13529 = vmatprep.subr.bf16.mxu1 %v16930_v11  ;;  %v16966_v11 = vld [vmem:[#allocation16 + $0x28c] ss:$16 sps:$4 sm:$0xff]  }
 0xb75   : > { %13489 = vmatpush2.bf16.msra.mxu0 %v16913_v52  ;;  %v16969_v52 = vld [vmem:[#allocation16 + $0x2c] ss:$16 sps:$4 sm:$0xff]  }
 0xb76   : > { %13490 = vmatprep.subr.bf16.mxu0 %v16921_v46  ;;  %v16964_v46 = vld [vmem:[#allocation16 + $0x288] ss:$16 sps:$4 sm:$0xff]  }
 0xb77   : > { %13530 = vmatpush2.bf16.msra.mxu1 %v16928_v54  ;;  %v16972_v54 = vld [vmem:[#allocation16 + $0x26c] ss:$16 sps:$4 sm:$0xff]  }
 0xb78   : > { %13531 = vmatprep.subr.bf16.mxu1 %v16936_v63  ;;  %v16975_v63 = vld [vmem:[#allocation16 + $0xc] ss:$16 sps:$4 sm:$0xff]  }
 0xb79   : > { %13491 = vmatpush2.bf16.msra.mxu0 %v16919_v1  ;;  %v16973_v1 = vld [vmem:[#allocation16 + $0x8] ss:$16 sps:$4 sm:$0xff]  }
 0xb7a   : > { %13492 = vmatprep.subr.bf16.mxu0 %v16927_v38  ;;  %v16981_v38 = vld [vmem:[#allocation16 + $0x1ec] ss:$16 sps:$4 sm:$0xff]  }
 0xb7b   : > { %13532 = vmatpush2.bf16.msra.mxu1 %v16934_v59  ;;  %v16976_v59 = vld [vmem:[#allocation16 + $0x248] ss:$16 sps:$4 sm:$0xff]  }
 0xb7c   : > { %13533 = vmatprep.subr.bf16.mxu1 %v16942_v4  ;;  %v16984_v4 = vld [vmem:[#allocation16 + $0x22c] ss:$16 sps:$4 sm:$0xff]  }
 0xb7d   : > { %13493 = vmatpush2.bf16.msra.mxu0 %v16925_v51  ;;  %v16987_v51 = vld [vmem:[#allocation16 + $0x1cc] ss:$16 sps:$4 sm:$0xff]  }
 0xb7e   : > { %13544 = vmatprep.subr.bf16.mxu0 %v16933_v24  ;;  %v16985_v24 = vld [vmem:[#allocation16 + $0x1c8] ss:$16 sps:$4 sm:$0xff]  }
 0xb7f   : > { %13534 = vmatpush2.bf16.msra.mxu1 %v16940_v44  ;;  %v16990_v44 = vld [vmem:[#allocation16 + $0x20c] ss:$16 sps:$4 sm:$0xff]  }
 0xb80   : > { %v10838_v9 = vpop.f32.mrf.mxu0  ;;  %13495 = vmatmul.mubr.bf16.vlgmr.msra.gmra.mxu0 %v18353_v14  ;;  %13585 = vmatprep.subr.bf16.mxu1 %v16948_v19  ;;  %v16993_v19 = vld [vmem:[#allocation16 + $0x1ac] ss:$16 sps:$4 sm:$0xff]  }
 0xb81   : > { %v10879_v8 = vpop.f32.mrf.mxu1  ;;  %13545 = vmatpush1.bf16.msra.mxu0 %v16931_v43  ;;  %13576 = vmatprep.mubr.bf16.mxu0 %v18285_v30  ;;  %v16951_v30 = vld [vmem:[#allocation16 + $0x8c] ss:$16 sps:$4 sm:$0xff]   ;;  %v16988_v43 = vld [vmem:[#allocation16 + $0x208] ss:$16 sps:$4 sm:$0xff]  }
 0xb82   : > { %v10880_v29 = vadd.f32 %v10879_v8, %v10838_v9  ;;  %v10840_v34 = vpop.f32.mrf.mxu0  ;;  %13546 = vmatprep.subr.bf16.mxu0 %v16939_v17  ;;  %v16991_v17 = vld [vmem:[#allocation16 + $0x1a8] ss:$16 sps:$4 sm:$0xff]   ;;  %v16999_v9 = vld [vmem:[#allocation16 + $0x18c] ss:$16 sps:$4 sm:$0xff]  }
 0xb83   : > { %v10881_v22 = vpop.f32.mrf.mxu1  ;;  %v16997_v8 = vld [vmem:[#allocation16 + $0x188] ss:$16 sps:$4 sm:$0xff]  }
 0xb84   : > { %v10882_v18 = vadd.f32 %v10881_v22, %v10840_v34  ;;  %v10842_v25 = vpop.f32.mrf.mxu0  ;;  %v10980_v27 = vmul.f32 %v10968_v13, %v10880_v29  ;;  %v17005_v29 = vld [vmem:[#allocation16 + $0x16c] ss:$16 sps:$4 sm:$0xff]   ;;  %v17000_v34 = vld [vmem:[#allocation16 + $0x3c8] ss:$16 sps:$4 sm:$0xff]  }
 0xb85   : > { %v10883_v56 = vpop.f32.mrf.mxu1  ;;  %13547 = vmatpush1.bf16.msra.mxu0 %v16937_v10  ;;  %v17002_v10 = vld [vmem:[#allocation16 + $0x3cc] ss:$16 sps:$4 sm:$0xff]  }
 0xb86   : > { %v10981_v31 = vmul.f32 %v10969_v20, %v10882_v18  ;;  %v10843_v35 = vpop.f32.mrf.mxu0  ;;  %13548 = vmatprep.subr.bf16.mxu0 %v16945_v36  ;;  %v18361_v39 = vpack.c.bf16 %v10980_v27, %v10980_v27  ;;  %v17003_v36 = vld [vmem:[#allocation16 + $0x168] ss:$16 sps:$4 sm:$0xff]   ;;  %v17008_v13 = vld [vmem:[#allocation16 + $0x3ac] ss:$16 sps:$4 sm:$0xff]  }
 0xb87   : > { %v10884_v2 = vpop.f32.mrf.mxu1  ;;  %v17011_v22 = vld [vmem:[#allocation16 + $0x14c] ss:$16 sps:$4 sm:$0xff]   ;;  %v17006_v20 = vld [vmem:[#allocation16 + $0x3a8] ss:$16 sps:$4 sm:$0xff]  }
 0xb88   : > { %v18359_v48 = vpack.c.bf16 %v10981_v31, %v10981_v31  ;;  %v17009_v18 = vld [vmem:[#allocation16 + $0x148] ss:$16 sps:$4 sm:$0xff]   ;;  %v17014_v25 = vld [vmem:[#allocation16 + $0x38c] ss:$16 sps:$4 sm:$0xff]  }
 0xb89   : > { %13549 = vmatpush1.bf16.msra.mxu0 %v16943_v61  ;;  %v17017_v27 = vld [vmem:[#allocation16 + $0x12c] ss:$16 sps:$4 sm:$0xff]   ;;  %v17012_v56 = vld [vmem:[#allocation16 + $0x388] ss:$16 sps:$4 sm:$0xff]  }
 0xb8a   : > { %13535 = vmatprep.mubr.bf16.mxu1 %v18359_v48  ;;  %13550 = vmatprep.subr.bf16.mxu0 %v16951_v30  ;;  %v17015_v61 = vld [vmem:[#allocation16 + $0x128] ss:$16 sps:$4 sm:$0xff]   ;;  %v17020_v31 = vld [vmem:[#allocation16 + $0x36c] ss:$16 sps:$4 sm:$0xff]  }
 0xb8b   : > { %13536 = vmatmul.mubr.bf16.vlgmr.msra.gmra.mxu1 %v18361_v39  ;;  %v17023_v35 = vld [vmem:[#allocation16 + $0x10c] ss:$16 sps:$4 sm:$0xff]   ;;  %v17018_v30 = vld [vmem:[#allocation16 + $0x368] ss:$16 sps:$4 sm:$0xff]  }
 0xb8c   : > { %13586 = vmatpush1.bf16.msra.mxu1 %v16946_v37  ;;  %13617 = vmatprep.mubr.bf16.mxu1 %v18288_v5  ;;  %v16967_v5 = vld [vmem:[#allocation16 + $0x28] ss:$16 sps:$4 sm:$0xff]   ;;  %v17026_v37 = vld [vmem:[#allocation16 + $0x34c] ss:$16 sps:$4 sm:$0xff]  }
 0xb8d   : > { %13551 = vmatpush1.bf16.msra.mxu0 %v16949_v47  ;;  %13587 = vmatprep.subr.bf16.mxu1 %v16954_v41  ;;  %v17021_v2 = vld [vmem:[#allocation16 + $0x108] ss:$16 sps:$4 sm:$0xff]   ;;  %v17029_v47 = vld [vmem:[#allocation16 + $0x4ec] ss:$16 sps:$4 sm:$0xff]  }
 0xb8e   : > { %13552 = vmatprep.subr.bf16.mxu0 %v16957_v15  ;;  %v17024_v41 = vld [vmem:[#allocation16 + $0x348] ss:$16 sps:$4 sm:$0xff]  }
 0xb8f   : > { %v17027_v15 = vld [vmem:[#allocation16 + $0x4e8] ss:$16 sps:$4 sm:$0xff]  }
 0xb90   : > { %13588 = vmatpush1.bf16.msra.mxu1 %v16952_v60  ;;  %v17032_v60 = vld [vmem:[#allocation16 + $0x32c] ss:$16 sps:$4 sm:$0xff]  }
 0xb91   : > { %13553 = vmatpush1.bf16.msra.mxu0 %v16955_v40  ;;  %13589 = vmatprep.subr.bf16.mxu1 %v16960_v49  ;;  %v17035_v40 = vld [vmem:[#allocation16 + $0x4cc] ss:$16 sps:$4 sm:$0xff]  }
 0xb92   : > { %13554 = vmatprep.subr.bf16.mxu0 %v16963_v50  ;;  %v17030_v50 = vld [vmem:[#allocation16 + $0x328] ss:$16 sps:$4 sm:$0xff]  }
 0xb94   : > { %13590 = vmatpush1.bf16.msra.mxu1 %v16958_v3 }
 0xb95   : > { %13555 = vmatpush1.bf16.msra.mxu0 %v16961_v23  ;;  %13591 = vmatprep.subr.bf16.mxu1 %v16966_v11  ;;  %v17033_v23 = vld [vmem:[#allocation16 + $0x4c8] ss:$16 sps:$4 sm:$0xff]   ;;  %v17038_v11 = vld [vmem:[#allocation16 + $0x30c] ss:$16 sps:$4 sm:$0xff]  }
 0xb96   : > { %13556 = vmatprep.subr.bf16.mxu0 %v16969_v52 }
 0xb98   : > { %13592 = vmatpush1.bf16.msra.mxu1 %v16964_v46 }
 0xb99   : > { %13557 = vmatpush1.bf16.msra.mxu0 %v16967_v5  ;;  %13593 = vmatprep.subr.bf16.mxu1 %v16972_v54  ;;  %v17041_v5 = vld [vmem:[#allocation16 + $0x4ac] ss:$16 sps:$4 sm:$0xff]  }
 0xb9a   : > { %13558 = vmatprep.subr.bf16.mxu0 %v16975_v63 }
 0xb9c   : > { %13594 = vmatpush1.bf16.msra.mxu1 %v16970_v62 }
 0xb9d   : > { %13559 = vmatpush1.bf16.msra.mxu0 %v16973_v1  ;;  %13595 = vmatprep.subr.bf16.mxu1 %v16978_v32  ;;  %v17036_v1 = vld [vmem:[#allocation16 + $0x308] ss:$16 sps:$4 sm:$0xff]  }
 0xb9e   : > { %13560 = vmatprep.subr.bf16.mxu0 %v16981_v38  ;;  %v17039_v32 = vld [vmem:[#allocation16 + $0x4a8] ss:$16 sps:$4 sm:$0xff]   ;;  %v17044_v38 = vld [vmem:[#allocation16 + $0x6ec] ss:$16 sps:$4 sm:$0xff]  }
 0xba0   : > { %13596 = vmatpush1.bf16.msra.mxu1 %v16976_v59 }
 0xba1   : > { %13561 = vmatpush2.bf16.msra.mxu0 %v16979_v21  ;;  %13597 = vmatprep.subr.bf16.mxu1 %v16984_v4  ;;  %v17047_v21 = vld [vmem:[#allocation16 + $0x48c] ss:$16 sps:$4 sm:$0xff]  }
 0xba2   : > { %13562 = vmatprep.subr.bf16.mxu0 %v16987_v51  ;;  %v17045_v51 = vld [vmem:[#allocation16 + $0x488] ss:$16 sps:$4 sm:$0xff]  }
 0xba4   : > { %13598 = vmatpush1.bf16.msra.mxu1 %v16982_v6  ;;  %v17050_v6 = vld [vmem:[#allocation16 + $0x6cc] ss:$16 sps:$4 sm:$0xff]  }
 0xba5   : > { %13563 = vmatpush2.bf16.msra.mxu0 %v16985_v24  ;;  %13599 = vmatprep.subr.bf16.mxu1 %v16990_v44  ;;  %v17053_v24 = vld [vmem:[#allocation16 + $0x46c] ss:$16 sps:$4 sm:$0xff]   ;;  %v17048_v44 = vld [vmem:[#allocation16 + $0x6c8] ss:$16 sps:$4 sm:$0xff]  }
 0xba6   : > { %13564 = vmatprep.subr.bf16.mxu0 %v16993_v19  ;;  %v17051_v19 = vld [vmem:[#allocation16 + $0x468] ss:$16 sps:$4 sm:$0xff]  }
 0xba8   : > { %13600 = vmatpush1.bf16.msra.mxu1 %v16988_v43  ;;  %v17056_v43 = vld [vmem:[#allocation16 + $0x6ac] ss:$16 sps:$4 sm:$0xff]  }
 0xba9   : > { %13565 = vmatpush2.bf16.msra.mxu0 %v16991_v17  ;;  %13601 = vmatprep.subr.bf16.mxu1 %v16996_v45  ;;  %v17059_v17 = vld [vmem:[#allocation16 + $0x44c] ss:$16 sps:$4 sm:$0xff]   ;;  %v17054_v45 = vld [vmem:[#allocation16 + $0x6a8] ss:$16 sps:$4 sm:$0xff]  }
 0xbaa   : > { %13566 = vmatprep.subr.bf16.mxu0 %v16999_v9  ;;  %v17057_v9 = vld [vmem:[#allocation16 + $0x448] ss:$16 sps:$4 sm:$0xff]  }
 0xbac   : > { %13602 = vmatpush2.bf16.msra.mxu1 %v16994_v7  ;;  %v17062_v7 = vld [vmem:[#allocation16 + $0x68c] ss:$16 sps:$4 sm:$0xff]  }
 0xbad   : > { %13567 = vmatpush2.bf16.msra.mxu0 %v16997_v8  ;;  %13603 = vmatprep.subr.bf16.mxu1 %v17002_v10  ;;  %v17065_v8 = vld [vmem:[#allocation16 + $0x42c] ss:$16 sps:$4 sm:$0xff]  }
 0xbae   : > { %13568 = vmatprep.subr.bf16.mxu0 %v17005_v29  ;;  %v17068_v10 = vld [vmem:[#allocation16 + $0x66c] ss:$16 sps:$4 sm:$0xff]  }
 0xbaf   : > { %v17071_v29 = vld [vmem:[#allocation16 + $0x40c] ss:$16 sps:$4 sm:$0xff]  }
 0xbb0   : > { %13604 = vmatpush2.bf16.msra.mxu1 %v17000_v34  ;;  %v17066_v34 = vld [vmem:[#allocation16 + $0x668] ss:$16 sps:$4 sm:$0xff]  }
 0xbb1   : > { %13569 = vmatpush2.bf16.msra.mxu0 %v17003_v36  ;;  %13605 = vmatprep.subr.bf16.mxu1 %v17008_v13  ;;  %v17069_v36 = vld [vmem:[#allocation16 + $0x408] ss:$16 sps:$4 sm:$0xff]   ;;  %v17074_v13 = vld [vmem:[#allocation16 + $0x64c] ss:$16 sps:$4 sm:$0xff]  }
 0xbb2   : > { %13570 = vmatprep.subr.bf16.mxu0 %v17011_v22  ;;  %v17077_v22 = vld [vmem:[#allocation16 + $0x5ec] ss:$16 sps:$4 sm:$0xff]  }
 0xbb4   : > { %13606 = vmatpush2.bf16.msra.mxu1 %v17006_v20  ;;  %v17072_v20 = vld [vmem:[#allocation16 + $0x648] ss:$16 sps:$4 sm:$0xff]  }
 0xbb5   : > { %13571 = vmatpush2.bf16.msra.mxu0 %v17009_v18  ;;  %13607 = vmatprep.subr.bf16.mxu1 %v17014_v25  ;;  %v17075_v18 = vld [vmem:[#allocation16 + $0x5e8] ss:$16 sps:$4 sm:$0xff]   ;;  %v17080_v25 = vld [vmem:[#allocation16 + $0x62c] ss:$16 sps:$4 sm:$0xff]  }
 0xbb6   : > { %13572 = vmatprep.subr.bf16.mxu0 %v17017_v27  ;;  %v17083_v27 = vld [vmem:[#allocation16 + $0x5cc] ss:$16 sps:$4 sm:$0xff]  }
 0xbb8   : > { %13608 = vmatpush2.bf16.msra.mxu1 %v17012_v56  ;;  %v17078_v56 = vld [vmem:[#allocation16 + $0x628] ss:$16 sps:$4 sm:$0xff]  }
 0xbb9   : > { %13573 = vmatpush2.bf16.msra.mxu0 %v17015_v61  ;;  %13609 = vmatprep.subr.bf16.mxu1 %v17020_v31  ;;  %v17081_v61 = vld [vmem:[#allocation16 + $0x5c8] ss:$16 sps:$4 sm:$0xff]   ;;  %v17086_v31 = vld [vmem:[#allocation16 + $0x60c] ss:$16 sps:$4 sm:$0xff]  }
 0xbba   : > { %13574 = vmatprep.subr.bf16.mxu0 %v17023_v35  ;;  %v17089_v35 = vld [vmem:[#allocation16 + $0x5ac] ss:$16 sps:$4 sm:$0xff]  }
 0xbbc   : > { %13610 = vmatpush2.bf16.msra.mxu1 %v17018_v30  ;;  %v17084_v30 = vld [vmem:[#allocation16 + $0x608] ss:$16 sps:$4 sm:$0xff]  }
 0xbbd   : > { %13575 = vmatpush2.bf16.msra.mxu0 %v17021_v2  ;;  %13611 = vmatprep.subr.bf16.mxu1 %v17026_v37  ;;  %v17087_v2 = vld [vmem:[#allocation16 + $0x5a8] ss:$16 sps:$4 sm:$0xff]   ;;  %v17092_v37 = vld [vmem:[#allocation16 + $0x7ec] ss:$16 sps:$4 sm:$0xff]  }
 0xbbe   : > { %13626 = vmatprep.subr.bf16.mxu0 %v17029_v47  ;;  %v17095_v47 = vld [vmem:[#allocation16 + $0x58c] ss:$16 sps:$4 sm:$0xff]  }
 0xbc0   : > { %13612 = vmatpush2.bf16.msra.mxu1 %v17024_v41  ;;  %v13332_v49 = vpop.f32.mrf.mxu0  ;;  %13577 = vmatmul.mubr.bf16.vlgmr.msra.gmra.mxu0 %v18307_v28  ;;  %v17090_v41 = vld [vmem:[#allocation16 + $0x7e8] ss:$16 sps:$4 sm:$0xff]  }
 0xbc1   : > { %v13373_v3 = vpop.f32.mrf.mxu1  ;;  %13613 = vmatprep.subr.bf16.mxu1 %v17032_v60  ;;  %13627 = vmatpush1.bf16.msra.mxu0 %v17027_v15  ;;  %v17093_v15 = vld [vmem:[#allocation16 + $0x588] ss:$16 sps:$4 sm:$0xff]   ;;  %v17098_v60 = vld [vmem:[#allocation16 + $0x7cc] ss:$16 sps:$4 sm:$0xff]  }
 0xbc2   : > { %v18367_v52 = vadd.f32 %v13373_v3, %v13332_v49  ;;  %13658 = vmatprep.mubr.bf16.mxu0 %v18313_v33  ;;  %v13334_v46 = vpop.f32.mrf.mxu0  ;;  %13628 = vmatprep.subr.bf16.mxu0 %v17035_v40  ;;  %v17042_v33 = vld [vmem:[#allocation16 + $0x6e8] ss:$16 sps:$4 sm:$0xff]   ;;  %v17101_v40 = vld [vmem:[#allocation16 + $0x56c] ss:$16 sps:$4 sm:$0xff]  }
 0xbc3   : > { %v13375_v54 = vpop.f32.mrf.mxu1  ;;  %v17096_v49 = vld [vmem:[#allocation16 + $0x7c8] ss:$16 sps:$4 sm:$0xff]   ;;  %v17104_v3 = vld [vmem:[#allocation16 + $0x7ac] ss:$16 sps:$4 sm:$0xff]  }
 0xbc4   : > { %v18370_v63 = vadd.f32 %v13375_v54, %v13334_v46  ;;  %13614 = vmatpush2.bf16.msra.mxu1 %v17030_v50  ;;  %v13336_v62 = vpop.f32.mrf.mxu0  ;;  %v17099_v50 = vld [vmem:[#allocation16 + $0x568] ss:$16 sps:$4 sm:$0xff]   ;;  %v17113_v54 = vld [vmem:[#allocation16 + $0x52c] ss:$16 sps:$4 sm:$0xff]  }
 0xbc5   : > { %v13377_v28 = vpop.f32.mrf.mxu1  ;;  %13615 = vmatprep.subr.bf16.mxu1 %v17038_v11  ;;  %13629 = vmatpush1.bf16.msra.mxu0 %v17033_v23  ;;  %v17107_v23 = vld [vmem:[#allocation16 + $0x54c] ss:$16 sps:$4 sm:$0xff]   ;;  %v17102_v11 = vld [vmem:[#allocation16 + $0x7a8] ss:$16 sps:$4 sm:$0xff]  }
 0xbc6   : > { %v13337_v59 = vpop.f32.mrf.mxu0  ;;  %13630 = vmatprep.subr.bf16.mxu0 %v17041_v5  ;;  %v17105_v46 = vld [vmem:[#allocation16 + $0x548] ss:$16 sps:$4 sm:$0xff]   ;;  %v17110_v5 = vld [vmem:[#allocation16 + $0x78c] ss:$16 sps:$4 sm:$0xff]  }
 0xbc7   : > { %v13378_v4 = vpop.f32.mrf.mxu1  ;;  %v17108_v62 = vld [vmem:[#allocation16 + $0x788] ss:$16 sps:$4 sm:$0xff]   ;;  %v17116_v28 = vld [vmem:[#allocation16 + $0x76c] ss:$16 sps:$4 sm:$0xff]  }
 0xbc8   : > { %13616 = vmatpush2.bf16.msra.mxu1 %v17036_v1  ;;  %v17111_v1 = vld [vmem:[#allocation16 + $0x528] ss:$16 sps:$4 sm:$0xff]   ;;  %v17125_v4 = vld [vmem:[#allocation16 + $0x8ec] ss:$16 sps:$4 sm:$0xff]  }
 0xbc9   : > { %13631 = vmatpush1.bf16.msra.mxu0 %v17039_v32  ;;  %13667 = vmatprep.subr.bf16.mxu1 %v17044_v38  ;;  %v17119_v32 = vld [vmem:[#allocation16 + $0x50c] ss:$16 sps:$4 sm:$0xff]   ;;  %v17114_v38 = vld [vmem:[#allocation16 + $0x768] ss:$16 sps:$4 sm:$0xff]  }
 0xbca   : > { %13632 = vmatprep.subr.bf16.mxu0 %v17047_v21  ;;  %v17117_v59 = vld [vmem:[#allocation16 + $0x508] ss:$16 sps:$4 sm:$0xff]   ;;  %v17122_v21 = vld [vmem:[#allocation16 + $0x74c] ss:$16 sps:$4 sm:$0xff]  }
 0xbcb   : > { %13618 = vmatmul.mubr.bf16.vlgmr.msra.gmra.mxu1 %v18311_v42  ;;  %v17060_v42 = vld [vmem:[#allocation16 + $0x688] ss:$16 sps:$4 sm:$0xff]  }
 0xbcc   : > { %13668 = vmatpush1.bf16.msra.mxu1 %v17042_v33  ;;  %13699 = vmatprep.mubr.bf16.mxu1 %v18323_v26  ;;  %v17063_v26 = vld [vmem:[#allocation16 + $0x428] ss:$16 sps:$4 sm:$0xff]  }
 0xbcd   : > { %13633 = vmatpush1.bf16.msra.mxu0 %v17045_v51  ;;  %13669 = vmatprep.subr.bf16.mxu1 %v17050_v6  ;;  %v17120_v33 = vld [vmem:[#allocation16 + $0x748] ss:$16 sps:$4 sm:$0xff]   ;;  %v17128_v6 = vld [vmem:[#allocation16 + $0x72c] ss:$16 sps:$4 sm:$0xff]  }
 0xbce   : > { %13634 = vmatprep.subr.bf16.mxu0 %v17053_v24  ;;  %v17123_v51 = vld [vmem:[#allocation16 + $0x8e8] ss:$16 sps:$4 sm:$0xff]   ;;  %v17131_v24 = vld [vmem:[#allocation16 + $0x8cc] ss:$16 sps:$4 sm:$0xff]  }
 0xbd0   : > { %13670 = vmatpush1.bf16.msra.mxu1 %v17048_v44 }
 0xbd1   : > { %13635 = vmatpush1.bf16.msra.mxu0 %v17051_v19  ;;  %13671 = vmatprep.subr.bf16.mxu1 %v17056_v43  ;;  %v17126_v19 = vld [vmem:[#allocation16 + $0x728] ss:$16 sps:$4 sm:$0xff]  }
 0xbd2   : > { %13636 = vmatprep.subr.bf16.mxu0 %v17059_v17 }
 0xbd4   : > { %13672 = vmatpush1.bf16.msra.mxu1 %v17054_v45  ;;  %v17129_v45 = vld [vmem:[#allocation16 + $0x8c8] ss:$16 sps:$4 sm:$0xff]  }
 0xbd5   : > { %13637 = vmatpush1.bf16.msra.mxu0 %v17057_v9  ;;  %13673 = vmatprep.subr.bf16.mxu1 %v17062_v7  ;;  %v17134_v9 = vld [vmem:[#allocation16 + $0x70c] ss:$16 sps:$4 sm:$0xff]  }
 0xbd6   : > { %13638 = vmatprep.subr.bf16.mxu0 %v17065_v8  ;;  %v17137_v8 = vld [vmem:[#allocation16 + $0x8ac] ss:$16 sps:$4 sm:$0xff]  }
 0xbd8   : > { %13674 = vmatpush1.bf16.msra.mxu1 %v17060_v42 }
 0xbd9   : > { %13639 = vmatpush1.bf16.msra.mxu0 %v17063_v26  ;;  %13675 = vmatprep.subr.bf16.mxu1 %v17068_v10 }
 0xbda   : > { %13640 = vmatprep.subr.bf16.mxu0 %v17071_v29  ;;  %v17132_v29 = vld [vmem:[#allocation16 + $0x708] ss:$16 sps:$4 sm:$0xff]  }
 0xbdc   : > { %13676 = vmatpush1.bf16.msra.mxu1 %v17066_v34 }
 0xbdd   : > { %13641 = vmatpush1.bf16.msra.mxu0 %v17069_v36  ;;  %13677 = vmatprep.subr.bf16.mxu1 %v17074_v13  ;;  %v17135_v36 = vld [vmem:[#allocation16 + $0x8a8] ss:$16 sps:$4 sm:$0xff]   ;;  %v17140_v13 = vld [vmem:[#allocation16 + $0xaec] ss:$16 sps:$4 sm:$0xff]  }
 0xbde   : > { %13642 = vmatprep.subr.bf16.mxu0 %v17077_v22 }
 0xbe0   : > { %13678 = vmatpush1.bf16.msra.mxu1 %v17072_v20 }
 0xbe1   : > { %13643 = vmatpush2.bf16.msra.mxu0 %v17075_v18  ;;  %13679 = vmatprep.subr.bf16.mxu1 %v17080_v25  ;;  %v17138_v18 = vld [vmem:[#allocation16 + $0xae8] ss:$16 sps:$4 sm:$0xff]   ;;  %v17146_v25 = vld [vmem:[#allocation16 + $0xacc] ss:$16 sps:$4 sm:$0xff]  }
 0xbe2   : > { %13644 = vmatprep.subr.bf16.mxu0 %v17083_v27  ;;  %v17149_v27 = vld [vmem:[#allocation16 + $0x86c] ss:$16 sps:$4 sm:$0xff]  }
 0xbe4   : > { %13680 = vmatpush1.bf16.msra.mxu1 %v17078_v56  ;;  %v17144_v56 = vld [vmem:[#allocation16 + $0xac8] ss:$16 sps:$4 sm:$0xff]  }
 0xbe5   : > { %13645 = vmatpush2.bf16.msra.mxu0 %v17081_v61  ;;  %13681 = vmatprep.subr.bf16.mxu1 %v17086_v31  ;;  %v17147_v61 = vld [vmem:[#allocation16 + $0x868] ss:$16 sps:$4 sm:$0xff]   ;;  %v17152_v31 = vld [vmem:[#allocation16 + $0xaac] ss:$16 sps:$4 sm:$0xff]  }
 0xbe6   : > { %13646 = vmatprep.subr.bf16.mxu0 %v17089_v35  ;;  %v17155_v35 = vld [vmem:[#allocation16 + $0x84c] ss:$16 sps:$4 sm:$0xff]  }
 0xbe8   : > { %13682 = vmatpush1.bf16.msra.mxu1 %v17084_v30  ;;  %v17150_v30 = vld [vmem:[#allocation16 + $0xaa8] ss:$16 sps:$4 sm:$0xff]  }
 0xbe9   : > { %13647 = vmatpush2.bf16.msra.mxu0 %v17087_v2  ;;  %13683 = vmatprep.subr.bf16.mxu1 %v17092_v37  ;;  %v17153_v2 = vld [vmem:[#allocation16 + $0x848] ss:$16 sps:$4 sm:$0xff]   ;;  %v17158_v37 = vld [vmem:[#allocation16 + $0xa8c] ss:$16 sps:$4 sm:$0xff]  }
 0xbea   : > { %13648 = vmatprep.subr.bf16.mxu0 %v17095_v47  ;;  %v17161_v47 = vld [vmem:[#allocation16 + $0x82c] ss:$16 sps:$4 sm:$0xff]  }
 0xbec   : > { %13684 = vmatpush2.bf16.msra.mxu1 %v17090_v41  ;;  %v17164_v41 = vld [vmem:[#allocation16 + $0xa6c] ss:$16 sps:$4 sm:$0xff]  }
 0xbed   : > { %13649 = vmatpush2.bf16.msra.mxu0 %v17093_v15  ;;  %13685 = vmatprep.subr.bf16.mxu1 %v17098_v60  ;;  %v17167_v15 = vld [vmem:[#allocation16 + $0x80c] ss:$16 sps:$4 sm:$0xff]   ;;  %v17162_v60 = vld [vmem:[#allocation16 + $0xa68] ss:$16 sps:$4 sm:$0xff]  }
 0xbee   : > { %13650 = vmatprep.subr.bf16.mxu0 %v17101_v40  ;;  %v17165_v40 = vld [vmem:[#allocation16 + $0x808] ss:$16 sps:$4 sm:$0xff]  }
 0xbf0   : > { %13686 = vmatpush2.bf16.msra.mxu1 %v17096_v49  ;;  %v17170_v49 = vld [vmem:[#allocation16 + $0xa4c] ss:$16 sps:$4 sm:$0xff]  }
 0xbf1   : > { %13651 = vmatpush2.bf16.msra.mxu0 %v17099_v50  ;;  %13687 = vmatprep.subr.bf16.mxu1 %v17104_v3  ;;  %v17173_v50 = vld [vmem:[#allocation16 + $0x9ec] ss:$16 sps:$4 sm:$0xff]   ;;  %v17168_v3 = vld [vmem:[#allocation16 + $0xa48] ss:$16 sps:$4 sm:$0xff]  }
 0xbf2   : > { %13652 = vmatprep.subr.bf16.mxu0 %v17107_v23  ;;  %v17171_v23 = vld [vmem:[#allocation16 + $0x9e8] ss:$16 sps:$4 sm:$0xff]  }
 0xbf4   : > { %13688 = vmatpush2.bf16.msra.mxu1 %v17102_v11  ;;  %v17176_v11 = vld [vmem:[#allocation16 + $0xa2c] ss:$16 sps:$4 sm:$0xff]  }
 0xbf5   : > { %13653 = vmatpush2.bf16.msra.mxu0 %v17105_v46  ;;  %13689 = vmatprep.subr.bf16.mxu1 %v17110_v5  ;;  %v17179_v46 = vld [vmem:[#allocation16 + $0x9cc] ss:$16 sps:$4 sm:$0xff]   ;;  %v17174_v5 = vld [vmem:[#allocation16 + $0xa28] ss:$16 sps:$4 sm:$0xff]  }
 0xbf6   : > { %13654 = vmatprep.subr.bf16.mxu0 %v17113_v54  ;;  %v17177_v54 = vld [vmem:[#allocation16 + $0x9c8] ss:$16 sps:$4 sm:$0xff]  }
 0xbf8   : > { %13690 = vmatpush2.bf16.msra.mxu1 %v17108_v62  ;;  %v17182_v62 = vld [vmem:[#allocation16 + $0xa0c] ss:$16 sps:$4 sm:$0xff]  }
 0xbf9   : > { %13655 = vmatpush2.bf16.msra.mxu0 %v17111_v1  ;;  %13691 = vmatprep.subr.bf16.mxu1 %v17116_v28  ;;  %v17185_v1 = vld [vmem:[#allocation16 + $0x9ac] ss:$16 sps:$4 sm:$0xff]   ;;  %v17180_v28 = vld [vmem:[#allocation16 + $0xa08] ss:$16 sps:$4 sm:$0xff]  }
 0xbfa   : > { %13656 = vmatprep.subr.bf16.mxu0 %v17119_v32  ;;  %v17183_v32 = vld [vmem:[#allocation16 + $0x9a8] ss:$16 sps:$4 sm:$0xff]  }
 0xbfc   : > { %13692 = vmatpush2.bf16.msra.mxu1 %v17114_v38  ;;  %v17188_v38 = vld [vmem:[#allocation16 + $0xbec] ss:$16 sps:$4 sm:$0xff]  }
 0xbfd   : > { %13657 = vmatpush2.bf16.msra.mxu0 %v17117_v59  ;;  %13693 = vmatprep.subr.bf16.mxu1 %v17122_v21  ;;  %v17191_v59 = vld [vmem:[#allocation16 + $0x98c] ss:$16 sps:$4 sm:$0xff]   ;;  %v17186_v21 = vld [vmem:[#allocation16 + $0xbe8] ss:$16 sps:$4 sm:$0xff]  }
 0xbfe   : > { %13708 = vmatprep.subr.bf16.mxu0 %v17125_v4  ;;  %v17189_v4 = vld [vmem:[#allocation16 + $0x988] ss:$16 sps:$4 sm:$0xff]  }
 0xc00   : > { %13694 = vmatpush2.bf16.msra.mxu1 %v17120_v33  ;;  %v13414_v44 = vpop.f32.mrf.mxu0  ;;  %13659 = vmatmul.mubr.bf16.vlgmr.msra.gmra.mxu0 %v18333_v12  ;;  %v17194_v33 = vld [vmem:[#allocation16 + $0xbcc] ss:$16 sps:$4 sm:$0xff]  }
 0xc01   : > { %v13415_v43 = vadd.f32 %v13414_v44, %v18367_v52  ;;  %v13455_v17 = vpop.f32.mrf.mxu1  ;;  %13695 = vmatprep.subr.bf16.mxu1 %v17128_v6  ;;  %13709 = vmatpush1.bf16.msra.mxu0 %v17123_v51  ;;  %v17197_v51 = vld [vmem:[#allocation16 + $0x96c] ss:$16 sps:$4 sm:$0xff]   ;;  %v17192_v6 = vld [vmem:[#allocation16 + $0xbc8] ss:$16 sps:$4 sm:$0xff]  }
 0xc02   : > { %13740 = vmatprep.mubr.bf16.mxu0 %v18344_v55  ;;  %v13416_v7 = vpop.f32.mrf.mxu0  ;;  %13710 = vmatprep.subr.bf16.mxu0 %v17131_v24  ;;  %v17143_v55 = vld [vmem:[#allocation16 + $0x88c] ss:$16 sps:$4 sm:$0xff]   ;;  %v17195_v24 = vld [vmem:[#allocation16 + $0x968] ss:$16 sps:$4 sm:$0xff]  }
 0xc03   : > { %v18377_v42 = vadd.f32 %v13455_v17, %v13415_v43  ;;  %v13417_v26 = vadd.f32 %v13416_v7, %v18370_v63  ;;  %v13457_v10 = vpop.f32.mrf.mxu1  ;;  %v17141_v63 = vld [vmem:[#allocation16 + $0x888] ss:$16 sps:$4 sm:$0xff]   ;;  %v17200_v44 = vld [vmem:[#allocation16 + $0xbac] ss:$16 sps:$4 sm:$0xff]  }
 0xc04   : > { %13696 = vmatpush2.bf16.msra.mxu1 %v17126_v19  ;;  %v13418_v12 = vpop.f32.mrf.mxu0  ;;  %v17203_v19 = vld [vmem:[#allocation16 + $0x94c] ss:$16 sps:$4 sm:$0xff]   ;;  %v17198_v43 = vld [vmem:[#allocation16 + $0xba8] ss:$16 sps:$4 sm:$0xff]  }
 0xc05   : > { %v18380_v34 = vadd.f32 %v13457_v10, %v13417_v26  ;;  %v13459_v52 = vpop.f32.mrf.mxu1  ;;  %13697 = vmatprep.subr.bf16.mxu1 %v17134_v9  ;;  %13711 = vmatpush1.bf16.msra.mxu0 %v17129_v45  ;;  %v17201_v17 = vld [vmem:[#allocation16 + $0x948] ss:$16 sps:$4 sm:$0xff]   ;;  %v17206_v45 = vld [vmem:[#allocation16 + $0xb8c] ss:$16 sps:$4 sm:$0xff]  }
 0xc06   : > { %v13419_v22 = vpop.f32.mrf.mxu0  ;;  %13712 = vmatprep.subr.bf16.mxu0 %v17137_v8  ;;  %v17209_v9 = vld [vmem:[#allocation16 + $0x92c] ss:$16 sps:$4 sm:$0xff]   ;;  %v17204_v7 = vld [vmem:[#allocation16 + $0xb88] ss:$16 sps:$4 sm:$0xff]  }
 0xc07   : > { %v13460_v20 = vpop.f32.mrf.mxu1  ;;  %v17207_v8 = vld [vmem:[#allocation16 + $0x928] ss:$16 sps:$4 sm:$0xff]   ;;  %v17212_v26 = vld [vmem:[#allocation16 + $0xb6c] ss:$16 sps:$4 sm:$0xff]  }
 0xc08   : > { %13698 = vmatpush2.bf16.msra.mxu1 %v17132_v29  ;;  %v17215_v10 = vld [vmem:[#allocation16 + $0x90c] ss:$16 sps:$4 sm:$0xff]   ;;  %v17210_v12 = vld [vmem:[#allocation16 + $0xb68] ss:$16 sps:$4 sm:$0xff]  }
 0xc09   : > { %13713 = vmatpush1.bf16.msra.mxu0 %v17135_v36  ;;  %13749 = vmatprep.subr.bf16.mxu1 %v17140_v13  ;;  %v17213_v29 = vld [vmem:[#allocation16 + $0x908] ss:$16 sps:$4 sm:$0xff]   ;;  %v17218_v52 = vld [vmem:[#allocation16 + $0xb4c] ss:$16 sps:$4 sm:$0xff]  }
 0xc0a   : > { %13714 = vmatprep.subr.bf16.mxu0 %v17143_v55  ;;  %v17216_v36 = vld [vmem:[#allocation16 + $0xb48] ss:$16 sps:$4 sm:$0xff]   ;;  %v17221_v13 = vld [vmem:[#allocation16 + $0xb2c] ss:$16 sps:$4 sm:$0xff]  }
 0xc0b   : > { %13700 = vmatmul.mubr.bf16.vlgmr.msra.gmra.mxu1 %v18335_v16  ;;  %v17156_v16 = vld [vmem:[#allocation16 + $0xa88] ss:$16 sps:$4 sm:$0xff]   ;;  %v17224_v20 = vld [vmem:[#allocation16 + $0xb0c] ss:$16 sps:$4 sm:$0xff]  }
 0xc0c   : > { %13750 = vmatpush1.bf16.msra.mxu1 %v17138_v18  ;;  %13781 = vmatprep.mubr.bf16.mxu1 %v18359_v48  ;;  %v17159_v48 = vld [vmem:[#allocation16 + $0x828] ss:$16 sps:$4 sm:$0xff]  }
 0xc0d   : > { %13715 = vmatpush1.bf16.msra.mxu0 %v17141_v63  ;;  %13751 = vmatprep.subr.bf16.mxu1 %v17146_v25  ;;  %v17219_v55 = vld [vmem:[#allocation16 + $0xb28] ss:$16 sps:$4 sm:$0xff]  }
 0xc0e   : > { %13716 = vmatprep.subr.bf16.mxu0 %v17149_v27  ;;  %v17222_v25 = vld [vmem:[#allocation16 + $0xb08] ss:$16 sps:$4 sm:$0xff]  }
 0xc10   : > { %13752 = vmatpush1.bf16.msra.mxu1 %v17144_v56 }
 0xc11   : > { %13717 = vmatpush1.bf16.msra.mxu0 %v17147_v61  ;;  %13753 = vmatprep.subr.bf16.mxu1 %v17152_v31 }
 0xc12   : > { %13718 = vmatprep.subr.bf16.mxu0 %v17155_v35 }
 0xc14   : > { %13754 = vmatpush1.bf16.msra.mxu1 %v17150_v30 }
 0xc15   : > { %13719 = vmatpush1.bf16.msra.mxu0 %v17153_v2  ;;  %13755 = vmatprep.subr.bf16.mxu1 %v17158_v37 }
 0xc16   : > { %13720 = vmatprep.subr.bf16.mxu0 %v17161_v47 }
 0xc18   : > { %13756 = vmatpush1.bf16.msra.mxu1 %v17156_v16 }
 0xc19   : > { %13721 = vmatpush1.bf16.msra.mxu0 %v17159_v48  ;;  %13757 = vmatprep.subr.bf16.mxu1 %v17164_v41 }
 0xc1a   : > { %13722 = vmatprep.subr.bf16.mxu0 %v17167_v15 }
 0xc1c   : > { %13758 = vmatpush1.bf16.msra.mxu1 %v17162_v60 }
 0xc1d   : > { %13723 = vmatpush1.bf16.msra.mxu0 %v17165_v40  ;;  %13759 = vmatprep.subr.bf16.mxu1 %v17170_v49 }
 0xc1e   : > { %13724 = vmatprep.subr.bf16.mxu0 %v17173_v50 }
 0xc20   : > { %13760 = vmatpush1.bf16.msra.mxu1 %v17168_v3 }
 0xc21   : > { %13725 = vmatpush2.bf16.msra.mxu0 %v17171_v23  ;;  %13761 = vmatprep.subr.bf16.mxu1 %v17176_v11 }
 0xc22   : > { %13726 = vmatprep.subr.bf16.mxu0 %v17179_v46 }
 0xc24   : > { %13762 = vmatpush1.bf16.msra.mxu1 %v17174_v5 }
 0xc25   : > { %13727 = vmatpush2.bf16.msra.mxu0 %v17177_v54  ;;  %13763 = vmatprep.subr.bf16.mxu1 %v17182_v62 }
 0xc26   : > { %13728 = vmatprep.subr.bf16.mxu0 %v17185_v1 }
 0xc28   : > { %13764 = vmatpush1.bf16.msra.mxu1 %v17180_v28 }
 0xc29   : > { %13729 = vmatpush2.bf16.msra.mxu0 %v17183_v32  ;;  %13765 = vmatprep.subr.bf16.mxu1 %v17188_v38 }
 0xc2a   : > { %13730 = vmatprep.subr.bf16.mxu0 %v17191_v59 }
 0xc2c   : > { %13766 = vmatpush2.bf16.msra.mxu1 %v17186_v21 }
 0xc2d   : > { %13731 = vmatpush2.bf16.msra.mxu0 %v17189_v4  ;;  %13767 = vmatprep.subr.bf16.mxu1 %v17194_v33 }
 0xc2e   : > { %13732 = vmatprep.subr.bf16.mxu0 %v17197_v51 }
 0xc30   : > { %13768 = vmatpush2.bf16.msra.mxu1 %v17192_v6 }
 0xc31   : > { %13733 = vmatpush2.bf16.msra.mxu0 %v17195_v24  ;;  %13769 = vmatprep.subr.bf16.mxu1 %v17200_v44 }
 0xc32   : > { %13734 = vmatprep.subr.bf16.mxu0 %v17203_v19 }
 0xc34   : > { %13770 = vmatpush2.bf16.msra.mxu1 %v17198_v43 }
 0xc35   : > { %13735 = vmatpush2.bf16.msra.mxu0 %v17201_v17  ;;  %13771 = vmatprep.subr.bf16.mxu1 %v17206_v45 }
 0xc36   : > { %13736 = vmatprep.subr.bf16.mxu0 %v17209_v9 }
 0xc38   : > { %13772 = vmatpush2.bf16.msra.mxu1 %v17204_v7 }
 0xc39   : > { %13737 = vmatpush2.bf16.msra.mxu0 %v17207_v8  ;;  %13773 = vmatprep.subr.bf16.mxu1 %v17212_v26 }
 0xc3a   : > { %13738 = vmatprep.subr.bf16.mxu0 %v17215_v10 }
 0xc3c   : > { %13774 = vmatpush2.bf16.msra.mxu1 %v17210_v12 }
 0xc3d   : > { %13739 = vmatpush2.bf16.msra.mxu0 %v17213_v29  ;;  %13775 = vmatprep.subr.bf16.mxu1 %v17218_v52 }
 0xc40   : > { %13776 = vmatpush2.bf16.msra.mxu1 %v17216_v36  ;;  %v13496_v22 = vpop.f32.mrf.mxu0  ;;  %13741 = vmatmul.mubr.bf16.vlgmr.msra.gmra.mxu0 %v18353_v14 }
 0xc41   : > { %13777 = vmatprep.subr.bf16.mxu1 %v17221_v13  ;;  %v13497_v56 = vadd.f32 %v13496_v22, %v18377_v42 }
 0xc42   : > { %v13498_v18 = vpop.f32.mrf.mxu0 }
 0xc43   : > { %v13499_v31 = vadd.f32 %v13498_v18, %v18380_v34 }
 0xc44   : > { %13778 = vmatpush2.bf16.msra.mxu1 %v17219_v55  ;;  %v13500_v63 = vpop.f32.mrf.mxu0 }
 0xc45   : > { %13779 = vmatprep.subr.bf16.mxu1 %v17224_v20 }
 0xc46   : > { %v13501_v27 = vpop.f32.mrf.mxu0 }
 0xc48   : > { %13780 = vmatpush2.bf16.msra.mxu1 %v17222_v25 }
 0xc4b   : > { %13782 = vmatmul.mubr.bf16.vlgmr.msra.gmra.mxu1 %v18361_v39  ;;  %v13537_v61 = vpop.f32.mrf.mxu1 }
 0xc4c   : > { %v13538_v35 = vadd.f32 %v13537_v61, %v13497_v56 }
 0xc4d   : > { %v13539_v14 = vpop.f32.mrf.mxu1 }
 0xc4e   : > { %v13790_v30 = vadd.f32 %v13538_v35, %v18156_v0  ;;  %v13540_v2 = vadd.f32 %v13539_v14, %v13499_v31 }
 0xc4f   : > { %v13541_v37 = vpop.f32.mrf.mxu1 }
 0xc50   : > { %13794 = vst [vmem:[%s18391_s16] sm:$0xff] %v13790_v30  ;;  %v13791_v47 = vadd.f32 %v13540_v2, %v18153_v57 }
 0xc51   : > { %v13542_v42 = vpop.f32.mrf.mxu1 }
 0xc52   : > { %13795 = vst [vmem:[%s18391_s16 + $0x8] sm:$0xff] %v13791_v47 }
 0xc80   : > { %v13578_v39 = vpop.f32.mrf.mxu0 }
 0xc82   : > { %v13580_v16 = vpop.f32.mrf.mxu0 }
 0xc84   : > { %v13582_v48 = vpop.f32.mrf.mxu0 }
 0xc86   : > { %v13583_v34 = vpop.f32.mrf.mxu0 }
 0xc8b   : > { %v13619_v41 = vpop.f32.mrf.mxu1 }
 0xc8c   : > { %v13620_v15 = vadd.f32 %v13619_v41, %v13578_v39 }
 0xc8d   : > { %v13621_v60 = vpop.f32.mrf.mxu1 }
 0xc8e   : > { %v13622_v0 = vadd.f32 %v13621_v60, %v13580_v16 }
 0xc8f   : > { %v13623_v40 = vpop.f32.mrf.mxu1 }
 0xc91   : > { %v13624_v49 = vpop.f32.mrf.mxu1 }
 0xcc0   : > { %v13660_v50 = vpop.f32.mrf.mxu0 }
 0xcc1   : > { %v13661_v3 = vadd.f32 %v13660_v50, %v13620_v15 }
 0xcc2   : > { %v13662_v23 = vpop.f32.mrf.mxu0 }
 0xcc3   : > { %v13663_v11 = vadd.f32 %v13662_v23, %v13622_v0 }
 0xcc4   : > { %v13664_v46 = vpop.f32.mrf.mxu0 }
 0xcc6   : > { %v13665_v5 = vpop.f32.mrf.mxu0 }
 0xccb   : > { %v13701_v57 = vpop.f32.mrf.mxu1 }
 0xccc   : > { %v13702_v21 = vadd.f32 %v13701_v57, %v13661_v3 }
 0xccd   : > { %v13703_v54 = vpop.f32.mrf.mxu1 }
 0xcce   : > { %v13704_v4 = vadd.f32 %v13703_v54, %v13663_v11 }
 0xccf   : > { %v13705_v62 = vpop.f32.mrf.mxu1 }
 0xcd1   : > { %v13706_v1 = vpop.f32.mrf.mxu1 }
 0xd00   : > { %v13742_v28 = vpop.f32.mrf.mxu0 }
 0xd01   : > { %v13743_v33 = vadd.f32 %v13742_v28, %v13702_v21 }
 0xd02   : > { %v13744_v32 = vpop.f32.mrf.mxu0 }
 0xd03   : > { %v13745_v6 = vadd.f32 %v13744_v32, %v13704_v4 }
 0xd04   : > { %v13746_v38 = vpop.f32.mrf.mxu0 }
 0xd06   : > { %v13747_v59 = vpop.f32.mrf.mxu0 }
 0xd0b   : > { %v13783_v51 = vpop.f32.mrf.mxu1 }
 0xd0c   : > { %v13784_v24 = vadd.f32 %v13783_v51, %v13743_v33 }
 0xd0d   : > { %v13785_v44 = vpop.f32.mrf.mxu1 }
 0xd0e   : > { %v13792_v19 = vadd.f32 %v13784_v24, %v18163_v53  ;;  %v13786_v43 = vadd.f32 %v13785_v44, %v13745_v6 }
 0xd0f   : > { %v13787_v17 = vpop.f32.mrf.mxu1 }
 0xd10   : > { %13796 = vst [vmem:[%s18391_s16 + $0x10] sm:$0xff] %v13792_v19  ;;  %v13793_v45 = vadd.f32 %v13786_v43, %v18166_v58 }
 0xd11   : > { %v13788_v9 = vpop.f32.mrf.mxu1 }
 0xd12   : > { %13797 = vst [vmem:[%s18391_s16 + $0x18] sm:$0xff] %v13793_v45 }
 0xd13   : > { %17546 = shalt.err (!%p17543_p13)
}
 0xd14   : > { %s17547_s29 = scalar_lea.hbm %s18404_s18, 512  ;;  %s17551_s3 = scalar_lea.hbm %s18451_s9, 1024 }
 0xd15   : > { %p17548_p1 = scmp.ne.s32.totalorder %s18404_s18, %s17547_s29  ;;  %p17552_p5 = scmp.lt.s32.totalorder %s18404_s18, %s18451_s9 }
 0xd16   : > { %p17553_p8 = scmp.lt.s32.totalorder %s17551_s3, %s17547_s29 }
 0xd17   : > { %p17549_p7 = pnand %p17548_p1, %p18483_p11 }
 0xd18   : > { %p17554_p9 = por %p17553_p8, %p17552_p5 }
 0xd19   : > { %p17550_p2 = pneg %p17549_p7 }
 0xd1b   : > { %p17555_p10 = pnand %p17554_p9, %p17550_p2 }
 0xd1d   : > { %17558 = shalt.err (!%p17555_p10)
}
 0xd1e   : > { %15777 = dma.vmem_to_hbm [thread:$0]  (%p18483_p11), %s13814_s24, 512, %s18404_s18, %s13799_s23  }
 0xd1f PF: > { %s13825_s16 = sand.u32 1, %s17601_s30   ;;  %p18484_p4 = scmp.ne.s32.totalorder %s18471_s14, 0 }
 0xd20   : > { %p18485_p3 = scmp.ge.s32.totalorder %s17613_s12, 2  ;;  %s13826_s28 = scalar_lea.sflag [#allocation4], %s13825_s16 }
 0xd22   : > { %p15809_p0 = pnand %p18485_p3, %p18484_p4 }
 0xd24   : > { %p15810_p6 = pneg %p15809_p0 }
 0xd26   : > { %17596 = dma.done.wait (%p15810_p6), %s13826_s28, 512  }
 0xd27   : > { %17598 = vsyncadd (%p15810_p6), %s13826_s28, 4294966784  ;;  %p26_p12 = scmp.ge.s32.totalorder %s17796_s21, 4   ;;  %s18486_s30 = smov %s17605_s10 }
 0xd28   : > { %s18487_s10 = smov %s17609_s11  ;;  %s18488_s11 = smov %s17807_s27 }
 0xd29   : > { %s18489_s12 = smov %s17796_s21  ;;  %28 = sbr.rel (!%p26_p12) target bundleno = 14 (0xe), region = 133 }
 0xd2e   :  { %13831 = vsyncpa [#allocation3], 1 }
 0xd2f   :  { %13833 = vsyncpa [#allocation3 + $0x1], 1 }
 0xd30   :  { %13834 = vsyncpa [#allocation6], 1 }
 0xd31   :  { %13835 = vsyncpa [#allocation9], 1 }
 0xd32   :  { %13836 = vsyncpa [#allocation12], 1 }
 0xd33   :  { %13837 = vsyncpa [#allocation15], 1 }
 0xd34   :  { %13838 = vsyncpa [#allocation4], 1 }
 0xd35   :  { %13840 = vsyncpa [#allocation4 + $0x1], 1 }

</bundles_post_ra>
